<compile_context>
chip_gen: v7x
topology: tpu7x:2x2x1
jax: 0.10.0
libtpu: 0.0.40
codegen_flags: <defaults>
</compile_context>

<pallas_src>
import functools

import jax
import jax.numpy as jnp
from jax.experimental import pallas as pl
from jax.experimental.pallas import tpu as pltpu

LRELU_SLOPE = 0.2
BN_EPS = 1e-5


def _lrelu(x):
    return jnp.where(x >= 0, x, LRELU_SLOPE * x)


def _round_up(a, b):
    return (a + b - 1) // b * b


def residual_block_kernel(xmain_ref, xhalo_ref, w1_ref, sh1_ref, w2_ref,
                          sh2_ref, out_ref):
    # xmain_ref: (TH, Wp, Cp) f32  padded-image rows [t*TH, t*TH+TH)
    # xhalo_ref: (4,  Wp, Cp) f32  padded-image rows [t*TH+TH, t*TH+TH+4)
    # w*_ref   : (3, 3*Cp, Cp)     dy-grouped im2col weights (BN scale folded)
    # sh*_ref  : (1, Cp) f32       folded conv-bias*scale + BN shift
    # out_ref  : (TH, W, Cp) f32
    TH, W, Cp = out_ref.shape
    Wp = xmain_ref.shape[1]
    wo1 = Wp - 8                       # h1 slab width (8-aligned, >= W + 2)
    H = TH * pl.num_programs(1)
    t = pl.program_id(1)
    mdt = w1_ref.dtype                 # matmul operand dtype (f32 or bf16)

    # Stitch the (TH+4)-row halo'd window from the two pipelined input streams.
    window = jnp.concatenate([xmain_ref[...], xhalo_ref[...]], axis=0)

    def conv3x3(src, w_ref, ho, wo, col0):
        # dy-grouped im2col: 3 accumulating MXU matmuls with K = 3*Cp.
        # dy slices are outer-dim offsets (cheap); only dx taps shift sublanes.
        acc = None
        for dy in range(3):
            taps = [src[dy:dy + ho, col0 + dx:col0 + dx + wo, :].astype(mdt)
                    for dx in range(3)]
            patches = jnp.concatenate(taps, axis=-1).reshape(ho * wo, 3 * Cp)
            part = jnp.dot(patches, w_ref[dy],
                           preferred_element_type=jnp.float32)
            acc = part if acc is None else acc + part
        return acc.reshape(ho, wo, Cp)

    # ---- layer 1: conv + folded bias/BN + LeakyReLU on the halo'd slab ----
    h1 = _lrelu(conv3x3(window, w1_ref, TH + 2, wo1, 6) + sh1_ref[...])

    # Zero h1 wherever it falls outside the image: exactly the zero padding
    # conv2 sees in PyTorch (and it kills the junk halo rows/columns).
    row = t * TH - 1 + jax.lax.broadcasted_iota(jnp.int32, (TH + 2, wo1, 1), 0)
    col = jax.lax.broadcasted_iota(jnp.int32, (TH + 2, wo1, 1), 1) - 1
    inside = (row >= 0) & (row < H) & (col >= 0) & (col < W)
    h1 = jnp.where(inside, h1, 0.0)

    # ---- layer 2: conv + folded bias/BN (no activation) ----
    h2 = conv3x3(h1, w2_ref, TH, W, 0) + sh2_ref[...]

    # ---- residual add (sublane-aligned column window) + tail LeakyReLU ----
    xres = window[2:2 + TH, 8:8 + W, :]
    out_ref[...] = _lrelu(h2 + xres)


@functools.partial(jax.jit, static_argnames=("matmul_dtype",))
def residual_block(x_nchw, params, matmul_dtype=jnp.float32):
    """x_nchw: (N, C, H, W) float32, PyTorch convention."""
    # TODO(synk): keeping the surrounding model NHWC end-to-end would remove
    #             these transpose / pad / slice HBM passes entirely.
    x = jnp.transpose(x_nchw, (0, 2, 3, 1)).astype(jnp.float32)      # NHWC
    N, H, W, C = x.shape

    Cp = _round_up(C, 128)                      # lane-dense channel pad
    assert H % 4 == 0, "ResidualBlock Pallas kernel needs H % 4 == 0"
    if H <= 32:
        TH = H                                  # whole image per program
    else:
        TH = next(th for th in (32, 16, 8, 4) if H % th == 0)
    assert H % TH == 0 and TH % 4 == 0
    nH = H // TH

    wo1 = _round_up(W + 2, 8)                   # sublane-aligned h1 width
    Wp = wo1 + 8                                # 8 left cols (aligned residual)

    # Zero halo: 2 rows top/bottom, 8 cols left, (wo1 - W) cols right, chan pad.
    xp = jnp.pad(x, ((0, 0), (2, 2), (8, Wp - 8 - W), (0, Cp - C)))

    def fold(w_pt, b, gamma, beta, mean, var):
        s = gamma / jnp.sqrt(var + BN_EPS)                      # BN scale
        shift = beta - mean * s + b * s                         # BN shift + bias
        # PyTorch (Cout, Cin, kH, kW) -> (kH, kW, Cin, Cout), scale per Cout.
        w = jnp.transpose(w_pt, (2, 3, 1, 0)) * s[None, None, None, :]
        w = jnp.pad(w, ((0, 0), (0, 0), (0, Cp - C), (0, Cp - C)))
        # dy-grouped im2col layout: (3, 3*Cp, Cp), rows ordered (dx, Cin).
        return (w.reshape(3, 3 * Cp, Cp).astype(matmul_dtype),
                jnp.pad(shift, (0, Cp - C)).reshape(1, Cp).astype(jnp.float32))

    w1m, sh1 = fold(params['w1'], params['b1'], params['gamma1'],
                    params['beta1'], params['mean1'], params['var1'])
    w2m, sh2 = fold(params['w2'], params['b2'], params['gamma2'],
                    params['beta2'], params['mean2'], params['var2'])

    # Size the scoped VMEM from the actual footprint (double-buffered streams
    # plus in-kernel window/h1/patch temps), clamped to a v7x-safe ceiling.
    msz = 2 if matmul_dtype == jnp.bfloat16 else 4
    stream = (2 * (TH * Wp * Cp * 4 + 4 * Wp * Cp * 4 + TH * W * Cp * 4)
              + 2 * 2 * (3 * 3 * Cp * Cp * msz + Cp * 4))
    temps = ((TH + 4) * Wp * Cp * 4                       # stitched window
             + 2 * (TH + 2) * wo1 * Cp * 4                # h1 + conv accumulator
             + (TH + 2) * wo1 * 3 * Cp * msz              # one dy patch group
             + 2 * TH * W * Cp * 4)                       # h2 + store staging
    vmem_bytes = int(min(56 * 1024 * 1024,
                         max(32 * 1024 * 1024, (stream + temps) * 3 // 2)))

    out = pl.pallas_call(
        residual_block_kernel,
        out_shape=jax.ShapeDtypeStruct((N, H, W, Cp), jnp.float32),
        grid=(N, nH),
        in_specs=[
            # main TH-row block of the padded image
            pl.BlockSpec((None, TH, Wp, Cp), lambda n, t: (n, t, 0, 0)),
            # 4-row bottom halo of the *same* padded image (second stream;
            # replaces the old wrapper-side duplicated window stack)
            pl.BlockSpec((None, 4, Wp, Cp),
                         lambda n, t: (n, (t + 1) * (TH // 4), 0, 0)),
            pl.BlockSpec((3, 3 * Cp, Cp), lambda n, t: (0, 0, 0)),
            pl.BlockSpec((1, Cp), lambda n, t: (0, 0)),
            pl.BlockSpec((3, 3 * Cp, Cp), lambda n, t: (0, 0, 0)),
            pl.BlockSpec((1, Cp), lambda n, t: (0, 0)),
        ],
        out_specs=pl.BlockSpec((None, TH, W, Cp), lambda n, t: (n, t, 0, 0)),
        compiler_params=pltpu.CompilerParams(
            dimension_semantics=("parallel", "parallel"),
            vmem_limit_bytes=vmem_bytes),
    )(xp, xp, w1m, sh1, w2m, sh2)

    return jnp.transpose(out[..., :C], (0, 3, 1, 2))      # back to NCHW


# ------------------------- reference (plain JAX) --------------------------
def residual_block_ref(x_nchw, params):
    def conv(x, w, b):
        y = jax.lax.conv_general_dilated(
            x, w, window_strides=(1, 1), padding=((1, 1), (1, 1)),
            dimension_numbers=('NCHW', 'OIHW', 'NCHW'))
        return y + b.reshape(1, -1, 1, 1)

    def bn(x, gamma, beta, mean, var):
        sh = lambda a: a.reshape(1, -1, 1, 1)
        return (x - sh(mean)) / jnp.sqrt(sh(var) + BN_EPS) * sh(gamma) + sh(beta)

    def lrelu(x):
        return jnp.where(x >= 0, x, LRELU_SLOPE * x)

    h = lrelu(bn(conv(x_nchw, params['w1'], params['b1']),
                 params['gamma1'], params['beta1'],
                 params['mean1'], params['var1']))
    h = bn(conv(h, params['w2'], params['b2']),
           params['gamma2'], params['beta2'],
           params['mean2'], params['var2'])
    return lrelu(h + x_nchw)


# --------------------------------- main -----------------------------------
if __name__ == "__main__":
    N, C, H, W = 2, 8, 16, 16
    key = jax.random.PRNGKey(0)
    ks = jax.random.split(key, 13)

    params = {
        'w1': 0.1 * jax.random.normal(ks[0], (C, C, 3, 3), jnp.float32),
        'b1': 0.1 * jax.random.normal(ks[1], (C,), jnp.float32),
        'gamma1': jax.random.uniform(ks[2], (C,), jnp.float32, 0.5, 1.5),
        'beta1': 0.1 * jax.random.normal(ks[3], (C,), jnp.float32),
        'mean1': 0.1 * jax.random.normal(ks[4], (C,), jnp.float32),
        'var1': jax.random.uniform(ks[5], (C,), jnp.float32, 0.5, 1.5),
        'w2': 0.1 * jax.random.normal(ks[6], (C, C, 3, 3), jnp.float32),
        'b2': 0.1 * jax.random.normal(ks[7], (C,), jnp.float32),
        'gamma2': jax.random.uniform(ks[8], (C,), jnp.float32, 0.5, 1.5),
        'beta2': 0.1 * jax.random.normal(ks[9], (C,), jnp.float32),
        'mean2': 0.1 * jax.random.normal(ks[10], (C,), jnp.float32),
        'var2': jax.random.uniform(ks[11], (C,), jnp.float32, 0.5, 1.5),
    }
    x = jax.random.normal(ks[12], (N, C, H, W), jnp.float32)

    ref = jax.block_until_ready(residual_block_ref(x, params))

    # f32 matmul path (default): must match the PyTorch math to 1e-4.
    out = jax.block_until_ready(residual_block(x, params))
    assert out.shape == (N, C, H, W)
    err = float(jnp.max(jnp.abs(out - ref)))
    assert jnp.allclose(out, ref, rtol=1e-4, atol=1e-4), err

    # bf16 matmul-operand path (v6e/v7x MXU rate); accumulation and all
    # elementwise work stay f32, so only a looser tolerance is expected.
    out_bf16 = jax.block_until_ready(
        residual_block(x, params, matmul_dtype=jnp.bfloat16))
    err_bf16 = float(jnp.max(jnp.abs(out_bf16 - ref)))
    assert jnp.allclose(out_bf16, ref, rtol=2e-1, atol=2e-1), err_bf16

    print("KERNEL_OK")
</pallas_src>

<mosaic_0001>
module attributes {stable_mosaic.version = 11 : i64} {
  func.func @residual_block_kernel(%arg0: i32, %arg1: i32, %arg2: memref<1x16x32x128xf32, #tpu.memory_space<vmem>>, %arg3: memref<1x4x32x128xf32, #tpu.memory_space<vmem>>, %arg4: memref<3x384x128xf32, #tpu.memory_space<vmem>>, %arg5: memref<1x128xf32, #tpu.memory_space<vmem>>, %arg6: memref<3x384x128xf32, #tpu.memory_space<vmem>>, %arg7: memref<1x128xf32, #tpu.memory_space<vmem>>, %arg8: memref<1x16x16x128xf32, #tpu.memory_space<vmem>>) attributes {dimension_semantics = [#tpu.dimension_semantics<parallel>, #tpu.dimension_semantics<parallel>], iteration_bounds = array<i64: 2, 1>, scalar_prefetch = 0 : i64, scratch_operands = 0 : i64, tpu.core_type = #tpu.core_type<tc>, window_params = [{transform_indices = @transform_0, window_bounds = array<i64: 1, 16, 32, 128>}, {transform_indices = @transform_1, window_bounds = array<i64: 1, 4, 32, 128>}, {pipeline_mode = #tpu.pipeline_mode<synchronous>, transform_indices = @transform_2, window_bounds = array<i64: 3, 384, 128>}, {pipeline_mode = #tpu.pipeline_mode<synchronous>, transform_indices = @transform_3, window_bounds = array<i64: 1, 128>}, {pipeline_mode = #tpu.pipeline_mode<synchronous>, transform_indices = @transform_4, window_bounds = array<i64: 3, 384, 128>}, {pipeline_mode = #tpu.pipeline_mode<synchronous>, transform_indices = @transform_5, window_bounds = array<i64: 1, 128>}, {transform_indices = @transform_6, window_bounds = array<i64: 1, 16, 16, 128>}]} {
    %c0 = arith.constant 0 : index
    %c0_0 = arith.constant 0 : index
    %c0_1 = arith.constant 0 : index
    %c0_2 = arith.constant 0 : index
    %0 = vector.load %arg2[%c0, %c0_0, %c0_1, %c0_2] : memref<1x16x32x128xf32, #tpu.memory_space<vmem>>, vector<1x16x32x128xf32>
    %1 = vector.shape_cast %0 : vector<1x16x32x128xf32> to vector<16x32x128xf32>
    %c0_3 = arith.constant 0 : index
    %c0_4 = arith.constant 0 : index
    %c0_5 = arith.constant 0 : index
    %c0_6 = arith.constant 0 : index
    %2 = vector.load %arg3[%c0_3, %c0_4, %c0_5, %c0_6] : memref<1x4x32x128xf32, #tpu.memory_space<vmem>>, vector<1x4x32x128xf32>
    %3 = vector.shape_cast %2 : vector<1x4x32x128xf32> to vector<4x32x128xf32>
    %4 = tpu.concatenate %1, %3 in 0 : vector<16x32x128xf32>, vector<4x32x128xf32> -> vector<20x32x128xf32>
    %5 = vector.extract_strided_slice %4 {offsets = [0, 6, 0], sizes = [18, 24, 128], strides = [1, 1, 1]} : vector<20x32x128xf32> to vector<18x24x128xf32>
    %6 = vector.extract_strided_slice %4 {offsets = [0, 7, 0], sizes = [18, 24, 128], strides = [1, 1, 1]} : vector<20x32x128xf32> to vector<18x24x128xf32>
    %7 = vector.extract_strided_slice %4 {offsets = [0, 8, 0], sizes = [18, 24, 128], strides = [1, 1, 1]} : vector<20x32x128xf32> to vector<18x24x128xf32>
    %8 = tpu.concatenate %5, %6, %7 in 2 : vector<18x24x128xf32>, vector<18x24x128xf32>, vector<18x24x128xf32> -> vector<18x24x384xf32>
    %9 = vector.shape_cast %8 : vector<18x24x384xf32> to vector<432x384xf32>
    %c0_7 = arith.constant 0 : index
    %c0_8 = arith.constant 0 : index
    %c0_9 = arith.constant 0 : index
    %10 = vector.load %arg4[%c0_7, %c0_8, %c0_9] : memref<3x384x128xf32, #tpu.memory_space<vmem>>, vector<1x384x128xf32>
    %11 = vector.shape_cast %10 : vector<1x384x128xf32> to vector<384x128xf32>
    %cst = arith.constant dense<0.000000e+00> : vector<432x128xf32>
    %12 = tpu.matmul %9, %11, %cst {dimension_numbers = #tpu.dot_dimension_numbers<[1], [0], [0], [1], [0, 0, 1, 1], [], []>} : vector<432x384xf32>, vector<384x128xf32>, vector<432x128xf32> -> vector<432x128xf32>
    %13 = vector.extract_strided_slice %4 {offsets = [1, 6, 0], sizes = [18, 24, 128], strides = [1, 1, 1]} : vector<20x32x128xf32> to vector<18x24x128xf32>
    %14 = vector.extract_strided_slice %4 {offsets = [1, 7, 0], sizes = [18, 24, 128], strides = [1, 1, 1]} : vector<20x32x128xf32> to vector<18x24x128xf32>
    %15 = vector.extract_strided_slice %4 {offsets = [1, 8, 0], sizes = [18, 24, 128], strides = [1, 1, 1]} : vector<20x32x128xf32> to vector<18x24x128xf32>
    %16 = tpu.concatenate %13, %14, %15 in 2 : vector<18x24x128xf32>, vector<18x24x128xf32>, vector<18x24x128xf32> -> vector<18x24x384xf32>
    %17 = vector.shape_cast %16 : vector<18x24x384xf32> to vector<432x384xf32>
    %c1 = arith.constant 1 : index
    %c0_10 = arith.constant 0 : index
    %c0_11 = arith.constant 0 : index
    %18 = vector.load %arg4[%c1, %c0_10, %c0_11] : memref<3x384x128xf32, #tpu.memory_space<vmem>>, vector<1x384x128xf32>
    %19 = vector.shape_cast %18 : vector<1x384x128xf32> to vector<384x128xf32>
    %cst_12 = arith.constant dense<0.000000e+00> : vector<432x128xf32>
    %20 = tpu.matmul %17, %19, %cst_12 {dimension_numbers = #tpu.dot_dimension_numbers<[1], [0], [0], [1], [0, 0, 1, 1], [], []>} : vector<432x384xf32>, vector<384x128xf32>, vector<432x128xf32> -> vector<432x128xf32>
    %21 = arith.addf %12, %20 : vector<432x128xf32>
    %22 = vector.extract_strided_slice %4 {offsets = [2, 6, 0], sizes = [18, 24, 128], strides = [1, 1, 1]} : vector<20x32x128xf32> to vector<18x24x128xf32>
    %23 = vector.extract_strided_slice %4 {offsets = [2, 7, 0], sizes = [18, 24, 128], strides = [1, 1, 1]} : vector<20x32x128xf32> to vector<18x24x128xf32>
    %24 = vector.extract_strided_slice %4 {offsets = [2, 8, 0], sizes = [18, 24, 128], strides = [1, 1, 1]} : vector<20x32x128xf32> to vector<18x24x128xf32>
    %25 = tpu.concatenate %22, %23, %24 in 2 : vector<18x24x128xf32>, vector<18x24x128xf32>, vector<18x24x128xf32> -> vector<18x24x384xf32>
    %26 = vector.shape_cast %25 : vector<18x24x384xf32> to vector<432x384xf32>
    %c2 = arith.constant 2 : index
    %c0_13 = arith.constant 0 : index
    %c0_14 = arith.constant 0 : index
    %27 = vector.load %arg4[%c2, %c0_13, %c0_14] : memref<3x384x128xf32, #tpu.memory_space<vmem>>, vector<1x384x128xf32>
    %28 = vector.shape_cast %27 : vector<1x384x128xf32> to vector<384x128xf32>
    %cst_15 = arith.constant dense<0.000000e+00> : vector<432x128xf32>
    %29 = tpu.matmul %26, %28, %cst_15 {dimension_numbers = #tpu.dot_dimension_numbers<[1], [0], [0], [1], [0, 0, 1, 1], [], []>} : vector<432x384xf32>, vector<384x128xf32>, vector<432x128xf32> -> vector<432x128xf32>
    %30 = arith.addf %21, %29 : vector<432x128xf32>
    %31 = vector.shape_cast %30 : vector<432x128xf32> to vector<18x24x128xf32>
    %c0_16 = arith.constant 0 : index
    %c0_17 = arith.constant 0 : index
    %32 = vector.load %arg5[%c0_16, %c0_17] : memref<1x128xf32, #tpu.memory_space<vmem>>, vector<1x128xf32>
    %33 = vector.shape_cast %32 : vector<1x128xf32> to vector<1x1x128xf32>
    %34 = vector.broadcast %33 : vector<1x1x128xf32> to vector<18x24x128xf32>
    %35 = arith.addf %31, %34 : vector<18x24x128xf32>
    %cst_18 = arith.constant 0.000000e+00 : f32
    %36 = vector.broadcast %cst_18 : f32 to vector<18x24x128xf32>
    %37 = arith.cmpf oge, %35, %36 : vector<18x24x128xf32>
    %cst_19 = arith.constant 2.000000e-01 : f32
    %38 = vector.broadcast %cst_19 : f32 to vector<18x24x128xf32>
    %39 = arith.mulf %38, %35 : vector<18x24x128xf32>
    %40 = arith.select %37, %35, %39 : vector<18x24x128xi1>, vector<18x24x128xf32>
    %c16_i32 = arith.constant 16 : i32
    %41 = arith.muli %arg1, %c16_i32 : i32
    %c1_i32 = arith.constant 1 : i32
    %42 = arith.subi %41, %c1_i32 : i32
    %43 = tpu.iota {dimensions = array<i32: 0>} : vector<18x24x1xi32>
    %44 = vector.broadcast %42 : i32 to vector<18x24x1xi32>
    %45 = arith.addi %44, %43 : vector<18x24x1xi32>
    %46 = tpu.iota {dimensions = array<i32: 1>} : vector<18x24x1xi32>
    %c1_i32_20 = arith.constant 1 : i32
    %47 = vector.broadcast %c1_i32_20 : i32 to vector<18x24x1xi32>
    %48 = arith.subi %46, %47 : vector<18x24x1xi32>
    %c0_i32 = arith.constant 0 : i32
    %49 = vector.broadcast %c0_i32 : i32 to vector<18x24x1xi32>
    %50 = arith.cmpi sge, %45, %49 : vector<18x24x1xi32>
    %c16_i32_21 = arith.constant 16 : i32
    %51 = vector.broadcast %c16_i32_21 : i32 to vector<18x24x1xi32>
    %52 = arith.cmpi slt, %45, %51 : vector<18x24x1xi32>
    %53 = arith.andi %50, %52 : vector<18x24x1xi1>
    %c0_i32_22 = arith.constant 0 : i32
    %54 = vector.broadcast %c0_i32_22 : i32 to vector<18x24x1xi32>
    %55 = arith.cmpi sge, %48, %54 : vector<18x24x1xi32>
    %56 = arith.andi %53, %55 : vector<18x24x1xi1>
    %c16_i32_23 = arith.constant 16 : i32
    %57 = vector.broadcast %c16_i32_23 : i32 to vector<18x24x1xi32>
    %58 = arith.cmpi slt, %48, %57 : vector<18x24x1xi32>
    %59 = arith.andi %56, %58 : vector<18x24x1xi1>
    %cst_24 = arith.constant 0.000000e+00 : f32
    %60 = vector.shape_cast %59 : vector<18x24x1xi1> to vector<18x24x1xi1>
    %61 = vector.broadcast %60 : vector<18x24x1xi1> to vector<18x24x128xi1>
    %62 = vector.broadcast %cst_24 : f32 to vector<18x24x128xf32>
    %63 = arith.select %61, %40, %62 : vector<18x24x128xi1>, vector<18x24x128xf32>
    %64 = vector.extract_strided_slice %63 {offsets = [0, 0, 0], sizes = [16, 16, 128], strides = [1, 1, 1]} : vector<18x24x128xf32> to vector<16x16x128xf32>
    %65 = vector.extract_strided_slice %63 {offsets = [0, 1, 0], sizes = [16, 16, 128], strides = [1, 1, 1]} : vector<18x24x128xf32> to vector<16x16x128xf32>
    %66 = vector.extract_strided_slice %63 {offsets = [0, 2, 0], sizes = [16, 16, 128], strides = [1, 1, 1]} : vector<18x24x128xf32> to vector<16x16x128xf32>
    %67 = tpu.concatenate %64, %65, %66 in 2 : vector<16x16x128xf32>, vector<16x16x128xf32>, vector<16x16x128xf32> -> vector<16x16x384xf32>
    %68 = vector.shape_cast %67 : vector<16x16x384xf32> to vector<256x384xf32>
    %c0_25 = arith.constant 0 : index
    %c0_26 = arith.constant 0 : index
    %c0_27 = arith.constant 0 : index
    %69 = vector.load %arg6[%c0_25, %c0_26, %c0_27] : memref<3x384x128xf32, #tpu.memory_space<vmem>>, vector<1x384x128xf32>
    %70 = vector.shape_cast %69 : vector<1x384x128xf32> to vector<384x128xf32>
    %cst_28 = arith.constant dense<0.000000e+00> : vector<256x128xf32>
    %71 = tpu.matmul %68, %70, %cst_28 {dimension_numbers = #tpu.dot_dimension_numbers<[1], [0], [0], [1], [0, 0, 1, 1], [], []>} : vector<256x384xf32>, vector<384x128xf32>, vector<256x128xf32> -> vector<256x128xf32>
    %72 = vector.extract_strided_slice %63 {offsets = [1, 0, 0], sizes = [16, 16, 128], strides = [1, 1, 1]} : vector<18x24x128xf32> to vector<16x16x128xf32>
    %73 = vector.extract_strided_slice %63 {offsets = [1, 1, 0], sizes = [16, 16, 128], strides = [1, 1, 1]} : vector<18x24x128xf32> to vector<16x16x128xf32>
    %74 = vector.extract_strided_slice %63 {offsets = [1, 2, 0], sizes = [16, 16, 128], strides = [1, 1, 1]} : vector<18x24x128xf32> to vector<16x16x128xf32>
    %75 = tpu.concatenate %72, %73, %74 in 2 : vector<16x16x128xf32>, vector<16x16x128xf32>, vector<16x16x128xf32> -> vector<16x16x384xf32>
    %76 = vector.shape_cast %75 : vector<16x16x384xf32> to vector<256x384xf32>
    %c1_29 = arith.constant 1 : index
    %c0_30 = arith.constant 0 : index
    %c0_31 = arith.constant 0 : index
    %77 = vector.load %arg6[%c1_29, %c0_30, %c0_31] : memref<3x384x128xf32, #tpu.memory_space<vmem>>, vector<1x384x128xf32>
    %78 = vector.shape_cast %77 : vector<1x384x128xf32> to vector<384x128xf32>
    %cst_32 = arith.constant dense<0.000000e+00> : vector<256x128xf32>
    %79 = tpu.matmul %76, %78, %cst_32 {dimension_numbers = #tpu.dot_dimension_numbers<[1], [0], [0], [1], [0, 0, 1, 1], [], []>} : vector<256x384xf32>, vector<384x128xf32>, vector<256x128xf32> -> vector<256x128xf32>
    %80 = arith.addf %71, %79 : vector<256x128xf32>
    %81 = vector.extract_strided_slice %63 {offsets = [2, 0, 0], sizes = [16, 16, 128], strides = [1, 1, 1]} : vector<18x24x128xf32> to vector<16x16x128xf32>
    %82 = vector.extract_strided_slice %63 {offsets = [2, 1, 0], sizes = [16, 16, 128], strides = [1, 1, 1]} : vector<18x24x128xf32> to vector<16x16x128xf32>
    %83 = vector.extract_strided_slice %63 {offsets = [2, 2, 0], sizes = [16, 16, 128], strides = [1, 1, 1]} : vector<18x24x128xf32> to vector<16x16x128xf32>
    %84 = tpu.concatenate %81, %82, %83 in 2 : vector<16x16x128xf32>, vector<16x16x128xf32>, vector<16x16x128xf32> -> vector<16x16x384xf32>
    %85 = vector.shape_cast %84 : vector<16x16x384xf32> to vector<256x384xf32>
    %c2_33 = arith.constant 2 : index
    %c0_34 = arith.constant 0 : index
    %c0_35 = arith.constant 0 : index
    %86 = vector.load %arg6[%c2_33, %c0_34, %c0_35] : memref<3x384x128xf32, #tpu.memory_space<vmem>>, vector<1x384x128xf32>
    %87 = vector.shape_cast %86 : vector<1x384x128xf32> to vector<384x128xf32>
    %cst_36 = arith.constant dense<0.000000e+00> : vector<256x128xf32>
    %88 = tpu.matmul %85, %87, %cst_36 {dimension_numbers = #tpu.dot_dimension_numbers<[1], [0], [0], [1], [0, 0, 1, 1], [], []>} : vector<256x384xf32>, vector<384x128xf32>, vector<256x128xf32> -> vector<256x128xf32>
    %89 = arith.addf %80, %88 : vector<256x128xf32>
    %90 = vector.shape_cast %89 : vector<256x128xf32> to vector<16x16x128xf32>
    %c0_37 = arith.constant 0 : index
    %c0_38 = arith.constant 0 : index
    %91 = vector.load %arg7[%c0_37, %c0_38] : memref<1x128xf32, #tpu.memory_space<vmem>>, vector<1x128xf32>
    %92 = vector.shape_cast %91 : vector<1x128xf32> to vector<1x1x128xf32>
    %93 = vector.broadcast %92 : vector<1x1x128xf32> to vector<16x16x128xf32>
    %94 = arith.addf %90, %93 : vector<16x16x128xf32>
    %95 = vector.extract_strided_slice %4 {offsets = [2, 8, 0], sizes = [16, 16, 128], strides = [1, 1, 1]} : vector<20x32x128xf32> to vector<16x16x128xf32>
    %96 = arith.addf %94, %95 : vector<16x16x128xf32>
    %cst_39 = arith.constant 0.000000e+00 : f32
    %97 = vector.broadcast %cst_39 : f32 to vector<16x16x128xf32>
    %98 = arith.cmpf oge, %96, %97 : vector<16x16x128xf32>
    %cst_40 = arith.constant 2.000000e-01 : f32
    %99 = vector.broadcast %cst_40 : f32 to vector<16x16x128xf32>
    %100 = arith.mulf %99, %96 : vector<16x16x128xf32>
    %101 = arith.select %98, %96, %100 : vector<16x16x128xi1>, vector<16x16x128xf32>
    %c0_41 = arith.constant 0 : index
    %c0_42 = arith.constant 0 : index
    %c0_43 = arith.constant 0 : index
    %c0_44 = arith.constant 0 : index
    %102 = vector.load %arg8[%c0_41, %c0_42, %c0_43, %c0_44] : memref<1x16x16x128xf32, #tpu.memory_space<vmem>>, vector<1x16x16x128xf32>
    %103 = vector.shape_cast %102 : vector<1x16x16x128xf32> to vector<16x16x128xf32>
    %104 = vector.shape_cast %101 : vector<16x16x128xf32> to vector<1x16x16x128xf32>
    tpu.vector_store %arg8[%c0_41, %c0_42, %c0_43, %c0_44], %104 {strides = array<i32>} : memref<1x16x16x128xf32, #tpu.memory_space<vmem>>, vector<1x16x16x128xf32>,
    return
  }
  func.func @transform_0(%arg0: i32, %arg1: i32) -> (i32, i32, i32, i32) {
    %c0_i32 = arith.constant 0 : i32
    %c0_i32_0 = arith.constant 0 : i32
    %c0_i32_1 = arith.constant 0 : i32
    return %arg0, %arg1, %c0_i32, %c0_i32_0 : i32, i32, i32, i32
  }
  func.func @transform_1(%arg0: i32, %arg1: i32) -> (i32, i32, i32, i32) {
    %c1_i32 = arith.constant 1 : i32
    %0 = arith.addi %arg1, %c1_i32 : i32
    %c4_i32 = arith.constant 4 : i32
    %1 = arith.muli %0, %c4_i32 : i32
    %c0_i32 = arith.constant 0 : i32
    %c0_i32_0 = arith.constant 0 : i32
    %c0_i32_1 = arith.constant 0 : i32
    return %arg0, %1, %c0_i32, %c0_i32_0 : i32, i32, i32, i32
  }
  func.func @transform_2(%arg0: i32, %arg1: i32) -> (i32, i32, i32) {
    %c0_i32 = arith.constant 0 : i32
    %c0_i32_0 = arith.constant 0 : i32
    %c0_i32_1 = arith.constant 0 : i32
    %c0_i32_2 = arith.constant 0 : i32
    return %c0_i32, %c0_i32_0, %c0_i32_1 : i32, i32, i32
  }
  func.func @transform_3(%arg0: i32, %arg1: i32) -> (i32, i32) {
    %c0_i32 = arith.constant 0 : i32
    %c0_i32_0 = arith.constant 0 : i32
    %c0_i32_1 = arith.constant 0 : i32
    return %c0_i32, %c0_i32_0 : i32, i32
  }
  func.func @transform_4(%arg0: i32, %arg1: i32) -> (i32, i32, i32) {
    %c0_i32 = arith.constant 0 : i32
    %c0_i32_0 = arith.constant 0 : i32
    %c0_i32_1 = arith.constant 0 : i32
    %c0_i32_2 = arith.constant 0 : i32
    return %c0_i32, %c0_i32_0, %c0_i32_1 : i32, i32, i32
  }
  func.func @transform_5(%arg0: i32, %arg1: i32) -> (i32, i32) {
    %c0_i32 = arith.constant 0 : i32
    %c0_i32_0 = arith.constant 0 : i32
    %c0_i32_1 = arith.constant 0 : i32
    return %c0_i32, %c0_i32_0 : i32, i32
  }
  func.func @transform_6(%arg0: i32, %arg1: i32) -> (i32, i32, i32, i32) {
    %c0_i32 = arith.constant 0 : i32
    %c0_i32_0 = arith.constant 0 : i32
    %c0_i32_1 = arith.constant 0 : i32
    return %arg0, %arg1, %c0_i32, %c0_i32_0 : i32, i32, i32, i32
  }
}

</mosaic_0001>

<bundles_post_ra>
// kernel: residual_block.1
= control target key start
LH: loop header
LB: loop body
LE: loop exit
PB: predicated region body
PF: predicated region fallthrough
CT: control target
= control target key end

     0   :  { %s8148_s21 = smov 0   ;;  %s8150_s22 = smov 0   ;;  %s12784_s0 = inlined_call_operand.vmem [shape: f32[2,20,32,128], index: 0, kind: input, shape index: {}, may-alias: {0,1}]   ;;  %s12785_s1 = inlined_call_operand.vmem [shape: f32[2,20,32,128], index: 1, kind: input, shape index: {}, may-alias: {0,1}]   ;;  %s12786_s2 = inlined_call_operand.vmem [shape: f32[3,384,128], index: 2, kind: input, shape index: {}]   ;;  %s12787_s3 = inlined_call_operand.vmem [shape: f32[1,128], index: 3, kind: input, shape index: {}]   ;;  %s12788_s4 = inlined_call_operand.vmem [shape: f32[3,384,128], index: 4, kind: input, shape index: {}]   ;;  %s12789_s5 = inlined_call_operand.vmem [shape: f32[1,128], index: 5, kind: input, shape index: {}]   ;;  %s12790_s6 = inlined_call_operand.vmem [shape: f32[2,16,16,128], index: 6, kind: output, shape index: {}]  }
   0x1   :  { %s8152_s23 = smov 0  }
   0x2 LB: > { %s28_s24 = sadd.s32 1, %s8105_s22  ;;  %p6321_p0 = scmp.ge.s32.totalorder %s8109_s23, 1  ;;  %s8109_s23 = sphi %s8152_s23, %s16_s23   ;;  %s8105_s22 = sphi %s8150_s22, %s13791_s22   ;;  %s8101_s21 = sphi %s8148_s21, %s13790_s21  }
   0x3   : > { %p30_p1 = scmp.ge.s32.totalorder %s28_s24, 2  ;;  %p270_p2 = scmp.lt.s32.totalorder %s8109_s23, 3 }
   0x5   : > { %s13793_s24 = smov (%p30_p1, %s28_s24), 0  ;;  %p271_p3 = pnand %p6321_p0, %p270_p2 }
   0x7   : > { %274 = sbr.rel (%p271_p3) target bundleno = 1217 (0x4c1), region = 44 }
   0xe   : > { %v6326_v0 = vld [vmem:[%s12786_s2 + $0x180] sm:$0xff]  ;;  %v6327_v1 = vld [vmem:[%s12786_s2 + $0x188] sm:$0xff]  ;;  %p333_p4 = scmp.lt.s32.totalorder %s8101_s21, 1  ;;  %v12804_v3 = vmov 0.0|0.0   ;;  %v6328_v6 = vld [vmem:[%s12786_s2 + $0x190] sm:$0xff]  ;;  %vm653_vm0 = vcmask 1045504  }
   0xf   : > { %v6358_v2 = vld [vmem:[%s12786_s2 + $0x280] sm:$0xff]  ;;  %7507 = vmatprep.subr.bf16.mxu0 %v12804_v3  ;;  %v7508_v4 = vpack.c.bf16 %v6327_v1, %v6326_v0  ;;  %v6359_v5 = vld [vmem:[%s12786_s2 + $0x288] sm:$0xff]  ;;  %v6329_v7 = vld [vmem:[%s12786_s2 + $0x198] sm:$0xff]  ;;  %vm744_vm1 = vcmask 1041408   ;;  %vm526_vm2 = vcmask 1046528  }
  0x10   : > { %v7555_v8 = vpack.c.bf16 %v6359_v5, %v6358_v2  ;;  %v6360_v9 = vld [vmem:[%s12786_s2 + $0x290] sm:$0xff]  ;;  %v6361_v10 = vld [vmem:[%s12786_s2 + $0x298] sm:$0xff]  ;;  %s13795_s21 = smov (!%p333_p4, %s8101_s21), 1  ;;  %v7511_v11 = vpack.c.bf16 %v6329_v7, %v6328_v6  ;;  %v6362_v13 = vld [vmem:[%s12786_s2 + $0x2a0] sm:$0xff] }
  0x11   : > { %7509 = vmatpush1.bf16.msra.mxu0 %v7508_v4  ;;  %v7559_v12 = vpack.c.bf16 %v6361_v10, %v6360_v9  ;;  %v6363_v14 = vld [vmem:[%s12786_s2 + $0x2a8] sm:$0xff]  ;;  %v6330_v15 = vld [vmem:[%s12786_s2 + $0x1a0] sm:$0xff]  ;;  %s7987_s29 = smul.u32 640, %s13795_s21  ;;  %v6364_v19 = vld [vmem:[%s12786_s2 + $0x2b0] sm:$0xff]  ;;  %s6573_s11 = sshll.u32 %s13795_s21, 8 }
  0x12   : > { %7556 = vmatprep.subr.bf16.mxu1 %v7555_v8  ;;  %7510 = vmatprep.subr.bf16.mxu0 %v12804_v3  ;;  %v6331_v16 = vld [vmem:[%s12786_s2 + $0x1a8] sm:$0xff]  ;;  %v7563_v17 = vpack.c.bf16 %v6363_v14, %v6362_v13  ;;  %v6365_v20 = vld [vmem:[%s12786_s2 + $0x2b8] sm:$0xff]  ;;  %v6332_v21 = vld [vmem:[%s12786_s2 + $0x1b0] sm:$0xff]  ;;  %s12614_s21 = scalar_lea.vmem %s12790_s6, %s6573_s11 }
  0x13   : > { %7558 = vmatpush3.bf16.msra.mxu1 %v7555_v8  ;;  %v7514_v18 = vpack.c.bf16 %v6331_v16, %v6330_v15  ;;  %s8218_s12 = scalar_lea.vmem %s12784_s0, %s7987_s29  ;;  %v6333_v22 = vld [vmem:[%s12786_s2 + $0x1b8] sm:$0xff]  ;;  %v7567_v23 = vpack.c.bf16 %v6365_v20, %v6364_v19  ;;  %v6366_v26 = vld [vmem:[%s12786_s2 + $0x2c0] sm:$0xff]  ;;  %v6367_v27 = vld [vmem:[%s12786_s2 + $0x2c8] sm:$0xff]  ;;  %s6572_s27 = sadd.s32 512, %s7987_s29 }
  0x14   : > { %7560 = vmatprep.subr.bf16.mxu1 %v7559_v12  ;;  %v8228_v24 = vld [vmem:[%s8218_s12 + $0x28] sm:$0xff]  ;;  %v7517_v25 = vpack.c.bf16 %v6333_v22, %v6332_v21  ;;  %v8237_v28 = vld [vmem:[%s8218_s12 + $0x30] sm:$0xff]  ;;  %v6334_v30 = vld [vmem:[%s12786_s2 + $0x1c0] sm:$0xff]  ;;  %v7571_v34 = vpack.c.bf16 %v6367_v27, %v6366_v26  ;;  %s9036_s10 = scalar_lea.vmem %s12785_s1, %s6572_s27 }
  0x15   : > { %7512 = vmatpush1.bf16.msra.mxu0 %v7511_v11  ;;  %v659_v29 = vrot.slane %v8228_v24, 2  ;;  %v6335_v31 = vld [vmem:[%s12786_s2 + $0x1c8] sm:$0xff]  ;;  %v660_v32 = vrot.slane %v8237_v28, 2  ;;  %v6368_v37 = vld [vmem:[%s12786_s2 + $0x2d0] sm:$0xff]  ;;  %v6369_v38 = vld [vmem:[%s12786_s2 + $0x2d8] sm:$0xff]  ;;  %v535_v60 = vrot.slane %v8228_v24, 1 }
  0x16   : > { %7513 = vmatprep.subr.bf16.mxu0 %v12804_v3  ;;  %v7520_v36 = vpack.c.bf16 %v6335_v31, %v6334_v30  ;;  %v6336_v40 = vld [vmem:[%s12786_s2 + $0x1d0] sm:$0xff]  ;;  %v6337_v41 = vld [vmem:[%s12786_s2 + $0x1d8] sm:$0xff]  ;;  %v7575_v43 = vpack.c.bf16 %v6369_v38, %v6368_v37  ;;  %v6370_v45 = vld [vmem:[%s12786_s2 + $0x2e0] sm:$0xff]  ;;  %v12792_v61 = vrot.slane %v8237_v28, 1 }
  0x17   : > { %7562 = vmatpush3.bf16.msra.mxu1 %v7559_v12  ;;  %v772_v33 = vrot.slane %v659_v29, 6  ;;  %v8249_v35 = vsel %vm653_vm0, %v659_v29, %v660_v32  ;;  %v7523_v44 = vpack.c.bf16 %v6337_v41, %v6336_v40  ;;  %v6371_v46 = vld [vmem:[%s12786_s2 + $0x2e8] sm:$0xff]  ;;  %v8278_v47 = vld [vmem:[%s8218_s12 + $0x38] sm:$0xff]  ;;  %v6338_v48 = vld [vmem:[%s12786_s2 + $0x1e0] sm:$0xff] }
  0x18   : > { %7564 = vmatprep.subr.bf16.mxu1 %v7563_v17  ;;  %v773_v39 = vrot.slane %v8249_v35, 6  ;;  %v6339_v49 = vld [vmem:[%s12786_s2 + $0x1e8] sm:$0xff]  ;;  %v7579_v50 = vpack.c.bf16 %v6371_v46, %v6370_v45  ;;  %v6372_v51 = vld [vmem:[%s12786_s2 + $0x2f0] sm:$0xff]  ;;  %v6373_v52 = vld [vmem:[%s12786_s2 + $0x2f8] sm:$0xff]  ;;  %v662_v53 = vrot.slane %v8278_v47, 2  ;;  %v8335_v10 = vsel %vm526_vm2, %v535_v60, %v12792_v61 }
  0x19   : > { %7515 = vmatpush1.bf16.msra.mxu0 %v7514_v18  ;;  %v7526_v54 = vpack.c.bf16 %v6339_v49, %v6338_v48  ;;  %v8295_v55 = vld [vmem:[%s8218_s12 + $0x48] sm:$0xff]  ;;  %v8298_v56 = vld [vmem:[%s8218_s12 + $0x50] sm:$0xff]  ;;  %v8301_v57 = vld [vmem:[%s8218_s12 + $0x58] sm:$0xff]  ;;  %v7583_v62 = vpack.c.bf16 %v6373_v52, %v6372_v51  ;;  %v12791_v22 = vrot.slane %v8335_v10, 6 }
  0x1a   : > { %7516 = vmatprep.subr.bf16.mxu0 %v12804_v3  ;;  %v8268_v42 = vsel %vm744_vm1, %v772_v33, %v773_v39  ;;  %v6340_v58 = vld [vmem:[%s12786_s2 + $0x1f0] sm:$0xff]  ;;  %v6341_v59 = vld [vmem:[%s12786_s2 + $0x1f8] sm:$0xff]  ;;  %v663_v63 = vsel %vm653_vm0, %v660_v32, %v662_v53  ;;  %v664_v0 = vrot.slane %v8295_v55, 2  ;;  %v665_v1 = vrot.slane %v8298_v56, 2  ;;  %v6342_v5 = vld [vmem:[%s12786_s2 + $0x200] sm:$0xff] }
  0x1b   : > { %7566 = vmatpush3.bf16.msra.mxu1 %v7563_v17  ;;  %13148 = vst [vmem:[#allocation2_spill] sm:$0xff] %v8268_v42  ;;  %6960 = vmatprep.mubr.f32.mxu1 %v8268_v42  ;;  %v667_v2 = vrot.slane %v8301_v57, 2  ;;  %v7529_v4 = vpack.c.bf16 %v6341_v59, %v6340_v58  ;;  %v8320_v6 = vld [vmem:[%s8218_s12 + $0x20] sm:$0xff]  ;;  %v6343_v7 = vld [vmem:[%s12786_s2 + $0x208] sm:$0xff]  ;;  %v8330_v9 = vld [vmem:[%s8218_s12 + $0x70] sm:$0xff]  ;;  %v779_v11 = vrot.slane %v663_v63, 6 }
  0x1c   : > { %7568 = vmatprep.subr.bf16.mxu1 %v7567_v23  ;;  %v8327_v8 = vld [vmem:[%s8218_s12 + $0x68] sm:$0xff]  ;;  %v1285_v12 = vld [vmem:[%s12786_s2] sm:$0xff]  ;;  %v785_v14 = vrot.slane %v662_v53, 6  ;;  %v666_v15 = vsel %vm653_vm0, %v664_v0, %v665_v1  ;;  %v534_v17 = vrot.slane %v8320_v6, 1  ;;  %v7532_v18 = vpack.c.bf16 %v6343_v7, %v6342_v5  ;;  %v8349_v21 = vld [vmem:[%s8218_s12 + $0x78] sm:$0xff] }
  0x1d   : > { %7518 = vmatpush1.bf16.msra.mxu0 %v7517_v25  ;;  %v1286_v13 = vld [vmem:[%s12786_s2 + $0x8] sm:$0xff]  ;;  %v668_v16 = vsel %vm653_vm0, %v665_v1, %v667_v2  ;;  %v669_v19 = vrot.slane %v8327_v8, 2  ;;  %v670_v20 = vrot.slane %v8330_v9, 2  ;;  %v6344_v25 = vld [vmem:[%s12786_s2 + $0x210] sm:$0xff]  ;;  %v6345_v26 = vld [vmem:[%s12786_s2 + $0x218] sm:$0xff]  ;;  %v793_v27 = vrot.slane %v664_v0, 6 }
  0x1e   : > { %7519 = vmatprep.subr.bf16.mxu0 %v12804_v3  ;;  %v536_v29 = vsel %vm526_vm2, %v534_v17, %v535_v60  ;;  %v8363_v30 = vsel %vm744_vm1, %v773_v39, %v779_v11  ;;  %v794_v31 = vrot.slane %v666_v15, 6  ;;  %v800_v32 = vrot.slane %v668_v16, 6  ;;  %v1287_v33 = vld [vmem:[%s12786_s2 + $0x10] sm:$0xff]  ;;  %v8378_v40 = vld [vmem:[%s8218_s12 + $0x88] sm:$0xff]  ;;  %v8397_v48 = vld [vmem:[%s8218_s12 + $0x98] sm:$0xff] }
  0x1f   : > { %7570 = vmatpush3.bf16.msra.mxu1 %v7567_v23  ;;  %v7588_v23 = vpack.c.bf16 %v1286_v13, %v1285_v12  ;;  %13149 = vst [vmem:[#allocation3_spill] sm:$0xff] %v8363_v30  ;;  %v8373_v37 = vsel %vm744_vm1, %v779_v11, %v785_v14  ;;  %v672_v35 = vrot.slane %v8349_v21, 2  ;;  %v7535_v38 = vpack.c.bf16 %v6345_v26, %v6344_v25  ;;  %v8381_v41 = vld [vmem:[%s8218_s12 + $0x90] sm:$0xff]  ;;  %v6347_v45 = vld [vmem:[%s12786_s2 + $0x228] sm:$0xff]  ;;  %v1289_v58 = vld [vmem:[%s12786_s2 + $0x20] sm:$0xff] }
  0x20   : > { %7572 = vmatprep.subr.bf16.mxu1 %v7571_v34  ;;  %13150 = vst [vmem:[#allocation4_spill] sm:$0xff] %v8373_v37  ;;  %v671_v39 = vsel %vm653_vm0, %v669_v19, %v670_v20  ;;  %v8401_v49 = vsel %vm744_vm1, %v793_v27, %v794_v31  ;;  %v806_v51 = vrot.slane %v667_v2, 6  ;;  %v814_v52 = vrot.slane %v669_v19, 6  ;;  %v1290_v59 = vld [vmem:[%s12786_s2 + $0x28] sm:$0xff]  ;;  %v6348_v0 = vld [vmem:[%s12786_s2 + $0x230] sm:$0xff]  ;;  %v6349_v2 = vld [vmem:[%s12786_s2 + $0x238] sm:$0xff] }
  0x21   : > { %7521 = vmatpush1.bf16.msra.mxu0 %v7520_v36  ;;  %v769_v36 = vrot.slane %v536_v29, 6  ;;  %13151 = vst [vmem:[#allocation5_spill] sm:$0xff] %v8401_v49  ;;  %v815_v53 = vrot.slane %v671_v39, 6  ;;  %v674_v60 = vrot.slane %v8378_v40, 2  ;;  %v677_v1 = vrot.slane %v8397_v48, 2  ;;  %v8430_v5 = vld [vmem:[%s8218_s12 + $0xb0] sm:$0xff] }
  0x22   : > { %7522 = vmatprep.subr.bf16.mxu0 %v12804_v3  ;;  %v8434_v7 = vsel %vm744_vm1, %v800_v32, %v806_v51  ;;  %v7594_v12 = vpack.c.bf16 %v1290_v59, %v1289_v58  ;;  %v827_v14 = vrot.slane %v672_v35, 6  ;;  %v1291_v16 = vld [vmem:[%s12786_s2 + $0x30] sm:$0xff]  ;;  %v1292_v17 = vld [vmem:[%s12786_s2 + $0x38] sm:$0xff]  ;;  %v6350_v26 = vld [vmem:[%s12786_s2 + $0x240] sm:$0xff] }
  0x23   : > { %7574 = vmatpush3.bf16.msra.mxu1 %v7571_v34  ;;  %v1288_v34 = vld [vmem:[%s12786_s2 + $0x18] sm:$0xff]  ;;  %13153 = vst [vmem:[#allocation7_spill] sm:$0xff] %v8434_v7  ;;  %v8437_v13 = vsel %vm744_vm1, %v814_v52, %v815_v53  ;;  %v6351_v27 = vld [vmem:[%s12786_s2 + $0x248] sm:$0xff]  ;;  %v8474_v39 = vld [vmem:[%s8218_s12 + $0xd0] sm:$0xff] }
  0x24   : > { %7576 = vmatprep.subr.bf16.mxu1 %v7575_v43  ;;  %v7591_v46 = vpack.c.bf16 %v1288_v34, %v1287_v33  ;;  %13154 = vst [vmem:[#allocation8_spill] sm:$0xff] %v8437_v13  ;;  %v8451_v25 = vld [vmem:[%s8218_s12 + $0xb8] sm:$0xff]  ;;  %v7597_v33 = vpack.c.bf16 %v1292_v17, %v1291_v16  ;;  %v8466_v34 = vld [vmem:[%s8218_s12 + $0xc8] sm:$0xff]  ;;  %v6352_v52 = vld [vmem:[%s12786_s2 + $0x250] sm:$0xff] }
  0x25   : > { %7524 = vmatpush1.bf16.msra.mxu0 %v7523_v44  ;;  %v6346_v44 = vld [vmem:[%s12786_s2 + $0x220] sm:$0xff]  ;;  %v8494_v58 = vld [vmem:[%s8218_s12 + $0xd8] sm:$0xff]  ;;  %v8516_v17 = vld [vmem:[%s8218_s12 + $0xe8] sm:$0xff] }
  0x26   : > { %7525 = vmatprep.subr.bf16.mxu0 %v12804_v3  ;;  %v7538_v63 = vpack.c.bf16 %v6347_v45, %v6346_v44  ;;  %v1293_v44 = vld [vmem:[%s12786_s2 + $0x40] sm:$0xff]  ;;  %v1294_v45 = vld [vmem:[%s12786_s2 + $0x48] sm:$0xff]  ;;  %v687_v16 = vrot.slane %v8494_v58, 2 }
  0x27   : > { %7578 = vmatpush3.bf16.msra.mxu1 %v7575_v43  ;;  %v8386_v43 = vsel %vm744_vm1, %v769_v36, %v12791_v22  ;;  %v8795_v42 = vld [vmem:[%s8218_s12 + $0x168] sm:$0xff] }
  0x28   : > { %7580 = vmatprep.subr.bf16.mxu1 %v7579_v50  ;;  %1492 = vmatprep.mubr.f32.mxu0 %v8386_v43 }
  0x29   : > { %7527 = vmatpush1.bf16.msra.mxu0 %v7526_v54  ;;  %v673_v54 = vsel %vm653_vm0, %v670_v20, %v672_v35 }
  0x2a   : > { %7528 = vmatprep.subr.bf16.mxu0 %v12804_v3  ;;  %v821_v11 = vrot.slane %v673_v54, 6  ;;  %v848_v54 = vrot.slane %v677_v1, 6 }
  0x2b   : > { %7582 = vmatpush3.bf16.msra.mxu1 %v7579_v50  ;;  %v8404_v50 = vsel %vm744_vm1, %v794_v31, %v800_v32  ;;  %v835_v31 = vrot.slane %v674_v60, 6 }
  0x2c   : > { %7584 = vmatprep.subr.bf16.mxu1 %v7583_v62  ;;  %13152 = vst [vmem:[#allocation6_spill] sm:$0xff] %v8404_v50  ;;  %v8463_v29 = vsel %vm744_vm1, %v815_v53, %v821_v11  ;;  %v8469_v36 = vsel %vm744_vm1, %v821_v11, %v827_v14  ;;  %v6353_v53 = vld [vmem:[%s12786_s2 + $0x258] sm:$0xff] }
  0x2d   : > { %7530 = vmatpush1.bf16.msra.mxu0 %v7529_v4  ;;  %v8427_v4 = vld [vmem:[%s8218_s12 + $0xa8] sm:$0xff]  ;;  %13155 = vst [vmem:[#allocation9_spill] sm:$0xff] %v8463_v29  ;;  %13156 = vst [vmem:[#allocation10_spill] sm:$0xff] %v8469_v36  ;;  %v1296_v14 = vld [vmem:[%s12786_s2 + $0x58] sm:$0xff] }
  0x2e   : > { %7531 = vmatprep.subr.bf16.mxu0 %v12804_v3  ;;  %v679_v20 = vrot.slane %v8427_v4, 2 }
  0x2f   : > { %7586 = vmatpush3.bf16.msra.mxu1 %v7583_v62  ;;  %v675_v62 = vrot.slane %v8381_v41, 2 }
  0x30   : > { %7587 = vmatprep.subr.bf16.mxu1 %v12804_v3 }
  0x31   : > { %7533 = vmatpush1.bf16.msra.mxu0 %v7532_v18  ;;  %v676_v15 = vsel %vm653_vm0, %v674_v60, %v675_v62  ;;  %v7541_v18 = vpack.c.bf16 %v6349_v2, %v6348_v0  ;;  %v678_v19 = vsel %vm653_vm0, %v675_v62, %v677_v1  ;;  %v684_v60 = vrot.slane %v8466_v34, 2 }
  0x32   : > { %6961 = vmatmul.mubr.f32.vlgmr.msra.gmra.mrb[0].mxu1 %v8363_v30  ;;  %7534 = vmatprep.subr.bf16.mxu0 %v12804_v3  ;;  %v836_v32 = vrot.slane %v676_v15, 6  ;;  %v842_v35 = vrot.slane %v678_v19, 6  ;;  %v685_v62 = vrot.slane %v8474_v39, 2  ;;  %v856_v2 = vrot.slane %v679_v20, 6  ;;  %v6354_v19 = vld [vmem:[%s12786_s2 + $0x260] sm:$0xff] }
  0x33   : > { %7589 = vmatpush1.bf16.msra.mxu1 %v7588_v23  ;;  %6963 = vmatprep.mubr.f32.mxu1 %v8373_v37  ;;  %v680_v23 = vrot.slane %v8430_v5, 2  ;;  %v7547_v15 = vpack.c.bf16 %v6353_v53, %v6352_v52  ;;  %v8552_v52 = vld [vmem:[%s8218_s12 + $0xf8] sm:$0xff]  ;;  %v1297_v53 = vld [vmem:[%s12786_s2 + $0x60] sm:$0xff]  ;;  %v877_v22 = vrot.slane %v684_v60, 6 }
  0x34   : > { %7590 = vmatprep.subr.bf16.mxu1 %v12804_v3  ;;  %v8498_v59 = vsel %vm744_vm1, %v835_v31, %v836_v32  ;;  %v8503_v0 = vsel %vm744_vm1, %v836_v32, %v842_v35  ;;  %v8537_v31 = vld [vmem:[%s12786_s2 + $0x270] sm:$0xff]  ;;  %v8542_v32 = vld [vmem:[%s12786_s2 + $0x278] sm:$0xff] }
  0x35   : > { %7536 = vmatpush1.bf16.msra.mxu0 %v7535_v38  ;;  %v682_v38 = vrot.slane %v8451_v25, 2  ;;  %v8483_v51 = vsel %vm653_vm0, %v679_v20, %v680_v23  ;;  %13157 = vst [vmem:[#allocation11_spill] sm:$0xff] %v8498_v59  ;;  %13158 = vst [vmem:[#allocation12_spill] sm:$0xff] %v8503_v0  ;;  %v6355_v20 = vld [vmem:[%s12786_s2 + $0x268] sm:$0xff] }
  0x36   : > { %6964 = vmatmul.mubr.f32.gmra.mrb[2].mxu1 %v8401_v49  ;;  %7537 = vmatprep.subr.bf16.mxu0 %v12804_v3  ;;  %v857_v1 = vrot.slane %v8483_v51, 6 }
  0x37   : > { %6966 = vmatprep.mubr.f32.mxu1 %v8404_v50  ;;  %7592 = vmatpush1.bf16.msra.mxu1 %v7591_v46  ;;  %v7544_v46 = vpack.c.bf16 %v6351_v27, %v6350_v26  ;;  %v683_v11 = vsel %vm653_vm0, %v680_v23, %v682_v38  ;;  %v12793_v23 = vrot.slane %v8278_v47, 1  ;;  %v8532_v26 = vsel %vm744_vm1, %v842_v35, %v848_v54  ;;  %v1298_v54 = vld [vmem:[%s12786_s2 + $0x68] sm:$0xff] }
  0x38   : > { %7593 = vmatprep.subr.bf16.mxu1 %v12804_v3  ;;  %13159 = vst [vmem:[#allocation13_spill] sm:$0xff] %v8532_v26  ;;  %v863_v27 = vrot.slane %v683_v11, 6  ;;  %v869_v35 = vrot.slane %v682_v38, 6  ;;  %v7550_v38 = vpack.c.bf16 %v6355_v20, %v6354_v19  ;;  %v8574_v19 = vld [vmem:[%s8218_s12 + $0x110] sm:$0xff]  ;;  %v13162_v20 = vrot.slane %v8237_v28, 1 }
  0x39   : > { %7539 = vmatpush1.bf16.msra.mxu0 %v7538_v63  ;;  %v7600_v63 = vpack.c.bf16 %v1294_v45, %v1293_v44  ;;  %v8546_v45 = vsel %vm744_vm1, %v856_v2, %v857_v1  ;;  %v8562_v2 = vsel %vm653_vm0, %v685_v62, %v687_v16 }
  0x3a   : > { %6967 = vmatmul.mubr.f32.gmra.mrb[4].mxu1 %v8434_v7  ;;  %7540 = vmatprep.subr.bf16.mxu0 %v12804_v3  ;;  %13160 = vst [vmem:[#allocation14_spill] sm:$0xff] %v8546_v45  ;;  %v8588_v11 = vsel %vm526_vm2, %v13162_v20, %v12793_v23  ;;  %v890_v23 = vrot.slane %v687_v16, 6  ;;  %v13166_v16 = vrot.slane %v8237_v28, 6 }
  0x3b   : > { %6969 = vmatprep.mubr.f32.mxu1 %v8437_v13  ;;  %7595 = vmatpush1.bf16.msra.mxu1 %v7594_v12  ;;  %v1295_v12 = vld [vmem:[%s12786_s2 + $0x50] sm:$0xff] }
  0x3c   : > { %7596 = vmatprep.subr.bf16.mxu1 %v12804_v3  ;;  %v7603_v44 = vpack.c.bf16 %v1296_v14, %v1295_v12  ;;  %v8566_v12 = vld [vmem:[%s8218_s12 + $0x108] sm:$0xff]  ;;  %v7553_v14 = vpack.c.bf16 %v8542_v32, %v8537_v31  ;;  %v8592_v31 = vsel %vm744_vm1, %v863_v27, %v869_v35  ;;  %v884_v32 = vrot.slane %v8562_v2, 6 }
  0x3d   : > { %7542 = vmatpush1.bf16.msra.mxu0 %v7541_v18  ;;  %v8519_v18 = vld [vmem:[%s8218_s12 + $0xf0] sm:$0xff]  ;;  %13163 = vst [vmem:[#allocation16_spill] sm:$0xff] %v8592_v31  ;;  %v544_v2 = vrot.slane %v8298_v56, 1 }
  0x3e   : > { %6970 = vmatmul.mubr.f32.gmra.mrb[6].mxu1 %v8463_v29  ;;  %7543 = vmatprep.subr.bf16.mxu0 %v12804_v3  ;;  %v690_v51 = vrot.slane %v8519_v18, 2  ;;  %v8662_v29 = vld [vmem:[%s8218_s12 + $0x130] sm:$0xff] }
  0x3f   : > { %6972 = vmatprep.mubr.f32.mxu1 %v8469_v36  ;;  %7598 = vmatpush1.bf16.msra.mxu1 %v7597_v33  ;;  %v686_v33 = vsel %vm653_vm0, %v684_v60, %v685_v62  ;;  %v8581_v62 = vsel %vm744_vm1, %v857_v1, %v863_v27  ;;  %v692_v60 = vrot.slane %v8552_v52, 2  ;;  %v695_v27 = vrot.slane %v8574_v19, 2 }
  0x40   : > { %7599 = vmatprep.subr.bf16.mxu1 %v12804_v3  ;;  %v878_v61 = vrot.slane %v686_v33, 6  ;;  %13161 = vst [vmem:[#allocation15_spill] sm:$0xff] %v8581_v62  ;;  %v694_v33 = vrot.slane %v8566_v12, 2  ;;  %v781_v36 = vrot.slane %v8278_v47, 6 }
  0x41   : > { %7545 = vmatpush1.bf16.msra.mxu0 %v7544_v46  ;;  %v689_v46 = vrot.slane %v8516_v17, 2 }
  0x42   : > { %6973 = vmatmul.mubr.f32.gmra.mrb[8].mxu1 %v8498_v59  ;;  %7546 = vmatprep.subr.bf16.mxu0 %v12804_v3  ;;  %v8613_v20 = vsel %vm744_vm1, %v877_v22, %v878_v61  ;;  %v693_v59 = vsel %vm653_vm0, %v690_v51, %v692_v60  ;;  %v8626_v22 = vsel %vm744_vm1, %v878_v61, %v884_v32  ;;  %v1302_v61 = vld [vmem:[%s12786_s2 + $0x88] sm:$0xff]  ;;  %v919_v13 = vrot.slane %v694_v33, 6 }
  0x43   : > { %6975 = vmatprep.mubr.f32.mxu1 %v8503_v0  ;;  %7601 = vmatpush1.bf16.msra.mxu1 %v7600_v63  ;;  %v767_v63 = vrot.slane %v8228_v24, 6  ;;  %v8577_v24 = vld [vmem:[%s8218_s12 + $0x40] sm:$0xff]  ;;  %v8596_v1 = vsel %vm653_vm0, %v689_v46, %v690_v51  ;;  %13164 = vst [vmem:[#allocation17_spill] sm:$0xff] %v8613_v20  ;;  %13165 = vst [vmem:[#allocation18_spill] sm:$0xff] %v8626_v22 }
  0x44   : > { %7602 = vmatprep.subr.bf16.mxu1 %v12804_v3  ;;  %v541_v35 = vrot.slane %v8577_v24, 1  ;;  %v899_v0 = vrot.slane %v8596_v1, 6  ;;  %v1301_v51 = vld [vmem:[%s12786_s2 + $0x80] sm:$0xff] }
  0x45   : > { %7548 = vmatpush1.bf16.msra.mxu0 %v7547_v15  ;;  %v766_v15 = vrot.slane %v8320_v6, 6  ;;  %v7606_v6 = vpack.c.bf16 %v1298_v54, %v1297_v53  ;;  %v1300_v53 = vld [vmem:[%s12786_s2 + $0x78] sm:$0xff]  ;;  %v542_v54 = vrot.slane %v8295_v55, 1 }
  0x46   : > { %6976 = vmatmul.mubr.f32.gmra.mrb[10].mxu1 %v8532_v26  ;;  %7549 = vmatprep.subr.bf16.mxu0 %v12804_v3  ;;  %v8617_v26 = vld [vmem:[%s8218_s12 + $0x118] sm:$0xff] }
  0x47   : > { %6978 = vmatprep.mubr.f32.mxu1 %v8546_v45  ;;  %7604 = vmatpush1.bf16.msra.mxu1 %v7603_v44  ;;  %v1299_v44 = vld [vmem:[%s12786_s2 + $0x70] sm:$0xff]  ;;  %v777_v45 = vrot.slane %v8588_v11, 6  ;;  %v8631_v11 = vsel %vm744_vm1, %v767_v63, %v13166_v16  ;;  %v13169_v16 = vrot.slane %v8335_v10, 6  ;;  %v8672_v10 = vsel %vm744_vm1, %v884_v32, %v890_v23 }
  0x48   : > { %7605 = vmatprep.subr.bf16.mxu1 %v12804_v3  ;;  %13170 = vst [vmem:[#allocation19_spill] sm:$0xff] %v8672_v10  ;;  %v1303_v23 = vld [vmem:[%s12786_s2 + $0x90] sm:$0xff] }
  0x49   : > { %7551 = vmatpush1.bf16.msra.mxu0 %v7550_v38  ;;  %v898_v38 = vrot.slane %v689_v46, 6  ;;  %v13167_v46 = vrot.slane %v8278_v47, 1  ;;  %v911_v47 = vrot.slane %v692_v60, 6 }
  0x4a   : > { %6979 = vmatmul.mubr.f32.gmra.mrb[12].mxu1 %v8581_v62  ;;  %7552 = vmatprep.subr.bf16.mxu0 %v12804_v3  ;;  %v7609_v62 = vpack.c.bf16 %v1300_v53, %v1299_v44  ;;  %v8623_v3 = vsel %vm744_vm1, %v766_v15, %v767_v63  ;;  %v8643_v15 = vsel %vm653_vm0, %v694_v33, %v695_v27  ;;  %v697_v44 = vrot.slane %v8617_v26, 2  ;;  %v8651_v53 = vld [vmem:[%s8218_s12 + $0x128] sm:$0xff] }
  0x4b   : > { %6981 = vmatprep.mubr.f32.mxu1 %v8592_v31  ;;  %7607 = vmatpush1.bf16.msra.mxu1 %v7606_v6  ;;  %v783_v1 = vrot.slane %v13167_v46, 6  ;;  %v13168_v31 = vmov 0.0|0.0   ;;  %v543_v63 = vsel %vm526_vm2, %v541_v35, %v542_v54  ;;  %v8647_v6 = vsel %vm526_vm2, %v542_v54, %v544_v2  ;;  %v1317_v54 = vld [vmem:[%s12786_s2 + $0x100] sm:$0xff] }
  0x4c   : > { %7608 = vmatprep.subr.bf16.mxu1 %v13168_v31  ;;  %v8657_v46 = vsel %vm744_vm1, %v13169_v16, %v777_v45  ;;  %v8678_v16 = vld [vmem:[%s8218_s12 + $0x138] sm:$0xff]  ;;  %v7612_v35 = vpack.c.bf16 %v1302_v61, %v1301_v51  ;;  %v920_v7 = vrot.slane %v8643_v15, 6  ;;  %v790_v50 = vrot.slane %v543_v63, 6 }
  0x4d   : > { %7554 = vmatpush1.bf16.msra.mxu0 %v7553_v14  ;;  %v905_v14 = vrot.slane %v693_v59, 6  ;;  %v8675_v59 = vsel %vm744_vm1, %v898_v38, %v899_v0  ;;  %v698_v60 = vsel %vm653_vm0, %v695_v27, %v697_v44  ;;  %v699_v32 = vrot.slane %v8651_v53, 2 }
  0x4e   : > { %6982 = vmatmul.mubr.f32.gmra.mrb[14].mxu1 %v8613_v20  ;;  %v1318_v20 = vld [vmem:[%s12786_s2 + $0x108] sm:$0xff]  ;;  %13171 = vst [vmem:[#allocation20_spill] sm:$0xff] %v8675_v59  ;;  %v700_v33 = vrot.slane %v8662_v29, 2  ;;  %v8699_v61 = vsel %vm744_vm1, %v777_v45, %v783_v1  ;;  %v13173_v15 = vrot.slane %v8237_v28, 6  ;;  %v13174_v27 = vrot.slane %v8301_v57, 1  ;;  %v8721_v28 = vld [vmem:[%s8218_s12 + $0x150] sm:$0xff] }
  0x4f   : > { %6984 = vmatprep.mubr.f32.mxu1 %v8626_v22  ;;  %7610 = vmatpush1.bf16.msra.mxu1 %v7609_v62  ;;  %v1304_v62 = vld [vmem:[%s12786_s2 + $0x98] sm:$0xff]  ;;  %v7635_v38 = vpack.c.bf16 %v1318_v20, %v1317_v54  ;;  %v8696_v51 = vsel %vm744_vm1, %v899_v0, %v905_v14  ;;  %v8713_v20 = vsel %vm744_vm1, %v905_v14, %v911_v47  ;;  %v787_v0 = vrot.slane %v8577_v24, 6  ;;  %v8718_v1 = vld [vmem:[%s8218_s12 + $0x148] sm:$0xff] }
  0x50   : > { %1493 = vmatmul.mubr.f32.vlgmr.msra.gmra.mrb[0].mxu0 %v8623_v3  ;;  %7611 = vmatprep.subr.bf16.mxu1 %v13168_v31  ;;  %13172 = vst [vmem:[#allocation21_spill] sm:$0xff] %v8696_v51  ;;  %v8704_v63 = vsel %vm744_vm1, %v13173_v15, %v781_v36  ;;  %v8709_v49 = vsel %vm526_vm2, %v544_v2, %v13174_v27  ;;  %13175 = vst [vmem:[#allocation22_spill] sm:$0xff] %v8713_v20  ;;  %v8724_v36 = vld [vmem:[%s8218_s12 + $0x60] sm:$0xff]  ;;  %v788_v14 = vrot.slane %v8295_v55, 6  ;;  %v8733_v15 = vld [vmem:[%s8218_s12 + $0x158] sm:$0xff] }
  0x51   : > { %1497 = vmatprep.mubr.f32.mxu0 %v8657_v46  ;;  %v7615_v54 = vpack.c.bf16 %v1304_v62, %v1303_v23  ;;  %v8728_v2 = vsel %vm744_vm1, %v919_v13, %v920_v7  ;;  %v926_v47 = vrot.slane %v698_v60, 6  ;;  %v1305_v27 = vld [vmem:[%s12786_s2 + $0xa0] sm:$0xff]  ;;  %v13177_v13 = vrot.slane %v8647_v6, 6  ;;  %7636 = vmatprep.subr.bf16.mxu0 %v7635_v38 }
  0x52   : > { %6985 = vmatmul.mubr.f32.gmra.mrb[16].mxu1 %v8672_v10  ;;  %13176 = vst [vmem:[#allocation23_spill] sm:$0xff] %v8728_v2  ;;  %v932_v23 = vrot.slane %v697_v44, 6  ;;  %v798_v62 = vrot.slane %v8709_v49, 6  ;;  %v701_v60 = vsel %vm653_vm0, %v699_v32, %v700_v33  ;;  %v704_v24 = vrot.slane %v8718_v1, 2  ;;  %7638 = vmatpush3.bf16.msra.mxu0 %v7635_v38 }
  0x53   : > { %6987 = vmatprep.mubr.f32.mxu1 %v8675_v59  ;;  %7613 = vmatpush1.bf16.msra.mxu1 %v7612_v35  ;;  %v1306_v35 = vld [vmem:[%s12786_s2 + $0xa8] sm:$0xff]  ;;  %v8746_v55 = vsel %vm744_vm1, %v790_v50, %v13177_v13  ;;  %v705_v45 = vrot.slane %v8721_v28, 2  ;;  %v548_v59 = vrot.slane %v8724_v36, 1  ;;  %v549_v10 = vrot.slane %v8327_v8, 1 }
  0x54   : > { %1498 = vmatmul.mubr.f32.gmra.mrb[2].mxu0 %v8631_v11  ;;  %7614 = vmatprep.subr.bf16.mxu1 %v13168_v31  ;;  %13178 = vst [vmem:[#allocation24_spill] sm:$0xff] %v8746_v55  ;;  %v13179_v50 = vrot.slane %v8678_v16, 2  ;;  %v551_v44 = vrot.slane %v8330_v9, 1  ;;  %v707_v13 = vrot.slane %v8733_v15, 2  ;;  %v8763_v22 = vsel %vm744_vm1, %v920_v7, %v926_v47 }
  0x55   : > { %1502 = vmatprep.mubr.f32.mxu0 %v8699_v61  ;;  %13180 = vst [vmem:[#allocation25_spill] sm:$0xff] %v8763_v22  ;;  %v940_v37 = vrot.slane %v699_v32, 6  ;;  %v941_v38 = vrot.slane %v701_v60, 6  ;;  %v8776_v7 = vsel %vm744_vm1, %v787_v0, %v788_v14  ;;  %v8779_v32 = vsel %vm744_vm1, %v926_v47, %v932_v23  ;;  %v8798_v47 = vld [vmem:[%s8218_s12 + $0x170] sm:$0xff] }
  0x56   : > { %6988 = vmatmul.mubr.f32.gmra.mrb[18].mxu1 %v8696_v51  ;;  %v703_v49 = vsel %vm653_vm0, %v700_v33, %v13179_v50  ;;  %v7618_v51 = vpack.c.bf16 %v1306_v35, %v1305_v27  ;;  %v1307_v33 = vld [vmem:[%s12786_s2 + $0xb0] sm:$0xff]  ;;  %13182 = vst [vmem:[#allocation26_spill] sm:$0xff] %v8776_v7  ;;  %13183 = vst [vmem:[#allocation27_spill] sm:$0xff] %v8779_v32  ;;  %v13186_v27 = vrot.slane %v8647_v6, 6  ;;  %v553_v6 = vrot.slane %v8349_v21, 1 }
  0x57   : > { %6990 = vmatprep.mubr.f32.mxu1 %v8713_v20  ;;  %7616 = vmatpush1.bf16.msra.mxu1 %v7615_v54  ;;  %v13181_v20 = vrot.slane %v8301_v57, 1  ;;  %v1308_v54 = vld [vmem:[%s12786_s2 + $0xb8] sm:$0xff]  ;;  %v947_v60 = vrot.slane %v703_v49, 6  ;;  %v706_v50 = vsel %vm653_vm0, %v704_v24, %v705_v45  ;;  %v550_v0 = vsel %vm526_vm2, %v548_v59, %v549_v10  ;;  %13188 = vst [vmem:[#allocation30_spill] sm:$0xff] %v8798_v47 }
  0x58   : > { %1503 = vmatmul.mubr.f32.gmra.mrb[4].mxu0 %v8704_v63  ;;  %7617 = vmatprep.subr.bf16.mxu1 %v13168_v31  ;;  %v8790_v35 = vsel %vm744_vm1, %v13186_v27, %v798_v62  ;;  %v8805_v23 = vsel %vm653_vm0, %v705_v45, %v707_v13  ;;  %v7621_v49 = vpack.c.bf16 %v1308_v54, %v1307_v33  ;;  %v1310_v33 = vld [vmem:[%s12786_s2 + $0xc8] sm:$0xff] }
  0x59   : > { %v804_v30 = vrot.slane %v13181_v20, 6  ;;  %1507 = vmatprep.mubr.f32.mxu0 %v8746_v55  ;;  %v13184_v20 = vrot.slane %v8298_v56, 6  ;;  %13187 = vst [vmem:[#allocation29_spill] sm:$0xff] %v8790_v35  ;;  %v8813_v59 = vsel %vm744_vm1, %v940_v37, %v941_v38  ;;  %v961_v37 = vrot.slane %v704_v24, 6 }
  0x5a   : > { %6991 = vmatmul.mubr.f32.gmra.mrb[20].mxu1 %v8728_v2  ;;  %13189 = vst [vmem:[#allocation31_spill] sm:$0xff] %v8813_v59  ;;  %v968_v2 = vrot.slane %v8805_v23, 6  ;;  %v554_v24 = vsel %vm526_vm2, %v551_v44, %v553_v6 }
  0x5b   : > { %v8784_v15 = vsel %vm744_vm1, %v788_v14, %v13184_v20  ;;  %6993 = vmatprep.mubr.f32.mxu1 %v8763_v22  ;;  %v8802_v14 = vsel %vm526_vm2, %v549_v10, %v551_v44  ;;  %v8809_v20 = vld [vmem:[%s8218_s12 + $0x178] sm:$0xff]  ;;  %7619 = vmatpush1.bf16.msra.mxu1 %v7618_v51  ;;  %v8816_v27 = vsel %vm744_vm1, %v798_v62, %v804_v30  ;;  %v802_v10 = vrot.slane %v8301_v57, 6  ;;  %v1309_v51 = vld [vmem:[%s12786_s2 + $0xc0] sm:$0xff] }
  0x5c   : > { %13185 = vst [vmem:[#allocation28_spill] sm:$0xff] %v8784_v15  ;;  %1508 = vmatmul.mubr.f32.gmra.mrb[6].mxu0 %v8776_v7  ;;  %13190 = vst [vmem:[#allocation32_spill] sm:$0xff] %v8816_v27  ;;  %v13191_v22 = vrot.slane %v8678_v16, 2  ;;  %7620 = vmatprep.subr.bf16.mxu1 %v13168_v31  ;;  %v962_v30 = vrot.slane %v706_v50, 6  ;;  %v709_v62 = vrot.slane %v8795_v42, 2  ;;  %v710_v57 = vrot.slane %v8798_v47, 2 }
  0x5d   : > { %1512 = vmatprep.mubr.f32.mxu0 %v8790_v35  ;;  %v812_v54 = vrot.slane %v8802_v14, 6  ;;  %v712_v7 = vrot.slane %v8809_v20, 2  ;;  %v8837_v35 = vsel %vm744_vm1, %v941_v38, %v947_v60  ;;  %v7624_v50 = vpack.c.bf16 %v1310_v33, %v1309_v51 }
  0x5e   : > { %v953_v45 = vrot.slane %v13191_v22, 6  ;;  %6994 = vmatmul.mubr.f32.gmra.mrb[22].mxu1 %v8779_v32  ;;  %v811_v22 = vrot.slane %v550_v0, 6  ;;  %13192 = vst [vmem:[#allocation33_spill] sm:$0xff] %v8837_v35  ;;  %v13193_v0 = vrot.slane %v8298_v56, 6  ;;  %v808_v20 = vrot.slane %v8724_v36, 6 }
  0x5f   : > { %6996 = vmatprep.mubr.f32.mxu1 %v8813_v59  ;;  %7622 = vmatpush1.bf16.msra.mxu1 %v7621_v49  ;;  %v809_v38 = vrot.slane %v8327_v8, 6  ;;  %v8852_v59 = vld [vmem:[%s8218_s12 + $0x80] sm:$0xff]  ;;  %v8857_v44 = vsel %vm744_vm1, %v961_v37, %v962_v30  ;;  %v974_v56 = vrot.slane %v707_v13, 6  ;;  %v817_v49 = vrot.slane %v8330_v9, 6  ;;  %v8872_v37 = vld [vmem:[%s8218_s12 + $0x198] sm:$0xff]  ;;  %v1311_v9 = vld [vmem:[%s12786_s2 + $0xd0] sm:$0xff] }
  0x60   : > { %1513 = vmatmul.mubr.f32.gmra.mrb[8].mxu0 %v8784_v15  ;;  %v8844_v14 = vsel %vm744_vm1, %v13193_v0, %v802_v10  ;;  %v8847_v23 = vsel %vm744_vm1, %v947_v60, %v953_v45  ;;  %7623 = vmatprep.subr.bf16.mxu1 %v13168_v31  ;;  %13196 = vst [vmem:[#allocation36_spill] sm:$0xff] %v8857_v44  ;;  %v423_v10 = vld [vmem:[%s8218_s12 + $0x188] sm:$0xff]  ;;  %v424_v45 = vld [vmem:[%s8218_s12 + $0x190] sm:$0xff]  ;;  %v819_v51 = vrot.slane %v554_v24, 6  ;;  %v1312_v13 = vld [vmem:[%s12786_s2 + $0xd8] sm:$0xff]  ;;  %v555_v0 = vrot.slane %v8852_v59, 1 }
  0x61   : > { %13194 = vst [vmem:[#allocation34_spill] sm:$0xff] %v8844_v14  ;;  %13195 = vst [vmem:[#allocation35_spill] sm:$0xff] %v8847_v23  ;;  %1517 = vmatprep.mubr.f32.mxu0 %v8816_v27  ;;  %v711_v60 = vsel %vm653_vm0, %v709_v62, %v710_v57  ;;  %v8865_v8 = vsel %vm744_vm1, %v811_v22, %v812_v54  ;;  %v8868_v36 = vsel %vm744_vm1, %v962_v30, %v968_v2 }
  0x62   : > { %6997 = vmatmul.mubr.f32.gmra.mrb[24].mxu1 %v8837_v35  ;;  %13197 = vst [vmem:[#allocation37_spill] sm:$0xff] %v8865_v8  ;;  %13198 = vst [vmem:[#allocation38_spill] sm:$0xff] %v8868_v36  ;;  %v713_v33 = vsel %vm653_vm0, %v710_v57, %v712_v7  ;;  %v982_v22 = vrot.slane %v709_v62, 6  ;;  %v556_v30 = vrot.slane %v8378_v40, 1  ;;  %v558_v24 = vrot.slane %v8381_v41, 1 }
  0x63   : > { %6999 = vmatprep.mubr.f32.mxu1 %v8847_v23  ;;  %7625 = vmatpush1.bf16.msra.mxu1 %v7624_v50  ;;  %v983_v57 = vrot.slane %v711_v60, 6  ;;  %v825_v35 = vrot.slane %v553_v6, 6  ;;  %v714_v32 = vrot.slane %v423_v10, 2  ;;  %v715_v27 = vrot.slane %v424_v45, 2  ;;  %v427_v45 = vld [vmem:[%s8218_s12 + $0x1a8] sm:$0xff] }
  0x64   : > { %1518 = vmatmul.mubr.f32.gmra.mrb[10].mxu0 %v8844_v14  ;;  %7626 = vmatprep.subr.bf16.mxu1 %v13168_v31  ;;  %v8888_v62 = vsel %vm744_vm1, %v808_v20, %v809_v38  ;;  %v989_v23 = vrot.slane %v713_v33, 6  ;;  %v717_v15 = vrot.slane %v8872_v37, 2  ;;  %v7627_v47 = vpack.c.bf16 %v1312_v13, %v1311_v9  ;;  %v8928_v13 = vld [vmem:[%s8218_s12 + $0x1b8] sm:$0xff] }
  0x65   : > { %1522 = vmatprep.mubr.f32.mxu0 %v8865_v8  ;;  %13199 = vst [vmem:[#allocation39_spill] sm:$0xff] %v8888_v62  ;;  %v8893_v50 = vsel %vm744_vm1, %v968_v2, %v974_v56  ;;  %v8896_v6 = vsel %vm744_vm1, %v812_v54, %v819_v51  ;;  %v823_v60 = vrot.slane %v8349_v21, 6  ;;  %v995_v10 = vrot.slane %v712_v7, 6  ;;  %v8901_v8 = vld [vmem:[%s8218_s12 + $0x1b0] sm:$0xff] }
  0x66   : > { %7000 = vmatmul.mubr.f32.gmra.mrb[26].mxu1 %v8857_v44  ;;  %13200 = vst [vmem:[#allocation40_spill] sm:$0xff] %v8893_v50  ;;  %13201 = vst [vmem:[#allocation41_spill] sm:$0xff] %v8896_v6  ;;  %v8905_v20 = vsel %vm744_vm1, %v809_v38, %v817_v49  ;;  %v557_v33 = vsel %vm526_vm2, %v555_v0, %v556_v30  ;;  %v8909_v2 = vsel %vm526_vm2, %v556_v30, %v558_v24  ;;  %v1313_v30 = vld [vmem:[%s12786_s2 + $0xe0] sm:$0xff] }
  0x67   : > { %7002 = vmatprep.mubr.f32.mxu1 %v8868_v36  ;;  %13202 = vst [vmem:[#allocation42_spill] sm:$0xff] %v8905_v20  ;;  %v560_v54 = vrot.slane %v8397_v48, 1  ;;  %7628 = vmatpush1.bf16.msra.mxu1 %v7627_v47  ;;  %v8914_v21 = vsel %vm744_vm1, %v982_v22, %v983_v57  ;;  %v8917_v7 = vsel %vm744_vm1, %v819_v51, %v825_v35  ;;  %v719_v47 = vrot.slane %v427_v45, 2  ;;  %v1319_v35 = vld [vmem:[%s12786_s2 + $0x110] sm:$0xff]  ;;  %v431_v45 = vld [vmem:[%s8218_s12 + $0x1c8] sm:$0xff] }
  0x68   : > { %1523 = vmatmul.mubr.f32.gmra.mrb[12].mxu0 %v8888_v62  ;;  %13203 = vst [vmem:[#allocation43_spill] sm:$0xff] %v8914_v21  ;;  %13204 = vst [vmem:[#allocation44_spill] sm:$0xff] %v8917_v7  ;;  %v716_v56 = vsel %vm653_vm0, %v714_v32, %v715_v27  ;;  %7629 = vmatprep.subr.bf16.mxu1 %v13168_v31  ;;  %v8923_v38 = vsel %vm744_vm1, %v983_v57, %v989_v23  ;;  %v720_v9 = vrot.slane %v8901_v8, 2  ;;  %v1320_v8 = vld [vmem:[%s12786_s2 + $0x118] sm:$0xff] }
  0x69   : > { %1527 = vmatprep.mubr.f32.mxu0 %v8896_v6  ;;  %13205 = vst [vmem:[#allocation45_spill] sm:$0xff] %v8923_v38  ;;  %v718_v37 = vsel %vm653_vm0, %v715_v27, %v717_v15  ;;  %v8935_v51 = vsel %vm744_vm1, %v817_v49, %v823_v60  ;;  %v8938_v22 = vsel %vm744_vm1, %v989_v23, %v995_v10  ;;  %v832_v27 = vrot.slane %v557_v33, 6  ;;  %v1314_v49 = vld [vmem:[%s12786_s2 + $0xe8] sm:$0xff]  ;;  %v8957_v33 = vld [vmem:[%s8218_s12 + $0x1d0] sm:$0xff] }
  0x6a   : > { %7003 = vmatmul.mubr.f32.gmra.mrb[28].mxu1 %v8893_v50  ;;  %13206 = vst [vmem:[#allocation46_spill] sm:$0xff] %v8935_v51  ;;  %13207 = vst [vmem:[#allocation47_spill] sm:$0xff] %v8938_v22  ;;  %v833_v0 = vrot.slane %v8909_v2, 6  ;;  %v1003_v23 = vrot.slane %v714_v32, 6  ;;  %v1004_v57 = vrot.slane %v716_v56, 6  ;;  %v829_v60 = vrot.slane %v8852_v59, 6 }
  0x6b   : > { %7005 = vmatprep.mubr.f32.mxu1 %v8914_v21  ;;  %v8953_v10 = vsel %vm526_vm2, %v558_v24, %v560_v54  ;;  %v830_v2 = vrot.slane %v8378_v40, 6  ;;  %v1010_v50 = vrot.slane %v718_v37, 6  ;;  %v1016_v36 = vrot.slane %v717_v15, 6  ;;  %v8963_v21 = vld [vmem:[%s8218_s12 + $0xa0] sm:$0xff] }
  0x6c   : > { %1528 = vmatmul.mubr.f32.gmra.mrb[14].mxu0 %v8905_v20  ;;  %v722_v44 = vrot.slane %v8928_v13, 2  ;;  %v8968_v59 = vsel %vm653_vm0, %v719_v47, %v720_v9  ;;  %v7639_v24 = vpack.c.bf16 %v1320_v8, %v1319_v35  ;;  %v7630_v56 = vpack.c.bf16 %v1314_v49, %v1313_v30  ;;  %v8977_v13 = vld [vmem:[%s8218_s12 + $0x1d8] sm:$0xff] }
  0x6d   : > { %1532 = vmatprep.mubr.f32.mxu0 %v8917_v7  ;;  %v8972_v20 = vsel %vm744_vm1, %v832_v27, %v833_v0  ;;  %v840_v40 = vrot.slane %v8953_v10, 6  ;;  %v724_v15 = vrot.slane %v431_v45, 2  ;;  %v725_v37 = vrot.slane %v8957_v33, 2 }
  0x6e   : > { %7006 = vmatmul.mubr.f32.gmra.mrb[30].mxu1 %v8923_v38  ;;  %13208 = vst [vmem:[#allocation48_spill] sm:$0xff] %v8972_v20  ;;  %v8981_v32 = vsel %vm744_vm1, %v1003_v23, %v1004_v57  ;;  %v562_v35 = vrot.slane %v8963_v21, 1  ;;  %v563_v8 = vrot.slane %v8427_v4, 1  ;;  %v565_v27 = vrot.slane %v8430_v5, 1  ;;  %7640 = vmatprep.subr.bf16.mxu0 %v7639_v24 }
  0x6f   : > { %7008 = vmatprep.mubr.f32.mxu1 %v8938_v22  ;;  %13209 = vst [vmem:[#allocation49_spill] sm:$0xff] %v8981_v32  ;;  %v8988_v30 = vsel %vm744_vm1, %v1004_v57, %v1010_v50  ;;  %v1024_v49 = vrot.slane %v719_v47, 6  ;;  %v1025_v10 = vrot.slane %v8968_v59, 6  ;;  %v723_v45 = vsel %vm653_vm0, %v720_v9, %v722_v44  ;;  %7631 = vmatpush1.bf16.msra.mxu1 %v7630_v56  ;;  %v1315_v47 = vld [vmem:[%s12786_s2 + $0xf0] sm:$0xff]  ;;  %v1316_v9 = vld [vmem:[%s12786_s2 + $0xf8] sm:$0xff] }
  0x70   : > { %1533 = vmatmul.mubr.f32.gmra.mrb[16].mxu0 %v8935_v51  ;;  %13210 = vst [vmem:[#allocation50_spill] sm:$0xff] %v8988_v30  ;;  %v8994_v23 = vsel %vm744_vm1, %v829_v60, %v830_v2  ;;  %v8997_v33 = vsel %vm744_vm1, %v1010_v50, %v1016_v36  ;;  %v846_v22 = vrot.slane %v560_v54, 6  ;;  %v727_v57 = vrot.slane %v8977_v13, 2  ;;  %v436_v56 = vld [vmem:[%s8218_s12 + $0x1f0] sm:$0xff]  ;;  %7632 = vmatprep.subr.bf16.mxu1 %v13168_v31  ;;  %v9031_v51 = vld [vmem:[%s8218_s12 + $0x1f8] sm:$0xff] }
  0x71   : > { %1537 = vmatprep.mubr.f32.mxu0 %v8972_v20  ;;  %13211 = vst [vmem:[#allocation51_spill] sm:$0xff] %v8994_v23  ;;  %13212 = vst [vmem:[#allocation52_spill] sm:$0xff] %v8997_v33  ;;  %7642 = vmatpush3.bf16.msra.mxu0 %v7639_v24  ;;  %v9010_v60 = vsel %vm744_vm1, %v833_v0, %v840_v40  ;;  %v13214_v36 = vrot.slane %v8381_v41, 6  ;;  %v726_v54 = vsel %vm653_vm0, %v724_v15, %v725_v37  ;;  %v435_v24 = vld [vmem:[%s8218_s12 + $0x1e8] sm:$0xff] }
  0x72   : > { %7009 = vmatmul.mubr.f32.gmra.mrb[32].mxu1 %v8981_v32  ;;  %13213 = vst [vmem:[#allocation53_spill] sm:$0xff] %v9010_v60  ;;  %v567_v59 = vrot.slane %v8451_v25, 1  ;;  %v1031_v13 = vrot.slane %v723_v45, 6  ;;  %v844_v0 = vrot.slane %v8397_v48, 6  ;;  %v564_v32 = vsel %vm526_vm2, %v562_v35, %v563_v8 }
  0x73   : > { %v9015_v50 = vsel %vm744_vm1, %v830_v2, %v13214_v36  ;;  %7011 = vmatprep.mubr.f32.mxu1 %v8988_v30  ;;  %v566_v38 = vsel %vm526_vm2, %v563_v8, %v565_v27  ;;  %v9028_v2 = vsel %vm744_vm1, %v1024_v49, %v1025_v10  ;;  %v1037_v36 = vrot.slane %v722_v44, 6 }
  0x74   : > { %13215 = vst [vmem:[#allocation54_spill] sm:$0xff] %v9015_v50  ;;  %1538 = vmatmul.mubr.f32.gmra.mrb[18].mxu0 %v8994_v23  ;;  %13216 = vst [vmem:[#allocation55_spill] sm:$0xff] %v9028_v2  ;;  %v1045_v20 = vrot.slane %v724_v15, 6  ;;  %v7633_v48 = vpack.c.bf16 %v1316_v9, %v1315_v47  ;;  %v1046_v35 = vrot.slane %v726_v54, 6  ;;  %v728_v8 = vsel %vm653_vm0, %v725_v37, %v727_v57 }
  0x75   : > { %1542 = vmatprep.mubr.f32.mxu0 %v9010_v60  ;;  %v729_v45 = vrot.slane %v435_v24, 2  ;;  %v730_v49 = vrot.slane %v436_v56, 2  ;;  %v9042_v44 = vsel %vm744_vm1, %v840_v40, %v846_v22  ;;  %v853_v15 = vrot.slane %v564_v32, 6  ;;  %v439_v24 = vld [vmem:[%s9036_s10 + $0x8] sm:$0xff]  ;;  %v440_v22 = vld [vmem:[%s9036_s10 + $0x10] sm:$0xff] }
  0x76   : > { %7012 = vmatmul.mubr.f32.gmra.mrb[34].mxu1 %v8997_v33  ;;  %13217 = vst [vmem:[#allocation56_spill] sm:$0xff] %v9042_v44  ;;  %v854_v30 = vrot.slane %v566_v38, 6  ;;  %v568_v23 = vsel %vm526_vm2, %v565_v27, %v567_v59  ;;  %v9047_v47 = vsel %vm744_vm1, %v1025_v10, %v1031_v13  ;;  %v13219_v9 = vrot.slane %v8381_v41, 6  ;;  %v9064_v41 = vld [vmem:[%s8218_s12 + $0xc0] sm:$0xff] }
  0x77   : > { %7014 = vmatprep.mubr.f32.mxu1 %v9028_v2  ;;  %13218 = vst [vmem:[#allocation57_spill] sm:$0xff] %v9047_v47  ;;  %v732_v54 = vrot.slane %v9031_v51, 2  ;;  %7634 = vmatpush1.bf16.msra.mxu1 %v7633_v48  ;;  %v9059_v38 = vsel %vm744_vm1, %v1031_v13, %v1037_v36  ;;  %v850_v32 = vrot.slane %v8963_v21, 6  ;;  %v851_v40 = vrot.slane %v8427_v4, 6  ;;  %v441_v48 = vld [vmem:[%s9036_s10 + $0x18] sm:$0xff]  ;;  %v444_v2 = vld [vmem:[%s9036_s10 + $0x30] sm:$0xff] }
  0x78   : > { %v9052_v37 = vsel %vm744_vm1, %v13219_v9, %v844_v0  ;;  %1543 = vmatmul.mubr.f32.gmra.mrb[20].mxu0 %v9015_v50  ;;  %13221 = vst [vmem:[#allocation59_spill] sm:$0xff] %v9059_v38  ;;  %v1052_v27 = vrot.slane %v728_v8, 6  ;;  %7667 = vmatprep.subr.bf16.mxu1 %v13168_v31  ;;  %v9069_v51 = vsel %vm744_vm1, %v1045_v20, %v1046_v35  ;;  %v1058_v10 = vrot.slane %v727_v57, 6 }
  0x79   : > { %13220 = vst [vmem:[#allocation58_spill] sm:$0xff] %v9052_v37  ;;  %1547 = vmatprep.mubr.f32.mxu0 %v9042_v44  ;;  %13222 = vst [vmem:[#allocation60_spill] sm:$0xff] %v9069_v51  ;;  %v861_v56 = vrot.slane %v568_v23, 6  ;;  %v731_v13 = vsel %vm653_vm0, %v729_v45, %v730_v49  ;;  %v9074_v21 = vsel %vm744_vm1, %v853_v15, %v854_v30  ;;  %v859_v4 = vrot.slane %v8430_v5, 6 }
  0x7a   : > { %7015 = vmatmul.mubr.f32.gmra.mrb[36].mxu1 %v9047_v47  ;;  %13223 = vst [vmem:[#allocation61_spill] sm:$0xff] %v9074_v21  ;;  %v734_v0 = vrot.slane %v439_v24, 2  ;;  %v735_v36 = vrot.slane %v440_v22, 2  ;;  %v733_v8 = vsel %vm653_vm0, %v730_v49, %v732_v54  ;;  %v569_v20 = vrot.slane %v9064_v41, 1 }
  0x7b   : > { %7017 = vmatprep.mubr.f32.mxu1 %v9059_v38  ;;  %v570_v23 = vrot.slane %v8466_v34, 1  ;;  %v572_v57 = vrot.slane %v8474_v39, 1  ;;  %v9085_v15 = vsel %vm744_vm1, %v1046_v35, %v1052_v27  ;;  %v1066_v5 = vrot.slane %v729_v45, 6 }
  0x7c   : > { %1548 = vmatmul.mubr.f32.gmra.mrb[22].mxu0 %v9052_v37  ;;  %13224 = vst [vmem:[#allocation62_spill] sm:$0xff] %v9085_v15  ;;  %v1067_v9 = vrot.slane %v731_v13, 6  ;;  %v867_v24 = vrot.slane %v567_v59, 6  ;;  %v9089_v49 = vsel %vm744_vm1, %v850_v32, %v851_v40  ;;  %v9092_v22 = vsel %vm744_vm1, %v1052_v27, %v1058_v10  ;;  %v443_v13 = vld [vmem:[%s9036_s10 + $0x28] sm:$0xff] }
  0x7d   : > { %1552 = vmatprep.mubr.f32.mxu0 %v9074_v21  ;;  %13225 = vst [vmem:[#allocation63_spill] sm:$0xff] %v9089_v49  ;;  %13226 = vst [vmem:[#allocation64_spill] sm:$0xff] %v9092_v22  ;;  %v737_v38 = vrot.slane %v441_v48, 2  ;;  %v9096_v47 = vsel %vm744_vm1, %v854_v30, %v861_v56  ;;  %v9099_v35 = vsel %vm744_vm1, %v851_v40, %v859_v4  ;;  %v1073_v45 = vrot.slane %v733_v8, 6  ;;  %v9110_v30 = vld [vmem:[%s9036_s10 + $0x38] sm:$0xff]  ;;  %v1321_v40 = vld [vmem:[%s12786_s2 + $0x120] sm:$0xff] }
  0x7e   : > { %7018 = vmatmul.mubr.f32.gmra.mrb[38].mxu1 %v9069_v51  ;;  %13227 = vst [vmem:[#allocation65_spill] sm:$0xff] %v9096_v47  ;;  %13228 = vst [vmem:[#allocation66_spill] sm:$0xff] %v9099_v35  ;;  %v736_v59 = vsel %vm653_vm0, %v734_v0, %v735_v36  ;;  %v865_v32 = vrot.slane %v8451_v25, 6  ;;  %v571_v27 = vsel %vm526_vm2, %v569_v20, %v570_v23  ;;  %v574_v48 = vrot.slane %v8494_v58, 1  ;;  %v1322_v8 = vld [vmem:[%s12786_s2 + $0x128] sm:$0xff] }
  0x7f   : > { %7020 = vmatprep.mubr.f32.mxu1 %v9085_v15  ;;  %v573_v10 = vsel %vm526_vm2, %v570_v23, %v572_v57  ;;  %v9120_v25 = vsel %vm744_vm1, %v1066_v5, %v1067_v9  ;;  %v9123_v20 = vsel %vm744_vm1, %v861_v56, %v867_v24  ;;  %v1079_v23 = vrot.slane %v732_v54, 6 }
  0x80   : > { %1553 = vmatmul.mubr.f32.gmra.mrb[24].mxu0 %v9089_v49  ;;  %13229 = vst [vmem:[#allocation67_spill] sm:$0xff] %v9120_v25  ;;  %13230 = vst [vmem:[#allocation68_spill] sm:$0xff] %v9123_v20  ;;  %v1087_v15 = vrot.slane %v734_v0, 6  ;;  %v1088_v51 = vrot.slane %v736_v59, 6  ;;  %v738_v33 = vsel %vm653_vm0, %v735_v36, %v737_v38  ;;  %v739_v21 = vrot.slane %v443_v13, 2 }
  0x81   : > { %1557 = vmatprep.mubr.f32.mxu0 %v9096_v47  ;;  %v740_v37 = vrot.slane %v444_v2, 2  ;;  %v874_v49 = vrot.slane %v571_v27, 6  ;;  %v875_v5 = vrot.slane %v573_v10, 6  ;;  %v742_v44 = vrot.slane %v9110_v30, 2  ;;  %v447_v2 = vld [vmem:[%s9036_s10 + $0x48] sm:$0xff]  ;;  %v448_v10 = vld [vmem:[%s9036_s10 + $0x50] sm:$0xff] }
  0x82   : > { %7021 = vmatmul.mubr.f32.gmra.mrb[40].mxu1 %v9092_v22  ;;  %v7643_v56 = vpack.c.bf16 %v1322_v8, %v1321_v40  ;;  %v9131_v54 = vsel %vm744_vm1, %v1067_v9, %v1073_v45  ;;  %v9134_v0 = vsel %vm744_vm1, %v859_v4, %v865_v32  ;;  %v575_v36 = vsel %vm526_vm2, %v572_v57, %v574_v48  ;;  %v9146_v9 = vld [vmem:[%s8218_s12 + $0xe0] sm:$0xff]  ;;  %v9160_v40 = vld [vmem:[%s9036_s10 + $0x58] sm:$0xff] }
  0x83   : > { %7023 = vmatprep.mubr.f32.mxu1 %v9120_v25  ;;  %13231 = vst [vmem:[#allocation69_spill] sm:$0xff] %v9131_v54  ;;  %13232 = vst [vmem:[#allocation70_spill] sm:$0xff] %v9134_v0  ;;  %v9140_v24 = vsel %vm744_vm1, %v1073_v45, %v1079_v23  ;;  %v871_v59 = vrot.slane %v9064_v41, 6  ;;  %v872_v13 = vrot.slane %v8466_v34, 6  ;;  %v1094_v27 = vrot.slane %v738_v33, 6  ;;  %v9220_v25 = vld [vmem:[%s8218_s12 + $0x18] sm:$0xff] }
  0x84   : > { %1558 = vmatmul.mubr.f32.gmra.mrb[26].mxu0 %v9099_v35  ;;  %13233 = vst [vmem:[#allocation71_spill] sm:$0xff] %v9140_v24  ;;  %7644 = vmatprep.subr.bf16.mxu0 %v7643_v56  ;;  %v9150_v4 = vsel %vm744_vm1, %v1087_v15, %v1088_v51  ;;  %v1100_v57 = vrot.slane %v737_v38, 6  ;;  %v880_v32 = vrot.slane %v8474_v39, 6  ;;  %v741_v45 = vsel %vm653_vm0, %v739_v21, %v740_v37 }
  0x85   : > { %1562 = vmatprep.mubr.f32.mxu0 %v9123_v20  ;;  %13234 = vst [vmem:[#allocation72_spill] sm:$0xff] %v9150_v4  ;;  %7646 = vmatpush3.bf16.msra.mxu0 %v7643_v56  ;;  %v9156_v34 = vsel %vm744_vm1, %v874_v49, %v875_v5  ;;  %v882_v33 = vrot.slane %v575_v36, 6  ;;  %v743_v41 = vsel %vm653_vm0, %v740_v37, %v742_v44  ;;  %v1344_v30 = vrot.slane %v447_v2, 2 }
  0x86   : > { %7024 = vmatmul.mubr.f32.gmra.mrb[42].mxu1 %v9131_v54  ;;  %13235 = vst [vmem:[#allocation73_spill] sm:$0xff] %v9156_v34  ;;  %v1345_v15 = vrot.slane %v448_v10, 2  ;;  %v576_v38 = vrot.slane %v9146_v9, 1  ;;  %v577_v39 = vrot.slane %v8516_v17, 1  ;;  %v579_v8 = vrot.slane %v8519_v18, 1 }
  0x87   : > { %7026 = vmatprep.mubr.f32.mxu1 %v9140_v24  ;;  %v9168_v49 = vsel %vm744_vm1, %v1088_v51, %v1094_v27  ;;  %v1108_v37 = vrot.slane %v739_v21, 6  ;;  %v1109_v23 = vrot.slane %v741_v45, 6  ;;  %v888_v56 = vrot.slane %v574_v48, 6  ;;  %v9186_v48 = vld [vmem:[%s8218_s12] sm:$0xff]  ;;  %v9189_v45 = vld [vmem:[%s8218_s12 + $0x8] sm:$0xff] }
  0x88   : > { %1563 = vmatmul.mubr.f32.gmra.mrb[28].mxu0 %v9134_v0  ;;  %13236 = vst [vmem:[#allocation74_spill] sm:$0xff] %v9168_v49  ;;  %v9172_v36 = vsel %vm744_vm1, %v871_v59, %v872_v13  ;;  %v1347_v2 = vrot.slane %v9160_v40, 2  ;;  %v9177_v18 = vsel %vm744_vm1, %v1094_v27, %v1100_v57  ;;  %v9180_v10 = vsel %vm744_vm1, %v875_v5, %v882_v33  ;;  %v9192_v59 = vld [vmem:[%s8218_s12 + $0x10] sm:$0xff] }
  0x89   : > { %1567 = vmatprep.mubr.f32.mxu0 %v9156_v34  ;;  %13237 = vst [vmem:[#allocation75_spill] sm:$0xff] %v9172_v36  ;;  %13238 = vst [vmem:[#allocation76_spill] sm:$0xff] %v9177_v18  ;;  %v9183_v51 = vsel %vm744_vm1, %v872_v13, %v880_v32  ;;  %v1115_v21 = vrot.slane %v743_v41, 6  ;;  %v1346_v40 = vsel %vm653_vm0, %v1344_v30, %v1345_v15  ;;  %v581_v5 = vrot.slane %v8552_v52, 1  ;;  %v1324_v52 = vld [vmem:[%s12786_s2 + $0x138] sm:$0xff] }
  0x8a   : > { %7027 = vmatmul.mubr.f32.gmra.mrb[44].mxu1 %v9150_v4  ;;  %13239 = vst [vmem:[#allocation77_spill] sm:$0xff] %v9180_v10  ;;  %13240 = vst [vmem:[#allocation78_spill] sm:$0xff] %v9183_v51  ;;  %v578_v27 = vsel %vm526_vm2, %v576_v38, %v577_v39  ;;  %v580_v57 = vsel %vm526_vm2, %v577_v39, %v579_v8  ;;  %v9201_v13 = vsel %vm744_vm1, %v1108_v37, %v1109_v23  ;;  %v1323_v38 = vld [vmem:[%s12786_s2 + $0x130] sm:$0xff] }
  0x8b   : > { %7029 = vmatprep.mubr.f32.mxu1 %v9168_v49  ;;  %13241 = vst [vmem:[#allocation79_spill] sm:$0xff] %v9201_v13  ;;  %v9204_v41 = vsel %vm744_vm1, %v882_v33, %v888_v56  ;;  %v886_v4 = vrot.slane %v8494_v58, 6  ;;  %v1121_v49 = vrot.slane %v742_v44, 6  ;;  %v1348_v39 = vsel %vm653_vm0, %v1345_v15, %v1347_v2 }
  0x8c   : > { %1568 = vmatmul.mubr.f32.gmra.mrb[30].mxu0 %v9172_v36  ;;  %13242 = vst [vmem:[#allocation80_spill] sm:$0xff] %v9204_v41  ;;  %v527_v37 = vrot.slane %v9186_v48, 1  ;;  %v528_v33 = vrot.slane %v9189_v45, 1  ;;  %v530_v56 = vrot.slane %v9192_v59, 1  ;;  %v1355_v58 = vrot.slane %v1344_v30, 6 }
  0x8d   : > { %1572 = vmatprep.mubr.f32.mxu0 %v9180_v10  ;;  %v1356_v44 = vrot.slane %v1346_v40, 6  ;;  %v895_v24 = vrot.slane %v578_v27, 6  ;;  %v896_v54 = vrot.slane %v580_v57, 6  ;;  %v9224_v22 = vsel %vm744_vm1, %v1109_v23, %v1115_v21  ;;  %v9236_v57 = vld [vmem:[%s8218_s12 + $0x100] sm:$0xff] }
  0x8e   : > { %7030 = vmatmul.mubr.f32.gmra.mrb[46].mxu1 %v9177_v18  ;;  %13243 = vst [vmem:[#allocation81_spill] sm:$0xff] %v9224_v22  ;;  %v582_v15 = vsel %vm526_vm2, %v579_v8, %v581_v5  ;;  %v7647_v10 = vpack.c.bf16 %v1324_v52, %v1323_v38  ;;  %v9229_v36 = vsel %vm744_vm1, %v880_v32, %v886_v4  ;;  %v892_v40 = vrot.slane %v9146_v9, 6 }
  0x8f   : > { %7032 = vmatprep.mubr.f32.mxu1 %v9201_v13  ;;  %13244 = vst [vmem:[#allocation82_spill] sm:$0xff] %v9229_v36  ;;  %v9232_v30 = vsel %vm744_vm1, %v1115_v21, %v1121_v49  ;;  %v1362_v27 = vrot.slane %v1348_v39, 6  ;;  %v893_v23 = vrot.slane %v8516_v17, 6  ;;  %v529_v8 = vsel %vm526_vm2, %v527_v37, %v528_v33 }
  0x90   : > { %1573 = vmatmul.mubr.f32.gmra.mrb[32].mxu0 %v9183_v51  ;;  %13245 = vst [vmem:[#allocation83_spill] sm:$0xff] %v9232_v30  ;;  %v531_v38 = vsel %vm526_vm2, %v528_v33, %v530_v56  ;;  %v532_v52 = vrot.slane %v9220_v25, 1  ;;  %7648 = vmatprep.subr.bf16.mxu0 %v7647_v10  ;;  %v9245_v4 = vsel %vm744_vm1, %v1355_v58, %v1356_v44  ;;  %v903_v32 = vrot.slane %v582_v15, 6 }
  0x91   : > { %1577 = vmatprep.mubr.f32.mxu0 %v9204_v41  ;;  %13246 = vst [vmem:[#allocation84_spill] sm:$0xff] %v9245_v4  ;;  %v9248_v9 = vsel %vm744_vm1, %v895_v24, %v896_v54  ;;  %7650 = vmatpush3.bf16.msra.mxu0 %v7647_v10  ;;  %v1368_v17 = vrot.slane %v1347_v2, 6  ;;  %v583_v49 = vrot.slane %v9236_v57, 1  ;;  %v584_v21 = vrot.slane %v8566_v12, 1  ;;  %v8016_v10 = vld [vmem:[%s8218_s12 + $0xf0] sm:$0xff] }
  0x92   : > { %7033 = vmatmul.mubr.f32.gmra.mrb[48].mxu1 %v9224_v22  ;;  %13247 = vst [vmem:[#allocation85_spill] sm:$0xff] %v9248_v9  ;;  %v586_v39 = vrot.slane %v8574_v19, 1  ;;  %v9256_v37 = vsel %vm744_vm1, %v1356_v44, %v1362_v27  ;;  %v748_v33 = vrot.slane %v529_v8, 6  ;;  %v749_v58 = vrot.slane %v531_v38, 6 }
  0x93   : > { %7035 = vmatprep.mubr.f32.mxu1 %v9232_v30  ;;  %13248 = vst [vmem:[#allocation86_spill] sm:$0xff] %v9256_v37  ;;  %v9260_v24 = vsel %vm744_vm1, %v892_v40, %v893_v23  ;;  %v901_v2 = vrot.slane %v8016_v10, 6  ;;  %v533_v15 = vsel %vm526_vm2, %v530_v56, %v532_v52  ;;  %v9266_v12 = vsel %vm744_vm1, %v896_v54, %v903_v32 }
  0x94   : > { %1578 = vmatmul.mubr.f32.gmra.mrb[34].mxu0 %v9229_v36  ;;  %13249 = vst [vmem:[#allocation87_spill] sm:$0xff] %v9260_v24  ;;  %13250 = vst [vmem:[#allocation88_spill] sm:$0xff] %v9266_v12  ;;  %v745_v19 = vrot.slane %v9186_v48, 6  ;;  %v746_v44 = vrot.slane %v9189_v45, 6  ;;  %v909_v8 = vrot.slane %v581_v5, 6  ;;  %v9272_v40 = vsel %vm744_vm1, %v1362_v27, %v1368_v17  ;;  %v6374_v48 = vld [vmem:[%s12786_s2 + $0x300] sm:$0xff] }
  0x95   : > { %1582 = vmatprep.mubr.f32.mxu0 %v9248_v9  ;;  %13251 = vst [vmem:[#allocation89_spill] sm:$0xff] %v9272_v40  ;;  %v585_v38 = vsel %vm526_vm2, %v583_v49, %v584_v21  ;;  %v587_v56 = vsel %vm526_vm2, %v584_v21, %v586_v39  ;;  %v588_v10 = vrot.slane %v8617_v26, 1  ;;  %v750_v54 = vsel %vm744_vm1, %v748_v33, %v749_v58  ;;  %v6375_v45 = vld [vmem:[%s12786_s2 + $0x308] sm:$0xff]  ;;  %v8017_v17 = vld [vmem:[%s8218_s12 + $0xf8] sm:$0xff] }
  0x96   : > { %7036 = vmatmul.mubr.f32.gmra.mrb[50].mxu1 %v9245_v4  ;;  %v756_v5 = vrot.slane %v533_v15, 6  ;;  %v9287_v27 = vsel %vm744_vm1, %v893_v23, %v901_v2  ;;  %v907_v26 = vrot.slane %v8017_v17, 6  ;;  %v9292_v49 = vsel %vm744_vm1, %v903_v32, %v909_v8  ;;  %v1325_v15 = vld [vmem:[%s12786_s2 + $0x140] sm:$0xff]  ;;  %v1326_v23 = vld [vmem:[%s12786_s2 + $0x148] sm:$0xff] }
  0x97   : > { %7038 = vmatprep.mubr.f32.mxu1 %v9256_v37  ;;  %13252 = vst [vmem:[#allocation90_spill] sm:$0xff] %v9287_v27  ;;  %13253 = vst [vmem:[#allocation91_spill] sm:$0xff] %v9292_v49  ;;  %v754_v21 = vrot.slane %v9192_v59, 6  ;;  %v916_v33 = vrot.slane %v585_v38, 6  ;;  %v917_v37 = vrot.slane %v587_v56, 6  ;;  %v747_v17 = vsel %vm744_vm1, %v745_v19, %v746_v44  ;;  %v6376_v38 = vld [vmem:[%s12786_s2 + $0x310] sm:$0xff] }
  0x98   : > { %1583 = vmatmul.mubr.f32.gmra.mrb[36].mxu0 %v9260_v24  ;;  %v589_v32 = vsel %vm526_vm2, %v586_v39, %v588_v10  ;;  %v757_v59 = vsel %vm744_vm1, %v749_v58, %v756_v5  ;;  %v762_v8 = vrot.slane %v532_v52, 6  ;;  %v6377_v56 = vld [vmem:[%s12786_s2 + $0x318] sm:$0xff]  ;;  %v9312_v4 = vld [vmem:[%s8218_s12 + $0x120] sm:$0xff]  ;;  %v9316_v19 = vsel %vm744_vm1, %v901_v2, %v907_v26 }
  0x99   : > { %1587 = vmatprep.mubr.f32.mxu0 %v9266_v12  ;;  %13254 = vst [vmem:[#allocation92_spill] sm:$0xff] %v9316_v19  ;;  %v913_v39 = vrot.slane %v9236_v57, 6  ;;  %v7651_v52 = vpack.c.bf16 %v1326_v23, %v1325_v15  ;;  %v760_v30 = vrot.slane %v9220_v25, 6  ;;  %v924_v22 = vrot.slane %v589_v32, 6  ;;  %v6378_v25 = vld [vmem:[%s12786_s2 + $0x320] sm:$0xff] }
  0x9a   : > { %7039 = vmatmul.mubr.f32.gmra.mrb[52].mxu1 %v9272_v40  ;;  %v7668_v40 = vpack.c.bf16 %v6375_v45, %v6374_v48  ;;  %v755_v48 = vsel %vm744_vm1, %v746_v44, %v754_v21  ;;  %v9322_v45 = vsel %vm744_vm1, %v916_v33, %v917_v37  ;;  %v7671_v13 = vpack.c.bf16 %v6377_v56, %v6376_v38 }
  0x9b   : > { %2162 = vmatprep.mubr.f32.mxu1 %v750_v54  ;;  %v8018_v54 = vld [vmem:[%s8218_s12 + $0x108] sm:$0xff]  ;;  %13255 = vst [vmem:[#allocation93_spill] sm:$0xff] %v9322_v45  ;;  %v590_v2 = vrot.slane %v9312_v4, 1  ;;  %v591_v57 = vrot.slane %v8651_v53, 1  ;;  %v593_v26 = vrot.slane %v8662_v29, 1  ;;  %v763_v44 = vsel %vm744_vm1, %v756_v5, %v762_v8  ;;  %v8019_v29 = vld [vmem:[%s8218_s12 + $0x110] sm:$0xff]  ;;  %7652 = vmatprep.subr.bf16.mxu0 %v7651_v52 }
  0x9c   : > { %1588 = vmatmul.mubr.f32.gmra.mrb[38].mxu0 %v9287_v27  ;;  %v914_v58 = vrot.slane %v8018_v54, 6  ;;  %v922_v33 = vrot.slane %v8019_v29, 6  ;;  %v761_v5 = vsel %vm744_vm1, %v754_v21, %v760_v30  ;;  %v9344_v15 = vsel %vm744_vm1, %v917_v37, %v924_v22  ;;  %v6380_v30 = vld [vmem:[%s12786_s2 + $0x330] sm:$0xff]  ;;  %v6381_v37 = vld [vmem:[%s12786_s2 + $0x338] sm:$0xff] }
  0x9d   : > { %1592 = vmatprep.mubr.f32.mxu0 %v9292_v49  ;;  %13257 = vst [vmem:[#allocation95_spill] sm:$0xff] %v9344_v15  ;;  %v930_v23 = vrot.slane %v588_v10, 6  ;;  %7654 = vmatpush3.bf16.msra.mxu0 %v7651_v52  ;;  %v594_v32 = vsel %vm526_vm2, %v591_v57, %v593_v26  ;;  %v7677_v54 = vpack.c.bf16 %v6381_v37, %v6380_v30  ;;  %v1328_v52 = vld [vmem:[%s12786_s2 + $0x158] sm:$0xff] }
  0x9e   : > { %2163 = vmatmul.mubr.f32.vlgmr.msra.gmra.mrb[54].mxu1 %v747_v17  ;;  %v9339_v53 = vsel %vm744_vm1, %v913_v39, %v914_v58  ;;  %v592_v17 = vsel %vm526_vm2, %v590_v2, %v591_v57  ;;  %v938_v56 = vrot.slane %v594_v32, 6  ;;  %v934_v57 = vrot.slane %v9312_v4, 6 }
  0x9f   : > { %7669 = vmatpush1.bf16.msra.mxu1 %v7668_v40  ;;  %2167 = vmatprep.mubr.f32.mxu1 %v757_v59  ;;  %v6379_v40 = vld [vmem:[%s12786_s2 + $0x328] sm:$0xff]  ;;  %13256 = vst [vmem:[#allocation94_spill] sm:$0xff] %v9339_v53  ;;  %v595_v59 = vrot.slane %v8678_v16, 1  ;;  %v8020_v16 = vld [vmem:[%s8218_s12 + $0x118] sm:$0xff]  ;;  %v9363_v21 = vsel %vm744_vm1, %v924_v22, %v930_v23  ;;  %v937_v38 = vrot.slane %v592_v17, 6  ;;  %v9375_v22 = vld [vmem:[%s8218_s12 + $0x140] sm:$0xff] }
  0xa0   : > { %1593 = vmatmul.mubr.f32.gmra.mrb[40].mxu0 %v9316_v19  ;;  %7670 = vmatprep.subr.bf16.mxu1 %v13168_v31  ;;  %v7674_v8 = vpack.c.bf16 %v6379_v40, %v6378_v25  ;;  %v928_v10 = vrot.slane %v8020_v16, 6  ;;  %13259 = vst [vmem:[#allocation97_spill] sm:$0xff] %v9363_v21  ;;  %v598_v23 = vrot.slane %v8718_v1, 1  ;;  %v9419_v16 = vld [vmem:[%s8218_s12 + $0x158] sm:$0xff] }
  0xa1   : > { %1597 = vmatprep.mubr.f32.mxu0 %v9322_v45  ;;  %v596_v39 = vsel %vm526_vm2, %v593_v26, %v595_v59  ;;  %v8021_v26 = vld [vmem:[%s8218_s12 + $0x128] sm:$0xff]  ;;  %v9392_v25 = vsel %vm744_vm1, %v937_v38, %v938_v56 }
  0xa2   : > { %2168 = vmatmul.mubr.f32.gmra.mrb[56].mxu1 %v755_v48  ;;  %v6383_v48 = vld [vmem:[%s12786_s2 + $0x348] sm:$0xff]  ;;  %v9386_v2 = vsel %vm744_vm1, %v922_v33, %v928_v10  ;;  %13261 = vst [vmem:[#allocation99_spill] sm:$0xff] %v9392_v25  ;;  %v945_v40 = vrot.slane %v596_v39, 6  ;;  %v602_v10 = vrot.slane %v9419_v16, 1 }
  0xa3   : > { %2172 = vmatprep.mubr.f32.mxu1 %v763_v44  ;;  %7672 = vmatpush1.bf16.msra.mxu1 %v7671_v13  ;;  %v9359_v13 = vsel %vm744_vm1, %v914_v58, %v922_v33  ;;  %v1327_v58 = vld [vmem:[%s12786_s2 + $0x150] sm:$0xff]  ;;  %13260 = vst [vmem:[#allocation98_spill] sm:$0xff] %v9386_v2  ;;  %v935_v44 = vrot.slane %v8021_v26, 6  ;;  %v600_v33 = vrot.slane %v8721_v28, 1  ;;  %v9448_v26 = vld [vmem:[%s8218_s12 + $0x160] sm:$0xff] }
  0xa4   : > { %1598 = vmatmul.mubr.f32.gmra.mrb[42].mxu0 %v9339_v53  ;;  %7673 = vmatprep.subr.bf16.mxu1 %v13168_v31  ;;  %13258 = vst [vmem:[#allocation96_spill] sm:$0xff] %v9359_v13  ;;  %v7655_v29 = vpack.c.bf16 %v1328_v52, %v1327_v58  ;;  %v8022_v28 = vld [vmem:[%s8218_s12 + $0x130] sm:$0xff]  ;;  %v9413_v32 = vsel %vm744_vm1, %v938_v56, %v945_v40  ;;  %v8024_v56 = vld [vmem:[%s8218_s12 + $0x138] sm:$0xff] }
  0xa5   : > { %1602 = vmatprep.mubr.f32.mxu0 %v9344_v15  ;;  %v9408_v1 = vsel %vm744_vm1, %v934_v57, %v935_v44  ;;  %v943_v17 = vrot.slane %v8022_v28, 6  ;;  %13263 = vst [vmem:[#allocation101_spill] sm:$0xff] %v9413_v32  ;;  %v601_v37 = vsel %vm526_vm2, %v598_v23, %v600_v33  ;;  %v949_v39 = vrot.slane %v8024_v56, 6  ;;  %v1332_v56 = vld [vmem:[%s12786_s2 + $0x178] sm:$0xff] }
  0xa6   : > { %2173 = vmatmul.mubr.f32.gmra.mrb[58].mxu1 %v761_v5  ;;  %v597_v5 = vrot.slane %v9375_v22, 1  ;;  %13262 = vst [vmem:[#allocation100_spill] sm:$0xff] %v9408_v1  ;;  %7656 = vmatprep.subr.bf16.mxu0 %v7655_v29  ;;  %v959_v52 = vrot.slane %v601_v37, 6  ;;  %v603_v57 = vsel %vm526_vm2, %v600_v33, %v602_v10  ;;  %v13269_v37 = vld [vmem:[#allocation29_spill] sm:$0xff] }
  0xa7   : > { %2177 = vmatprep.mubr.f32.mxu1 %v8386_v43  ;;  %7675 = vmatpush1.bf16.msra.mxu1 %v7674_v8  ;;  %v6382_v43 = vld [vmem:[%s12786_s2 + $0x340] sm:$0xff]  ;;  %v951_v8 = vrot.slane %v595_v59, 6  ;;  %v9432_v59 = vsel %vm744_vm1, %v935_v44, %v943_v17  ;;  %v6388_v44 = vld [vmem:[%s12786_s2 + $0x370] sm:$0xff]  ;;  %v966_v28 = vrot.slane %v603_v57, 6 }
  0xa8   : > { %1603 = vmatmul.mubr.f32.gmra.mrb[44].mxu0 %v9359_v13  ;;  %7676 = vmatprep.subr.bf16.mxu1 %v13168_v31  ;;  %v7680_v4 = vpack.c.bf16 %v6383_v48, %v6382_v43  ;;  %v599_v30 = vsel %vm526_vm2, %v597_v5, %v598_v23  ;;  %13264 = vst [vmem:[#allocation102_spill] sm:$0xff] %v9432_v59  ;;  %v1329_v43 = vld [vmem:[%s12786_s2 + $0x160] sm:$0xff]  ;;  %v1330_v48 = vld [vmem:[%s12786_s2 + $0x168] sm:$0xff]  ;;  %v955_v5 = vrot.slane %v9375_v22, 6 }
  0xa9   : > { %1607 = vmatprep.mubr.f32.mxu0 %v9363_v21  ;;  %7658 = vmatpush3.bf16.msra.mxu0 %v7655_v29  ;;  %v958_v58 = vrot.slane %v599_v30, 6  ;;  %v9460_v29 = vsel %vm744_vm1, %v943_v17, %v949_v39  ;;  %v8025_v23 = vld [vmem:[%s8218_s12 + $0x148] sm:$0xff]  ;;  %v605_v30 = vrot.slane %v8795_v42, 1  ;;  %v13270_v17 = vld [vmem:[#allocation30_spill] sm:$0xff]  ;;  %v1331_v42 = vld [vmem:[%s12786_s2 + $0x170] sm:$0xff]  ;;  %v9493_v57 = vsel %vm744_vm1, %v959_v52, %v966_v28 }
  0xaa   : > { %2178 = vmatmul.mubr.f32.gmra.mrb[60].mxu1 %v8623_v3  ;;  %v6384_v3 = vld [vmem:[%s12786_s2 + $0x350] sm:$0xff]  ;;  %13266 = vst [vmem:[#allocation104_spill] sm:$0xff] %v9460_v29  ;;  %v956_v33 = vrot.slane %v8025_v23, 6  ;;  %13273 = vst [vmem:[#allocation106_spill] sm:$0xff] %v9493_v57  ;;  %v7663_v18 = vpack.c.bf16 %v1332_v56, %v1331_v42 }
  0xab   : > { %2182 = vmatprep.mubr.f32.mxu1 %v8657_v46  ;;  %7678 = vmatpush1.bf16.msra.mxu1 %v7677_v54  ;;  %v6385_v46 = vld [vmem:[%s12786_s2 + $0x358] sm:$0xff]  ;;  %v9437_v54 = vsel %vm744_vm1, %v945_v40, %v951_v8  ;;  %v604_v8 = vrot.slane %v9448_v26, 1 }
  0xac   : > { %1608 = vmatmul.mubr.f32.gmra.mrb[46].mxu0 %v9386_v2  ;;  %7679 = vmatprep.subr.bf16.mxu1 %v13168_v31  ;;  %v7683_v38 = vpack.c.bf16 %v6385_v46, %v6384_v3  ;;  %13265 = vst [vmem:[#allocation103_spill] sm:$0xff] %v9437_v54  ;;  %v6389_v40 = vld [vmem:[%s12786_s2 + $0x378] sm:$0xff]  ;;  %v13267_v3 = vld [vmem:[#allocation26_spill] sm:$0xff]  ;;  %v9466_v46 = vsel %vm744_vm1, %v958_v58, %v959_v52  ;;  %v8026_v58 = vld [vmem:[%s8218_s12 + $0x150] sm:$0xff] }
  0xad   : > { %1612 = vmatprep.mubr.f32.mxu0 %v9392_v25  ;;  %13268 = vst [vmem:[#allocation105_spill] sm:$0xff] %v9466_v46  ;;  %v7689_v22 = vpack.c.bf16 %v6389_v40, %v6388_v44  ;;  %v9488_v39 = vsel %vm744_vm1, %v955_v5, %v956_v33  ;;  %v606_v44 = vsel %vm526_vm2, %v604_v8, %v605_v30  ;;  %v13274_v40 = vld [vmem:[#allocation32_spill] sm:$0xff]  ;;  %v6393_v52 = vld [vmem:[%s12786_s2 + $0x398] sm:$0xff]  ;;  %v970_v8 = vrot.slane %v9419_v16, 6  ;;  %v9523_v16 = vld [vmem:[%s8218_s12 + $0x180] sm:$0xff] }
  0xae   : > { %2183 = vmatmul.mubr.f32.gmra.mrb[62].mxu1 %v8631_v11  ;;  %v6386_v11 = vld [vmem:[%s12786_s2 + $0x360] sm:$0xff]  ;;  %13271 = vst [vmem:[#allocation30_spill] sm:$0xff] %v9488_v39 }
  0xaf   : > { %2187 = vmatprep.mubr.f32.mxu1 %v8699_v61  ;;  %7681 = vmatpush1.bf16.msra.mxu1 %v7680_v4  ;;  %v6387_v61 = vld [vmem:[%s12786_s2 + $0x368] sm:$0xff]  ;;  %v7659_v4 = vpack.c.bf16 %v1330_v48, %v1329_v43  ;;  %v964_v43 = vrot.slane %v8026_v58, 6  ;;  %v13272_v48 = vld [vmem:[#allocation28_spill] sm:$0xff] }
  0xb0   : > { %1613 = vmatmul.mubr.f32.gmra.mrb[48].mxu0 %v9408_v1  ;;  %7682 = vmatprep.subr.bf16.mxu1 %v13168_v31 }
  0xb1   : > { %1617 = vmatprep.mubr.f32.mxu0 %v9413_v32  ;;  %7660 = vmatprep.subr.bf16.mxu0 %v7659_v4 }
  0xb2   : > { %2188 = vmatmul.mubr.f32.gmra.mrb[64].mxu1 %v8704_v63  ;;  %v7686_v63 = vpack.c.bf16 %v6387_v61, %v6386_v11  ;;  %v6390_v11 = vld [vmem:[%s12786_s2 + $0x380] sm:$0xff]  ;;  %v6391_v61 = vld [vmem:[%s12786_s2 + $0x388] sm:$0xff]  ;;  %7662 = vmatpush3.bf16.msra.mxu0 %v7659_v4  ;;  %v9512_v4 = vsel %vm744_vm1, %v956_v33, %v964_v43 }
  0xb3   : > { %2192 = vmatprep.mubr.f32.mxu1 %v8746_v55  ;;  %7684 = vmatpush1.bf16.msra.mxu1 %v7683_v38  ;;  %v607_v38 = vrot.slane %v13270_v17, 1  ;;  %v9499_v17 = vld [vmem:[%s8218_s12 + $0x178] sm:$0xff]  ;;  %v7692_v58 = vpack.c.bf16 %v6391_v61, %v6390_v11  ;;  %13275 = vst [vmem:[#allocation107_spill] sm:$0xff] %v9512_v4  ;;  %v6394_v33 = vld [vmem:[%s12786_s2 + $0x3a0] sm:$0xff] }
  0xb4   : > { %1618 = vmatmul.mubr.f32.gmra.mrb[50].mxu0 %v9432_v59  ;;  %7685 = vmatprep.subr.bf16.mxu1 %v13168_v31  ;;  %v609_v5 = vrot.slane %v9499_v17, 1  ;;  %v13277_v61 = vld [vmem:[#allocation37_spill] sm:$0xff] }
  0xb5   : > { %1622 = vmatprep.mubr.f32.mxu0 %v9437_v54  ;;  %v608_v23 = vsel %vm526_vm2, %v605_v30, %v607_v38  ;;  %7664 = vmatprep.subr.bf16.mxu0 %v7663_v18 }
  0xb6   : > { %2193 = vmatmul.mubr.f32.gmra.mrb[66].mxu1 %v13267_v3  ;;  %v980_v11 = vrot.slane %v608_v23, 6  ;;  %7666 = vmatpush3.bf16.msra.mxu0 %v7663_v18  ;;  %v610_v42 = vsel %vm526_vm2, %v607_v38, %v609_v5  ;;  %v6395_v18 = vld [vmem:[%s12786_s2 + $0x3a8] sm:$0xff]  ;;  %v976_v38 = vrot.slane %v9448_v26, 6 }
  0xb7   : > { %2197 = vmatprep.mubr.f32.mxu1 %v13269_v37  ;;  %7687 = vmatpush1.bf16.msra.mxu1 %v7686_v63  ;;  %v972_v63 = vrot.slane %v602_v10, 6  ;;  %v6392_v10 = vld [vmem:[%s12786_s2 + $0x390] sm:$0xff] }
  0xb8   : > { %1623 = vmatmul.mubr.f32.gmra.mrb[52].mxu0 %v9460_v29  ;;  %7688 = vmatprep.subr.bf16.mxu1 %v13168_v31  ;;  %v7695_v56 = vpack.c.bf16 %v6393_v52, %v6392_v10  ;;  %v611_v10 = vrot.slane %v9523_v16, 1  ;;  %v9545_v52 = vld [vmem:[%s8218_s12 + $0x188] sm:$0xff] }
  0xb9   : > { %1627 = vmatprep.mubr.f32.mxu0 %v9466_v46  ;;  %v9517_v30 = vsel %vm744_vm1, %v966_v28, %v972_v63  ;;  %v9534_v28 = vsel %vm744_vm1, %v964_v43, %v970_v8  ;;  %v8028_v63 = vld [vmem:[%s8218_s12 + $0x168] sm:$0xff]  ;;  %v612_v43 = vrot.slane %v9545_v52, 1  ;;  %v9549_v8 = vld [vmem:[%s8218_s12 + $0x190] sm:$0xff] }
  0xba   : > { %2198 = vmatmul.mubr.f32.gmra.mrb[68].mxu1 %v13272_v48  ;;  %13276 = vst [vmem:[#allocation108_spill] sm:$0xff] %v9517_v30  ;;  %13278 = vst [vmem:[#allocation109_spill] sm:$0xff] %v9534_v28  ;;  %v614_v26 = vrot.slane %v9549_v8, 1  ;;  %v9573_v48 = vld [vmem:[%s8218_s12 + $0x198] sm:$0xff] }
  0xbb   : > { %2202 = vmatprep.mubr.f32.mxu1 %v13274_v40  ;;  %7690 = vmatpush1.bf16.msra.mxu1 %v7689_v22  ;;  %v979_v22 = vrot.slane %v606_v44, 6  ;;  %v977_v44 = vrot.slane %v8028_v63, 6  ;;  %v7698_v63 = vpack.c.bf16 %v6395_v18, %v6394_v33  ;;  %v13281_v33 = vld [vmem:[#allocation42_spill] sm:$0xff]  ;;  %v616_v37 = vrot.slane %v9573_v48, 1 }
  0xbc   : > { %1628 = vmatmul.mubr.f32.gmra.mrb[54].mxu0 %v9488_v39  ;;  %7691 = vmatprep.subr.bf16.mxu1 %v13168_v31  ;;  %v615_v40 = vsel %vm526_vm2, %v612_v43, %v614_v26 }
  0xbd   : > { %1632 = vmatprep.mubr.f32.mxu0 %v9493_v57  ;;  %v9540_v23 = vsel %vm744_vm1, %v979_v22, %v980_v11  ;;  %v6396_v22 = vld [vmem:[%s12786_s2 + $0x3b0] sm:$0xff] }
  0xbe   : > { %2203 = vmatmul.mubr.f32.gmra.mrb[70].mxu1 %v8844_v14  ;;  %13279 = vst [vmem:[#allocation110_spill] sm:$0xff] %v9540_v23  ;;  %v613_v14 = vsel %vm526_vm2, %v611_v10, %v612_v43  ;;  %v991_v43 = vrot.slane %v9499_v17, 6 }
  0xbf   : > { %2207 = vmatprep.mubr.f32.mxu1 %v13277_v61  ;;  %7693 = vmatpush1.bf16.msra.mxu1 %v7692_v58  ;;  %v987_v58 = vrot.slane %v610_v42, 6  ;;  %v6397_v42 = vld [vmem:[%s12786_s2 + $0x3b8] sm:$0xff]  ;;  %v993_v61 = vrot.slane %v609_v5, 6  ;;  %v6398_v5 = vld [vmem:[%s12786_s2 + $0x3c0] sm:$0xff] }
  0xc0   : > { %1633 = vmatmul.mubr.f32.gmra.mrb[56].mxu0 %v9512_v4  ;;  %7694 = vmatprep.subr.bf16.mxu1 %v13168_v31 }
  0xc1   : > { %1637 = vmatprep.mubr.f32.mxu0 %v9517_v30  ;;  %v9567_v18 = vsel %vm744_vm1, %v980_v11, %v987_v58  ;;  %v6399_v11 = vld [vmem:[%s12786_s2 + $0x3c8] sm:$0xff] }
  0xc2   : > { %2208 = vmatmul.mubr.f32.gmra.mrb[72].mxu1 %v8888_v62  ;;  %13282 = vst [vmem:[#allocation112_spill] sm:$0xff] %v9567_v18  ;;  %v7704_v3 = vpack.c.bf16 %v6399_v11, %v6398_v5  ;;  %v6407_v5 = vld [vmem:[%s12786_s2 + $0x408] sm:$0xff]  ;;  %v9626_v11 = vld [vmem:[%s8218_s12 + $0x1b0] sm:$0xff] }
  0xc3   : > { %2212 = vmatprep.mubr.f32.mxu1 %v8896_v6  ;;  %7696 = vmatpush1.bf16.msra.mxu1 %v7695_v56  ;;  %v9562_v6 = vsel %vm744_vm1, %v976_v38, %v977_v44  ;;  %v8031_v56 = vld [vmem:[%s8218_s12 + $0x170] sm:$0xff]  ;;  %v7701_v38 = vpack.c.bf16 %v6397_v42, %v6396_v22  ;;  %v9591_v22 = vsel %vm744_vm1, %v987_v58, %v993_v61  ;;  %v1000_v42 = vrot.slane %v613_v14, 6  ;;  %v13288_v61 = vld [vmem:[#allocation51_spill] sm:$0xff] }
  0xc4   : > { %1638 = vmatmul.mubr.f32.gmra.mrb[58].mxu0 %v9534_v28  ;;  %7697 = vmatprep.subr.bf16.mxu1 %v13168_v31  ;;  %13280 = vst [vmem:[#allocation111_spill] sm:$0xff] %v9562_v6  ;;  %v985_v62 = vrot.slane %v8031_v56, 6  ;;  %13285 = vst [vmem:[#allocation114_spill] sm:$0xff] %v9591_v22  ;;  %v1001_v56 = vrot.slane %v615_v40, 6  ;;  %v997_v14 = vrot.slane %v9523_v16, 6  ;;  %v998_v40 = vrot.slane %v9545_v52, 6 }
  0xc5   : > { %1642 = vmatprep.mubr.f32.mxu0 %v9540_v23  ;;  %v9622_v52 = vld [vmem:[%s8218_s12 + $0x1a8] sm:$0xff] }
  0xc6   : > { %2213 = vmatmul.mubr.f32.gmra.mrb[74].mxu1 %v13281_v33  ;;  %v9586_v10 = vsel %vm744_vm1, %v977_v44, %v985_v62  ;;  %v617_v33 = vsel %vm526_vm2, %v614_v26, %v616_v37  ;;  %v9597_v44 = vld [vmem:[%s8218_s12 + $0x1a0] sm:$0xff]  ;;  %v9602_v17 = vsel %vm744_vm1, %v985_v62, %v991_v43  ;;  %v9608_v58 = vsel %vm744_vm1, %v1000_v42, %v1001_v56  ;;  %v6400_v62 = vld [vmem:[%s12786_s2 + $0x3d0] sm:$0xff] }
  0xc7   : > { %2217 = vmatprep.mubr.f32.mxu1 %v8917_v7  ;;  %7699 = vmatpush1.bf16.msra.mxu1 %v7698_v63  ;;  %13283 = vst [vmem:[#allocation113_spill] sm:$0xff] %v9586_v10  ;;  %v13284_v63 = vld [vmem:[#allocation46_spill] sm:$0xff]  ;;  %v13286_v7 = vld [vmem:[#allocation48_spill] sm:$0xff]  ;;  %13287 = vst [vmem:[#allocation115_spill] sm:$0xff] %v9602_v17  ;;  %v1008_v26 = vrot.slane %v617_v33, 6  ;;  %v618_v16 = vrot.slane %v9597_v44, 1 }
  0xc8   : > { %1643 = vmatmul.mubr.f32.gmra.mrb[60].mxu0 %v9562_v6  ;;  %7700 = vmatprep.subr.bf16.mxu1 %v13168_v31  ;;  %13289 = vst [vmem:[#allocation116_spill] sm:$0xff] %v9608_v58  ;;  %v619_v33 = vrot.slane %v9622_v52, 1  ;;  %v621_v43 = vrot.slane %v9626_v11, 1 }
  0xc9   : > { %1647 = vmatprep.mubr.f32.mxu0 %v9567_v18 }
  0xca   : > { %2218 = vmatmul.mubr.f32.gmra.mrb[76].mxu1 %v13284_v63  ;;  %v1006_v63 = vrot.slane %v9549_v8, 6  ;;  %v620_v55 = vsel %vm526_vm2, %v618_v16, %v619_v33 }
  0xcb   : > { %2222 = vmatprep.mubr.f32.mxu1 %v13286_v7  ;;  %7702 = vmatpush1.bf16.msra.mxu1 %v7701_v38  ;;  %v6406_v38 = vld [vmem:[%s12786_s2 + $0x400] sm:$0xff]  ;;  %v9638_v7 = vsel %vm744_vm1, %v997_v14, %v998_v40 }
  0xcc   : > { %1648 = vmatmul.mubr.f32.gmra.mrb[62].mxu0 %v9586_v10  ;;  %7703 = vmatprep.subr.bf16.mxu1 %v13168_v31  ;;  %v9629_v42 = vpack.c.bf16 %v6407_v5, %v6406_v38  ;;  %13290 = vst [vmem:[#allocation117_spill] sm:$0xff] %v9638_v7  ;;  %v1014_v38 = vrot.slane %v616_v37, 6  ;;  %v13292_v5 = vld [vmem:[#allocation56_spill] sm:$0xff]  ;;  %v9654_v8 = vsel %vm744_vm1, %v998_v40, %v1006_v63  ;;  %v1012_v37 = vrot.slane %v9573_v48, 6 }
  0xcd   : > { %1652 = vmatprep.mubr.f32.mxu0 %v9591_v22  ;;  %13293 = vst [vmem:[#allocation119_spill] sm:$0xff] %v9654_v8  ;;  %v1018_v40 = vrot.slane %v9597_v44, 6 }
  0xce   : > { %2223 = vmatmul.mubr.f32.gmra.mrb[78].mxu1 %v13288_v61  ;;  %v6401_v61 = vld [vmem:[%s12786_s2 + $0x3d8] sm:$0xff]  ;;  %7716 = vmatprep.subr.bf16.mxu0 %v9629_v42  ;;  %v9659_v16 = vsel %vm744_vm1, %v1008_v26, %v1014_v38  ;;  %v9667_v48 = vsel %vm744_vm1, %v1006_v63, %v1012_v37  ;;  %v13298_v38 = vld [vmem:[#allocation63_spill] sm:$0xff]  ;;  %v9681_v63 = vld [vmem:[%s8218_s12 + $0x1d0] sm:$0xff] }
  0xcf   : > { %2227 = vmatprep.mubr.f32.mxu1 %v9010_v60  ;;  %7705 = vmatpush1.bf16.msra.mxu1 %v7704_v3  ;;  %v7707_v60 = vpack.c.bf16 %v6401_v61, %v6400_v62  ;;  %v9644_v3 = vsel %vm744_vm1, %v1001_v56, %v1008_v26  ;;  %v622_v61 = vsel %vm526_vm2, %v619_v33, %v621_v43  ;;  %v8035_v62 = vld [vmem:[%s8218_s12 + $0x1b8] sm:$0xff]  ;;  %v13294_v56 = vld [vmem:[#allocation58_spill] sm:$0xff]  ;;  %v1021_v33 = vrot.slane %v620_v55, 6 }
  0xd0   : > { %1653 = vmatmul.mubr.f32.gmra.mrb[64].mxu0 %v9602_v17  ;;  %7706 = vmatprep.subr.bf16.mxu1 %v13168_v31  ;;  %13291 = vst [vmem:[#allocation118_spill] sm:$0xff] %v9644_v3  ;;  %v623_v14 = vrot.slane %v8035_v62, 1  ;;  %13295 = vst [vmem:[#allocation120_spill] sm:$0xff] %v9659_v16  ;;  %v1019_v26 = vrot.slane %v9622_v52, 6  ;;  %v628_v44 = vrot.slane %v9681_v63, 1  ;;  %v6402_v52 = vld [vmem:[%s12786_s2 + $0x3e0] sm:$0xff] }
  0xd1   : > { %1657 = vmatprep.mubr.f32.mxu0 %v9608_v58  ;;  %13297 = vst [vmem:[#allocation121_spill] sm:$0xff] %v9667_v48 }
  0xd2   : > { %2228 = vmatmul.mubr.f32.gmra.mrb[80].mxu1 %v9015_v50  ;;  %v624_v50 = vsel %vm526_vm2, %v621_v43, %v623_v14  ;;  %v9693_v37 = vsel %vm744_vm1, %v1018_v40, %v1019_v26 }
  0xd3   : > { %2232 = vmatprep.mubr.f32.mxu1 %v13292_v5  ;;  %7708 = vmatpush1.bf16.msra.mxu1 %v7707_v60  ;;  %v1022_v5 = vrot.slane %v622_v61, 6  ;;  %v13296_v60 = vld [vmem:[#allocation61_spill] sm:$0xff]  ;;  %v1029_v61 = vrot.slane %v624_v50, 6  ;;  %v6403_v50 = vld [vmem:[%s12786_s2 + $0x3e8] sm:$0xff]  ;;  %13300 = vst [vmem:[#allocation123_spill] sm:$0xff] %v9693_v37 }
  0xd4   : > { %1658 = vmatmul.mubr.f32.gmra.mrb[66].mxu0 %v9638_v7  ;;  %7709 = vmatprep.subr.bf16.mxu1 %v13168_v31 }
  0xd5   : > { %1662 = vmatprep.mubr.f32.mxu0 %v9644_v3  ;;  %v430_v3 = vld [vmem:[%s8218_s12 + $0x1c0] sm:$0xff]  ;;  %v9673_v55 = vsel %vm744_vm1, %v1021_v33, %v1022_v5  ;;  %v1027_v33 = vrot.slane %v9626_v11, 6 }
  0xd6   : > { %2233 = vmatmul.mubr.f32.gmra.mrb[82].mxu1 %v13294_v56  ;;  %13299 = vst [vmem:[#allocation122_spill] sm:$0xff] %v9673_v55  ;;  %v625_v43 = vrot.slane %v430_v3, 1 }
  0xd7   : > { %2237 = vmatprep.mubr.f32.mxu1 %v13296_v60  ;;  %v9677_v60 = vld [vmem:[%s8218_s12 + $0x1c8] sm:$0xff]  ;;  %v9708_v11 = vsel %vm744_vm1, %v1019_v26, %v1027_v33  ;;  %v1039_v26 = vrot.slane %v430_v3, 6 }
  0xd8   : > { %1663 = vmatmul.mubr.f32.gmra.mrb[68].mxu0 %v9654_v8  ;;  %v626_v56 = vrot.slane %v9677_v60, 1  ;;  %13302 = vst [vmem:[#allocation125_spill] sm:$0xff] %v9708_v11 }
  0xd9   : > { %1667 = vmatprep.mubr.f32.mxu0 %v9659_v16 }
  0xda   : > { %2238 = vmatmul.mubr.f32.gmra.mrb[84].mxu1 %v13298_v38  ;;  %v9698_v38 = vsel %vm744_vm1, %v1022_v5, %v1029_v61  ;;  %v627_v16 = vsel %vm526_vm2, %v625_v43, %v626_v56  ;;  %v629_v8 = vsel %vm526_vm2, %v626_v56, %v628_v44  ;;  %v1033_v5 = vrot.slane %v8035_v62, 6  ;;  %v434_v43 = vld [vmem:[%s8218_s12 + $0x1e0] sm:$0xff] }
  0xdb   : > { %2242 = vmatprep.mubr.f32.mxu1 %v9096_v47  ;;  %v7710_v47 = vpack.c.bf16 %v6403_v50, %v6402_v52  ;;  %13301 = vst [vmem:[#allocation124_spill] sm:$0xff] %v9698_v38  ;;  %v1042_v56 = vrot.slane %v627_v16, 6  ;;  %v1043_v40 = vrot.slane %v629_v8, 6  ;;  %v13307_v52 = vld [vmem:[#allocation77_spill] sm:$0xff]  ;;  %v8039_v50 = vld [vmem:[%s8218_s12 + $0x1e8] sm:$0xff] }
  0xdc   : > { %1668 = vmatmul.mubr.f32.gmra.mrb[70].mxu0 %v9667_v48  ;;  %v1035_v48 = vrot.slane %v623_v14, 6  ;;  %v9720_v62 = vsel %vm744_vm1, %v1027_v33, %v1033_v5 }
  0xdd   : > { %1672 = vmatprep.mubr.f32.mxu0 %v9673_v55  ;;  %v8038_v55 = vld [vmem:[%s8218_s12 + $0x1d8] sm:$0xff]  ;;  %7711 = vmatpush1.bf16.msra.mxu1 %v7710_v47  ;;  %13304 = vst [vmem:[#allocation127_spill] sm:$0xff] %v9720_v62  ;;  %v9725_v8 = vsel %vm744_vm1, %v1042_v56, %v1043_v40 }
  0xde   : > { %2243 = vmatmul.mubr.f32.gmra.mrb[86].mxu1 %v9099_v35  ;;  %v630_v7 = vrot.slane %v8038_v55, 1  ;;  %7712 = vmatprep.subr.bf16.mxu1 %v13168_v31  ;;  %v9712_v14 = vsel %vm744_vm1, %v1029_v61, %v1035_v48  ;;  %v1040_v48 = vrot.slane %v9677_v60, 6  ;;  %v13305_v61 = vld [vmem:[#allocation75_spill] sm:$0xff]  ;;  %13306 = vst [vmem:[#allocation128_spill] sm:$0xff] %v9725_v8  ;;  %v1048_v60 = vrot.slane %v9681_v63, 6 }
  0xdf   : > { %2247 = vmatprep.mubr.f32.mxu1 %v9123_v20  ;;  %13303 = vst [vmem:[#allocation126_spill] sm:$0xff] %v9712_v14  ;;  %v1054_v20 = vrot.slane %v8038_v55, 6 }
  0xe0   : > { %1673 = vmatmul.mubr.f32.gmra.mrb[72].mxu0 %v9693_v37  ;;  %v631_v47 = vsel %vm526_vm2, %v628_v44, %v630_v7  ;;  %v632_v44 = vrot.slane %v434_v43, 1  ;;  %v9736_v3 = vsel %vm744_vm1, %v1039_v26, %v1040_v48  ;;  %v1056_v56 = vrot.slane %v630_v7, 6 }
  0xe1   : > { %1677 = vmatprep.mubr.f32.mxu0 %v9698_v38  ;;  %v1050_v16 = vrot.slane %v631_v47, 6  ;;  %13308 = vst [vmem:[#allocation129_spill] sm:$0xff] %v9736_v3  ;;  %v6404_v47 = vld [vmem:[%s12786_s2 + $0x3f0] sm:$0xff]  ;;  %v9756_v7 = vsel %vm744_vm1, %v1040_v48, %v1048_v60  ;;  %v9768_v55 = vsel %vm744_vm1, %v1048_v60, %v1054_v20  ;;  %v1060_v48 = vrot.slane %v434_v43, 6 }
  0xe2   : > { %2248 = vmatmul.mubr.f32.gmra.mrb[88].mxu1 %v9134_v0  ;;  %v9730_v0 = vld [vmem:[%s8218_s12 + $0x1f0] sm:$0xff]  ;;  %13310 = vst [vmem:[#allocation131_spill] sm:$0xff] %v9756_v7  ;;  %13312 = vst [vmem:[#allocation133_spill] sm:$0xff] %v9768_v55 }
  0xe3   : > { %2252 = vmatprep.mubr.f32.mxu1 %v9156_v34  ;;  %v633_v34 = vrot.slane %v8039_v50, 1  ;;  %v635_v33 = vrot.slane %v9730_v0, 1  ;;  %v9741_v5 = vsel %vm744_vm1, %v1043_v40, %v1050_v16  ;;  %v1069_v43 = vrot.slane %v9730_v0, 6 }
  0xe4   : > { %1678 = vmatmul.mubr.f32.gmra.mrb[74].mxu0 %v9708_v11  ;;  %13309 = vst [vmem:[#allocation130_spill] sm:$0xff] %v9741_v5 }
  0xe5   : > { %1682 = vmatprep.mubr.f32.mxu0 %v9712_v14  ;;  %v634_v26 = vsel %vm526_vm2, %v632_v44, %v633_v34  ;;  %v636_v63 = vsel %vm526_vm2, %v633_v34, %v635_v33 }
  0xe6   : > { %2253 = vmatmul.mubr.f32.gmra.mrb[90].mxu1 %v13305_v61  ;;  %v1063_v34 = vrot.slane %v634_v26, 6  ;;  %v1064_v44 = vrot.slane %v636_v63, 6  ;;  %v8042_v26 = vld [vmem:[%s9036_s10 + $0x8] sm:$0xff] }
  0xe7   : > { %2257 = vmatprep.mubr.f32.mxu1 %v13307_v52  ;;  %v6405_v52 = vld [vmem:[%s12786_s2 + $0x3f8] sm:$0xff]  ;;  %v640_v63 = vrot.slane %v8042_v26, 1 }
  0xe8   : > { %1683 = vmatmul.mubr.f32.gmra.mrb[76].mxu0 %v9720_v62  ;;  %v7713_v40 = vpack.c.bf16 %v6405_v52, %v6404_v47  ;;  %v438_v47 = vld [vmem:[%s9036_s10] sm:$0xff] }
  0xe9   : > { %1687 = vmatprep.mubr.f32.mxu0 %v9725_v8 }
  0xea   : > { %2258 = vmatmul.mubr.f32.gmra.mrb[92].mxu1 %v9183_v51  ;;  %v8041_v51 = vld [vmem:[%s8218_s12 + $0x1f8] sm:$0xff] }
  0xeb   : > { %2262 = vmatprep.mubr.f32.mxu1 %v9204_v41  ;;  %v637_v61 = vrot.slane %v8041_v51, 1  ;;  %7714 = vmatpush1.bf16.msra.mxu1 %v7713_v40  ;;  %v9760_v41 = vsel %vm744_vm1, %v1050_v16, %v1056_v56  ;;  %v1061_v40 = vrot.slane %v8039_v50, 6  ;;  %v9772_v16 = vsel %vm744_vm1, %v1063_v34, %v1064_v44 }
  0xec   : > { %1688 = vmatmul.mubr.f32.gmra.mrb[78].mxu0 %v9736_v3  ;;  %13311 = vst [vmem:[#allocation132_spill] sm:$0xff] %v9760_v41  ;;  %13313 = vst [vmem:[#allocation134_spill] sm:$0xff] %v9772_v16 }
  0xed   : > { %1692 = vmatprep.mubr.f32.mxu0 %v9741_v5  ;;  %v638_v52 = vsel %vm526_vm2, %v635_v33, %v637_v61  ;;  %v639_v33 = vrot.slane %v438_v47, 1  ;;  %v9783_v20 = vsel %vm744_vm1, %v1060_v48, %v1061_v40  ;;  %v1077_v60 = vrot.slane %v637_v61, 6 }
  0xee   : > { %2263 = vmatmul.mubr.f32.gmra.mrb[94].mxu1 %v9229_v36  ;;  %v1071_v56 = vrot.slane %v638_v52, 6  ;;  %13314 = vst [vmem:[#allocation135_spill] sm:$0xff] %v9783_v20  ;;  %v9797_v0 = vsel %vm744_vm1, %v1061_v40, %v1069_v43  ;;  %v1075_v48 = vrot.slane %v8041_v51, 6  ;;  %v1081_v40 = vrot.slane %v438_v47, 6 }
  0xef   : > { %2267 = vmatprep.mubr.f32.mxu1 %v9248_v9  ;;  %v9777_v9 = vld [vmem:[%s9036_s10 + $0x10] sm:$0xff]  ;;  %v641_v34 = vsel %vm526_vm2, %v639_v33, %v640_v63  ;;  %13316 = vst [vmem:[#allocation137_spill] sm:$0xff] %v9797_v0 }
  0xf0   : > { %1693 = vmatmul.mubr.f32.gmra.mrb[80].mxu0 %v9756_v7  ;;  %v642_v36 = vrot.slane %v9777_v9, 1  ;;  %v9788_v50 = vsel %vm744_vm1, %v1064_v44, %v1071_v56  ;;  %v9801_v61 = vsel %vm744_vm1, %v1071_v56, %v1077_v60  ;;  %v1084_v44 = vrot.slane %v641_v34, 6  ;;  %v9817_v34 = vld [vmem:[%s9036_s10 + $0x28] sm:$0xff] }
  0xf1   : > { %1697 = vmatprep.mubr.f32.mxu0 %v9760_v41  ;;  %13315 = vst [vmem:[#allocation136_spill] sm:$0xff] %v9788_v50  ;;  %13317 = vst [vmem:[#allocation138_spill] sm:$0xff] %v9801_v61  ;;  %v9809_v51 = vsel %vm744_vm1, %v1069_v43, %v1075_v48 }
  0xf2   : > { %2268 = vmatmul.mubr.f32.gmra.mrb[96].mxu1 %v9260_v24  ;;  %v643_v52 = vsel %vm526_vm2, %v640_v63, %v642_v36  ;;  %13318 = vst [vmem:[#allocation139_spill] sm:$0xff] %v9809_v51 }
  0xf3   : > { %2272 = vmatprep.mubr.f32.mxu1 %v9266_v12  ;;  %v8044_v12 = vld [vmem:[%s9036_s10 + $0x18] sm:$0xff]  ;;  %v1085_v33 = vrot.slane %v643_v52, 6  ;;  %v647_v52 = vrot.slane %v9817_v34, 1 }
  0xf4   : > { %1698 = vmatmul.mubr.f32.gmra.mrb[82].mxu0 %v9768_v55  ;;  %v644_v24 = vrot.slane %v8044_v12, 1 }
  0xf5   : > { %1702 = vmatprep.mubr.f32.mxu0 %v9772_v16  ;;  %v9813_v56 = vsel %vm744_vm1, %v1084_v44, %v1085_v33 }
  0xf6   : > { %2273 = vmatmul.mubr.f32.gmra.mrb[98].mxu1 %v9287_v27  ;;  %v645_v63 = vsel %vm526_vm2, %v642_v36, %v644_v24  ;;  %13319 = vst [vmem:[#allocation140_spill] sm:$0xff] %v9813_v56  ;;  %v1098_v44 = vrot.slane %v644_v24, 6 }
  0xf7   : > { %2277 = vmatprep.mubr.f32.mxu1 %v9292_v49  ;;  %v442_v49 = vld [vmem:[%s9036_s10 + $0x20] sm:$0xff]  ;;  %v1092_v60 = vrot.slane %v645_v63, 6 }
  0xf8   : > { %1703 = vmatmul.mubr.f32.gmra.mrb[84].mxu0 %v9783_v20  ;;  %v646_v36 = vrot.slane %v442_v49, 1 }
  0xf9   : > { %1707 = vmatprep.mubr.f32.mxu0 %v9788_v50  ;;  %v9832_v48 = vsel %vm744_vm1, %v1085_v33, %v1092_v60  ;;  %v1096_v33 = vrot.slane %v8044_v12, 6  ;;  %v9845_v24 = vsel %vm744_vm1, %v1092_v60, %v1098_v44  ;;  %v1103_v60 = vrot.slane %v9817_v34, 6 }
  0xfa   : > { %2278 = vmatmul.mubr.f32.gmra.mrb[100].mxu1 %v9316_v19  ;;  %v1082_v19 = vrot.slane %v8042_v26, 6  ;;  %v1090_v26 = vrot.slane %v9777_v9, 6  ;;  %13321 = vst [vmem:[#allocation142_spill] sm:$0xff] %v9832_v48  ;;  %v648_v63 = vsel %vm526_vm2, %v646_v36, %v647_v52  ;;  %13323 = vst [vmem:[#allocation144_spill] sm:$0xff] %v9845_v24 }
  0xfb   : > { %2282 = vmatprep.mubr.f32.mxu1 %v9322_v45  ;;  %v9821_v45 = vld [vmem:[%s9036_s10 + $0x30] sm:$0xff]  ;;  %v1105_v36 = vrot.slane %v648_v63, 6 }
  0xfc   : > { %1708 = vmatmul.mubr.f32.gmra.mrb[86].mxu0 %v9797_v0  ;;  %v649_v43 = vrot.slane %v9821_v45, 1  ;;  %v9827_v47 = vsel %vm744_vm1, %v1081_v40, %v1082_v19  ;;  %v9841_v9 = vsel %vm744_vm1, %v1082_v19, %v1090_v26  ;;  %v9855_v12 = vsel %vm744_vm1, %v1090_v26, %v1096_v33  ;;  %v9868_v26 = vld [vmem:[%s9036_s10 + $0x50] sm:$0xff] }
  0xfd   : > { %1712 = vmatprep.mubr.f32.mxu0 %v9801_v61  ;;  %13320 = vst [vmem:[#allocation141_spill] sm:$0xff] %v9827_v47  ;;  %13322 = vst [vmem:[#allocation143_spill] sm:$0xff] %v9841_v9  ;;  %v1111_v33 = vrot.slane %v9821_v45, 6 }
  0xfe   : > { %2283 = vmatmul.mubr.f32.gmra.mrb[102].mxu1 %v9339_v53  ;;  %v8047_v53 = vld [vmem:[%s9036_s10 + $0x38] sm:$0xff]  ;;  %13324 = vst [vmem:[#allocation145_spill] sm:$0xff] %v9855_v12 }
  0xff   : > { %2287 = vmatprep.mubr.f32.mxu1 %v9344_v15  ;;  %v650_v15 = vsel %vm526_vm2, %v647_v52, %v649_v43  ;;  %v651_v27 = vrot.slane %v8047_v53, 1  ;;  %v9894_v45 = vsel %vm744_vm1, %v1103_v60, %v1111_v33 }
 0x100   : > { %1713 = vmatmul.mubr.f32.gmra.mrb[88].mxu0 %v9809_v51  ;;  %v1106_v52 = vrot.slane %v650_v15, 6  ;;  %13328 = vst [vmem:[#allocation149_spill] sm:$0xff] %v9894_v45 }
 0x101   : > { %1717 = vmatprep.mubr.f32.mxu0 %v9813_v56 }
 0x102   : > { %2288 = vmatmul.mubr.f32.gmra.mrb[104].mxu1 %v9359_v13  ;;  %v9860_v44 = vsel %vm744_vm1, %v1105_v36, %v1106_v52 }
 0x103   : > { %2292 = vmatprep.mubr.f32.mxu1 %v9363_v21  ;;  %v652_v21 = vsel %vm526_vm2, %v649_v43, %v651_v27  ;;  %13325 = vst [vmem:[#allocation146_spill] sm:$0xff] %v9860_v44 }
 0x104   : > { %1718 = vmatmul.mubr.f32.gmra.mrb[90].mxu0 %v9827_v47  ;;  %v1113_v43 = vrot.slane %v652_v21, 6 }
 0x105   : > { %v6962_v40 = vpop.f32.mrb[0].mxu1  ;;  %1722 = vmatprep.mubr.f32.mxu0 %v9832_v48 }
 0x106   : > { %v1829_v13 = vpop.f32.mrb[1].mxu1  ;;  %2293 = vmatmul.mubr.f32.gmra.mrb[106].mxu1 %v9386_v2  ;;  %v446_v40 = vld [vmem:[%s9036_s10 + $0x40] sm:$0xff] }
 0x107   : > { %2297 = vmatprep.mubr.f32.mxu1 %v9392_v25  ;;  %v1102_v13 = vrot.slane %v442_v49, 6  ;;  %v1337_v63 = vrot.slane %v446_v40, 1  ;;  %v9864_v25 = vld [vmem:[%s9036_s10 + $0x48] sm:$0xff]  ;;  %v1340_v49 = vrot.slane %v9868_v26, 1 }
 0x108   : > { %1723 = vmatmul.mubr.f32.gmra.mrb[92].mxu0 %v9841_v9  ;;  %v1338_v2 = vrot.slane %v9864_v25, 1 }
 0x109   : > { %v9851_v19 = vpop.f32.mrb[2].mxu1  ;;  %1727 = vmatprep.mubr.f32.mxu0 %v9845_v24  ;;  %v9876_v21 = vsel %vm744_vm1, %v1102_v13, %v1103_v60 }
 0x10a   : > { %v1839_v15 = vpop.f32.mrb[3].mxu1  ;;  %2298 = vmatmul.mubr.f32.gmra.mrb[108].mxu1 %v9408_v1  ;;  %13326 = vst [vmem:[#allocation147_spill] sm:$0xff] %v9876_v21  ;;  %v1339_v1 = vsel %vm526_vm2, %v1337_v63, %v1338_v2  ;;  %v1341_v35 = vsel %vm526_vm2, %v1338_v2, %v1340_v49 }
 0x10b   : > { %2302 = vmatprep.mubr.f32.mxu1 %v9413_v32  ;;  %v9883_v15 = vsel %vm744_vm1, %v1106_v52, %v1113_v43  ;;  %v1119_v32 = vrot.slane %v651_v27, 6  ;;  %v1117_v52 = vrot.slane %v8047_v53, 6  ;;  %v1352_v2 = vrot.slane %v1339_v1, 6 }
 0x10c   : > { %1728 = vmatmul.mubr.f32.gmra.mrb[94].mxu0 %v9855_v12  ;;  %13327 = vst [vmem:[#allocation148_spill] sm:$0xff] %v9883_v15  ;;  %v1353_v63 = vrot.slane %v1341_v35, 6 }
 0x10d   : > { %v9872_v34 = vpop.f32.mrb[4].mxu1  ;;  %1732 = vmatprep.mubr.f32.mxu0 %v9860_v44  ;;  %v8050_v44 = vld [vmem:[%s9036_s10 + $0x58] sm:$0xff]  ;;  %v9900_v27 = vsel %vm744_vm1, %v1113_v43, %v1119_v32  ;;  %v9909_v53 = vsel %vm744_vm1, %v1111_v33, %v1117_v52  ;;  %v1350_v32 = vrot.slane %v9864_v25, 6  ;;  %v1358_v33 = vrot.slane %v9868_v26, 6 }
 0x10e   : > { %v9879_v36 = vpop.f32.mrb[5].mxu1  ;;  %2303 = vmatmul.mubr.f32.gmra.mrb[110].mxu1 %v9432_v59  ;;  %v1342_v12 = vrot.slane %v8050_v44, 1  ;;  %13329 = vst [vmem:[#allocation150_spill] sm:$0xff] %v9900_v27  ;;  %13330 = vst [vmem:[#allocation151_spill] sm:$0xff] %v9909_v53  ;;  %v9916_v35 = vsel %vm744_vm1, %v1352_v2, %v1353_v63 }
 0x10f   : > { %2307 = vmatprep.mubr.f32.mxu1 %v9437_v54  ;;  %13331 = vst [vmem:[#allocation152_spill] sm:$0xff] %v9916_v35  ;;  %v9943_v26 = vsel %vm744_vm1, %v1350_v32, %v1358_v33 }
 0x110   : > { %1733 = vmatmul.mubr.f32.gmra.mrb[96].mxu0 %v9876_v21  ;;  %v1343_v54 = vsel %vm526_vm2, %v1340_v49, %v1342_v12  ;;  %v8051_v49 = vld [vmem:[%s8218_s12 + $0x8] sm:$0xff]  ;;  %v1366_v2 = vrot.slane %v1342_v12, 6  ;;  %13334 = vst [vmem:[#allocation155_spill] sm:$0xff] %v9943_v26 }
 0x111   : > { %v9890_v13 = vpop.f32.mrb[6].mxu1  ;;  %1737 = vmatprep.mubr.f32.mxu0 %v9883_v15  ;;  %v1360_v1 = vrot.slane %v1343_v54, 6 }
 0x112   : > { %v9896_v59 = vpop.f32.mrb[7].mxu1  ;;  %2308 = vmatmul.mubr.f32.gmra.mrb[112].mxu1 %v9460_v29  ;;  %v1349_v29 = vrot.slane %v446_v40, 6 }
 0x113   : > { %2312 = vmatprep.mubr.f32.mxu1 %v9466_v46  ;;  %v654_v46 = vrot.slane %v8051_v49, 2  ;;  %v9933_v54 = vsel %vm744_vm1, %v1353_v63, %v1360_v1  ;;  %v9949_v12 = vsel %vm744_vm1, %v1360_v1, %v1366_v2  ;;  %v6408_v1 = vld [vmem:[%s12786_s2 + $0x410] sm:$0xff] }
 0x114   : > { %1738 = vmatmul.mubr.f32.gmra.mrb[98].mxu0 %v9894_v45  ;;  %v9926_v25 = vsel %vm744_vm1, %v1349_v29, %v1350_v32  ;;  %13333 = vst [vmem:[#allocation154_spill] sm:$0xff] %v9933_v54  ;;  %13335 = vst [vmem:[#allocation156_spill] sm:$0xff] %v9949_v12 }
 0x115   : > { %v9905_v60 = vpop.f32.mrb[8].mxu1  ;;  %1742 = vmatprep.mubr.f32.mxu0 %v9900_v27  ;;  %v8052_v27 = vld [vmem:[%s8218_s12 + $0x10] sm:$0xff]  ;;  %13332 = vst [vmem:[#allocation153_spill] sm:$0xff] %v9926_v25  ;;  %v751_v63 = vrot.slane %v654_v46, 6 }
 0x116   : > { %v9912_v43 = vpop.f32.mrb[9].mxu1  ;;  %2313 = vmatmul.mubr.f32.gmra.mrb[114].mxu1 %v9488_v39  ;;  %v655_v45 = vrot.slane %v8052_v27, 2  ;;  %v8053_v27 = vld [vmem:[%s8218_s12 + $0x18] sm:$0xff] }
 0x117   : > { %2317 = vmatprep.mubr.f32.mxu1 %v9493_v57  ;;  %v657_v49 = vrot.slane %v8053_v27, 2 }
 0x118   : > { %1743 = vmatmul.mubr.f32.gmra.mrb[100].mxu0 %v9909_v53  ;;  %v656_v57 = vsel %vm653_vm0, %v654_v46, %v655_v45 }
 0x119   : > { %v9922_v40 = vpop.f32.mrb[10].mxu1  ;;  %1747 = vmatprep.mubr.f32.mxu0 %v9916_v35  ;;  %v1364_v35 = vrot.slane %v8050_v44, 6  ;;  %v752_v27 = vrot.slane %v656_v57, 6  ;;  %v764_v57 = vrot.slane %v657_v49, 6 }
 0x11a   : > { %v9929_v52 = vpop.f32.mrb[11].mxu1  ;;  %2318 = vmatmul.mubr.f32.gmra.mrb[116].mxu1 %v9512_v4 }
 0x11b   : > { %2322 = vmatprep.mubr.f32.mxu1 %v9517_v30  ;;  %v658_v30 = vsel %vm653_vm0, %v655_v45, %v657_v49  ;;  %v9958_v44 = vsel %vm744_vm1, %v1358_v33, %v1364_v35  ;;  %v753_v46 = vsel %vm744_vm1, %v751_v63, %v752_v27  ;;  %v6409_v35 = vld [vmem:[%s12786_s2 + $0x418] sm:$0xff] }
 0x11c   : > { %1748 = vmatmul.mubr.f32.gmra.mrb[102].mxu0 %v9926_v25  ;;  %13336 = vst [vmem:[#allocation157_spill] sm:$0xff] %v9958_v44  ;;  %v758_v32 = vrot.slane %v658_v30, 6 }
 0x11d   : > { %v9939_v29 = vpop.f32.mrb[12].mxu1  ;;  %1752 = vmatprep.mubr.f32.mxu0 %v9933_v54 }
 0x11e   : > { %v9945_v4 = vpop.f32.mrb[13].mxu1  ;;  %2323 = vmatmul.mubr.f32.gmra.mrb[118].mxu1 %v9534_v28  ;;  %v759_v2 = vsel %vm744_vm1, %v752_v27, %v758_v32  ;;  %v765_v63 = vsel %vm744_vm1, %v758_v32, %v764_v57  ;;  %v13348_v28 = vld [vmem:[#allocation122_spill] sm:$0xff] }
 0x11f   : > { %2327 = vmatprep.mubr.f32.mxu1 %v9540_v23 }
 0x120   : > { %1753 = vmatmul.mubr.f32.gmra.mrb[104].mxu0 %v9943_v26 }
 0x121   : > { %v9954_v54 = vpop.f32.mrb[14].mxu1  ;;  %1757 = vmatprep.mubr.f32.mxu0 %v9949_v12 }
 0x122   : > { %v9960_v25 = vpop.f32.mrb[15].mxu1  ;;  %2328 = vmatmul.mubr.f32.gmra.mrb[120].mxu1 %v9562_v6 }
 0x123   : > { %2332 = vmatprep.mubr.f32.mxu1 %v9567_v18  ;;  %v1494_v45 = vpop.f32.mrb[0].mxu0  ;;  %v13344_v18 = vld [vmem:[#allocation120_spill] sm:$0xff] }
 0x124   : > { %1758 = vmatmul.mubr.f32.gmra.mrb[106].mxu0 %v9958_v44  ;;  %v1496_v30 = vpop.f32.mrb[1].mxu0  ;;  %v7719_v45 = vpack.c.bf16 %v6409_v35, %v6408_v1  ;;  %v6410_v44 = vld [vmem:[%s12786_s2 + $0x420] sm:$0xff]  ;;  %v6412_v1 = vld [vmem:[%s12786_s2 + $0x430] sm:$0xff]  ;;  %v6413_v35 = vld [vmem:[%s12786_s2 + $0x438] sm:$0xff] }
 0x125   : > { %v9972_v33 = vpop.f32.mrb[16].mxu1  ;;  %7073 = vmatprep.mubr.f32.mxu0 %v753_v46  ;;  %v6411_v46 = vld [vmem:[%s12786_s2 + $0x428] sm:$0xff] }
 0x126   : > { %v9975_v49 = vpop.f32.mrb[17].mxu1  ;;  %2333 = vmatmul.mubr.f32.gmra.mrb[122].mxu1 %v9586_v10 }
 0x127   : > { %2337 = vmatprep.mubr.f32.mxu1 %v9591_v22  ;;  %v1499_v12 = vpop.f32.mrb[2].mxu0 }
 0x128   : > { %7074 = vmatmul.mubr.f32.vlgmr.msra.gmra.mrb[108].mxu0 %v759_v2  ;;  %v1501_v27 = vpop.f32.mrb[3].mxu0  ;;  %v7723_v12 = vpack.c.bf16 %v6411_v46, %v6410_v44  ;;  %v13337_v2 = vld [vmem:[#allocation2_spill] sm:$0xff]  ;;  %v13339_v46 = vld [vmem:[#allocation117_spill] sm:$0xff] }
 0x129   : > { %v9986_v30 = vpop.f32.mrb[18].mxu1  ;;  %7076 = vmatprep.mubr.f32.mxu0 %v765_v63  ;;  %7718 = vmatpush3.bf16.msra.mxu0 %v9629_v42  ;;  %v13338_v27 = vld [vmem:[#allocation3_spill] sm:$0xff] }
 0x12a   : > { %v9989_v32 = vpop.f32.mrb[19].mxu1  ;;  %2338 = vmatmul.mubr.f32.gmra.mrb[124].mxu1 %v9602_v17  ;;  %7720 = vmatprep.subr.bf16.mxu0 %v7719_v45  ;;  %v6414_v17 = vld [vmem:[%s12786_s2 + $0x440] sm:$0xff] }
 0x12b   : > { %2342 = vmatprep.mubr.f32.mxu1 %v9608_v58  ;;  %v1504_v57 = vpop.f32.mrb[4].mxu0  ;;  %v13340_v58 = vld [vmem:[#allocation118_spill] sm:$0xff] }
 0x12c   : > { %7077 = vmatmul.mubr.f32.gmra.mrb[110].mxu0 %v13337_v2  ;;  %v1506_v42 = vpop.f32.mrb[5].mxu0  ;;  %v7727_v57 = vpack.c.bf16 %v6413_v35, %v6412_v1  ;;  %v6415_v2 = vld [vmem:[%s12786_s2 + $0x448] sm:$0xff]  ;;  %v13342_v1 = vld [vmem:[#allocation5_spill] sm:$0xff] }
 0x12d   : > { %v10000_v63 = vpop.f32.mrb[20].mxu1  ;;  %7079 = vmatprep.mubr.f32.mxu0 %v13338_v27  ;;  %7722 = vmatpush3.bf16.msra.mxu0 %v7719_v45  ;;  %v13341_v45 = vld [vmem:[#allocation4_spill] sm:$0xff]  ;;  %v7731_v22 = vpack.c.bf16 %v6415_v2, %v6414_v17  ;;  %v13346_v17 = vld [vmem:[#allocation7_spill] sm:$0xff] }
 0x12e   : > { %v10003_v44 = vpop.f32.mrb[21].mxu1  ;;  %2343 = vmatmul.mubr.f32.gmra.mrb[126].mxu1 %v13339_v46  ;;  %7724 = vmatprep.subr.bf16.mxu0 %v7723_v12 }
 0x12f   : > { %v1509_v26 = vpop.f32.mrb[6].mxu0  ;;  %2347 = vmatprep.mubr.f32.mxu1 %v13340_v58  ;;  %v13343_v58 = vld [vmem:[#allocation119_spill] sm:$0xff] }
 0x130   : > { %v10014_v42 = vadd.f32 %v9851_v19, %v1509_v26  ;;  %7080 = vmatmul.mubr.f32.gmra.mrb[112].mxu0 %v13341_v45  ;;  %v1511_v27 = vpop.f32.mrb[7].mxu0  ;;  %v6416_v19 = vld [vmem:[%s12786_s2 + $0x450] sm:$0xff]  ;;  %v6417_v26 = vld [vmem:[%s12786_s2 + $0x458] sm:$0xff] }
 0x131   : > { %v10017_v46 = vpop.f32.mrb[22].mxu1  ;;  %7082 = vmatprep.mubr.f32.mxu0 %v13342_v1  ;;  %7726 = vmatpush3.bf16.msra.mxu0 %v7723_v12  ;;  %v13345_v12 = vld [vmem:[#allocation6_spill] sm:$0xff]  ;;  %v7735_v6 = vpack.c.bf16 %v6417_v26, %v6416_v19  ;;  %v13350_v19 = vld [vmem:[#allocation9_spill] sm:$0xff] }
 0x132   : > { %v10020_v35 = vpop.f32.mrb[23].mxu1  ;;  %2348 = vmatmul.mubr.f32.gmra.mrb[128].mxu1 %v13343_v58  ;;  %7728 = vmatprep.subr.bf16.mxu0 %v7727_v57 }
 0x133   : > { %v1514_v10 = vpop.f32.mrb[8].mxu0  ;;  %2352 = vmatprep.mubr.f32.mxu1 %v13344_v18  ;;  %v13347_v18 = vld [vmem:[#allocation121_spill] sm:$0xff] }
 0x134   : > { %v10031_v45 = vadd.f32 %v9879_v36, %v1514_v10  ;;  %7083 = vmatmul.mubr.f32.gmra.mrb[114].mxu0 %v13345_v12  ;;  %v1516_v27 = vpop.f32.mrb[9].mxu0  ;;  %v6418_v10 = vld [vmem:[%s12786_s2 + $0x460] sm:$0xff]  ;;  %v6419_v36 = vld [vmem:[%s12786_s2 + $0x468] sm:$0xff] }
 0x135   : > { %v10034_v58 = vpop.f32.mrb[24].mxu1  ;;  %7085 = vmatprep.mubr.f32.mxu0 %v13346_v17  ;;  %7730 = vmatpush3.bf16.msra.mxu0 %v7727_v57  ;;  %v13349_v57 = vld [vmem:[#allocation8_spill] sm:$0xff] }
 0x136   : > { %v10037_v2 = vpop.f32.mrb[25].mxu1  ;;  %2353 = vmatmul.mubr.f32.gmra.mrb[130].mxu1 %v13347_v18  ;;  %7732 = vmatprep.subr.bf16.mxu0 %v7731_v22 }
 0x137   : > { %v1519_v23 = vpop.f32.mrb[10].mxu0  ;;  %2357 = vmatprep.mubr.f32.mxu1 %v13348_v28  ;;  %v7739_v28 = vpack.c.bf16 %v6419_v36, %v6418_v10  ;;  %v13353_v10 = vld [vmem:[#allocation11_spill] sm:$0xff] }
 0x138   : > { %v10048_v27 = vadd.f32 %v9872_v34, %v1519_v23  ;;  %7086 = vmatmul.mubr.f32.gmra.mrb[116].mxu0 %v13349_v57  ;;  %v1521_v39 = vpop.f32.mrb[11].mxu0  ;;  %v6420_v23 = vld [vmem:[%s12786_s2 + $0x470] sm:$0xff] }
 0x139   : > { %v10051_v18 = vpop.f32.mrb[26].mxu1  ;;  %7088 = vmatprep.mubr.f32.mxu0 %v13350_v19  ;;  %7734 = vmatpush3.bf16.msra.mxu0 %v7731_v22  ;;  %v6421_v39 = vld [vmem:[%s12786_s2 + $0x478] sm:$0xff]  ;;  %v13351_v22 = vld [vmem:[#allocation10_spill] sm:$0xff] }
 0x13a   : > { %v10054_v26 = vpop.f32.mrb[27].mxu1  ;;  %2358 = vmatmul.mubr.f32.gmra.mrb[132].mxu1 %v9693_v37  ;;  %7736 = vmatprep.subr.bf16.mxu0 %v7735_v6 }
 0x13b   : > { %v1524_v17 = vpop.f32.mrb[12].mxu0  ;;  %2362 = vmatprep.mubr.f32.mxu1 %v9698_v38  ;;  %v7743_v38 = vpack.c.bf16 %v6421_v39, %v6420_v23 }
 0x13c   : > { %v10065_v34 = vadd.f32 %v9896_v59, %v1524_v17  ;;  %7089 = vmatmul.mubr.f32.gmra.mrb[118].mxu0 %v13351_v22  ;;  %v1526_v19 = vpop.f32.mrb[13].mxu0  ;;  %v13354_v17 = vld [vmem:[#allocation12_spill] sm:$0xff] }
 0x13d   : > { %v10068_v37 = vpop.f32.mrb[28].mxu1  ;;  %7091 = vmatprep.mubr.f32.mxu0 %v13353_v10  ;;  %7738 = vmatpush3.bf16.msra.mxu0 %v7735_v6 }
 0x13e   : > { %13352 = vst [vmem:[#allocation2_spill] sm:$0xff] %v10068_v37  ;;  %v10071_v36 = vpop.f32.mrb[29].mxu1  ;;  %2363 = vmatmul.mubr.f32.gmra.mrb[134].mxu1 %v9708_v11  ;;  %7740 = vmatprep.subr.bf16.mxu0 %v7739_v28  ;;  %v13355_v37 = vld [vmem:[#allocation13_spill] sm:$0xff] }
 0x13f   : > { %v1529_v57 = vpop.f32.mrb[14].mxu0  ;;  %2367 = vmatprep.mubr.f32.mxu1 %v9712_v14  ;;  %v13357_v14 = vld [vmem:[#allocation15_spill] sm:$0xff]  ;;  %v13360_v11 = vld [vmem:[#allocation17_spill] sm:$0xff] }
 0x140   : > { %v10076_v59 = vadd.f32 %v9890_v13, %v1529_v57  ;;  %7092 = vmatmul.mubr.f32.gmra.mrb[120].mxu0 %v13354_v17  ;;  %v1531_v19 = vpop.f32.mrb[15].mxu0  ;;  %v13356_v13 = vld [vmem:[#allocation14_spill] sm:$0xff] }
 0x141   : > { %v10079_v22 = vpop.f32.mrb[30].mxu1  ;;  %7094 = vmatprep.mubr.f32.mxu0 %v13355_v37  ;;  %7742 = vmatpush3.bf16.msra.mxu0 %v7739_v28 }
 0x142   : > { %v10082_v6 = vpop.f32.mrb[31].mxu1  ;;  %2368 = vmatmul.mubr.f32.gmra.mrb[136].mxu1 %v9720_v62  ;;  %7744 = vmatprep.subr.bf16.mxu0 %v7743_v38 }
 0x143   : > { %v1534_v23 = vpop.f32.mrb[16].mxu0  ;;  %2372 = vmatprep.mubr.f32.mxu1 %v9725_v8 }
 0x144   : > { %v10087_v39 = vadd.f32 %v9912_v43, %v1534_v23  ;;  %7095 = vmatmul.mubr.f32.gmra.mrb[122].mxu0 %v13356_v13  ;;  %v1536_v57 = vpop.f32.mrb[17].mxu0  ;;  %v13358_v23 = vld [vmem:[#allocation16_spill] sm:$0xff] }
 0x145   : > { %v10090_v19 = vpop.f32.mrb[32].mxu1  ;;  %7097 = vmatprep.mubr.f32.mxu0 %v13357_v14  ;;  %7746 = vmatpush3.bf16.msra.mxu0 %v7743_v38 }
 0x146   : > { %v10093_v28 = vpop.f32.mrb[33].mxu1  ;;  %2373 = vmatmul.mubr.f32.gmra.mrb[138].mxu1 %v9736_v3  ;;  %7747 = vmatprep.subr.bf16.mxu0 %v13168_v31 }
 0x147   : > { %v1539_v62 = vpop.f32.mrb[18].mxu0  ;;  %2377 = vmatprep.mubr.f32.mxu1 %v9741_v5  ;;  %v13362_v5 = vld [vmem:[#allocation18_spill] sm:$0xff] }
 0x148   : > { %v10099_v43 = vadd.f32 %v9905_v60, %v1539_v62  ;;  %7098 = vmatmul.mubr.f32.gmra.mrb[124].mxu0 %v13358_v23  ;;  %v1541_v57 = vpop.f32.mrb[19].mxu0 }
 0x149   : > { %v10102_v8 = vpop.f32.mrb[34].mxu1  ;;  %7100 = vmatprep.mubr.f32.mxu0 %v13360_v11  ;;  %v13364_v57 = vld [vmem:[#allocation19_spill] sm:$0xff] }
 0x14a   : > { %13359 = vst [vmem:[#allocation3_spill] sm:$0xff] %v10102_v8  ;;  %v10105_v38 = vpop.f32.mrb[35].mxu1  ;;  %2378 = vmatmul.mubr.f32.gmra.mrb[140].mxu1 %v9756_v7 }
 0x14b   : > { %13361 = vst [vmem:[#allocation4_spill] sm:$0xff] %v10105_v38  ;;  %v1544_v3 = vpop.f32.mrb[20].mxu0  ;;  %2382 = vmatprep.mubr.f32.mxu1 %v9760_v41  ;;  %v13366_v41 = vld [vmem:[#allocation20_spill] sm:$0xff] }
 0x14c   : > { %v10110_v31 = vadd.f32 %v9929_v52, %v1544_v3  ;;  %7101 = vmatmul.mubr.f32.gmra.mrb[126].mxu0 %v13362_v5  ;;  %v1546_v62 = vpop.f32.mrb[21].mxu0 }
 0x14d   : > { %v10113_v60 = vpop.f32.mrb[36].mxu1  ;;  %7103 = vmatprep.mubr.f32.mxu0 %v13364_v57  ;;  %v13368_v62 = vld [vmem:[#allocation21_spill] sm:$0xff] }
 0x14e   : > { %13363 = vst [vmem:[#allocation5_spill] sm:$0xff] %v10113_v60  ;;  %v10116_v8 = vpop.f32.mrb[37].mxu1  ;;  %2383 = vmatmul.mubr.f32.gmra.mrb[142].mxu1 %v9768_v55 }
 0x14f   : > { %13365 = vst [vmem:[#allocation6_spill] sm:$0xff] %v10116_v8  ;;  %v1549_v38 = vpop.f32.mrb[22].mxu0  ;;  %2387 = vmatprep.mubr.f32.mxu1 %v9772_v16  ;;  %v13370_v16 = vld [vmem:[#allocation22_spill] sm:$0xff] }
 0x150   : > { %v10121_v7 = vadd.f32 %v9922_v40, %v1549_v38  ;;  %7104 = vmatmul.mubr.f32.gmra.mrb[128].mxu0 %v13366_v41  ;;  %v1551_v3 = vpop.f32.mrb[23].mxu0 }
 0x151   : > { %v10124_v52 = vpop.f32.mrb[38].mxu1  ;;  %7106 = vmatprep.mubr.f32.mxu0 %v13368_v62  ;;  %v13372_v3 = vld [vmem:[#allocation23_spill] sm:$0xff] }
 0x152   : > { %13367 = vst [vmem:[#allocation11_spill] sm:$0xff] %v10124_v52  ;;  %v10127_v60 = vpop.f32.mrb[39].mxu1  ;;  %2388 = vmatmul.mubr.f32.gmra.mrb[144].mxu1 %v9783_v20 }
 0x153   : > { %13369 = vst [vmem:[#allocation12_spill] sm:$0xff] %v10127_v60  ;;  %v1554_v8 = vpop.f32.mrb[24].mxu0  ;;  %2392 = vmatprep.mubr.f32.mxu1 %v9788_v50  ;;  %v13374_v50 = vld [vmem:[#allocation25_spill] sm:$0xff] }
 0x154   : > { %v10132_v55 = vadd.f32 %v9945_v4, %v1554_v8  ;;  %7107 = vmatmul.mubr.f32.gmra.mrb[130].mxu0 %v13370_v16  ;;  %v1556_v40 = vpop.f32.mrb[25].mxu0 }
 0x155   : > { %v10135_v38 = vpop.f32.mrb[40].mxu1  ;;  %7109 = vmatprep.mubr.f32.mxu0 %v13372_v3  ;;  %v13376_v40 = vld [vmem:[#allocation27_spill] sm:$0xff] }
 0x156   : > { %13371 = vst [vmem:[#allocation13_spill] sm:$0xff] %v10135_v38  ;;  %v10138_v52 = vpop.f32.mrb[41].mxu1  ;;  %2393 = vmatmul.mubr.f32.gmra.mrb[146].mxu1 %v9797_v0 }
 0x157   : > { %13373 = vst [vmem:[#allocation14_spill] sm:$0xff] %v10138_v52  ;;  %v1559_v60 = vpop.f32.mrb[26].mxu0  ;;  %2397 = vmatprep.mubr.f32.mxu1 %v9801_v61  ;;  %v13378_v61 = vld [vmem:[#allocation31_spill] sm:$0xff] }
 0x158   : > { %v10143_v20 = vadd.f32 %v9939_v29, %v1559_v60  ;;  %7110 = vmatmul.mubr.f32.gmra.mrb[132].mxu0 %v13374_v50  ;;  %v1561_v4 = vpop.f32.mrb[27].mxu0 }
 0x159   : > { %v10146_v8 = vpop.f32.mrb[42].mxu1  ;;  %7112 = vmatprep.mubr.f32.mxu0 %v13376_v40  ;;  %v13380_v4 = vld [vmem:[#allocation33_spill] sm:$0xff] }
 0x15a   : > { %13375 = vst [vmem:[#allocation15_spill] sm:$0xff] %v10146_v8  ;;  %v10149_v38 = vpop.f32.mrb[43].mxu1  ;;  %2398 = vmatmul.mubr.f32.gmra.mrb[148].mxu1 %v9809_v51 }
 0x15b   : > { %13377 = vst [vmem:[#allocation16_spill] sm:$0xff] %v10149_v38  ;;  %v1564_v52 = vpop.f32.mrb[28].mxu0  ;;  %2402 = vmatprep.mubr.f32.mxu1 %v9813_v56  ;;  %v13382_v56 = vld [vmem:[#allocation35_spill] sm:$0xff] }
 0x15c   : > { %v10154_v0 = vadd.f32 %v9960_v25, %v1564_v52  ;;  %7113 = vmatmul.mubr.f32.gmra.mrb[134].mxu0 %v13378_v61  ;;  %v1566_v29 = vpop.f32.mrb[29].mxu0 }
 0x15d   : > { %v10157_v60 = vpop.f32.mrb[44].mxu1  ;;  %7115 = vmatprep.mubr.f32.mxu0 %v13380_v4  ;;  %v13384_v29 = vld [vmem:[#allocation36_spill] sm:$0xff] }
 0x15e   : > { %13379 = vst [vmem:[#allocation17_spill] sm:$0xff] %v10157_v60  ;;  %v10160_v8 = vpop.f32.mrb[45].mxu1  ;;  %2403 = vmatmul.mubr.f32.gmra.mrb[150].mxu1 %v9827_v47 }
 0x15f   : > { %13381 = vst [vmem:[#allocation18_spill] sm:$0xff] %v10160_v8  ;;  %v1569_v38 = vpop.f32.mrb[30].mxu0  ;;  %2407 = vmatprep.mubr.f32.mxu1 %v9832_v48  ;;  %v13386_v48 = vld [vmem:[#allocation38_spill] sm:$0xff] }
 0x160   : > { %v10165_v51 = vadd.f32 %v9954_v54, %v1569_v38  ;;  %7116 = vmatmul.mubr.f32.gmra.mrb[136].mxu0 %v13382_v56  ;;  %v1571_v25 = vpop.f32.mrb[31].mxu0  ;;  %v13391_v56 = vld [vmem:[#allocation146_spill] sm:$0xff] }
 0x161   : > { %v10168_v52 = vpop.f32.mrb[46].mxu1  ;;  %7118 = vmatprep.mubr.f32.mxu0 %v13384_v29  ;;  %v13388_v25 = vld [vmem:[#allocation40_spill] sm:$0xff]  ;;  %v13390_v29 = vld [vmem:[#allocation145_spill] sm:$0xff] }
 0x162   : > { %13383 = vst [vmem:[#allocation19_spill] sm:$0xff] %v10168_v52  ;;  %v10171_v60 = vpop.f32.mrb[47].mxu1  ;;  %2408 = vmatmul.mubr.f32.gmra.mrb[152].mxu1 %v9841_v9 }
 0x163   : > { %13385 = vst [vmem:[#allocation20_spill] sm:$0xff] %v10171_v60  ;;  %v1574_v8 = vpop.f32.mrb[32].mxu0  ;;  %2412 = vmatprep.mubr.f32.mxu1 %v9845_v24  ;;  %v13392_v24 = vld [vmem:[#allocation43_spill] sm:$0xff] }
 0x164   : > { %v10176_v47 = vadd.f32 %v9975_v49, %v1574_v8  ;;  %7119 = vmatmul.mubr.f32.gmra.mrb[138].mxu0 %v13386_v48  ;;  %v1576_v54 = vpop.f32.mrb[33].mxu0  ;;  %v13393_v48 = vld [vmem:[#allocation45_spill] sm:$0xff] }
 0x165   : > { %v10179_v38 = vpop.f32.mrb[48].mxu1  ;;  %7121 = vmatprep.mubr.f32.mxu0 %v13388_v25 }
 0x166   : > { %13387 = vst [vmem:[#allocation21_spill] sm:$0xff] %v10179_v38  ;;  %v10182_v52 = vpop.f32.mrb[49].mxu1  ;;  %2413 = vmatmul.mubr.f32.gmra.mrb[154].mxu1 %v13390_v29 }
 0x167   : > { %13389 = vst [vmem:[#allocation22_spill] sm:$0xff] %v10182_v52  ;;  %v1579_v60 = vpop.f32.mrb[34].mxu0  ;;  %2417 = vmatprep.mubr.f32.mxu1 %v13391_v56  ;;  %v13395_v56 = vld [vmem:[#allocation47_spill] sm:$0xff]  ;;  %v13396_v52 = vld [vmem:[#allocation49_spill] sm:$0xff] }
 0x168   : > { %v10187_v9 = vadd.f32 %v9972_v33, %v1579_v60  ;;  %7122 = vmatmul.mubr.f32.gmra.mrb[140].mxu0 %v13392_v24  ;;  %v1581_v49 = vpop.f32.mrb[35].mxu0  ;;  %v13398_v24 = vld [vmem:[#allocation150_spill] sm:$0xff] }
 0x169   : > { %v7037_v8 = vpop.f32.mrb[50].mxu1  ;;  %7124 = vmatprep.mubr.f32.mxu0 %v13393_v48 }
 0x16a   : > { %v10191_v54 = vpop.f32.mrb[51].mxu1  ;;  %2418 = vmatmul.mubr.f32.gmra.mrb[156].mxu1 %v9876_v21  ;;  %v13397_v8 = vld [vmem:[#allocation149_spill] sm:$0xff] }
 0x16b   : > { %13394 = vst [vmem:[#allocation23_spill] sm:$0xff] %v10191_v54  ;;  %v1584_v38 = vpop.f32.mrb[36].mxu0  ;;  %2422 = vmatprep.mubr.f32.mxu1 %v9883_v15  ;;  %v13399_v54 = vld [vmem:[#allocation50_spill] sm:$0xff] }
 0x16c   : > { %v10196_v29 = vadd.f32 %v9989_v32, %v1584_v38  ;;  %7125 = vmatmul.mubr.f32.gmra.mrb[142].mxu0 %v13395_v56  ;;  %v1586_v33 = vpop.f32.mrb[37].mxu0  ;;  %v13400_v38 = vld [vmem:[#allocation52_spill] sm:$0xff] }
 0x16d   : > { %v7040_v60 = vpop.f32.mrb[52].mxu1  ;;  %7127 = vmatprep.mubr.f32.mxu0 %v13396_v52 }
 0x16e   : > { %v2089_v49 = vpop.f32.mrb[53].mxu1  ;;  %2423 = vmatmul.mubr.f32.gmra.mrb[158].mxu1 %v13397_v8  ;;  %v13401_v60 = vld [vmem:[#allocation24_spill] sm:$0xff]  ;;  %v13402_v8 = vld [vmem:[#allocation55_spill] sm:$0xff] }
 0x16f   : > { %v1589_v48 = vpop.f32.mrb[38].mxu0  ;;  %2427 = vmatprep.mubr.f32.mxu1 %v13398_v24 }
 0x170   : > { %v10203_v21 = vadd.f32 %v9986_v30, %v1589_v48  ;;  %7128 = vmatmul.mubr.f32.gmra.mrb[144].mxu0 %v13399_v54  ;;  %v1591_v15 = vpop.f32.mrb[39].mxu0  ;;  %v13403_v30 = vld [vmem:[#allocation57_spill] sm:$0xff] }
 0x171   : > { %v2164_v32 = vpop.f32.mrb[54].mxu1  ;;  %7130 = vmatprep.mubr.f32.mxu0 %v13400_v38  ;;  %v13404_v15 = vld [vmem:[#allocation26_spill] sm:$0xff]  ;;  %v13405_v38 = vld [vmem:[#allocation29_spill] sm:$0xff] }
 0x172   : > { %v2166_v56 = vpop.f32.mrb[55].mxu1  ;;  %2428 = vmatmul.mubr.f32.gmra.mrb[160].mxu1 %v9909_v53  ;;  %v13406_v53 = vld [vmem:[#allocation59_spill] sm:$0xff] }
 0x173   : > { %v1594_v33 = vpop.f32.mrb[40].mxu0  ;;  %2927 = vmatprep.mubr.f32.mxu1 %v13401_v60 }
 0x174   : > { %v10210_v49 = vadd.f32 %v10003_v44, %v1594_v33  ;;  %7131 = vmatmul.mubr.f32.gmra.mrb[146].mxu0 %v13402_v8  ;;  %v1596_v24 = vpop.f32.mrb[41].mxu0  ;;  %v13407_v33 = vld [vmem:[#allocation60_spill] sm:$0xff] }
 0x175   : > { %v2169_v48 = vpop.f32.mrb[56].mxu1  ;;  %7133 = vmatprep.mubr.f32.mxu0 %v13403_v30  ;;  %v13408_v24 = vld [vmem:[#allocation28_spill] sm:$0xff] }
 0x176   : > { %v2171_v54 = vpop.f32.mrb[57].mxu1  ;;  %2928 = vmatmul.mubr.f32.vlgmr.msra.gmra.mrb[162].mxu1 %v13404_v15  ;;  %v13409_v30 = vld [vmem:[#allocation32_spill] sm:$0xff]  ;;  %v13410_v15 = vld [vmem:[#allocation62_spill] sm:$0xff] }
 0x177   : > { %v1599_v32 = vpop.f32.mrb[42].mxu0  ;;  %2932 = vmatprep.mubr.f32.mxu1 %v13405_v38 }
 0x178   : > { %v10217_v56 = vadd.f32 %v10000_v63, %v1599_v32  ;;  %7134 = vmatmul.mubr.f32.gmra.mrb[148].mxu0 %v13406_v53  ;;  %v1601_v60 = vpop.f32.mrb[43].mxu0  ;;  %v13411_v32 = vld [vmem:[#allocation64_spill] sm:$0xff] }
 0x179   : > { %v2174_v44 = vpop.f32.mrb[58].mxu1  ;;  %7136 = vmatprep.mubr.f32.mxu0 %v13407_v33  ;;  %v13413_v33 = vld [vmem:[#allocation34_spill] sm:$0xff] }
 0x17a   : > { %v2176_v8 = vpop.f32.mrb[59].mxu1  ;;  %2933 = vmatmul.mubr.f32.gmra.mrb[164].mxu1 %v13408_v24  ;;  %v13414_v24 = vld [vmem:[#allocation37_spill] sm:$0xff] }
 0x17b   : > { %v1604_v48 = vpop.f32.mrb[44].mxu0  ;;  %2937 = vmatprep.mubr.f32.mxu1 %v13409_v30 }
 0x17c   : > { %v10224_v54 = vadd.f32 %v10020_v35, %v1604_v48  ;;  %7137 = vmatmul.mubr.f32.gmra.mrb[150].mxu0 %v13410_v15  ;;  %v1606_v38 = vpop.f32.mrb[45].mxu0  ;;  %v13415_v35 = vld [vmem:[#allocation67_spill] sm:$0xff] }
 0x17d   : > { %v2179_v63 = vpop.f32.mrb[60].mxu1  ;;  %7139 = vmatprep.mubr.f32.mxu0 %v13411_v32  ;;  %v13416_v38 = vld [vmem:[#allocation69_spill] sm:$0xff] }
 0x17e   : > { %v10229_v60 = vadd.f32 %v2179_v63, %v10014_v42  ;;  %v2181_v44 = vpop.f32.mrb[61].mxu1  ;;  %2938 = vmatmul.mubr.f32.gmra.mrb[166].mxu1 %v13413_v33  ;;  %v13418_v63 = vld [vmem:[#allocation39_spill] sm:$0xff]  ;;  %v13419_v33 = vld [vmem:[#allocation41_spill] sm:$0xff] }
 0x17f   : > { %v1609_v8 = vpop.f32.mrb[46].mxu0  ;;  %2942 = vmatprep.mubr.f32.mxu1 %v13414_v24 }
 0x180   : > { %13412 = vst [vmem:[#allocation25_spill] sm:$0xff] %v10229_v60  ;;  %v10234_v30 = vadd.f32 %v10017_v46, %v1609_v8  ;;  %7140 = vmatmul.mubr.f32.gmra.mrb[152].mxu0 %v13415_v35  ;;  %v1611_v48 = vpop.f32.mrb[47].mxu0  ;;  %v13420_v46 = vld [vmem:[#allocation71_spill] sm:$0xff] }
 0x181   : > { %v2184_v15 = vpop.f32.mrb[62].mxu1  ;;  %7142 = vmatprep.mubr.f32.mxu0 %v13416_v38  ;;  %v13421_v48 = vld [vmem:[#allocation72_spill] sm:$0xff] }
 0x182   : > { %v10239_v32 = vadd.f32 %v2184_v15, %v10031_v45  ;;  %v2186_v42 = vpop.f32.mrb[63].mxu1  ;;  %2943 = vmatmul.mubr.f32.gmra.mrb[168].mxu1 %v13418_v63  ;;  %v13423_v15 = vld [vmem:[#allocation42_spill] sm:$0xff]  ;;  %v13424_v63 = vld [vmem:[#allocation44_spill] sm:$0xff] }
 0x183   : > { %v1614_v44 = vpop.f32.mrb[48].mxu0  ;;  %2947 = vmatprep.mubr.f32.mxu1 %v13419_v33 }
 0x184   : > { %13417 = vst [vmem:[#allocation27_spill] sm:$0xff] %v10239_v32  ;;  %v10244_v24 = vadd.f32 %v10037_v2, %v1614_v44  ;;  %7143 = vmatmul.mubr.f32.gmra.mrb[154].mxu0 %v13420_v46  ;;  %v1616_v8 = vpop.f32.mrb[49].mxu0  ;;  %v13425_v2 = vld [vmem:[#allocation74_spill] sm:$0xff] }
 0x185   : > { %v2189_v60 = vpop.f32.mrb[64].mxu1  ;;  %7145 = vmatprep.mubr.f32.mxu0 %v13421_v48  ;;  %v13426_v8 = vld [vmem:[#allocation76_spill] sm:$0xff] }
 0x186   : > { %v10249_v38 = vadd.f32 %v2189_v60, %v10048_v27  ;;  %v2191_v45 = vpop.f32.mrb[65].mxu1  ;;  %2948 = vmatmul.mubr.f32.gmra.mrb[170].mxu1 %v13423_v15  ;;  %v13428_v60 = vld [vmem:[#allocation46_spill] sm:$0xff]  ;;  %v13429_v15 = vld [vmem:[#allocation48_spill] sm:$0xff] }
 0x187   : > { %v1619_v42 = vpop.f32.mrb[50].mxu0  ;;  %2952 = vmatprep.mubr.f32.mxu1 %v13424_v63 }
 0x188   : > { %13422 = vst [vmem:[#allocation31_spill] sm:$0xff] %v10249_v38  ;;  %v10254_v33 = vadd.f32 %v10034_v58, %v1619_v42  ;;  %7146 = vmatmul.mubr.f32.gmra.mrb[156].mxu0 %v13425_v2  ;;  %v1621_v44 = vpop.f32.mrb[51].mxu0  ;;  %v13430_v58 = vld [vmem:[#allocation79_spill] sm:$0xff] }
 0x189   : > { %v2194_v32 = vpop.f32.mrb[66].mxu1  ;;  %7148 = vmatprep.mubr.f32.mxu0 %v13426_v8  ;;  %v13431_v44 = vld [vmem:[#allocation81_spill] sm:$0xff] }
 0x18a   : > { %v10259_v48 = vadd.f32 %v2194_v32, %v10065_v34  ;;  %v2196_v27 = vpop.f32.mrb[67].mxu1  ;;  %2953 = vmatmul.mubr.f32.gmra.mrb[172].mxu1 %v13428_v60  ;;  %v6458_v34 = vld [vmem:[%s12788_s4 + $0x280] sm:$0xff]  ;;  %v6459_v32 = vld [vmem:[%s12788_s4 + $0x288] sm:$0xff] }
 0x18b   : > { %v1624_v45 = vpop.f32.mrb[52].mxu0  ;;  %2957 = vmatprep.mubr.f32.mxu1 %v13429_v15 }
 0x18c   : > { %13427 = vst [vmem:[#allocation33_spill] sm:$0xff] %v10259_v48  ;;  %v10264_v63 = vadd.f32 %v10054_v26, %v1624_v45  ;;  %7149 = vmatmul.mubr.f32.gmra.mrb[158].mxu0 %v13430_v58  ;;  %v1626_v42 = vpop.f32.mrb[53].mxu0  ;;  %v13432_v26 = vld [vmem:[#allocation51_spill] sm:$0xff]  ;;  %v7795_v45 = vpack.c.bf16 %v6459_v32, %v6458_v34  ;;  %v13436_v32 = vld [vmem:[#allocation56_spill] sm:$0xff] }
 0x18d   : > { %v2199_v38 = vpop.f32.mrb[68].mxu1  ;;  %7151 = vmatprep.mubr.f32.mxu0 %v13431_v44  ;;  %v13433_v42 = vld [vmem:[#allocation53_spill] sm:$0xff]  ;;  %v13434_v44 = vld [vmem:[#allocation83_spill] sm:$0xff] }
 0x18e   : > { %v10275_v27 = vadd.f32 %v2199_v38, %v10076_v59  ;;  %v2201_v60 = vpop.f32.mrb[69].mxu1  ;;  %2958 = vmatmul.mubr.f32.gmra.mrb[174].mxu1 %v13432_v26  ;;  %7796 = vmatprep.subr.bf16.mxu1 %v7795_v45 }
 0x18f   : > { %v1629_v15 = vpop.f32.mrb[54].mxu0  ;;  %2962 = vmatprep.mubr.f32.mxu1 %v13433_v42  ;;  %7798 = vmatpush3.bf16.msra.mxu1 %v7795_v45  ;;  %v13435_v60 = vld [vmem:[#allocation54_spill] sm:$0xff]  ;;  %v13439_v42 = vld [vmem:[#allocation61_spill] sm:$0xff] }
 0x190   : > { %v10280_v48 = vadd.f32 %v10051_v18, %v1629_v15  ;;  %7152 = vmatmul.mubr.f32.gmra.mrb[160].mxu0 %v13434_v44  ;;  %v1631_v58 = vpop.f32.mrb[55].mxu0  ;;  %v13437_v15 = vld [vmem:[#allocation7_spill] sm:$0xff] }
 0x191   : > { %v2204_v8 = vpop.f32.mrb[70].mxu1  ;;  %7186 = vmatprep.mubr.f32.mxu0 %v13342_v1 }
 0x192   : > { %v10285_v59 = vadd.f32 %v2204_v8, %v10087_v39  ;;  %v2206_v38 = vpop.f32.mrb[71].mxu1  ;;  %2963 = vmatmul.mubr.f32.gmra.mrb[176].mxu1 %v13435_v60  ;;  %v13438_v8 = vld [vmem:[#allocation58_spill] sm:$0xff] }
 0x193   : > { %v1634_v34 = vpop.f32.mrb[56].mxu0  ;;  %2967 = vmatprep.mubr.f32.mxu1 %v13436_v32  ;;  %v13440_v38 = vld [vmem:[#allocation2_spill] sm:$0xff]  ;;  %v13442_v32 = vld [vmem:[#allocation9_spill] sm:$0xff] }
 0x194   : > { %v10290_v18 = vadd.f32 %v10071_v36, %v1634_v34  ;;  %7187 = vmatmul.mubr.f32.vlgmr.msra.gmra.mrb[162].mxu0 %v13345_v12  ;;  %v1636_v58 = vpop.f32.mrb[57].mxu0  ;;  %v13441_v36 = vld [vmem:[#allocation8_spill] sm:$0xff] }
 0x195   : > { %v2209_v26 = vpop.f32.mrb[72].mxu1  ;;  %7189 = vmatprep.mubr.f32.mxu0 %v13437_v15 }
 0x196   : > { %v10295_v1 = vadd.f32 %v2209_v26, %v10099_v43  ;;  %v2211_v39 = vpop.f32.mrb[73].mxu1  ;;  %2968 = vmatmul.mubr.f32.gmra.mrb[178].mxu1 %v13438_v8  ;;  %v13443_v26 = vld [vmem:[#allocation63_spill] sm:$0xff] }
 0x197   : > { %v1639_v45 = vpop.f32.mrb[58].mxu0  ;;  %2972 = vmatprep.mubr.f32.mxu1 %v13439_v42  ;;  %v13444_v39 = vld [vmem:[#allocation65_spill] sm:$0xff] }
 0x198   : > { %v10300_v60 = vadd.f32 %v13440_v38, %v1639_v45  ;;  %7190 = vmatmul.mubr.f32.gmra.mrb[164].mxu0 %v13441_v36  ;;  %v1641_v34 = vpop.f32.mrb[59].mxu0  ;;  %v13445_v45 = vld [vmem:[#allocation10_spill] sm:$0xff] }
 0x199   : > { %v2214_v12 = vpop.f32.mrb[74].mxu1  ;;  %7192 = vmatprep.mubr.f32.mxu0 %v13442_v32  ;;  %v13446_v34 = vld [vmem:[#allocation66_spill] sm:$0xff]  ;;  %v13447_v32 = vld [vmem:[#allocation68_spill] sm:$0xff] }
 0x19a   : > { %v10305_v58 = vadd.f32 %v2214_v12, %v10110_v31  ;;  %v2216_v43 = vpop.f32.mrb[75].mxu1  ;;  %2973 = vmatmul.mubr.f32.gmra.mrb[180].mxu1 %v13443_v26 }
 0x19b   : > { %v1644_v15 = vpop.f32.mrb[60].mxu0  ;;  %2977 = vmatprep.mubr.f32.mxu1 %v13444_v39 }
 0x19c   : > { %v10310_v8 = vadd.f32 %v10082_v6, %v1644_v15  ;;  %7193 = vmatmul.mubr.f32.gmra.mrb[166].mxu0 %v13445_v45  ;;  %v1646_v42 = vpop.f32.mrb[61].mxu0  ;;  %v13449_v45 = vld [vmem:[#allocation73_spill] sm:$0xff] }
 0x19d   : > { %v2219_v38 = vpop.f32.mrb[76].mxu1  ;;  %7195 = vmatprep.mubr.f32.mxu0 %v13353_v10  ;;  %v13448_v10 = vld [vmem:[#allocation70_spill] sm:$0xff] }
 0x19e   : > { %v10315_v36 = vadd.f32 %v2219_v38, %v10121_v7  ;;  %v2221_v31 = vpop.f32.mrb[77].mxu1  ;;  %2978 = vmatmul.mubr.f32.gmra.mrb[182].mxu1 %v13446_v34  ;;  %v13451_v34 = vld [vmem:[#allocation77_spill] sm:$0xff] }
 0x19f   : > { %v1649_v12 = vpop.f32.mrb[62].mxu0  ;;  %2982 = vmatprep.mubr.f32.mxu1 %v13447_v32 }
 0x1a0   : > { %v10320_v43 = vadd.f32 %v10079_v22, %v1649_v12  ;;  %7196 = vmatmul.mubr.f32.gmra.mrb[168].mxu0 %v13354_v17  ;;  %v1651_v6 = vpop.f32.mrb[63].mxu0 }
 0x1a1   : > { %v2224_v26 = vpop.f32.mrb[78].mxu1  ;;  %7198 = vmatprep.mubr.f32.mxu0 %v13355_v37  ;;  %v13450_v37 = vld [vmem:[#allocation75_spill] sm:$0xff] }
 0x1a2   : > { %v2226_v15 = vpop.f32.mrb[79].mxu1  ;;  %2983 = vmatmul.mubr.f32.gmra.mrb[184].mxu1 %v13448_v10  ;;  %v10326_v7 = vadd.f32 %v2224_v26, %v10132_v55  ;;  %v13452_v26 = vld [vmem:[#allocation78_spill] sm:$0xff]  ;;  %v13454_v10 = vld [vmem:[#allocation4_spill] sm:$0xff] }
 0x1a3   : > { %v1654_v39 = vpop.f32.mrb[64].mxu0  ;;  %2987 = vmatprep.mubr.f32.mxu1 %v13449_v45  ;;  %v13453_v15 = vld [vmem:[#allocation80_spill] sm:$0xff] }
 0x1a4   : > { %v10330_v42 = vadd.f32 %v10093_v28, %v1654_v39  ;;  %7199 = vmatmul.mubr.f32.gmra.mrb[170].mxu0 %v13356_v13  ;;  %v1656_v22 = vpop.f32.mrb[65].mxu0  ;;  %v6460_v13 = vld [vmem:[%s12788_s4 + $0x290] sm:$0xff] }
 0x1a5   : > { %v2229_v17 = vpop.f32.mrb[80].mxu1  ;;  %7201 = vmatprep.mubr.f32.mxu0 %v13357_v14  ;;  %v6461_v14 = vld [vmem:[%s12788_s4 + $0x298] sm:$0xff] }
 0x1a6   : > { %v2231_v38 = vpop.f32.mrb[81].mxu1  ;;  %2988 = vmatmul.mubr.f32.gmra.mrb[186].mxu1 %v13450_v37  ;;  %v10336_v31 = vadd.f32 %v2229_v17, %v10143_v20  ;;  %v7799_v20 = vpack.c.bf16 %v6461_v14, %v6460_v13  ;;  %v13455_v17 = vld [vmem:[#allocation82_spill] sm:$0xff]  ;;  %v13456_v37 = vld [vmem:[#allocation85_spill] sm:$0xff] }
 0x1a7   : > { %v1659_v55 = vpop.f32.mrb[66].mxu0  ;;  %2992 = vmatprep.mubr.f32.mxu1 %v13451_v34 }
 0x1a8   : > { %v10340_v12 = vadd.f32 %v10090_v19, %v1659_v55  ;;  %7202 = vmatmul.mubr.f32.gmra.mrb[172].mxu0 %v13358_v23  ;;  %v1661_v28 = vpop.f32.mrb[67].mxu0  ;;  %7800 = vmatprep.subr.bf16.mxu1 %v7799_v20  ;;  %v13457_v55 = vld [vmem:[#allocation3_spill] sm:$0xff] }
 0x1a9   : > { %v2234_v32 = vpop.f32.mrb[82].mxu1  ;;  %7204 = vmatprep.mubr.f32.mxu0 %v13360_v11  ;;  %7802 = vmatpush3.bf16.msra.mxu1 %v7799_v20  ;;  %v13460_v20 = vld [vmem:[#allocation6_spill] sm:$0xff] }
 0x1aa   : > { %v2236_v6 = vpop.f32.mrb[83].mxu1  ;;  %2993 = vmatmul.mubr.f32.gmra.mrb[188].mxu1 %v13452_v26  ;;  %v10352_v19 = vadd.f32 %v2234_v32, %v10154_v0  ;;  %v13459_v32 = vld [vmem:[#allocation88_spill] sm:$0xff] }
 0x1ab   : > { %v1664_v23 = vpop.f32.mrb[68].mxu0  ;;  %2997 = vmatprep.mubr.f32.mxu1 %v13453_v15 }
 0x1ac   : > { %v10356_v39 = vadd.f32 %v13454_v10, %v1664_v23  ;;  %7205 = vmatmul.mubr.f32.gmra.mrb[174].mxu0 %v13362_v5  ;;  %v1666_v45 = vpop.f32.mrb[69].mxu0  ;;  %v13462_v10 = vld [vmem:[#allocation91_spill] sm:$0xff] }
 0x1ad   : > { %v2239_v22 = vpop.f32.mrb[84].mxu1  ;;  %7207 = vmatprep.mubr.f32.mxu0 %v13364_v57  ;;  %v13458_v57 = vld [vmem:[#allocation87_spill] sm:$0xff]  ;;  %v13463_v45 = vld [vmem:[#allocation5_spill] sm:$0xff] }
 0x1ae   : > { %v2241_v11 = vpop.f32.mrb[85].mxu1  ;;  %2998 = vmatmul.mubr.f32.gmra.mrb[190].mxu1 %v13455_v17  ;;  %v10362_v0 = vadd.f32 %v2239_v22, %v10165_v51 }
 0x1af   : > { %v1669_v38 = vpop.f32.mrb[70].mxu0  ;;  %3002 = vmatprep.mubr.f32.mxu1 %v13456_v37  ;;  %v6427_v37 = vld [vmem:[%s12788_s4 + $0x188] sm:$0xff] }
 0x1b0   : > { %v10366_v34 = vadd.f32 %v13457_v55, %v1669_v38  ;;  %7208 = vmatmul.mubr.f32.gmra.mrb[176].mxu0 %v13366_v41  ;;  %v1671_v5 = vpop.f32.mrb[71].mxu0 }
 0x1b1   : > { %v2244_v28 = vpop.f32.mrb[86].mxu1  ;;  %7210 = vmatprep.mubr.f32.mxu0 %v13368_v62  ;;  %v13461_v62 = vld [vmem:[#allocation90_spill] sm:$0xff]  ;;  %v13465_v5 = vld [vmem:[#allocation93_spill] sm:$0xff] }
 0x1b2   : > { %v2246_v13 = vpop.f32.mrb[87].mxu1  ;;  %3003 = vmatmul.mubr.f32.gmra.mrb[192].mxu1 %v13458_v57  ;;  %v10372_v14 = vadd.f32 %v2244_v28, %v10176_v47  ;;  %v13466_v28 = vld [vmem:[#allocation12_spill] sm:$0xff] }
 0x1b3   : > { %v1674_v51 = vpop.f32.mrb[72].mxu0  ;;  %3007 = vmatprep.mubr.f32.mxu1 %v13459_v32 }
 0x1b4   : > { %v10376_v6 = vadd.f32 %v13460_v20, %v1674_v51  ;;  %7211 = vmatmul.mubr.f32.gmra.mrb[178].mxu0 %v13370_v16  ;;  %v1676_v26 = vpop.f32.mrb[73].mxu0  ;;  %v13467_v51 = vld [vmem:[#allocation94_spill] sm:$0xff]  ;;  %v13468_v20 = vmov 0.0|0.0  }
 0x1b5   : > { %v2249_v41 = vpop.f32.mrb[88].mxu1  ;;  %7213 = vmatprep.mubr.f32.mxu0 %v13372_v3  ;;  %v13464_v3 = vld [vmem:[#allocation92_spill] sm:$0xff] }
 0x1b6   : > { %v2251_v23 = vpop.f32.mrb[89].mxu1  ;;  %3008 = vmatmul.mubr.f32.gmra.mrb[194].mxu1 %v13461_v62  ;;  %v10382_v15 = vadd.f32 %v2249_v41, %v10187_v9  ;;  %v6426_v9 = vld [vmem:[%s12788_s4 + $0x180] sm:$0xff]  ;;  %v13469_v41 = vld [vmem:[#allocation95_spill] sm:$0xff] }
 0x1b7   : > { %v1679_v47 = vpop.f32.mrb[74].mxu0  ;;  %3012 = vmatprep.mubr.f32.mxu1 %v13462_v10  ;;  %v13470_v23 = vld [vmem:[#allocation11_spill] sm:$0xff] }
 0x1b8   : > { %v10386_v22 = vadd.f32 %v13463_v45, %v1679_v47  ;;  %v1681_v11 = vpop.f32.mrb[75].mxu0  ;;  %7214 = vmatmul.mubr.f32.gmra.mrb[180].mxu0 %v13374_v50  ;;  %v7748_v50 = vpack.c.bf16 %v6427_v37, %v6426_v9  ;;  %v13472_v45 = vld [vmem:[#allocation36_spill] sm:$0xff]  ;;  %v6462_v9 = vld [vmem:[%s12788_s4 + $0x2a0] sm:$0xff]  ;;  %v6463_v37 = vld [vmem:[%s12788_s4 + $0x2a8] sm:$0xff] }
 0x1b9   : > { %v2254_v16 = vpop.f32.mrb[90].mxu1  ;;  %7216 = vmatprep.mubr.f32.mxu0 %v13376_v40 }
 0x1ba   : > { %v2256_v17 = vpop.f32.mrb[91].mxu1  ;;  %3013 = vmatmul.mubr.f32.gmra.mrb[196].mxu1 %v13464_v3  ;;  %v10392_v38 = vadd.f32 %v2254_v16, %v10196_v29  ;;  %7749 = vmatpush1.bf16.msra.mxu0 %v7748_v50  ;;  %v7803_v50 = vpack.c.bf16 %v6463_v37, %v6462_v9  ;;  %v6433_v9 = vld [vmem:[%s12788_s4 + $0x1b8] sm:$0xff] }
 0x1bb   : > { %v1684_v55 = vpop.f32.mrb[76].mxu0  ;;  %3017 = vmatprep.mubr.f32.mxu1 %v13465_v5  ;;  %7750 = vmatprep.subr.bf16.mxu0 %v13468_v20  ;;  %v13473_v17 = vld [vmem:[#allocation96_spill] sm:$0xff]  ;;  %v13474_v5 = vld [vmem:[#allocation97_spill] sm:$0xff] }
 0x1bc   : > { %v10402_v40 = vadd.f32 %v13466_v28, %v1684_v55  ;;  %v1686_v13 = vpop.f32.mrb[77].mxu0  ;;  %7217 = vmatmul.mubr.f32.gmra.mrb[182].mxu0 %v13378_v61  ;;  %v13471_v61 = vld [vmem:[#allocation35_spill] sm:$0xff]  ;;  %v13475_v28 = vld [vmem:[#allocation14_spill] sm:$0xff]  ;;  %7804 = vmatprep.subr.bf16.mxu1 %v7803_v50 }
 0x1bd   : > { %v2259_v29 = vpop.f32.mrb[92].mxu1  ;;  %7219 = vmatprep.mubr.f32.mxu0 %v13380_v4  ;;  %v6428_v4 = vld [vmem:[%s12788_s4 + $0x190] sm:$0xff]  ;;  %7806 = vmatpush3.bf16.msra.mxu1 %v7803_v50 }
 0x1be   : > { %v2261_v57 = vpop.f32.mrb[93].mxu1  ;;  %3018 = vmatmul.mubr.f32.gmra.mrb[198].mxu1 %v13467_v51  ;;  %v10408_v32 = vadd.f32 %v2259_v29, %v10203_v21  ;;  %v6429_v21 = vld [vmem:[%s12788_s4 + $0x198] sm:$0xff]  ;;  %v6430_v51 = vld [vmem:[%s12788_s4 + $0x1a0] sm:$0xff] }
 0x1bf   : > { %v1689_v26 = vpop.f32.mrb[78].mxu0  ;;  %3022 = vmatprep.mubr.f32.mxu1 %v13469_v41  ;;  %v7751_v11 = vpack.c.bf16 %v6429_v21, %v6428_v4  ;;  %v13476_v57 = vld [vmem:[#allocation38_spill] sm:$0xff]  ;;  %v13478_v21 = vld [vmem:[#allocation99_spill] sm:$0xff] }
 0x1c0   : > { %v10413_v62 = vadd.f32 %v13470_v23, %v1689_v26  ;;  %v1691_v47 = vpop.f32.mrb[79].mxu0  ;;  %7220 = vmatmul.mubr.f32.gmra.mrb[184].mxu0 %v13471_v61  ;;  %v6431_v26 = vld [vmem:[%s12788_s4 + $0x1a8] sm:$0xff]  ;;  %v13477_v23 = vld [vmem:[#allocation98_spill] sm:$0xff] }
 0x1c1   : > { %v2264_v10 = vpop.f32.mrb[94].mxu1  ;;  %7222 = vmatprep.mubr.f32.mxu0 %v13472_v45  ;;  %7752 = vmatpush1.bf16.msra.mxu0 %v7751_v11  ;;  %v7754_v61 = vpack.c.bf16 %v6431_v26, %v6430_v51  ;;  %v13480_v11 = vld [vmem:[#allocation43_spill] sm:$0xff] }
 0x1c2   : > { %v2266_v16 = vpop.f32.mrb[95].mxu1  ;;  %3023 = vmatmul.mubr.f32.gmra.mrb[200].mxu1 %v13473_v17  ;;  %v10425_v3 = vadd.f32 %v2264_v10, %v10210_v49  ;;  %7753 = vmatprep.subr.bf16.mxu0 %v13468_v20  ;;  %v13481_v17 = vld [vmem:[#allocation45_spill] sm:$0xff]  ;;  %v13485_v26 = vld [vmem:[#allocation47_spill] sm:$0xff] }
 0x1c3   : > { %v1694_v55 = vpop.f32.mrb[80].mxu0  ;;  %3027 = vmatprep.mubr.f32.mxu1 %v13474_v5 }
 0x1c4   : > { %v10435_v13 = vadd.f32 %v13475_v28, %v1694_v55  ;;  %v1696_v29 = vpop.f32.mrb[81].mxu0  ;;  %7223 = vmatmul.mubr.f32.gmra.mrb[186].mxu0 %v13476_v57  ;;  %v13482_v55 = vld [vmem:[#allocation100_spill] sm:$0xff] }
 0x1c5   : > { %v2269_v49 = vpop.f32.mrb[96].mxu1  ;;  %7225 = vmatprep.mubr.f32.mxu0 %v13388_v25  ;;  %v13479_v25 = vld [vmem:[#allocation13_spill] sm:$0xff]  ;;  %7755 = vmatpush1.bf16.msra.mxu0 %v7754_v61  ;;  %v13484_v57 = vld [vmem:[#allocation16_spill] sm:$0xff] }
 0x1c6   : > { %v2271_v41 = vpop.f32.mrb[97].mxu1  ;;  %3028 = vmatmul.mubr.f32.gmra.mrb[202].mxu1 %v13477_v23  ;;  %v10448_v47 = vadd.f32 %v2269_v49, %v10217_v56  ;;  %v6432_v56 = vld [vmem:[%s12788_s4 + $0x1b0] sm:$0xff]  ;;  %7756 = vmatprep.subr.bf16.mxu0 %v13468_v20  ;;  %v13483_v29 = vld [vmem:[#allocation101_spill] sm:$0xff]  ;;  %v6435_v23 = vld [vmem:[%s12788_s4 + $0x1c8] sm:$0xff] }
 0x1c7   : > { %v1699_v4 = vpop.f32.mrb[82].mxu0  ;;  %3032 = vmatprep.mubr.f32.mxu1 %v13478_v21  ;;  %v7757_v50 = vpack.c.bf16 %v6433_v9, %v6432_v56  ;;  %v13489_v56 = vld [vmem:[#allocation50_spill] sm:$0xff] }
 0x1c8   : > { %v10452_v10 = vadd.f32 %v13479_v25, %v1699_v4  ;;  %v1701_v45 = vpop.f32.mrb[83].mxu0  ;;  %7226 = vmatmul.mubr.f32.gmra.mrb[188].mxu0 %v13480_v11  ;;  %v13486_v4 = vld [vmem:[#allocation102_spill] sm:$0xff]  ;;  %v13488_v11 = vld [vmem:[#allocation15_spill] sm:$0xff] }
 0x1c9   : > { %v2274_v16 = vpop.f32.mrb[98].mxu1  ;;  %7228 = vmatprep.mubr.f32.mxu0 %v13481_v17  ;;  %7758 = vmatpush1.bf16.msra.mxu0 %v7757_v50 }
 0x1ca   : > { %v2276_v37 = vpop.f32.mrb[99].mxu1  ;;  %3033 = vmatmul.mubr.f32.gmra.mrb[204].mxu1 %v13482_v55  ;;  %v10464_v5 = vadd.f32 %v2274_v16, %v10224_v54  ;;  %v6434_v54 = vld [vmem:[%s12788_s4 + $0x1c0] sm:$0xff]  ;;  %7759 = vmatprep.subr.bf16.mxu0 %v13468_v20  ;;  %v6437_v55 = vld [vmem:[%s12788_s4 + $0x1d8] sm:$0xff] }
 0x1cb   : > { %v1704_v28 = vpop.f32.mrb[84].mxu0  ;;  %3037 = vmatprep.mubr.f32.mxu1 %v13483_v29  ;;  %v7760_v25 = vpack.c.bf16 %v6435_v23, %v6434_v54  ;;  %v13490_v37 = vld [vmem:[#allocation52_spill] sm:$0xff]  ;;  %v13493_v54 = vld [vmem:[#allocation55_spill] sm:$0xff]  ;;  %v13494_v23 = vld [vmem:[#allocation18_spill] sm:$0xff] }
 0x1cc   : > { %v10469_v49 = vadd.f32 %v13484_v57, %v1704_v28  ;;  %v1706_v51 = vpop.f32.mrb[85].mxu0  ;;  %7229 = vmatmul.mubr.f32.gmra.mrb[190].mxu0 %v13485_v26  ;;  %v13491_v28 = vld [vmem:[#allocation104_spill] sm:$0xff]  ;;  %v13492_v26 = vld [vmem:[#allocation105_spill] sm:$0xff] }
 0x1cd   : > { %v2279_v41 = vpop.f32.mrb[100].mxu1  ;;  %7231 = vmatprep.mubr.f32.mxu0 %v13396_v52  ;;  %v13487_v52 = vld [vmem:[#allocation103_spill] sm:$0xff]  ;;  %7761 = vmatpush1.bf16.msra.mxu0 %v7760_v25  ;;  %v13495_v25 = vld [vmem:[#allocation57_spill] sm:$0xff] }
 0x1ce   : > { %v2281_v61 = vpop.f32.mrb[101].mxu1  ;;  %3038 = vmatmul.mubr.f32.gmra.mrb[206].mxu1 %v13486_v4  ;;  %v10481_v21 = vadd.f32 %v2279_v41, %v10234_v30  ;;  %v6436_v30 = vld [vmem:[%s12788_s4 + $0x1d0] sm:$0xff]  ;;  %7762 = vmatprep.subr.bf16.mxu0 %v13468_v20 }
 0x1cf   : > { %v1709_v45 = vpop.f32.mrb[86].mxu0  ;;  %3042 = vmatprep.mubr.f32.mxu1 %v13487_v52  ;;  %v7763_v57 = vpack.c.bf16 %v6437_v55, %v6436_v30  ;;  %v13498_v55 = vld [vmem:[#allocation17_spill] sm:$0xff] }
 0x1d0   : > { %v10486_v16 = vadd.f32 %v13488_v11, %v1709_v45  ;;  %v1711_v17 = vpop.f32.mrb[87].mxu0  ;;  %7232 = vmatmul.mubr.f32.gmra.mrb[192].mxu0 %v13489_v56  ;;  %v6439_v45 = vld [vmem:[%s12788_s4 + $0x1e8] sm:$0xff]  ;;  %v13496_v11 = vld [vmem:[#allocation30_spill] sm:$0xff] }
 0x1d1   : > { %v2284_v9 = vpop.f32.mrb[102].mxu1  ;;  %7234 = vmatprep.mubr.f32.mxu0 %v13490_v37  ;;  %7764 = vmatpush1.bf16.msra.mxu0 %v7763_v57  ;;  %v13497_v37 = vld [vmem:[#allocation106_spill] sm:$0xff]  ;;  %v13499_v57 = vld [vmem:[#allocation60_spill] sm:$0xff] }
 0x1d2   : > { %v2286_v50 = vpop.f32.mrb[103].mxu1  ;;  %3043 = vmatmul.mubr.f32.gmra.mrb[208].mxu1 %v13491_v28  ;;  %v10498_v29 = vadd.f32 %v2284_v9, %v10244_v24  ;;  %v6438_v24 = vld [vmem:[%s12788_s4 + $0x1e0] sm:$0xff]  ;;  %7765 = vmatprep.subr.bf16.mxu0 %v13468_v20 }
 0x1d3   : > { %v1714_v51 = vpop.f32.mrb[88].mxu0  ;;  %3047 = vmatprep.mubr.f32.mxu1 %v13492_v26  ;;  %v7766_v56 = vpack.c.bf16 %v6439_v45, %v6438_v24  ;;  %v13502_v24 = vld [vmem:[#allocation62_spill] sm:$0xff]  ;;  %v13503_v45 = vld [vmem:[#allocation20_spill] sm:$0xff] }
 0x1d4   : > { %v1716_v41 = vpop.f32.mrb[89].mxu0  ;;  %7235 = vmatmul.mubr.f32.gmra.mrb[194].mxu0 %v13493_v54  ;;  %v10504_v61 = vadd.f32 %v13494_v23, %v1714_v51  ;;  %v6441_v51 = vld [vmem:[%s12788_s4 + $0x1f8] sm:$0xff] }
 0x1d5   : > { %v2289_v4 = vpop.f32.mrb[104].mxu1  ;;  %7237 = vmatprep.mubr.f32.mxu0 %v13495_v25  ;;  %7767 = vmatpush1.bf16.msra.mxu0 %v7766_v56  ;;  %v13500_v41 = vld [vmem:[#allocation107_spill] sm:$0xff]  ;;  %v13504_v56 = vld [vmem:[#allocation64_spill] sm:$0xff] }
 0x1d6   : > { %v2291_v52 = vpop.f32.mrb[105].mxu1  ;;  %3048 = vmatmul.mubr.f32.gmra.mrb[210].mxu1 %v13496_v11  ;;  %v10515_v17 = vadd.f32 %v2289_v4, %v10254_v33  ;;  %v6440_v33 = vld [vmem:[%s12788_s4 + $0x1f0] sm:$0xff]  ;;  %7768 = vmatprep.subr.bf16.mxu0 %v13468_v20 }
 0x1d7   : > { %v1719_v9 = vpop.f32.mrb[90].mxu0  ;;  %3052 = vmatprep.mubr.f32.mxu1 %v13497_v37  ;;  %v7769_v54 = vpack.c.bf16 %v6441_v51, %v6440_v33  ;;  %v13501_v4 = vld [vmem:[#allocation108_spill] sm:$0xff] }
 0x1d8   : > { %v1721_v30 = vpop.f32.mrb[91].mxu0  ;;  %7238 = vmatmul.mubr.f32.gmra.mrb[196].mxu0 %v13406_v53  ;;  %v10521_v50 = vadd.f32 %v13498_v55, %v1719_v9  ;;  %v6443_v9 = vld [vmem:[%s12788_s4 + $0x208] sm:$0xff] }
 0x1d9   : > { %v2294_v28 = vpop.f32.mrb[106].mxu1  ;;  %7240 = vmatprep.mubr.f32.mxu0 %v13499_v57  ;;  %7770 = vmatpush1.bf16.msra.mxu0 %v7769_v54  ;;  %v13505_v30 = vld [vmem:[#allocation109_spill] sm:$0xff] }
 0x1da   : > { %v2296_v26 = vpop.f32.mrb[107].mxu1  ;;  %3053 = vmatmul.mubr.f32.gmra.mrb[212].mxu1 %v13500_v41  ;;  %v10532_v53 = vadd.f32 %v2294_v28, %v10264_v63  ;;  %v6442_v63 = vld [vmem:[%s12788_s4 + $0x200] sm:$0xff]  ;;  %v6464_v28 = vld [vmem:[%s12788_s4 + $0x2b0] sm:$0xff]  ;;  %v6465_v57 = vld [vmem:[%s12788_s4 + $0x2b8] sm:$0xff]  ;;  %7771 = vmatprep.subr.bf16.mxu0 %v13468_v20 }
 0x1db   : > { %v1724_v23 = vpop.f32.mrb[92].mxu0  ;;  %3057 = vmatprep.mubr.f32.mxu1 %v13501_v4  ;;  %v7772_v33 = vpack.c.bf16 %v6443_v9, %v6442_v63  ;;  %v13506_v26 = vld [vmem:[#allocation110_spill] sm:$0xff]  ;;  %v7807_v41 = vpack.c.bf16 %v6465_v57, %v6464_v28 }
 0x1dc   : > { %v1726_v25 = vpop.f32.mrb[93].mxu0  ;;  %7241 = vmatmul.mubr.f32.gmra.mrb[198].mxu0 %v13502_v24  ;;  %v10538_v52 = vadd.f32 %v13503_v45, %v1724_v23  ;;  %v6444_v24 = vld [vmem:[%s12788_s4 + $0x210] sm:$0xff]  ;;  %v6445_v45 = vld [vmem:[%s12788_s4 + $0x218] sm:$0xff]  ;;  %v13512_v28 = vld [vmem:[#allocation22_spill] sm:$0xff] }
 0x1dd   : > { %v2299_v11 = vpop.f32.mrb[108].mxu1  ;;  %7243 = vmatprep.mubr.f32.mxu0 %v13504_v56  ;;  %v13508_v25 = vld [vmem:[#allocation69_spill] sm:$0xff]  ;;  %7808 = vmatprep.subr.bf16.mxu1 %v7807_v41  ;;  %v13509_v56 = vld [vmem:[#allocation111_spill] sm:$0xff]  ;;  %v7775_v63 = vpack.c.bf16 %v6445_v45, %v6444_v24  ;;  %v13515_v45 = vld [vmem:[#allocation114_spill] sm:$0xff] }
 0x1de   : > { %v2301_v37 = vpop.f32.mrb[109].mxu1  ;;  %3058 = vmatmul.mubr.f32.gmra.mrb[214].mxu1 %v13505_v30  ;;  %v10549_v55 = vadd.f32 %v2299_v11, %v10280_v48  ;;  %v13507_v48 = vld [vmem:[#allocation19_spill] sm:$0xff]  ;;  %7773 = vmatpush1.bf16.msra.mxu0 %v7772_v33 }
 0x1df   : > { %v1729_v51 = vpop.f32.mrb[94].mxu0  ;;  %3062 = vmatprep.mubr.f32.mxu1 %v13506_v26  ;;  %v13511_v37 = vld [vmem:[#allocation112_spill] sm:$0xff]  ;;  %7810 = vmatpush3.bf16.msra.mxu1 %v7807_v41  ;;  %v6447_v33 = vld [vmem:[%s12788_s4 + $0x228] sm:$0xff] }
 0x1e0   : > { %v1731_v54 = vpop.f32.mrb[95].mxu0  ;;  %7244 = vmatmul.mubr.f32.gmra.mrb[200].mxu0 %v13415_v35  ;;  %v10561_v23 = vadd.f32 %v13507_v48, %v1729_v51  ;;  %7774 = vmatprep.subr.bf16.mxu0 %v13468_v20  ;;  %v13513_v26 = vld [vmem:[#allocation72_spill] sm:$0xff]  ;;  %v10592_v48 = vld [vmem:[%s9036_s10 + $0x68] sm:$0xff] }
 0x1e1   : > { %v2304_v4 = vpop.f32.mrb[110].mxu1  ;;  %7246 = vmatprep.mubr.f32.mxu0 %v13508_v25  ;;  %v13514_v54 = vld [vmem:[#allocation113_spill] sm:$0xff] }
 0x1e2   : > { %v2306_v11 = vpop.f32.mrb[111].mxu1  ;;  %3063 = vmatmul.mubr.f32.gmra.mrb[216].mxu1 %v13509_v56  ;;  %v10572_v35 = vadd.f32 %v2304_v4, %v10290_v18  ;;  %v6446_v18 = vld [vmem:[%s12788_s4 + $0x220] sm:$0xff]  ;;  %v10595_v4 = vld [vmem:[%s9036_s10 + $0x70] sm:$0xff]  ;;  %7776 = vmatpush1.bf16.msra.mxu0 %v7775_v63  ;;  %v13516_v56 = vld [vmem:[#allocation21_spill] sm:$0xff] }
 0x1e3   : > { %v1734_v9 = vpop.f32.mrb[96].mxu0  ;;  %3067 = vmatprep.mubr.f32.mxu1 %v13511_v37  ;;  %v7778_v25 = vpack.c.bf16 %v6447_v33, %v6446_v18  ;;  %7777 = vmatprep.subr.bf16.mxu0 %v13468_v20  ;;  %v13518_v37 = vld [vmem:[#allocation76_spill] sm:$0xff]  ;;  %v13028_v63 = vrot.slane %v10595_v4, 2 }
 0x1e4   : > { %13510 = vst [vmem:[#allocation40_spill] sm:$0xff] %v10572_v35  ;;  %v1736_v30 = vpop.f32.mrb[97].mxu0  ;;  %7247 = vmatmul.mubr.f32.gmra.mrb[202].mxu0 %v13420_v46  ;;  %v10577_v57 = vadd.f32 %v13512_v28, %v1734_v9  ;;  %v6448_v28 = vld [vmem:[%s12788_s4 + $0x230] sm:$0xff]  ;;  %v10655_v35 = vld [vmem:[%s9036_s10 + $0x78] sm:$0xff] }
 0x1e5   : > { %v2309_v51 = vpop.f32.mrb[112].mxu1  ;;  %7249 = vmatprep.mubr.f32.mxu0 %v13513_v26  ;;  %v2779_v30 = vrot.slane %v10592_v48, 2  ;;  %v13519_v26 = vld [vmem:[#allocation115_spill] sm:$0xff] }
 0x1e6   : > { %v2311_v41 = vpop.f32.mrb[113].mxu1  ;;  %3068 = vmatmul.mubr.f32.gmra.mrb[218].mxu1 %v13514_v54  ;;  %v10589_v46 = vadd.f32 %v2309_v51, %v10300_v60  ;;  %v6449_v51 = vld [vmem:[%s12788_s4 + $0x238] sm:$0xff]  ;;  %7779 = vmatpush1.bf16.msra.mxu0 %v7778_v25  ;;  %v13521_v54 = vld [vmem:[#allocation116_spill] sm:$0xff]  ;;  %v6467_v25 = vld [vmem:[%s12788_s4 + $0x2c8] sm:$0xff] }
 0x1e7   : > { %v1739_v24 = vpop.f32.mrb[98].mxu0  ;;  %3072 = vmatprep.mubr.f32.mxu1 %v13515_v45  ;;  %v7781_v33 = vpack.c.bf16 %v6449_v51, %v6448_v28  ;;  %7780 = vmatprep.subr.bf16.mxu0 %v13468_v20  ;;  %v2773_v28 = vrot.slane %v10592_v48, 1  ;;  %v2775_v51 = vrot.slane %v10595_v4, 1 }
 0x1e8   : > { %v1741_v11 = vpop.f32.mrb[99].mxu0  ;;  %7250 = vmatmul.mubr.f32.gmra.mrb[204].mxu0 %v13425_v2  ;;  %v10601_v9 = vadd.f32 %v13516_v56, %v1739_v24  ;;  %v10619_v24 = vld [vmem:[%s9036_s10 + $0x60] sm:$0xff]  ;;  %v13524_v56 = vld [vmem:[#allocation23_spill] sm:$0xff] }
 0x1e9   : > { %v2314_v60 = vpop.f32.mrb[114].mxu1  ;;  %7252 = vmatprep.mubr.f32.mxu0 %v13518_v37  ;;  %13522 = vst [vmem:[#allocation26_spill] sm:$0xff] %v10619_v24  ;;  %v13523_v11 = vld [vmem:[#allocation79_spill] sm:$0xff] }
 0x1ea   : > { %13517 = vst [vmem:[#allocation49_spill] sm:$0xff] %v10601_v9  ;;  %v2316_v2 = vpop.f32.mrb[115].mxu1  ;;  %3073 = vmatmul.mubr.f32.gmra.mrb[220].mxu1 %v13519_v26  ;;  %v10614_v18 = vadd.f32 %v2314_v60, %v10310_v8  ;;  %v6466_v8 = vld [vmem:[%s12788_s4 + $0x2c0] sm:$0xff]  ;;  %v2772_v60 = vrot.slane %v10619_v24, 1  ;;  %v13526_v26 = vld [vmem:[#allocation81_spill] sm:$0xff]  ;;  %7782 = vmatpush1.bf16.msra.mxu0 %v7781_v33  ;;  %v6468_v33 = vld [vmem:[%s12788_s4 + $0x2d0] sm:$0xff] }
 0x1eb   : > { %v1744_v41 = vpop.f32.mrb[100].mxu0  ;;  %3077 = vmatprep.mubr.f32.mxu1 %v13521_v54  ;;  %v7811_v54 = vpack.c.bf16 %v6467_v25, %v6466_v8  ;;  %v13527_v24 = vld [vmem:[#allocation117_spill] sm:$0xff]  ;;  %7783 = vmatprep.subr.bf16.mxu0 %v13468_v20  ;;  %v2776_v25 = vsel %vm526_vm2, %v2773_v28, %v2775_v51 }
 0x1ec   : > { %13520 = vst [vmem:[#allocation24_spill] sm:$0xff] %v10614_v18  ;;  %v1746_v45 = vpop.f32.mrb[101].mxu0  ;;  %7253 = vmatmul.mubr.f32.gmra.mrb[206].mxu0 %v13523_v11  ;;  %v10623_v37 = vadd.f32 %v13524_v56, %v1744_v41  ;;  %v10638_v41 = vsel %vm653_vm0, %v2779_v30, %v13028_v63  ;;  %v6451_v11 = vld [vmem:[%s12788_s4 + $0x248] sm:$0xff]  ;;  %v2774_v63 = vsel %vm526_vm2, %v2772_v60, %v2773_v28  ;;  %v13529_v18 = vld [vmem:[#allocation118_spill] sm:$0xff]  ;;  %v13530_v60 = vld [vmem:[#allocation84_spill] sm:$0xff]  ;;  %v2790_v28 = vrot.slane %v2779_v30, 6 }
 0x1ed   : > { %v2319_v2 = vpop.f32.mrb[116].mxu1  ;;  %7255 = vmatprep.mubr.f32.mxu0 %v13526_v26  ;;  %v6450_v45 = vld [vmem:[%s12788_s4 + $0x240] sm:$0xff]  ;;  %v2787_v9 = vrot.slane %v2774_v63, 6  ;;  %7812 = vmatprep.subr.bf16.mxu1 %v7811_v54 }
 0x1ee   : > { %13525 = vst [vmem:[#allocation29_spill] sm:$0xff] %v10623_v37  ;;  %v2321_v56 = vpop.f32.mrb[117].mxu1  ;;  %3078 = vmatmul.mubr.f32.gmra.mrb[222].mxu1 %v13527_v24  ;;  %v10648_v26 = vadd.f32 %v2319_v2, %v10320_v43  ;;  %v7784_v37 = vpack.c.bf16 %v6451_v11, %v6450_v45  ;;  %v2788_v43 = vrot.slane %v2776_v25, 6  ;;  %v6453_v45 = vld [vmem:[%s12788_s4 + $0x258] sm:$0xff]  ;;  %v2777_v11 = vrot.slane %v10655_v35, 1  ;;  %v13531_v25 = vld [vmem:[#allocation119_spill] sm:$0xff] }
 0x1ef   : > { %3082 = vmatprep.mubr.f32.mxu1 %v13529_v18  ;;  %v1749_v8 = vpop.f32.mrb[102].mxu0  ;;  %v6469_v18 = vld [vmem:[%s12788_s4 + $0x2d8] sm:$0xff]  ;;  %7814 = vmatpush3.bf16.msra.mxu1 %v7811_v54  ;;  %v13533_v54 = vld [vmem:[#allocation120_spill] sm:$0xff] }
 0x1f0   : > { %13528 = vst [vmem:[#allocation59_spill] sm:$0xff] %v10648_v26  ;;  %v1751_v56 = vpop.f32.mrb[103].mxu0  ;;  %7256 = vmatmul.mubr.f32.gmra.mrb[208].mxu0 %v13434_v44  ;;  %v7815_v2 = vpack.c.bf16 %v6469_v18, %v6468_v33  ;;  %v6452_v44 = vld [vmem:[%s12788_s4 + $0x250] sm:$0xff]  ;;  %v10678_v30 = vsel %vm744_vm1, %v2787_v9, %v2788_v43  ;;  %v2778_v63 = vsel %vm526_vm2, %v2775_v51, %v2777_v11  ;;  %v13534_v26 = vld [vmem:[#allocation86_spill] sm:$0xff]  ;;  %v13536_v51 = vrot.slane %v10638_v41, 6  ;;  %v13537_v18 = vld [vmem:[#allocation121_spill] sm:$0xff] }
 0x1f1   : > { %v2324_v24 = vpop.f32.mrb[118].mxu1  ;;  %7258 = vmatprep.mubr.f32.mxu0 %v13530_v60  ;;  %7785 = vmatpush1.bf16.msra.mxu0 %v7784_v37  ;;  %13532 = vst [vmem:[#allocation28_spill] sm:$0xff] %v10678_v30  ;;  %v7787_v60 = vpack.c.bf16 %v6453_v45, %v6452_v44  ;;  %v2793_v37 = vrot.slane %v10595_v4, 6  ;;  %v6470_v9 = vld [vmem:[%s12788_s4 + $0x2e0] sm:$0xff]  ;;  %v13535_v45 = vld [vmem:[#allocation89_spill] sm:$0xff] }
 0x1f2   : > { %v2326_v8 = vpop.f32.mrb[119].mxu1  ;;  %3083 = vmatmul.mubr.f32.gmra.mrb[224].mxu1 %v13531_v25  ;;  %v10675_v56 = vadd.f32 %v2324_v24, %v10330_v42  ;;  %7786 = vmatprep.subr.bf16.mxu0 %v13468_v20  ;;  %v2795_v42 = vrot.slane %v2778_v63, 6  ;;  %v6471_v24 = vld [vmem:[%s12788_s4 + $0x2e8] sm:$0xff]  ;;  %v2782_v25 = vrot.slane %v10655_v35, 2 }
 0x1f3   : > { %3087 = vmatprep.mubr.f32.mxu1 %v13533_v54  ;;  %v1754_v33 = vpop.f32.mrb[104].mxu0  ;;  %7816 = vmatprep.subr.bf16.mxu1 %v7815_v2  ;;  %v7819_v63 = vpack.c.bf16 %v6471_v24, %v6470_v9  ;;  %v6454_v54 = vld [vmem:[%s12788_s4 + $0x260] sm:$0xff] }
 0x1f4   : > { %v1756_v8 = vpop.f32.mrb[105].mxu0  ;;  %7259 = vmatmul.mubr.f32.gmra.mrb[210].mxu0 %v13534_v26  ;;  %v2792_v26 = vsel %vm744_vm1, %v2790_v28, %v13536_v51  ;;  %7818 = vmatpush3.bf16.msra.mxu1 %v7815_v2  ;;  %v6455_v33 = vld [vmem:[%s12788_s4 + $0x268] sm:$0xff]  ;;  %v13539_v28 = vrot.slane %v10592_v48, 6  ;;  %v13540_v9 = vld [vmem:[#allocation122_spill] sm:$0xff] }
 0x1f5   : > { %v2329_v44 = vpop.f32.mrb[120].mxu1  ;;  %7261 = vmatprep.mubr.f32.mxu0 %v13535_v45  ;;  %7788 = vmatpush1.bf16.msra.mxu0 %v7787_v60  ;;  %v10708_v45 = vsel %vm744_vm1, %v2788_v43, %v2795_v42  ;;  %v7790_v51 = vpack.c.bf16 %v6455_v33, %v6454_v54  ;;  %v6473_v54 = vld [vmem:[%s12788_s4 + $0x2f8] sm:$0xff] }
 0x1f6   : > { %v2331_v8 = vpop.f32.mrb[121].mxu1  ;;  %3088 = vmatmul.mubr.f32.gmra.mrb[226].mxu1 %v13537_v18  ;;  %v10705_v30 = vadd.f32 %v2329_v44, %v10340_v12  ;;  %13538 = vst [vmem:[#allocation32_spill] sm:$0xff] %v10708_v45  ;;  %v10713_v2 = vsel %vm744_vm1, %v13539_v28, %v2793_v37  ;;  %7789 = vmatprep.subr.bf16.mxu0 %v13468_v20  ;;  %v13541_v18 = vrot.slane %v10595_v4, 2  ;;  %v2799_v44 = vrot.slane %v10655_v35, 6  ;;  %v6472_v28 = vld [vmem:[%s12788_s4 + $0x2f0] sm:$0xff]  ;;  %v6457_v35 = vld [vmem:[%s12788_s4 + $0x278] sm:$0xff] }
 0x1f7   : > { %3092 = vmatprep.mubr.f32.mxu1 %v13540_v9  ;;  %v1759_v24 = vpop.f32.mrb[106].mxu0  ;;  %v2801_v8 = vrot.slane %v2777_v11, 6  ;;  %7820 = vmatprep.subr.bf16.mxu1 %v7819_v63  ;;  %v2803_v45 = vrot.slane %v2782_v25, 6  ;;  %v7823_v33 = vpack.c.bf16 %v6473_v54, %v6472_v28  ;;  %v13542_v9 = vld [vmem:[#allocation123_spill] sm:$0xff] }
 0x1f8   : > { %v2783_v12 = vsel %vm653_vm0, %v13541_v18, %v2782_v25  ;;  %v1761_v60 = vpop.f32.mrb[107].mxu0  ;;  %7262 = vmatmul.mubr.f32.gmra.mrb[212].mxu0 %v2792_v26  ;;  %7822 = vmatpush3.bf16.msra.mxu1 %v7819_v63  ;;  %v6456_v26 = vld [vmem:[%s12788_s4 + $0x270] sm:$0xff]  ;;  %v13543_v63 = vrot.slane %v10638_v41, 6  ;;  %v13545_v41 = vld [vmem:[#allocation125_spill] sm:$0xff] }
 0x1f9   : > { %v2797_v43 = vrot.slane %v2783_v12, 6  ;;  %v2334_v11 = vpop.f32.mrb[122].mxu1  ;;  %v10728_v4 = vsel %vm744_vm1, %v2795_v42, %v2801_v8  ;;  %7791 = vmatpush1.bf16.msra.mxu0 %v7790_v51  ;;  %v10744_v8 = vsel %vm744_vm1, %v2793_v37, %v2799_v44  ;;  %v13544_v18 = vld [vmem:[#allocation124_spill] sm:$0xff]  ;;  %v7793_v28 = vpack.c.bf16 %v6457_v35, %v6456_v26  ;;  %7824 = vmatprep.subr.bf16.mxu1 %v7823_v33  ;;  %v13546_v44 = vld [vmem:[#allocation126_spill] sm:$0xff] }
 0x1fa   : > { %v2336_v25 = vpop.f32.mrb[123].mxu1  ;;  %3093 = vmatmul.mubr.f32.gmra.mrb[228].mxu1 %v13542_v9  ;;  %v10738_v24 = vadd.f32 %v2334_v11, %v10356_v39  ;;  %7792 = vmatprep.subr.bf16.mxu0 %v13468_v20  ;;  %v13548_v9 = vld [vmem:[#allocation127_spill] sm:$0xff] }
 0x1fb   : > { %v2798_v42 = vsel %vm744_vm1, %v13543_v63, %v2797_v43  ;;  %3097 = vmatprep.mubr.f32.mxu1 %v13544_v18  ;;  %v7075_v12 = vpop.f32.mrb[108].mxu0  ;;  %v2804_v60 = vsel %vm744_vm1, %v2797_v43, %v2803_v45  ;;  %v13547_v25 = vld [vmem:[#allocation25_spill] sm:$0xff]  ;;  %v13550_v18 = vld [vmem:[#allocation31_spill] sm:$0xff] }
 0x1fc   : > { %7264 = vmatprep.mubr.f32.mxu0 %v2798_v42  ;;  %v2499_v54 = vpop.f32.mrb[109].mxu0  ;;  %7826 = vmatpush3.bf16.msra.mxu1 %v7823_v33  ;;  %v13549_v42 = vld [vmem:[#allocation128_spill] sm:$0xff] }
 0x1fd   : > { %7265 = vmatmul.mubr.f32.gmra.mrb[214].mxu0 %v2804_v60  ;;  %v2339_v39 = vpop.f32.mrb[124].mxu1 }
 0x1fe   : > { %v2341_v51 = vpop.f32.mrb[125].mxu1  ;;  %3098 = vmatmul.mubr.f32.gmra.mrb[230].mxu1 %v13545_v41  ;;  %v10751_v11 = vadd.f32 %v2339_v39, %v10366_v34  ;;  %7794 = vmatpush1.bf16.msra.mxu0 %v7793_v28  ;;  %v13551_v28 = vld [vmem:[#allocation27_spill] sm:$0xff] }
 0x1ff   : > { %v7078_v37 = vpop.f32.mrb[110].mxu0  ;;  %3102 = vmatprep.mubr.f32.mxu1 %v13546_v44  ;;  %7827 = vmatprep.subr.bf16.mxu0 %v13468_v20  ;;  %v13552_v51 = vld [vmem:[#allocation129_spill] sm:$0xff] }
 0x200   : > { %v10755_v45 = vadd.f32 %v7078_v37, %v13547_v25  ;;  %v2509_v43 = vpop.f32.mrb[111].mxu0 }
 0x201   : > { %v2344_v26 = vpop.f32.mrb[126].mxu1 }
 0x202   : > { %v2346_v35 = vpop.f32.mrb[127].mxu1  ;;  %3103 = vmatmul.mubr.f32.gmra.mrb[232].mxu1 %v13548_v9  ;;  %v10760_v63 = vadd.f32 %v2344_v26, %v10376_v6  ;;  %v13553_v6 = vld [vmem:[#allocation130_spill] sm:$0xff]  ;;  %v13554_v26 = vld [vmem:[#allocation33_spill] sm:$0xff] }
 0x203   : > { %v7081_v34 = vpop.f32.mrb[112].mxu0  ;;  %3107 = vmatprep.mubr.f32.mxu1 %v13549_v42 }
 0x204   : > { %v10764_v12 = vadd.f32 %v7081_v34, %v13550_v18  ;;  %v2519_v33 = vpop.f32.mrb[113].mxu0  ;;  %v13555_v34 = vld [vmem:[#allocation131_spill] sm:$0xff] }
 0x205   : > { %v2349_v60 = vpop.f32.mrb[128].mxu1  ;;  %v10767_v54 = vadd.f32 %v2519_v33, %v13551_v28 }
 0x206   : > { %v2351_v39 = vpop.f32.mrb[129].mxu1  ;;  %3108 = vmatmul.mubr.f32.gmra.mrb[234].mxu1 %v13552_v51  ;;  %v10771_v41 = vadd.f32 %v2349_v60, %v10386_v22  ;;  %v13556_v22 = vld [vmem:[#allocation132_spill] sm:$0xff]  ;;  %v13557_v51 = vld [vmem:[#allocation133_spill] sm:$0xff] }
 0x207   : > { %v7084_v37 = vpop.f32.mrb[114].mxu0  ;;  %3112 = vmatprep.mubr.f32.mxu1 %v13553_v6 }
 0x208   : > { %v10775_v44 = vadd.f32 %v7084_v37, %v10275_v27  ;;  %v2529_v25 = vpop.f32.mrb[115].mxu0 }
 0x209   : > { %v2354_v43 = vpop.f32.mrb[130].mxu1  ;;  %v10778_v35 = vadd.f32 %v2529_v25, %v13554_v26 }
 0x20a   : > { %v2356_v9 = vpop.f32.mrb[131].mxu1  ;;  %3113 = vmatmul.mubr.f32.gmra.mrb[236].mxu1 %v13555_v34  ;;  %v10782_v42 = vadd.f32 %v2354_v43, %v10402_v40  ;;  %v13558_v40 = vld [vmem:[#allocation134_spill] sm:$0xff] }
 0x20b   : > { %v7087_v18 = vpop.f32.mrb[116].mxu0  ;;  %3117 = vmatprep.mubr.f32.mxu1 %v13556_v22 }
 0x20c   : > { %v10786_v33 = vadd.f32 %v7087_v18, %v10295_v1  ;;  %v2539_v60 = vpop.f32.mrb[117].mxu0 }
 0x20d   : > { %v2359_v27 = vpop.f32.mrb[132].mxu1  ;;  %v10789_v28 = vadd.f32 %v2539_v60, %v10285_v59  ;;  %v13559_v59 = vld [vmem:[#allocation135_spill] sm:$0xff] }
 0x20e   : > { %v2361_v39 = vpop.f32.mrb[133].mxu1  ;;  %3118 = vmatmul.mubr.f32.gmra.mrb[238].mxu1 %v13557_v51  ;;  %v10793_v37 = vadd.f32 %v2359_v27, %v10413_v62  ;;  %v13560_v62 = vld [vmem:[#allocation136_spill] sm:$0xff] }
 0x20f   : > { %v7090_v6 = vpop.f32.mrb[118].mxu0  ;;  %3122 = vmatprep.mubr.f32.mxu1 %v13558_v40 }
 0x210   : > { %v10797_v25 = vadd.f32 %v7090_v6, %v10315_v36  ;;  %v2549_v43 = vpop.f32.mrb[119].mxu0 }
 0x211   : > { %v2364_v1 = vpop.f32.mrb[134].mxu1  ;;  %v10800_v26 = vadd.f32 %v2549_v43, %v10305_v58  ;;  %v13561_v58 = vld [vmem:[#allocation137_spill] sm:$0xff] }
 0x212   : > { %v2366_v9 = vpop.f32.mrb[135].mxu1  ;;  %3123 = vmatmul.mubr.f32.gmra.mrb[240].mxu1 %v13559_v59  ;;  %v10804_v34 = vadd.f32 %v2364_v1, %v10435_v13  ;;  %v13562_v13 = vld [vmem:[#allocation138_spill] sm:$0xff] }
 0x213   : > { %v7093_v18 = vpop.f32.mrb[120].mxu0  ;;  %3127 = vmatprep.mubr.f32.mxu1 %v13560_v62 }
 0x214   : > { %v10808_v22 = vadd.f32 %v7093_v18, %v10336_v31  ;;  %v2559_v60 = vpop.f32.mrb[121].mxu0 }
 0x215   : > { %v2369_v36 = vpop.f32.mrb[136].mxu1  ;;  %v10811_v27 = vadd.f32 %v2559_v60, %v10326_v7  ;;  %v13563_v7 = vld [vmem:[#allocation139_spill] sm:$0xff] }
 0x216   : > { %v2371_v39 = vpop.f32.mrb[137].mxu1  ;;  %3128 = vmatmul.mubr.f32.gmra.mrb[242].mxu1 %v13561_v58  ;;  %v10815_v51 = vadd.f32 %v2369_v36, %v10452_v10  ;;  %v13564_v10 = vld [vmem:[#allocation140_spill] sm:$0xff] }
 0x217   : > { %v7096_v6 = vpop.f32.mrb[122].mxu0  ;;  %3132 = vmatprep.mubr.f32.mxu1 %v13562_v13 }
 0x218   : > { %v10819_v40 = vadd.f32 %v7096_v6, %v10362_v0  ;;  %v2569_v43 = vpop.f32.mrb[123].mxu0 }
 0x219   : > { %v2374_v31 = vpop.f32.mrb[138].mxu1  ;;  %v10822_v1 = vadd.f32 %v2569_v43, %v10352_v19  ;;  %v13565_v19 = vld [vmem:[#allocation141_spill] sm:$0xff] }
 0x21a   : > { %v2376_v9 = vpop.f32.mrb[139].mxu1  ;;  %3133 = vmatmul.mubr.f32.gmra.mrb[244].mxu1 %v13563_v7  ;;  %v10826_v59 = vadd.f32 %v2374_v31, %v10469_v49  ;;  %v13566_v49 = vld [vmem:[#allocation142_spill] sm:$0xff]  ;;  %v13567_v7 = vld [vmem:[#allocation143_spill] sm:$0xff] }
 0x21b   : > { %v7099_v18 = vpop.f32.mrb[124].mxu0  ;;  %3137 = vmatprep.mubr.f32.mxu1 %v13564_v10 }
 0x21c   : > { %v10830_v62 = vadd.f32 %v7099_v18, %v10382_v15  ;;  %v2579_v60 = vpop.f32.mrb[125].mxu0 }
 0x21d   : > { %v2379_v0 = vpop.f32.mrb[140].mxu1  ;;  %v10833_v36 = vadd.f32 %v2579_v60, %v10372_v14 }
 0x21e   : > { %v2381_v39 = vpop.f32.mrb[141].mxu1  ;;  %3138 = vmatmul.mubr.f32.gmra.mrb[246].mxu1 %v13565_v19  ;;  %v10837_v58 = vadd.f32 %v2379_v0, %v10486_v16  ;;  %v13568_v16 = vld [vmem:[#allocation144_spill] sm:$0xff] }
 0x21f   : > { %v7102_v6 = vpop.f32.mrb[126].mxu0  ;;  %3142 = vmatprep.mubr.f32.mxu1 %v13566_v49 }
 0x220   : > { %v10841_v13 = vadd.f32 %v7102_v6, %v10408_v32  ;;  %v2589_v43 = vpop.f32.mrb[127].mxu0  ;;  %v13570_v6 = vld [vmem:[#allocation146_spill] sm:$0xff] }
 0x221   : > { %v2384_v15 = vpop.f32.mrb[142].mxu1  ;;  %v10844_v31 = vadd.f32 %v2589_v43, %v10392_v38 }
 0x222   : > { %v10847_v14 = vadd.f32 %v2384_v15, %v10504_v61  ;;  %v2386_v9 = vpop.f32.mrb[143].mxu1  ;;  %3143 = vmatmul.mubr.f32.gmra.mrb[248].mxu1 %v13567_v7  ;;  %v13569_v61 = vld [vmem:[#allocation145_spill] sm:$0xff] }
 0x223   : > { %v7105_v18 = vpop.f32.mrb[128].mxu0  ;;  %3147 = vmatprep.mubr.f32.mxu1 %v13568_v16 }
 0x224   : > { %v10852_v10 = vadd.f32 %v7105_v18, %v10448_v47  ;;  %v2599_v60 = vpop.f32.mrb[129].mxu0  ;;  %v13572_v18 = vld [vmem:[#allocation148_spill] sm:$0xff] }
 0x225   : > { %v2389_v32 = vpop.f32.mrb[144].mxu1  ;;  %v10855_v0 = vadd.f32 %v2599_v60, %v10425_v3 }
 0x226   : > { %v10858_v38 = vadd.f32 %v2389_v32, %v10521_v50  ;;  %v2391_v39 = vpop.f32.mrb[145].mxu1  ;;  %3148 = vmatmul.mubr.f32.gmra.mrb[250].mxu1 %v13569_v61  ;;  %v13571_v50 = vld [vmem:[#allocation147_spill] sm:$0xff] }
 0x227   : > { %v7108_v19 = vpop.f32.mrb[130].mxu0  ;;  %3152 = vmatprep.mubr.f32.mxu1 %v13570_v6 }
 0x228   : > { %v10863_v49 = vadd.f32 %v7108_v19, %v10481_v21  ;;  %v2609_v43 = vpop.f32.mrb[131].mxu0  ;;  %v13574_v19 = vld [vmem:[#allocation150_spill] sm:$0xff] }
 0x229   : > { %v2394_v47 = vpop.f32.mrb[146].mxu1  ;;  %v10866_v15 = vadd.f32 %v2609_v43, %v10464_v5 }
 0x22a   : > { %v10869_v3 = vadd.f32 %v2394_v47, %v10538_v52  ;;  %v2396_v9 = vpop.f32.mrb[147].mxu1  ;;  %3153 = vmatmul.mubr.f32.gmra.mrb[252].mxu1 %v13571_v50  ;;  %v13573_v52 = vld [vmem:[#allocation149_spill] sm:$0xff] }
 0x22b   : > { %v7111_v7 = vpop.f32.mrb[132].mxu0  ;;  %3157 = vmatprep.mubr.f32.mxu1 %v13572_v18 }
 0x22c   : > { %v10874_v16 = vadd.f32 %v7111_v7, %v10515_v17  ;;  %v2619_v60 = vpop.f32.mrb[133].mxu0  ;;  %v13577_v7 = vld [vmem:[#allocation152_spill] sm:$0xff] }
 0x22d   : > { %v2399_v21 = vpop.f32.mrb[148].mxu1  ;;  %v10877_v32 = vadd.f32 %v2619_v60, %v10498_v29 }
 0x22e   : > { %v10880_v5 = vadd.f32 %v2399_v21, %v10561_v23  ;;  %v2401_v39 = vpop.f32.mrb[149].mxu1  ;;  %3158 = vmatmul.mubr.f32.gmra.mrb[254].mxu1 %v13573_v52  ;;  %v13576_v23 = vld [vmem:[#allocation151_spill] sm:$0xff]  ;;  %v13579_v21 = vld [vmem:[#allocation40_spill] sm:$0xff]  ;;  %v13581_v52 = vld [vmem:[#allocation49_spill] sm:$0xff] }
 0x22f   : > { %v7114_v61 = vpop.f32.mrb[134].mxu0  ;;  %3162 = vmatprep.mubr.f32.mxu1 %v13574_v19 }
 0x230   : > { %v10885_v6 = vadd.f32 %v7114_v61, %v10549_v55  ;;  %v2629_v43 = vpop.f32.mrb[135].mxu0 }
 0x231   : > { %v2404_v17 = vpop.f32.mrb[150].mxu1  ;;  %v10888_v47 = vadd.f32 %v2629_v43, %v10532_v53  ;;  %v13583_v43 = vld [vmem:[#allocation154_spill] sm:$0xff] }
 0x232   : > { %13575 = vst [vmem:[#allocation34_spill] sm:$0xff] %v10885_v6  ;;  %v10891_v29 = vadd.f32 %v2404_v17, %v10577_v57  ;;  %v2406_v9 = vpop.f32.mrb[151].mxu1  ;;  %3163 = vmatmul.mubr.f32.gmra.mrb[0].mxu1 %v13576_v23  ;;  %v13582_v57 = vld [vmem:[#allocation153_spill] sm:$0xff]  ;;  %v13584_v17 = vld [vmem:[#allocation59_spill] sm:$0xff] }
 0x233   : > { %v7117_v50 = vpop.f32.mrb[136].mxu0  ;;  %3167 = vmatprep.mubr.f32.mxu1 %v13577_v7 }
 0x234   : > { %v10896_v18 = vadd.f32 %v7117_v50, %v10589_v46  ;;  %v2639_v60 = vpop.f32.mrb[137].mxu0  ;;  %v13586_v50 = vld [vmem:[#allocation24_spill] sm:$0xff] }
 0x235   : > { %v2409_v55 = vpop.f32.mrb[152].mxu1  ;;  %v10899_v39 = vadd.f32 %v2639_v60, %v13579_v21 }
 0x236   : > { %13578 = vst [vmem:[#allocation37_spill] sm:$0xff] %v10896_v18  ;;  %v10902_v53 = vadd.f32 %v2409_v55, %v13581_v52  ;;  %v2411_v61 = vpop.f32.mrb[153].mxu1  ;;  %3168 = vmatmul.mubr.f32.gmra.mrb[2].mxu1 %v13582_v57  ;;  %v13588_v18 = vld [vmem:[#allocation29_spill] sm:$0xff]  ;;  %v13589_v55 = vld [vmem:[#allocation155_spill] sm:$0xff]  ;;  %v13591_v57 = vld [vmem:[#allocation26_spill] sm:$0xff] }
 0x237   : > { %13580 = vst [vmem:[#allocation67_spill] sm:$0xff] %v10899_v39  ;;  %v7120_v19 = vpop.f32.mrb[138].mxu0  ;;  %3172 = vmatprep.mubr.f32.mxu1 %v13583_v43  ;;  %v13590_v61 = vld [vmem:[#allocation156_spill] sm:$0xff]  ;;  %v2784_v39 = vrot.slane %v13591_v57, 6 }
 0x238   : > { %v10907_v9 = vadd.f32 %v7120_v19, %v13584_v17  ;;  %v2649_v23 = vpop.f32.mrb[139].mxu0 }
 0x239   : > { %v2414_v46 = vpop.f32.mrb[154].mxu1  ;;  %v10910_v7 = vadd.f32 %v2649_v23, %v13586_v50  ;;  %v13594_v50 = vld [vmem:[#allocation157_spill] sm:$0xff] }
 0x23a   : > { %13585 = vst [vmem:[#allocation39_spill] sm:$0xff] %v10907_v9  ;;  %v10913_v60 = vadd.f32 %v2414_v46, %v13588_v18  ;;  %v2416_v21 = vpop.f32.mrb[155].mxu1  ;;  %3173 = vmatmul.mubr.f32.gmra.mrb[4].mxu1 %v13589_v55  ;;  %v13595_v46 = vld [vmem:[#allocation28_spill] sm:$0xff] }
 0x23b   : > { %13587 = vst [vmem:[#allocation41_spill] sm:$0xff] %v10910_v7  ;;  %v7123_v52 = vpop.f32.mrb[140].mxu0  ;;  %3177 = vmatprep.mubr.f32.mxu1 %v13590_v61  ;;  %v13596_v21 = vrot.slane %v10592_v48, 6 }
 0x23c   : > { %v10919_v43 = vadd.f32 %v7123_v52, %v10705_v30  ;;  %v2659_v19 = vpop.f32.mrb[141].mxu0 }
 0x23d   : > { %v2419_v17 = vpop.f32.mrb[156].mxu1  ;;  %v10922_v9 = vadd.f32 %v2659_v19, %v10675_v56  ;;  %v2786_v55 = vsel %vm744_vm1, %v2784_v39, %v13596_v21 }
 0x23e   : > { %13592 = vst [vmem:[#allocation71_spill] sm:$0xff] %v10919_v43  ;;  %v2421_v23 = vpop.f32.mrb[157].mxu1  ;;  %3178 = vmatmul.mubr.f32.gmra.mrb[6].mxu1 %v13594_v50  ;;  %v13599_v17 = vld [vmem:[#allocation32_spill] sm:$0xff] }
 0x23f   : > { %13593 = vst [vmem:[#allocation42_spill] sm:$0xff] %v10922_v9  ;;  %v7126_v18 = vpop.f32.mrb[142].mxu0  ;;  %3182 = vmatprep.mubr.f32.mxu1 %v13595_v46 }
 0x240   : > { %v10930_v61 = vadd.f32 %v7126_v18, %v10751_v11  ;;  %v2669_v30 = vpop.f32.mrb[143].mxu0 }
 0x241   : > { %v2424_v52 = vpop.f32.mrb[158].mxu1  ;;  %v10933_v57 = vadd.f32 %v2669_v30, %v10738_v24 }
 0x242   : > { %13597 = vst [vmem:[#allocation44_spill] sm:$0xff] %v10930_v61  ;;  %v2426_v56 = vpop.f32.mrb[159].mxu1  ;;  %3183 = vmatmul.mubr.f32.gmra.mrb[8].mxu1 %v2786_v55 }
 0x243   : > { %13598 = vst [vmem:[#allocation74_spill] sm:$0xff] %v10933_v57  ;;  %v7129_v19 = vpop.f32.mrb[144].mxu0  ;;  %3187 = vmatprep.mubr.f32.mxu1 %v13599_v17 }
 0x244   : > { %v10937_v23 = vadd.f32 %v7129_v19, %v10771_v41  ;;  %v2679_v50 = vpop.f32.mrb[145].mxu0 }
 0x245   : > { %v2429_v48 = vpop.f32.mrb[160].mxu1  ;;  %v10940_v39 = vadd.f32 %v2679_v50, %v10760_v63 }
 0x246   : > { %13600 = vst [vmem:[#allocation46_spill] sm:$0xff] %v10937_v23  ;;  %v2431_v11 = vpop.f32.mrb[161].mxu1  ;;  %3188 = vmatmul.mubr.f32.gmra.mrb[10].mxu1 %v10713_v2 }
 0x247   : > { %13601 = vst [vmem:[#allocation48_spill] sm:$0xff] %v10940_v39  ;;  %v7132_v18 = vpop.f32.mrb[146].mxu0  ;;  %3192 = vmatprep.mubr.f32.mxu1 %v10728_v4 }
 0x248   : > { %v10945_v24 = vadd.f32 %v7132_v18, %v10793_v37  ;;  %v2689_v46 = vpop.f32.mrb[147].mxu0 }
 0x249   : > { %v10948_v21 = vadd.f32 %v2689_v46, %v10782_v42  ;;  %v2929_v41 = vpop.f32.mrb[162].mxu1 }
 0x24a   : > { %13602 = vst [vmem:[#allocation51_spill] sm:$0xff] %v10945_v24  ;;  %v2931_v55 = vpop.f32.mrb[163].mxu1  ;;  %3193 = vmatmul.mubr.f32.gmra.mrb[12].mxu1 %v10744_v8 }
 0x24b   : > { %13603 = vst [vmem:[#allocation53_spill] sm:$0xff] %v10948_v21  ;;  %v7135_v30 = vpop.f32.mrb[148].mxu0 }
 0x24c   : > { %v10952_v63 = vadd.f32 %v7135_v30, %v10815_v51  ;;  %v2699_v52 = vpop.f32.mrb[149].mxu0 }
 0x24d   : > { %v10955_v2 = vadd.f32 %v2699_v52, %v10804_v34  ;;  %v2934_v4 = vpop.f32.mrb[164].mxu1 }
 0x24e   : > { %13604 = vst [vmem:[#allocation83_spill] sm:$0xff] %v10952_v63  ;;  %v2936_v56 = vpop.f32.mrb[165].mxu1 }
 0x24f   : > { %13605 = vst [vmem:[#allocation54_spill] sm:$0xff] %v10955_v2  ;;  %v7138_v37 = vpop.f32.mrb[150].mxu0 }
 0x250   : > { %v10958_v19 = vadd.f32 %v7138_v37, %v10837_v58  ;;  %v2709_v42 = vpop.f32.mrb[151].mxu0 }
 0x251   : > { %v10961_v17 = vadd.f32 %v2709_v42, %v10826_v59  ;;  %v2939_v50 = vpop.f32.mrb[166].mxu1 }
 0x252   : > { %13606 = vst [vmem:[#allocation56_spill] sm:$0xff] %v10958_v19  ;;  %v2941_v8 = vpop.f32.mrb[167].mxu1 }
 0x253   : > { %13607 = vst [vmem:[#allocation7_spill] sm:$0xff] %v10961_v17  ;;  %v7141_v48 = vpop.f32.mrb[152].mxu0 }
 0x254   : > { %v10964_v51 = vadd.f32 %v7141_v48, %v10858_v38  ;;  %v2719_v11 = vpop.f32.mrb[153].mxu0 }
 0x255   : > { %v10967_v34 = vadd.f32 %v2719_v11, %v10847_v14  ;;  %v2944_v18 = vpop.f32.mrb[168].mxu1 }
 0x256   : > { %13608 = vst [vmem:[#allocation58_spill] sm:$0xff] %v10964_v51  ;;  %v2946_v46 = vpop.f32.mrb[169].mxu1 }
 0x257   : > { %13609 = vst [vmem:[#allocation61_spill] sm:$0xff] %v10967_v34  ;;  %v7144_v41 = vpop.f32.mrb[154].mxu0  ;;  %v3830_v46 = vlaneseq  ;;  %v11061_v34 = vld [vmem:[%s12788_s4 + $0x48] sm:$0xff] }
 0x258   : > { %v10970_v58 = vadd.f32 %v7144_v41, %v10880_v5  ;;  %v2729_v55 = vpop.f32.mrb[155].mxu0 }
 0x259   : > { %v10973_v59 = vadd.f32 %v2729_v55, %v10869_v3  ;;  %v2949_v30 = vpop.f32.mrb[170].mxu1 }
 0x25a   : > { %13610 = vst [vmem:[#allocation2_spill] sm:$0xff] %v10970_v58  ;;  %v2951_v52 = vpop.f32.mrb[171].mxu1 }
 0x25b   : > { %13611 = vst [vmem:[#allocation8_spill] sm:$0xff] %v10973_v59  ;;  %v7147_v4 = vpop.f32.mrb[156].mxu0  ;;  %v11045_v59 = vld [vmem:[%s12788_s4 + $0x38] sm:$0xff] }
 0x25c   : > { %v10976_v38 = vadd.f32 %v7147_v4, %v10902_v53  ;;  %v2739_v56 = vpop.f32.mrb[157].mxu0  ;;  %v3831_v4 = vshrl.u32 %v3830_v46, 7 }
 0x25d   : > { %v10979_v14 = vadd.f32 %v2739_v56, %v10891_v29  ;;  %v2954_v37 = vpop.f32.mrb[172].mxu1 }
 0x25e   : > { %13612 = vst [vmem:[#allocation9_spill] sm:$0xff] %v10976_v38  ;;  %v2956_v42 = vpop.f32.mrb[173].mxu1  ;;  %v3833_v56 = vadd.s32 16, %v3831_v4 }
 0x25f   : > { %13613 = vst [vmem:[#allocation63_spill] sm:$0xff] %v10979_v14  ;;  %v7150_v50 = vpop.f32.mrb[158].mxu0 }
 0x260   : > { %v2749_v8 = vpop.f32.mrb[159].mxu0 }
 0x261   : > { %v10982_v5 = vadd.f32 %v2749_v8, %v10913_v60  ;;  %v10984_v48 = vpop.f32.mrb[174].mxu1  ;;  %v10991_v60 = vld [vmem:[%s12787_s3] ss:$0 sm:$0xff] }
 0x262   : > { %v2961_v3 = vpop.f32.mrb[175].mxu1 }
 0x263   : > { %13614 = vst [vmem:[#allocation65_spill] sm:$0xff] %v10982_v5  ;;  %v7153_v11 = vpop.f32.mrb[160].mxu0  ;;  %v10995_v3 = vadd.s32 4294967295, %v3831_v4  ;;  %v4472_v4 = vld [vmem:[%s12788_s4 + $0x108] sm:$0xff]  ;;  %v11040_v5 = vld [vmem:[%s12788_s4 + $0x30] sm:$0xff] }
 0x264   : > { %v2759_v41 = vpop.f32.mrb[161].mxu0  ;;  %v10997_v11 = vadd.s32 4294967295, %v3833_v56 }
 0x265   : > { %v2964_v55 = vpop.f32.mrb[176].mxu1  ;;  %v11013_v41 = vld [vmem:[%s12788_s4 + $0x10] sm:$0xff]  ;;  %vm3891_vm3 = vcmp.ge.s32.totalorder %v10995_v3, 0 }
 0x266   : > { %v2966_v53 = vpop.f32.mrb[177].mxu1  ;;  %vm3950_vm4 = vcmp.lt.s32.totalorder %v10997_v11, 16  ;;  %v6505_v11 = vld [vmem:[%s12788_s4 + $0x300] sm:$0xff] }
 0x267   : > { %v7188_v52 = vpop.f32.mrb[162].mxu0  ;;  %v4471_v53 = vld [vmem:[%s12788_s4 + $0x100] sm:$0xff] }
 0x268   : > { %v3264_v38 = vpop.f32.mrb[163].mxu0  ;;  %v11047_v51 = vpack.c.bf16 %v4472_v4, %v4471_v53 }
 0x269   : > { %v10986_v29 = vpop.f32.mrb[178].mxu1  ;;  %v11002_v38 = vld [vmem:[%s12788_s4] sm:$0xff] }
 0x26a   : > { %v2971_v42 = vpop.f32.mrb[179].mxu1  ;;  %7876 = vmatprep.subr.bf16.mxu1 %v11047_v51 }
 0x26b   : > { %v7191_v50 = vpop.f32.mrb[164].mxu0 }
 0x26c   : > { %v3280_v14 = vadd.f32 %v7191_v50, %v2944_v18  ;;  %v3274_v58 = vpop.f32.mrb[165].mxu0 }
 0x26d   : > { %v10993_v8 = vpop.f32.mrb[180].mxu1  ;;  %v11008_v58 = vld [vmem:[%s12788_s4 + $0x8] sm:$0xff] }
 0x26e   : > { %v3536_v46 = vadd.f32 %v3280_v14, %v10755_v45  ;;  %v2976_v18 = vpop.f32.mrb[181].mxu1  ;;  %v11021_v45 = vld [vmem:[%s12788_s4 + $0x18] sm:$0xff]  ;;  %v11026_v14 = vld [vmem:[%s12788_s4 + $0x20] sm:$0xff] }
 0x26f   : > { %v7194_v52 = vpop.f32.mrb[166].mxu0  ;;  %v11035_v18 = vld [vmem:[%s12788_s4 + $0x28] sm:$0xff] }
 0x270   : > { %v3597_v56 = vadd.f32 %v10991_v60, %v3536_v46  ;;  %v3290_v42 = vadd.f32 %v7194_v52, %v2954_v37  ;;  %v3284_v50 = vpop.f32.mrb[167].mxu0  ;;  %v11056_v52 = vld [vmem:[%s12788_s4 + $0x40] sm:$0xff] }
 0x271   : > { %v11051_v37 = vpop.f32.mrb[182].mxu1  ;;  %v3285_v46 = vadd.f32 %v3284_v50, %v2949_v30  ;;  %v11069_v30 = vld [vmem:[%s12788_s4 + $0x50] sm:$0xff]  ;;  %v11074_v50 = vld [vmem:[%s12788_s4 + $0x58] sm:$0xff] }
 0x272   : > { %vm3651_vm5 = vcmp.ge.f32.partialorder %v3597_v56, 0.0  ;;  %v3705_v53 = vmul.f32 0.2, %v3597_v56  ;;  %v3538_v4 = vadd.f32 %v3290_v42, %v10764_v12  ;;  %v2981_v19 = vpop.f32.mrb[183].mxu1 }
 0x273   : > { %v3537_v63 = vadd.f32 %v3285_v46, %v10767_v54  ;;  %v7197_v2 = vpop.f32.mrb[168].mxu0 }
 0x274   : > { %v11084_v17 = vsel %vm3651_vm5, %v3597_v56, %v3705_v53  ;;  %v3599_v24 = vadd.f32 %v10991_v60, %v3538_v4  ;;  %v3300_v21 = vadd.f32 %v7197_v2, %v2964_v55  ;;  %v3294_v23 = vpop.f32.mrb[169].mxu0  ;;  %v4473_v2 = vld [vmem:[%s12788_s4 + $0x110] sm:$0xff]  ;;  %v4474_v55 = vld [vmem:[%s12788_s4 + $0x118] sm:$0xff] }
 0x275   : > { %v3598_v54 = vadd.f32 %v10991_v60, %v3537_v63  ;;  %v2984_v46 = vpop.f32.mrb[184].mxu1  ;;  %v3295_v12 = vadd.f32 %v3294_v23, %v10984_v48  ;;  %v4116_v19 = vsel %vm3891_vm3, %v11084_v17, 0.0  ;;  %v11106_v7 = vpack.c.bf16 %v4474_v55, %v4473_v2 }
 0x276   : > { %vm3653_vm6 = vcmp.ge.f32.partialorder %v3599_v24, 0.0  ;;  %v3707_v63 = vmul.f32 0.2, %v3599_v24  ;;  %v3540_v53 = vadd.f32 %v3300_v21, %v10775_v44  ;;  %v2986_v23 = vpop.f32.mrb[185].mxu1  ;;  %v4220_v48 = vrot.slane %v4116_v19, 1 }
 0x277   : > { %vm3652_vm7 = vcmp.ge.f32.partialorder %v3598_v54, 0.0  ;;  %v3706_v4 = vmul.f32 0.2, %v3598_v54  ;;  %v3539_v39 = vadd.f32 %v3295_v12, %v10778_v35  ;;  %v7200_v42 = vpop.f32.mrb[170].mxu0  ;;  %v4332_v56 = vrot.slane %v4116_v19, 2 }
 0x278   : > { %v3761_v61 = vsel %vm3653_vm6, %v3599_v24, %v3707_v63  ;;  %v3601_v57 = vadd.f32 %v10991_v60, %v3540_v53  ;;  %v3310_v43 = vadd.f32 %v7200_v42, %v10993_v8  ;;  %v3304_v9 = vpop.f32.mrb[171].mxu0 }
 0x279   : > { %v4118_v6 = vsel %vm3950_vm4, %v3761_v61, 0.0  ;;  %v11110_v44 = vsel %vm3652_vm7, %v3598_v54, %v3706_v4  ;;  %v3600_v21 = vadd.f32 %v10991_v60, %v3539_v39  ;;  %v2989_v23 = vpop.f32.mrb[186].mxu1  ;;  %v3305_v35 = vadd.f32 %v3304_v9, %v10986_v29 }
 0x27a   : > { %v4335_v12 = vrot.slane %v4118_v6, 2  ;;  %vm3655_vm8 = vcmp.ge.f32.partialorder %v3601_v57, 0.0  ;;  %v3709_v24 = vmul.f32 0.2, %v3601_v57  ;;  %v3542_v19 = vadd.f32 %v3310_v43, %v10786_v33  ;;  %v2991_v63 = vpop.f32.mrb[187].mxu1 }
 0x27b   : > { %vm3654_vm9 = vcmp.ge.f32.partialorder %v3600_v21, 0.0  ;;  %v3708_v8 = vmul.f32 0.2, %v3600_v21  ;;  %v3541_v42 = vadd.f32 %v3305_v35, %v10789_v28  ;;  %v7203_v2 = vpop.f32.mrb[172].mxu0  ;;  %v4221_v61 = vrot.slane %v11110_v44, 1 }
 0x27c   : > { %v11117_v54 = vsel %vm3655_vm8, %v3601_v57, %v3709_v24  ;;  %v3603_v39 = vadd.f32 %v10991_v60, %v3542_v19  ;;  %v3320_v55 = vadd.f32 %v7203_v2, %v2984_v46  ;;  %v3314_v53 = vpop.f32.mrb[173].mxu0  ;;  %v4333_v9 = vrot.slane %v11110_v44, 2 }
 0x27d   : > { %v11121_v29 = vsel %vm3654_vm9, %v3600_v21, %v3708_v8  ;;  %v3602_v33 = vadd.f32 %v10991_v60, %v3541_v42  ;;  %v2994_v43 = vpop.f32.mrb[188].mxu1  ;;  %v3315_v4 = vadd.f32 %v3314_v53, %v11051_v37  ;;  %v11126_v28 = vsel %vm526_vm2, %v4220_v48, %v4221_v61 }
 0x27e   : > { %vm3657_vm10 = vcmp.ge.f32.partialorder %v3603_v39, 0.0  ;;  %v3711_v35 = vmul.f32 0.2, %v3603_v39  ;;  %v3544_v57 = vadd.f32 %v3320_v55, %v10797_v25  ;;  %v2996_v24 = vpop.f32.mrb[189].mxu1  ;;  %4617 = vmatprep.mubr.f32.mxu0 %v11126_v28  ;;  %v11131_v46 = vsel %vm653_vm0, %v4332_v56, %v4333_v9 }
 0x27f   : > { %vm3656_vm11 = vcmp.ge.f32.partialorder %v3602_v33, 0.0  ;;  %v3710_v21 = vmul.f32 0.2, %v3602_v33  ;;  %v3543_v19 = vadd.f32 %v3315_v4, %v10800_v26  ;;  %v11135_v63 = vsel %vm653_vm0, %v4333_v9, %v4335_v12  ;;  %7299 = vmatprep.mubr.f32.mxu1 %v11131_v46  ;;  %6474 = vmatmul.mubr.msk.f32.vlgmr.msra.gmra.mrb[216].mxu0 %vm3891_vm3, %v11084_v17  ;;  %v7206_v25 = vpop.f32.mrb[174].mxu0 }
 0x280   : > { %v11141_v37 = vsel %vm3657_vm10, %v3603_v39, %v3711_v35  ;;  %v3605_v48 = vadd.f32 %v10991_v60, %v3544_v57  ;;  %7300 = vmatmul.mubr.f32.vlgmr.msra.gmra.mrb[14].mxu1 %v11135_v63  ;;  %v3330_v56 = vadd.f32 %v7206_v25, %v2994_v43  ;;  %v4223_v8 = vrot.slane %v4118_v6, 1  ;;  %v3324_v42 = vpop.f32.mrb[175].mxu0 }
 0x281   : > { %13615 = vst [vmem:[#allocation10_spill] sm:$0xff] %v11141_v37  ;;  %v13616_v26 = vpack.c.bf16 %v11008_v58, %v11002_v38  ;;  %v3764_v12 = vsel %vm3656_vm11, %v3602_v33, %v3710_v21  ;;  %v3604_v2 = vadd.f32 %v10991_v60, %v3543_v19  ;;  %v2999_v55 = vpop.f32.mrb[190].mxu1  ;;  %v3325_v53 = vadd.f32 %v3324_v42, %v2989_v23 }
 0x282   : > { %v4119_v39 = vsel %vm3891_vm3, %v11121_v29, 0.0  ;;  %7878 = vmatpush3.bf16.msra.mxu1 %v11047_v51  ;;  %v4121_v6 = vsel %vm3950_vm4, %v3764_v12, 0.0  ;;  %vm3659_vm12 = vcmp.ge.f32.partialorder %v3605_v48, 0.0  ;;  %v3713_v9 = vmul.f32 0.2, %v3605_v48  ;;  %v3001_v58 = vpop.f32.mrb[191].mxu1 }
 0x283   : > { %7829 = vmatpush1.bf16.msra.mxu0 %v13616_v26  ;;  %v3546_v38 = vadd.f32 %v3330_v56, %v10808_v22  ;;  %7880 = vmatprep.subr.bf16.mxu1 %v11106_v7  ;;  %vm3658_vm13 = vcmp.ge.f32.partialorder %v3604_v2, 0.0  ;;  %v3712_v23 = vmul.f32 0.2, %v3604_v2  ;;  %v11159_v33 = vsel %vm526_vm2, %v4221_v61, %v4223_v8  ;;  %v7209_v4 = vpop.f32.mrb[176].mxu0 }
 0x284   : > { %7830 = vmatprep.subr.bf16.mxu0 %v13468_v20  ;;  %v3545_v43 = vadd.f32 %v3325_v53, %v10811_v27  ;;  %v3767_v35 = vsel %vm3659_vm12, %v3605_v48, %v3713_v9  ;;  %4622 = vmatprep.mubr.f32.mxu0 %v11159_v33  ;;  %v4337_v57 = vrot.slane %v4119_v39, 2  ;;  %v4338_v24 = vrot.slane %v11117_v54, 2  ;;  %v3334_v22 = vpop.f32.mrb[177].mxu0 }
 0x285   : > { %v3607_v51 = vadd.f32 %v10991_v60, %v3546_v38  ;;  %v13617_v21 = vpack.c.bf16 %v11021_v45, %v11013_v41  ;;  %v11170_v61 = vsel %vm3950_vm4, %v3767_v35, 0.0  ;;  %v11172_v19 = vsel %vm3658_vm13, %v3604_v2, %v3712_v23  ;;  %4623 = vmatmul.mubr.f32.gmra.mrb[218].mxu0 %v11110_v44  ;;  %v3004_v48 = vpop.f32.mrb[192].mxu1 }
 0x286   : > { %13618 = vst [vmem:[#allocation66_spill] sm:$0xff] %v11172_v19  ;;  %v3606_v27 = vadd.f32 %v10991_v60, %v3545_v43  ;;  %v4225_v25 = vrot.slane %v4119_v39, 1  ;;  %v11178_v8 = vsel %vm653_vm0, %v4337_v57, %v4338_v24  ;;  %v4226_v41 = vrot.slane %v11117_v54, 1  ;;  %v3006_v45 = vpop.f32.mrb[193].mxu1  ;;  %7882 = vmatpush3.bf16.msra.mxu1 %v11106_v7 }
 0x287   : > { %7832 = vmatpush1.bf16.msra.mxu0 %v13617_v21  ;;  %vm3661_vm14 = vcmp.ge.f32.partialorder %v3607_v51, 0.0  ;;  %v3715_v56 = vmul.f32 0.2, %v3607_v51  ;;  %7302 = vmatprep.mubr.f32.mxu1 %v11178_v8  ;;  %v3340_v26 = vadd.f32 %v7209_v4, %v3004_v48  ;;  %v3335_v12 = vadd.f32 %v3334_v22, %v2999_v55  ;;  %v7212_v2 = vpop.f32.mrb[178].mxu0 }
 0x288   : > { %7833 = vmatprep.subr.bf16.mxu0 %v13468_v20  ;;  %vm3660_vm15 = vcmp.ge.f32.partialorder %v3606_v27, 0.0  ;;  %v3714_v42 = vmul.f32 0.2, %v3606_v27  ;;  %v11186_v39 = vsel %vm526_vm2, %v4225_v25, %v4226_v41  ;;  %v4340_v9 = vrot.slane %v4121_v6, 2  ;;  %v3344_v58 = vpop.f32.mrb[179].mxu0 }
 0x289   : > { %v11183_v53 = vsel %vm3661_vm14, %v3607_v51, %v3715_v56  ;;  %v4228_v38 = vrot.slane %v4121_v6, 1  ;;  %v13620_v23 = vpack.c.bf16 %v11035_v18, %v11026_v14  ;;  %4627 = vmatprep.mubr.f32.mxu0 %v11186_v39  ;;  %v3548_v43 = vadd.f32 %v3340_v26, %v10819_v40  ;;  %v3009_v4 = vpop.f32.mrb[194].mxu1 }
 0x28a   : > { %13619 = vst [vmem:[#allocation68_spill] sm:$0xff] %v11183_v53  ;;  %v11191_v7 = vsel %vm3660_vm15, %v3606_v27, %v3714_v42  ;;  %v3547_v55 = vadd.f32 %v3335_v12, %v10822_v1  ;;  %v4122_v35 = vsel %vm3891_vm3, %v11141_v37, 0.0  ;;  %6475 = vmatmul.mubr.msk.f32.gmra.mrb[220].mxu0 %vm3891_vm3, %v11121_v29  ;;  %v11204_v14 = vsel %vm653_vm0, %v4338_v24, %v4340_v9  ;;  %v3011_v6 = vpop.f32.mrb[195].mxu1 }
 0x28b   : > { %7835 = vmatpush1.bf16.msra.mxu0 %v13620_v23  ;;  %13621 = vst [vmem:[#allocation70_spill] sm:$0xff] %v11191_v7  ;;  %v11207_v18 = vsel %vm526_vm2, %v4226_v41, %v4228_v38  ;;  %v3345_v40 = vadd.f32 %v3344_v58, %v3009_v4  ;;  %v4342_v1 = vrot.slane %v4122_v35, 2  ;;  %v3609_v51 = vadd.f32 %v10991_v60, %v3548_v43  ;;  %v11215_v24 = vpop.f32.mrb[180].mxu0 }
 0x28c   : > { %7836 = vmatprep.subr.bf16.mxu0 %v13468_v20  ;;  %v3608_v57 = vadd.f32 %v10991_v60, %v3547_v55  ;;  %7303 = vmatmul.mubr.f32.gmra.mrb[16].mxu1 %v11204_v14  ;;  %v4343_v22 = vrot.slane %v11172_v19, 2  ;;  %v4345_v21 = vrot.slane %v11170_v61, 2  ;;  %v4230_v25 = vrot.slane %v4122_v35, 1  ;;  %v3354_v41 = vpop.f32.mrb[181].mxu0 }
 0x28d   : > { %4632 = vmatprep.mubr.f32.mxu0 %v11207_v18  ;;  %v3549_v27 = vadd.f32 %v3345_v40, %v10833_v36  ;;  %v4231_v48 = vrot.slane %v11172_v19, 1  ;;  %v4125_v56 = vsel %vm3891_vm3, %v11191_v7, 0.0  ;;  %v13622_v45 = vpack.c.bf16 %v11045_v59, %v11040_v5  ;;  %v3014_v59 = vpop.f32.mrb[196].mxu1 }
 0x28e   : > { %vm3663_vm1 = vcmp.ge.f32.partialorder %v3609_v51, 0.0  ;;  %v3717_v42 = vmul.f32 0.2, %v3609_v51  ;;  %vm3662_vm5 = vcmp.ge.f32.partialorder %v3608_v57, 0.0  ;;  %v3716_v26 = vmul.f32 0.2, %v3608_v57  ;;  %4633 = vmatmul.mubr.f32.gmra.mrb[222].mxu0 %v11117_v54 }
 0x28f   : > { %7838 = vmatpush1.bf16.msra.mxu0 %v13622_v45  ;;  %v3610_v36 = vadd.f32 %v10991_v60, %v3549_v27  ;;  %v11228_v12 = vsel %vm653_vm0, %v4342_v1, %v4343_v22  ;;  %v11232_v9 = vsel %vm653_vm0, %v4343_v22, %v4345_v21  ;;  %v11235_v38 = vsel %vm526_vm2, %v4230_v25, %v4231_v48  ;;  %v3016_v43 = vpop.f32.mrb[197].mxu1  ;;  %v11241_v4 = vpop.f32.mrb[182].mxu0  ;;  %v4451_v25 = vld [vmem:[%s12788_s4 + $0x60] sm:$0xff]  ;;  %v4452_v45 = vld [vmem:[%s12788_s4 + $0x68] sm:$0xff] }
 0x290   : > { %7839 = vmatprep.subr.bf16.mxu0 %v13468_v20  ;;  %v11237_v5 = vsel %vm3663_vm1, %v3609_v51, %v3717_v42  ;;  %v3770_v58 = vsel %vm3662_vm5, %v3608_v57, %v3716_v26  ;;  %7305 = vmatprep.mubr.f32.mxu1 %v11228_v12  ;;  %v3350_v23 = vadd.f32 %v7212_v2, %v3014_v59  ;;  %v4347_v55 = vrot.slane %v4125_v56, 2  ;;  %v11247_v1 = vpop.f32.mrb[183].mxu0 }
 0x291   : > { %13623 = vst [vmem:[#allocation73_spill] sm:$0xff] %v11237_v5  ;;  %4637 = vmatprep.mubr.f32.mxu0 %v11235_v38  ;;  %v4127_v35 = vsel %vm3950_vm4, %v3770_v58, 0.0  ;;  %vm3664_vm6 = vcmp.ge.f32.partialorder %v3610_v36, 0.0  ;;  %v3718_v40 = vmul.f32 0.2, %v3610_v36  ;;  %7306 = vmatmul.mubr.f32.gmra.mrb[18].mxu1 %v11232_v9  ;;  %v4348_v6 = vrot.slane %v11183_v53, 2 }
 0x292   : > { %v13624_v51 = vpack.c.bf16 %v11061_v34, %v11056_v52  ;;  %v3550_v2 = vadd.f32 %v3350_v23, %v10830_v62  ;;  %v4233_v57 = vrot.slane %v11170_v61, 1  ;;  %v3019_v22 = vpop.f32.mrb[198].mxu1  ;;  %v4350_v21 = vrot.slane %v4127_v35, 2  ;;  %6476 = vmatmul.mubr.msk.f32.gmra.mrb[224].mxu0 %vm3891_vm3, %v11141_v37 }
 0x293   : > { %v4235_v27 = vrot.slane %v4125_v56, 1  ;;  %v11261_v42 = vsel %vm3664_vm6, %v3610_v36, %v3718_v40  ;;  %v11267_v62 = vsel %vm653_vm0, %v4347_v55, %v4348_v6  ;;  %v3355_v34 = vadd.f32 %v3354_v41, %v3019_v22  ;;  %v3021_v52 = vpop.f32.mrb[199].mxu1  ;;  %v11283_v58 = vpop.f32.mrb[184].mxu0  ;;  %v4453_v40 = vld [vmem:[%s12788_s4 + $0x70] sm:$0xff] }
 0x294   : > { %7841 = vmatpush1.bf16.msra.mxu0 %v13624_v51  ;;  %13625 = vst [vmem:[#allocation75_spill] sm:$0xff] %v11261_v42  ;;  %v4236_v61 = vrot.slane %v11183_v53, 1  ;;  %v3611_v56 = vadd.f32 %v10991_v60, %v3550_v2  ;;  %7308 = vmatprep.mubr.f32.mxu1 %v11267_v62  ;;  %v11273_v26 = vsel %vm526_vm2, %v4231_v48, %v4233_v57  ;;  %v11281_v59 = vsel %vm3891_vm3, %v11237_v5, 0.0  ;;  %v11290_v43 = vpop.f32.mrb[185].mxu0 }
 0x295   : > { %7842 = vmatprep.subr.bf16.mxu0 %v13468_v20  ;;  %13626 = vst [vmem:[#allocation77_spill] sm:$0xff] %v11273_v26  ;;  %v11276_v36 = vsel %vm653_vm0, %v4348_v6, %v4350_v21  ;;  %4642 = vmatprep.mubr.f32.mxu0 %v11273_v26  ;;  %v3551_v41 = vadd.f32 %v3355_v34, %v10844_v31  ;;  %v4352_v23 = vrot.slane %v11281_v59, 2  ;;  %v4353_v48 = vrot.slane %v11261_v42, 2  ;;  %v4454_v6 = vld [vmem:[%s12788_s4 + $0x78] sm:$0xff]  ;;  %v3024_v2 = vpop.f32.mrb[200].mxu1 }
 0x296   : > { %7309 = vmatmul.mubr.f32.gmra.mrb[20].mxu1 %v11276_v36  ;;  %v7846_v55 = vpack.c.bf16 %v4452_v45, %v4451_v25  ;;  %vm3665_vm7 = vcmp.ge.f32.partialorder %v3611_v56, 0.0  ;;  %v3719_v51 = vmul.f32 0.2, %v3611_v56  ;;  %v11299_v31 = vsel %vm526_vm2, %v4235_v27, %v4236_v61  ;;  %4643 = vmatmul.mubr.f32.gmra.mrb[226].mxu0 %v11172_v19  ;;  %v3026_v45 = vpop.f32.mrb[201].mxu1 }
 0x297   : > { %13627 = vst [vmem:[#allocation78_spill] sm:$0xff] %v11299_v31  ;;  %v4238_v57 = vrot.slane %v4127_v35, 1  ;;  %v13628_v22 = vpack.c.bf16 %v11074_v50, %v11069_v30  ;;  %v3612_v21 = vadd.f32 %v10991_v60, %v3551_v41  ;;  %v3360_v25 = vadd.f32 %v11215_v24, %v3024_v2  ;;  %v4475_v35 = vld [vmem:[%s12788_s4 + $0x120] sm:$0xff]  ;;  %v4476_v30 = vld [vmem:[%s12788_s4 + $0x128] sm:$0xff]  ;;  %4647 = vmatprep.mubr.f32.mxu0 %v11299_v31  ;;  %v11319_v24 = vpop.f32.mrb[186].mxu0 }
 0x298   : > { %v11308_v34 = vsel %vm653_vm0, %v4352_v23, %v4353_v48  ;;  %v3773_v50 = vsel %vm3665_vm7, %v3611_v56, %v3719_v51  ;;  %v7849_v27 = vpack.c.bf16 %v4454_v6, %v4453_v40  ;;  %v11326_v2 = vpop.f32.mrb[187].mxu0  ;;  %v4241_v45 = vrot.slane %v11261_v42, 1  ;;  %v4455_v40 = vld [vmem:[%s12788_s4 + $0x80] sm:$0xff] }
 0x299   : > { %7844 = vmatpush1.bf16.msra.mxu0 %v13628_v22  ;;  %7311 = vmatprep.mubr.f32.mxu1 %v11308_v34  ;;  %v11323_v52 = vsel %vm3950_vm4, %v3773_v50, 0.0  ;;  %vm3666_vm8 = vcmp.ge.f32.partialorder %v3612_v21, 0.0  ;;  %v3720_v41 = vmul.f32 0.2, %v3612_v21  ;;  %v3552_v23 = vadd.f32 %v3360_v25, %v10841_v13  ;;  %v3029_v56 = vpop.f32.mrb[202].mxu1  ;;  %v4478_v25 = vld [vmem:[%s12788_s4 + $0x138] sm:$0xff] }
 0x29a   : > { %7845 = vmatprep.subr.bf16.mxu0 %v13468_v20  ;;  %v11329_v22 = vsel %vm526_vm2, %v4236_v61, %v4238_v57  ;;  %v4355_v51 = vrot.slane %v11323_v52, 2  ;;  %v7883_v6 = vpack.c.bf16 %v4476_v30, %v4475_v35  ;;  %6477 = vmatmul.mubr.msk.f32.gmra.mrb[228].mxu0 %vm3891_vm3, %v11191_v7  ;;  %v3365_v61 = vadd.f32 %v11247_v1, %v3029_v56  ;;  %v3031_v57 = vpop.f32.mrb[203].mxu1 }
 0x29b   : > { %13629 = vst [vmem:[#allocation80_spill] sm:$0xff] %v11329_v22  ;;  %v11336_v50 = vsel %vm3666_vm8, %v3612_v21, %v3720_v41  ;;  %v3613_v13 = vadd.f32 %v10991_v60, %v3552_v23  ;;  %v4477_v21 = vld [vmem:[%s12788_s4 + $0x130] sm:$0xff]  ;;  %4652 = vmatprep.mubr.f32.mxu0 %v11329_v22  ;;  %v4240_v1 = vrot.slane %v11281_v59, 1  ;;  %v11358_v30 = vpop.f32.mrb[188].mxu0  ;;  %v4243_v59 = vrot.slane %v11323_v52, 1 }
 0x29c   : > { %13630 = vst [vmem:[#allocation4_spill] sm:$0xff] %v11336_v50  ;;  %v11355_v35 = vsel %vm653_vm0, %v4353_v48, %v4355_v51  ;;  %7884 = vmatprep.subr.bf16.mxu1 %v7883_v6  ;;  %v3553_v23 = vadd.f32 %v3365_v61, %v10855_v0  ;;  %v4131_v56 = vsel %vm3891_vm3, %v11336_v50, 0.0  ;;  %v11365_v57 = vpop.f32.mrb[189].mxu0  ;;  %v7887_v7 = vpack.c.bf16 %v4478_v25, %v4477_v21  ;;  %v4479_v0 = vld [vmem:[%s12788_s4 + $0x140] sm:$0xff]  ;;  %v4480_v61 = vld [vmem:[%s12788_s4 + $0x148] sm:$0xff] }
 0x29d   : > { %7847 = vmatpush1.bf16.msra.mxu0 %v7846_v55  ;;  %v4456_v55 = vld [vmem:[%s12788_s4 + $0x88] sm:$0xff]  ;;  %vm3667_vm9 = vcmp.ge.f32.partialorder %v3613_v13, 0.0  ;;  %v3721_v41 = vmul.f32 0.2, %v3613_v13  ;;  %7312 = vmatmul.mubr.f32.gmra.mrb[22].mxu1 %v11355_v35  ;;  %v11368_v48 = vsel %vm526_vm2, %v4240_v1, %v4241_v45  ;;  %v3034_v51 = vpop.f32.mrb[204].mxu1 }
 0x29e   : > { %7848 = vmatprep.subr.bf16.mxu0 %v13468_v20  ;;  %13631 = vst [vmem:[#allocation82_spill] sm:$0xff] %v11368_v48  ;;  %v7852_v22 = vpack.c.bf16 %v4456_v55, %v4455_v40  ;;  %7886 = vmatpush3.bf16.msra.mxu1 %v7883_v6  ;;  %v3614_v1 = vadd.f32 %v10991_v60, %v3553_v23  ;;  %v4457_v40 = vld [vmem:[%s12788_s4 + $0x90] sm:$0xff]  ;;  %v4458_v6 = vld [vmem:[%s12788_s4 + $0x98] sm:$0xff] }
 0x29f   : > { %v11377_v31 = vsel %vm3667_vm9, %v3613_v13, %v3721_v41  ;;  %4653 = vmatmul.mubr.f32.gmra.mrb[230].mxu0 %v11183_v53  ;;  %v3370_v52 = vadd.f32 %v11241_v4, %v3034_v51  ;;  %v4357_v13 = vrot.slane %v4131_v56, 2  ;;  %v11391_v21 = vpop.f32.mrb[190].mxu0  ;;  %7888 = vmatprep.subr.bf16.mxu1 %v7887_v7  ;;  %v7891_v23 = vpack.c.bf16 %v4480_v61, %v4479_v0  ;;  %v4481_v51 = vld [vmem:[%s12788_s4 + $0x150] sm:$0xff] }
 0x2a0   : > { %13632 = vst [vmem:[#allocation85_spill] sm:$0xff] %v11377_v31  ;;  %4657 = vmatprep.mubr.f32.mxu0 %v11368_v48  ;;  %v4358_v55 = vrot.slane %v11377_v31, 2  ;;  %vm3668_vm10 = vcmp.ge.f32.partialorder %v3614_v1, 0.0  ;;  %v3722_v4 = vmul.f32 0.2, %v3614_v1  ;;  %v11394_v41 = vpop.f32.mrb[191].mxu0  ;;  %v11403_v48 = vsel %vm526_vm2, %v4241_v45, %v4243_v59 }
 0x2a1   : > { %7850 = vmatpush1.bf16.msra.mxu0 %v7849_v27  ;;  %v3036_v27 = vpop.f32.mrb[205].mxu1  ;;  %v3554_v25 = vadd.f32 %v3370_v52, %v10852_v10  ;;  %13633 = vst [vmem:[#allocation3_spill] sm:$0xff] %v11403_v48  ;;  %v4246_v10 = vrot.slane %v11377_v31, 1  ;;  %v7855_v52 = vpack.c.bf16 %v4458_v6, %v4457_v40  ;;  %v4459_v59 = vld [vmem:[%s12788_s4 + $0xa0] sm:$0xff] }
 0x2a2   : > { %7851 = vmatprep.subr.bf16.mxu0 %v13468_v20  ;;  %v4482_v27 = vld [vmem:[%s12788_s4 + $0x158] sm:$0xff]  ;;  %v3039_v53 = vpop.f32.mrb[206].mxu1  ;;  %v11406_v19 = vsel %vm653_vm0, %v4357_v13, %v4358_v55  ;;  %7890 = vmatpush3.bf16.msra.mxu1 %v7887_v7  ;;  %v3776_v0 = vsel %vm3668_vm10, %v3614_v1, %v3722_v4  ;;  %v4460_v7 = vld [vmem:[%s12788_s4 + $0xa8] sm:$0xff]  ;;  %v4245_v1 = vrot.slane %v4131_v56, 1 }
 0x2a3   : > { %v3615_v61 = vadd.f32 %v10991_v60, %v3554_v25  ;;  %6478 = vmatmul.mubr.msk.f32.gmra.mrb[232].mxu0 %vm3891_vm3, %v11237_v5  ;;  %v3375_v26 = vadd.f32 %v11290_v43, %v3039_v53  ;;  %v3041_v45 = vpop.f32.mrb[207].mxu1  ;;  %7314 = vmatprep.mubr.f32.mxu1 %v11406_v19  ;;  %v11424_v40 = vpop.f32.mrb[192].mxu0  ;;  %v7895_v53 = vpack.c.bf16 %v4482_v27, %v4481_v51  ;;  %v4483_v43 = vld [vmem:[%s12788_s4 + $0x160] sm:$0xff]  ;;  %v4484_v56 = vld [vmem:[%s12788_s4 + $0x168] sm:$0xff] }
 0x2a4   : > { %4662 = vmatprep.mubr.f32.mxu0 %v11403_v48  ;;  %v11431_v25 = vpop.f32.mrb[193].mxu0  ;;  %7892 = vmatprep.subr.bf16.mxu1 %v7891_v23  ;;  %v7858_v45 = vpack.c.bf16 %v4460_v7, %v4459_v59 }
 0x2a5   : > { %7853 = vmatpush1.bf16.msra.mxu0 %v7852_v22  ;;  %v4133_v22 = vsel %vm3950_vm4, %v3776_v0, 0.0  ;;  %vm3669_vm11 = vcmp.ge.f32.partialorder %v3615_v61, 0.0  ;;  %v3723_v6 = vmul.f32 0.2, %v3615_v61  ;;  %v3555_v13 = vadd.f32 %v3375_v26, %v10866_v15  ;;  %v3044_v51 = vpop.f32.mrb[208].mxu1 }
 0x2a6   : > { %7854 = vmatprep.subr.bf16.mxu0 %v13468_v20  ;;  %v4360_v4 = vrot.slane %v4133_v22, 2  ;;  %v11437_v0 = vsel %vm526_vm2, %v4245_v1, %v4246_v10  ;;  %v4248_v27 = vrot.slane %v4133_v22, 1  ;;  %7894 = vmatpush3.bf16.msra.mxu1 %v7891_v23  ;;  %v3380_v26 = vadd.f32 %v11283_v58, %v3044_v51  ;;  %v3046_v5 = vpop.f32.mrb[209].mxu1  ;;  %v4461_v1 = vld [vmem:[%s12788_s4 + $0xb0] sm:$0xff]  ;;  %v4462_v23 = vld [vmem:[%s12788_s4 + $0xb8] sm:$0xff]  ;;  %v4464_v51 = vld [vmem:[%s12788_s4 + $0xc8] sm:$0xff] }
 0x2a7   : > { %13634 = vst [vmem:[#allocation87_spill] sm:$0xff] %v11437_v0  ;;  %v11439_v48 = vsel %vm3669_vm11, %v3615_v61, %v3723_v6  ;;  %v3616_v15 = vadd.f32 %v10991_v60, %v3555_v13  ;;  %4663 = vmatmul.mubr.f32.gmra.mrb[234].mxu0 %v11261_v42  ;;  %v11458_v58 = vpop.f32.mrb[194].mxu0  ;;  %v7899_v5 = vpack.c.bf16 %v4484_v56, %v4483_v43  ;;  %v4485_v43 = vld [vmem:[%s12788_s4 + $0x170] sm:$0xff] }
 0x2a8   : > { %13635 = vst [vmem:[#allocation88_spill] sm:$0xff] %v11439_v48  ;;  %v11445_v37 = vsel %vm653_vm0, %v4358_v55, %v4360_v4  ;;  %4667 = vmatprep.mubr.f32.mxu0 %v11437_v0  ;;  %v3556_v61 = vadd.f32 %v3380_v26, %v10863_v49  ;;  %v4134_v59 = vsel %vm3891_vm3, %v11439_v48, 0.0  ;;  %v11464_v7 = vpop.f32.mrb[195].mxu0  ;;  %7896 = vmatprep.subr.bf16.mxu1 %v7895_v53  ;;  %v4486_v49 = vld [vmem:[%s12788_s4 + $0x178] sm:$0xff] }
 0x2a9   : > { %7856 = vmatpush1.bf16.msra.mxu0 %v7855_v52  ;;  %7315 = vmatmul.mubr.f32.gmra.mrb[24].mxu1 %v11445_v37  ;;  %v11456_v52 = vsel %vm526_vm2, %v4246_v10, %v4248_v27  ;;  %vm3670_vm12 = vcmp.ge.f32.partialorder %v3616_v15, 0.0  ;;  %v3724_v55 = vmul.f32 0.2, %v3616_v15  ;;  %v3049_v22 = vpop.f32.mrb[210].mxu1  ;;  %v7861_v10 = vpack.c.bf16 %v4462_v23, %v4461_v1 }
 0x2aa   : > { %13636 = vst [vmem:[#allocation6_spill] sm:$0xff] %v11456_v52  ;;  %7857 = vmatprep.subr.bf16.mxu0 %v13468_v20  ;;  %7898 = vmatpush3.bf16.msra.mxu1 %v7895_v53  ;;  %v3617_v13 = vadd.f32 %v10991_v60, %v3556_v61  ;;  %v3385_v4 = vadd.f32 %v11326_v2, %v3049_v22  ;;  %v3051_v56 = vpop.f32.mrb[211].mxu1  ;;  %v4463_v53 = vld [vmem:[%s12788_s4 + $0xc0] sm:$0xff]  ;;  %v4250_v27 = vrot.slane %v4134_v59, 1 }
 0x2ab   : > { %v11473_v6 = vsel %vm3670_vm12, %v3616_v15, %v3724_v55  ;;  %6479 = vmatmul.mubr.msk.f32.gmra.mrb[236].mxu0 %vm3891_vm3, %v11336_v50  ;;  %v4362_v15 = vrot.slane %v4134_v59, 2  ;;  %v11490_v2 = vpop.f32.mrb[196].mxu0  ;;  %7900 = vmatprep.subr.bf16.mxu1 %v7899_v5  ;;  %v7903_v61 = vpack.c.bf16 %v4486_v49, %v4485_v43  ;;  %v7864_v59 = vpack.c.bf16 %v4464_v51, %v4463_v53  ;;  %v4465_v49 = vld [vmem:[%s12788_s4 + $0xd0] sm:$0xff] }
 0x2ac   : > { %13637 = vst [vmem:[#allocation90_spill] sm:$0xff] %v11473_v6  ;;  %4672 = vmatprep.mubr.f32.mxu0 %v11456_v52  ;;  %v4363_v26 = vrot.slane %v11473_v6, 2  ;;  %vm3671_vm13 = vcmp.ge.f32.partialorder %v3617_v13, 0.0  ;;  %v3725_v1 = vmul.f32 0.2, %v3617_v13  ;;  %v3557_v23 = vadd.f32 %v3385_v4, %v10877_v32  ;;  %v11493_v55 = vpop.f32.mrb[197].mxu0 }
 0x2ad   : > { %7859 = vmatpush1.bf16.msra.mxu0 %v7858_v45  ;;  %v4251_v45 = vrot.slane %v11473_v6, 1  ;;  %v3054_v22 = vpop.f32.mrb[212].mxu1 }
 0x2ae   : > { %7860 = vmatprep.subr.bf16.mxu0 %v13468_v20  ;;  %v11499_v52 = vsel %vm653_vm0, %v4362_v15, %v4363_v26  ;;  %7902 = vmatpush3.bf16.msra.mxu1 %v7899_v5  ;;  %v3618_v50 = vadd.f32 %v10991_v60, %v3557_v23  ;;  %v3390_v0 = vadd.f32 %v11319_v24, %v3054_v22  ;;  %v3056_v32 = vpop.f32.mrb[213].mxu1 }
 0x2af   : > { %v11496_v56 = vsel %vm526_vm2, %v4250_v27, %v4251_v45  ;;  %13639 = vst [vmem:[#allocation5_spill] sm:$0xff] %v11499_v52  ;;  %4673 = vmatmul.mubr.f32.gmra.mrb[238].mxu0 %v11377_v31  ;;  %7317 = vmatprep.mubr.f32.mxu1 %v11499_v52  ;;  %v3779_v43 = vsel %vm3671_vm13, %v3617_v13, %v3725_v1  ;;  %v11515_v4 = vpop.f32.mrb[198].mxu0 }
 0x2b0   : > { %13638 = vst [vmem:[#allocation91_spill] sm:$0xff] %v11496_v56  ;;  %4677 = vmatprep.mubr.f32.mxu0 %v11496_v56  ;;  %v4136_v5 = vsel %vm3950_vm4, %v3779_v43, 0.0  ;;  %vm3672_vm14 = vcmp.ge.f32.partialorder %v3618_v50, 0.0  ;;  %v3726_v24 = vmul.f32 0.2, %v3618_v50  ;;  %v3558_v13 = vadd.f32 %v3390_v0, %v10874_v16  ;;  %v11519_v51 = vpop.f32.mrb[199].mxu0  ;;  %7904 = vmatprep.subr.bf16.mxu1 %v7903_v61 }
 0x2b1   : > { %7862 = vmatpush1.bf16.msra.mxu0 %v7861_v10  ;;  %v4466_v10 = vld [vmem:[%s12788_s4 + $0xd8] sm:$0xff]  ;;  %v4253_v53 = vrot.slane %v4136_v5, 1  ;;  %v3059_v27 = vpop.f32.mrb[214].mxu1  ;;  %v4365_v15 = vrot.slane %v4136_v5, 2 }
 0x2b2   : > { %7863 = vmatprep.subr.bf16.mxu0 %v13468_v20  ;;  %v7867_v1 = vpack.c.bf16 %v4466_v10, %v4465_v49  ;;  %7906 = vmatpush3.bf16.msra.mxu1 %v7903_v61  ;;  %v11521_v23 = vsel %vm3672_vm14, %v3618_v50, %v3726_v24  ;;  %v3619_v22 = vadd.f32 %v10991_v60, %v3558_v13  ;;  %v3061_v16 = vpop.f32.mrb[215].mxu1  ;;  %v4468_v50 = vld [vmem:[%s12788_s4 + $0xe8] sm:$0xff]  ;;  %v4469_v24 = vld [vmem:[%s12788_s4 + $0xf0] sm:$0xff] }
 0x2b3   : > { %13640 = vst [vmem:[#allocation92_spill] sm:$0xff] %v11521_v23  ;;  %6480 = vmatmul.mubr.msk.f32.gmra.mrb[240].mxu0 %vm3891_vm3, %v11439_v48  ;;  %v3395_v32 = vadd.f32 %v11365_v57, %v3059_v27  ;;  %v11529_v0 = vsel %vm526_vm2, %v4251_v45, %v4253_v53  ;;  %v11539_v61 = vsel %vm653_vm0, %v4363_v26, %v4365_v15  ;;  %v11541_v43 = vpop.f32.mrb[200].mxu0  ;;  %v4137_v49 = vsel %vm3891_vm3, %v11521_v23, 0.0  ;;  %v4470_v15 = vld [vmem:[%s12788_s4 + $0xf8] sm:$0xff] }
 0x2b4   : > { %13641 = vst [vmem:[#allocation93_spill] sm:$0xff] %v11529_v0  ;;  %4682 = vmatprep.mubr.f32.mxu0 %v11529_v0  ;;  %13642 = vst [vmem:[#allocation12_spill] sm:$0xff] %v11539_v61  ;;  %vm3673_vm15 = vcmp.ge.f32.partialorder %v3619_v22, 0.0  ;;  %v3727_v57 = vmul.f32 0.2, %v3619_v22  ;;  %7318 = vmatmul.mubr.f32.gmra.mrb[26].mxu1 %v11539_v61  ;;  %v11549_v10 = vpop.f32.mrb[201].mxu0  ;;  %v7873_v56 = vpack.c.bf16 %v4470_v15, %v4469_v24 }
 0x2b5   : > { %7865 = vmatpush1.bf16.msra.mxu0 %v7864_v59  ;;  %v4467_v59 = vld [vmem:[%s12788_s4 + $0xe0] sm:$0xff]  ;;  %v3559_v45 = vadd.f32 %v3395_v32, %v10888_v47  ;;  %7907 = vmatprep.subr.bf16.mxu1 %v13468_v20  ;;  %v3064_v26 = vpop.f32.mrb[216].mxu1  ;;  %v4255_v32 = vrot.slane %v4137_v49, 1 }
 0x2b6   : > { %7866 = vmatprep.subr.bf16.mxu0 %v13468_v20  ;;  %v7870_v5 = vpack.c.bf16 %v4468_v50, %v4467_v59  ;;  %v11555_v13 = vsel %vm3673_vm15, %v3619_v22, %v3727_v57  ;;  %v3400_v53 = vadd.f32 %v11358_v30, %v3064_v26  ;;  %v3066_v27 = vpop.f32.mrb[217].mxu1  ;;  %v6538_v22 = vld [vmem:[%s12788_s4 + $0x408] sm:$0xff]  ;;  %v4367_v59 = vrot.slane %v4137_v49, 2 }
 0x2b7   : > { %13643 = vst [vmem:[#allocation94_spill] sm:$0xff] %v11555_v13  ;;  %v3620_v47 = vadd.f32 %v10991_v60, %v3559_v45  ;;  %4683 = vmatmul.mubr.f32.gmra.mrb[242].mxu0 %v11473_v6  ;;  %v4256_v16 = vrot.slane %v11555_v13, 1  ;;  %v4368_v30 = vrot.slane %v11555_v13, 2  ;;  %v11572_v50 = vpop.f32.mrb[202].mxu0  ;;  %v13644_v45 = vld [vmem:[#allocation34_spill] sm:$0xff] }
 0x2b8   : > { %v3560_v26 = vadd.f32 %v3400_v53, %v13644_v45  ;;  %v11575_v27 = vpop.f32.mrb[203].mxu0 }
 0x2b9   : > { %7868 = vmatpush1.bf16.msra.mxu0 %v7867_v1  ;;  %v6537_v1 = vld [vmem:[%s12788_s4 + $0x400] sm:$0xff]  ;;  %vm3674_vm1 = vcmp.ge.f32.partialorder %v3620_v47, 0.0  ;;  %v3728_v57 = vmul.f32 0.2, %v3620_v47  ;;  %v3069_v6 = vpop.f32.mrb[218].mxu1  ;;  %v11578_v0 = vsel %vm526_vm2, %v4255_v32, %v4256_v16  ;;  %v11581_v48 = vsel %vm653_vm0, %v4367_v59, %v4368_v30 }
 0x2ba   : > { %7869 = vmatprep.subr.bf16.mxu0 %v13468_v20  ;;  %13645 = vst [vmem:[#allocation95_spill] sm:$0xff] %v11578_v0  ;;  %13646 = vst [vmem:[#allocation11_spill] sm:$0xff] %v11581_v48  ;;  %v11583_v49 = vpack.c.bf16 %v6538_v22, %v6537_v1  ;;  %v3621_v31 = vadd.f32 %v10991_v60, %v3560_v26  ;;  %v3405_v42 = vadd.f32 %v11394_v41, %v3069_v6  ;;  %v3071_v61 = vpop.f32.mrb[219].mxu1  ;;  %v13647_v41 = vld [vmem:[#allocation67_spill] sm:$0xff] }
 0x2bb   : > { %4687 = vmatprep.mubr.f32.mxu0 %v11578_v0  ;;  %7320 = vmatprep.mubr.f32.mxu1 %v11581_v48  ;;  %v3782_v53 = vsel %vm3674_vm1, %v3620_v47, %v3728_v57  ;;  %v11594_v24 = vpop.f32.mrb[204].mxu0  ;;  %v13659_v48 = vld [vmem:[#allocation42_spill] sm:$0xff] }
 0x2bc   : > { %6481 = vmatmul.mubr.msk.f32.gmra.mrb[244].mxu0 %vm3891_vm3, %v11521_v23  ;;  %vm3675_vm5 = vcmp.ge.f32.partialorder %v3621_v31, 0.0  ;;  %v3729_v15 = vmul.f32 0.2, %v3621_v31  ;;  %v3561_v6 = vadd.f32 %v3405_v42, %v13647_v41  ;;  %v11598_v1 = vpop.f32.mrb[205].mxu0 }
 0x2bd   : > { %7871 = vmatpush1.bf16.msra.mxu0 %v7870_v5  ;;  %v4139_v5 = vsel %vm3950_vm4, %v3782_v53, 0.0  ;;  %v3074_v22 = vpop.f32.mrb[220].mxu1 }
 0x2be   : > { %7872 = vmatprep.subr.bf16.mxu0 %v13468_v20  ;;  %v4258_v61 = vrot.slane %v4139_v5, 1  ;;  %v4370_v47 = vrot.slane %v4139_v5, 2  ;;  %v11600_v32 = vsel %vm3675_vm5, %v3621_v31, %v3729_v15  ;;  %v3622_v59 = vadd.f32 %v10991_v60, %v3561_v6  ;;  %v3076_v45 = vpop.f32.mrb[221].mxu1 }
 0x2bf   : > { %13648 = vst [vmem:[#allocation35_spill] sm:$0xff] %v11600_v32  ;;  %v3410_v57 = vadd.f32 %v11391_v21, %v3074_v22  ;;  %v11612_v53 = vpop.f32.mrb[206].mxu0  ;;  %v4140_v60 = vsel %vm3891_vm3, %v11600_v32, 0.0 }
 0x2c0   : > { %v11605_v26 = vsel %vm526_vm2, %v4256_v16, %v4258_v61  ;;  %v11610_v42 = vsel %vm653_vm0, %v4368_v30, %v4370_v47  ;;  %vm3676_vm6 = vcmp.ge.f32.partialorder %v3622_v59, 0.0  ;;  %v3730_v31 = vmul.f32 0.2, %v3622_v59  ;;  %v11620_v21 = vpop.f32.mrb[207].mxu0  ;;  %v11627_v30 = vld [vmem:[%s12787_s3] ss:$0 sm:$0xff] }
 0x2c1   : > { %7874 = vmatpush1.bf16.msra.mxu0 %v7873_v56  ;;  %13649 = vst [vmem:[#allocation36_spill] sm:$0xff] %v11605_v26  ;;  %4692 = vmatprep.mubr.f32.mxu0 %v11605_v26  ;;  %13650 = vst [vmem:[#allocation96_spill] sm:$0xff] %v11610_v42  ;;  %v13651_v56 = vld [vmem:[#allocation37_spill] sm:$0xff]  ;;  %v3079_v16 = vpop.f32.mrb[222].mxu1  ;;  %v4260_v22 = vrot.slane %v4140_v60, 1 }
 0x2c2   : > { %7956 = vmatprep.subr.bf16.mxu0 %v11583_v49  ;;  %v3562_v5 = vadd.f32 %v3410_v57, %v13651_v56  ;;  %7321 = vmatmul.mubr.f32.gmra.mrb[28].mxu1 %v11610_v42  ;;  %v11622_v15 = vsel %vm3676_vm6, %v3622_v59, %v3730_v31  ;;  %v3415_v6 = vadd.f32 %v11431_v25, %v3079_v16  ;;  %v3081_v61 = vpop.f32.mrb[223].mxu1  ;;  %v4372_v57 = vrot.slane %v4140_v60, 2  ;;  %v13653_v31 = vld [vmem:[#allocation41_spill] sm:$0xff] }
 0x2c3   : > { %4693 = vmatmul.mubr.f32.gmra.mrb[246].mxu0 %v11555_v13  ;;  %13652 = vst [vmem:[#allocation97_spill] sm:$0xff] %v11622_v15  ;;  %v4261_v47 = vrot.slane %v11622_v15, 1  ;;  %v4373_v45 = vrot.slane %v11622_v15, 2  ;;  %v11633_v56 = vpop.f32.mrb[208].mxu0 }
 0x2c4   : > { %v3623_v41 = vadd.f32 %v11627_v30, %v3562_v5  ;;  %v3563_v13 = vadd.f32 %v3415_v6, %v13653_v31  ;;  %v11636_v26 = vpop.f32.mrb[209].mxu0 }
 0x2c5   : > { %v3084_v23 = vpop.f32.mrb[224].mxu1  ;;  %v11639_v5 = vsel %vm526_vm2, %v4260_v22, %v4261_v47  ;;  %v11642_v25 = vsel %vm653_vm0, %v4372_v57, %v4373_v45 }
 0x2c6   : > { %vm3677_vm7 = vcmp.ge.f32.partialorder %v3623_v41, 0.0  ;;  %v3731_v59 = vmul.f32 0.2, %v3623_v41  ;;  %13654 = vst [vmem:[#allocation14_spill] sm:$0xff] %v11639_v5  ;;  %13655 = vst [vmem:[#allocation38_spill] sm:$0xff] %v11642_v25  ;;  %v3624_v16 = vadd.f32 %v11627_v30, %v3563_v13  ;;  %v3420_v60 = vadd.f32 %v11424_v40, %v3084_v23  ;;  %v3086_v61 = vpop.f32.mrb[225].mxu1  ;;  %4697 = vmatprep.mubr.f32.mxu0 %v11639_v5 }
 0x2c7   : > { %7323 = vmatprep.mubr.f32.mxu1 %v11642_v25  ;;  %6482 = vmatmul.mubr.msk.f32.gmra.mrb[248].mxu0 %vm3891_vm3, %v11600_v32  ;;  %v11653_v22 = vpop.f32.mrb[210].mxu0  ;;  %v13656_v13 = vld [vmem:[#allocation39_spill] sm:$0xff] }
 0x2c8   : > { %v3785_v0 = vsel %vm3677_vm7, %v3623_v41, %v3731_v59  ;;  %vm3678_vm8 = vcmp.ge.f32.partialorder %v3624_v16, 0.0  ;;  %v3732_v57 = vmul.f32 0.2, %v3624_v16  ;;  %v3564_v31 = vadd.f32 %v3420_v60, %v13656_v13  ;;  %v11656_v23 = vpop.f32.mrb[211].mxu0 }
 0x2c9   : > { %v4142_v6 = vsel %vm3950_vm4, %v3785_v0, 0.0  ;;  %v3089_v61 = vpop.f32.mrb[226].mxu1 }
 0x2ca   : > { %v4263_v40 = vrot.slane %v4142_v6, 1  ;;  %v4375_v5 = vrot.slane %v4142_v6, 2  ;;  %v11658_v25 = vsel %vm3678_vm8, %v3624_v16, %v3732_v57  ;;  %v3625_v41 = vadd.f32 %v11627_v30, %v3564_v31  ;;  %v3091_v32 = vpop.f32.mrb[227].mxu1 }
 0x2cb   : > { %v3425_v59 = vadd.f32 %v11464_v7, %v3089_v61  ;;  %v7263_v60 = vpop.f32.mrb[212].mxu0  ;;  %v4143_v7 = vsel %vm3891_vm3, %v11658_v25, 0.0 }
 0x2cc   : > { %v11663_v0 = vsel %vm526_vm2, %v4261_v47, %v4263_v40  ;;  %v11667_v42 = vsel %vm653_vm0, %v4373_v45, %v4375_v5  ;;  %vm3679_vm9 = vcmp.ge.f32.partialorder %v3625_v41, 0.0  ;;  %v3733_v13 = vmul.f32 0.2, %v3625_v41  ;;  %v11675_v32 = vpop.f32.mrb[213].mxu0 }
 0x2cd   : > { %13657 = vst [vmem:[#allocation98_spill] sm:$0xff] %v11663_v0  ;;  %4702 = vmatprep.mubr.f32.mxu0 %v11663_v0  ;;  %13658 = vst [vmem:[#allocation99_spill] sm:$0xff] %v11667_v42  ;;  %v3565_v6 = vadd.f32 %v3425_v59, %v13659_v48  ;;  %7324 = vmatmul.mubr.f32.gmra.mrb[30].mxu1 %v11667_v42  ;;  %v3094_v47 = vpop.f32.mrb[228].mxu1  ;;  %v4265_v31 = vrot.slane %v4143_v7, 1  ;;  %v4377_v40 = vrot.slane %v4143_v7, 2 }
 0x2ce   : > { %4703 = vmatmul.mubr.f32.gmra.mrb[250].mxu0 %v11622_v15  ;;  %v11677_v16 = vsel %vm3679_vm9, %v3625_v41, %v3733_v13  ;;  %v3430_v5 = vadd.f32 %v11458_v58, %v3094_v47  ;;  %v3096_v57 = vpop.f32.mrb[229].mxu1  ;;  %v13661_v15 = vld [vmem:[#allocation71_spill] sm:$0xff] }
 0x2cf   : > { %13660 = vst [vmem:[#allocation13_spill] sm:$0xff] %v11677_v16  ;;  %v3626_v45 = vadd.f32 %v11627_v30, %v3565_v6  ;;  %v4266_v48 = vrot.slane %v11677_v16, 1  ;;  %v4378_v61 = vrot.slane %v11677_v16, 2 }
 0x2d0   : > { %v7266_v59 = vpop.f32.mrb[214].mxu0  ;;  %v3566_v0 = vadd.f32 %v3430_v5, %v13661_v15  ;;  %v13662_v5 = vld [vmem:[#allocation74_spill] sm:$0xff] }
 0x2d1   : > { %vm3680_vm10 = vcmp.ge.f32.partialorder %v3626_v45, 0.0  ;;  %v3734_v60 = vmul.f32 0.2, %v3626_v45  ;;  %v3524_v42 = vpop.f32.mrb[215].mxu0  ;;  %v3099_v52 = vpop.f32.mrb[230].mxu1  ;;  %v11685_v41 = vsel %vm526_vm2, %v4265_v31, %v4266_v48  ;;  %v11688_v13 = vsel %vm653_vm0, %v4377_v40, %v4378_v61 }
 0x2d2   : > { %v3627_v58 = vadd.f32 %v11627_v30, %v3566_v0  ;;  %v3435_v6 = vadd.f32 %v11493_v55, %v3099_v52  ;;  %v3101_v7 = vpop.f32.mrb[231].mxu1  ;;  %4707 = vmatprep.mubr.f32.mxu0 %v11685_v41  ;;  %7326 = vmatprep.mubr.f32.mxu1 %v11688_v13 }
 0x2d3   : > { %v3788_v47 = vsel %vm3680_vm10, %v3626_v45, %v3734_v60  ;;  %6483 = vmatmul.mubr.msk.f32.gmra.mrb[252].mxu0 %vm3891_vm3, %v11658_v25 }
 0x2d4   : > { %v4145_v42 = vsel %vm3950_vm4, %v3788_v47, 0.0  ;;  %vm3681_vm11 = vcmp.ge.f32.partialorder %v3627_v58, 0.0  ;;  %v3735_v15 = vmul.f32 0.2, %v3627_v58  ;;  %v3567_v57 = vadd.f32 %v3435_v6, %v13662_v5  ;;  %v13666_v47 = vld [vmem:[#allocation44_spill] sm:$0xff] }
 0x2d5   : > { %v4268_v0 = vrot.slane %v4145_v42, 1  ;;  %v3104_v31 = vpop.f32.mrb[232].mxu1  ;;  %v4380_v52 = vrot.slane %v4145_v42, 2 }
 0x2d6   : > { %v11700_v55 = vsel %vm3681_vm11, %v3627_v58, %v3735_v15  ;;  %v3628_v40 = vadd.f32 %v11627_v30, %v3567_v57  ;;  %v3440_v45 = vadd.f32 %v11490_v2, %v3104_v31  ;;  %v3106_v59 = vpop.f32.mrb[233].mxu1 }
 0x2d7   : > { %13663 = vst [vmem:[#allocation43_spill] sm:$0xff] %v11700_v55  ;;  %v11705_v60 = vsel %vm526_vm2, %v4266_v48, %v4268_v0  ;;  %v11709_v7 = vsel %vm653_vm0, %v4378_v61, %v4380_v52  ;;  %v4146_v2 = vsel %vm3891_vm3, %v11700_v55, 0.0  ;;  %v13668_v59 = vld [vmem:[#allocation48_spill] sm:$0xff] }
 0x2d8   : > { %13664 = vst [vmem:[#allocation45_spill] sm:$0xff] %v11705_v60  ;;  %4712 = vmatprep.mubr.f32.mxu0 %v11705_v60  ;;  %13665 = vst [vmem:[#allocation100_spill] sm:$0xff] %v11709_v7  ;;  %vm3682_vm12 = vcmp.ge.f32.partialorder %v3628_v40, 0.0  ;;  %v3736_v6 = vmul.f32 0.2, %v3628_v40  ;;  %v3568_v5 = vadd.f32 %v3440_v45, %v13666_v47  ;;  %7327 = vmatmul.mubr.f32.gmra.mrb[32].mxu1 %v11709_v7  ;;  %v4270_v57 = vrot.slane %v4146_v2, 1 }
 0x2d9   : > { %4713 = vmatmul.mubr.f32.gmra.mrb[254].mxu0 %v11677_v16  ;;  %v3109_v58 = vpop.f32.mrb[234].mxu1  ;;  %v4382_v31 = vrot.slane %v4146_v2, 2 }
 0x2da   : > { %v11717_v48 = vsel %vm3682_vm12, %v3628_v40, %v3736_v6  ;;  %v3629_v42 = vadd.f32 %v11627_v30, %v3568_v5  ;;  %v3445_v61 = vadd.f32 %v11519_v51, %v3109_v58  ;;  %v3111_v15 = vpop.f32.mrb[235].mxu1 }
 0x2db   : > { %13667 = vst [vmem:[#allocation101_spill] sm:$0xff] %v11717_v48  ;;  %v4271_v0 = vrot.slane %v11717_v48, 1  ;;  %v4383_v52 = vrot.slane %v11717_v48, 2  ;;  %v13670_v15 = vld [vmem:[#allocation46_spill] sm:$0xff] }
 0x2dc   : > { %vm3683_vm13 = vcmp.ge.f32.partialorder %v3629_v42, 0.0  ;;  %v3737_v45 = vmul.f32 0.2, %v3629_v42  ;;  %v3569_v47 = vadd.f32 %v3445_v61, %v13668_v59 }
 0x2dd   : > { %v3114_v16 = vpop.f32.mrb[236].mxu1  ;;  %v11725_v60 = vsel %vm526_vm2, %v4270_v57, %v4271_v0  ;;  %v11728_v40 = vsel %vm653_vm0, %v4382_v31, %v4383_v52 }
 0x2de   : > { %13669 = vst [vmem:[#allocation16_spill] sm:$0xff] %v11728_v40  ;;  %v3630_v51 = vadd.f32 %v11627_v30, %v3569_v47  ;;  %v3450_v6 = vadd.f32 %v11515_v4, %v3114_v16  ;;  %v3116_v5 = vpop.f32.mrb[237].mxu1  ;;  %4717 = vmatprep.mubr.f32.mxu0 %v11725_v60  ;;  %7329 = vmatprep.mubr.f32.mxu1 %v11728_v40 }
 0x2df   : > { %v3791_v2 = vsel %vm3683_vm13, %v3629_v42, %v3737_v45  ;;  %6484 = vmatmul.mubr.msk.f32.gmra.mrb[0].mxu0 %vm3891_vm3, %v11700_v55 }
 0x2e0   : > { %v4148_v58 = vsel %vm3950_vm4, %v3791_v2, 0.0  ;;  %vm3684_vm14 = vcmp.ge.f32.partialorder %v3630_v51, 0.0  ;;  %v3738_v61 = vmul.f32 0.2, %v3630_v51  ;;  %v3570_v57 = vadd.f32 %v3450_v6, %v13670_v15  ;;  %v13674_v15 = vld [vmem:[#allocation53_spill] sm:$0xff] }
 0x2e1   : > { %v4273_v31 = vrot.slane %v4148_v58, 1  ;;  %v3119_v59 = vpop.f32.mrb[238].mxu1  ;;  %v4385_v4 = vrot.slane %v4148_v58, 2 }
 0x2e2   : > { %v11740_v16 = vsel %vm3684_vm14, %v3630_v51, %v3738_v61  ;;  %v3631_v47 = vadd.f32 %v11627_v30, %v3570_v57  ;;  %v3455_v42 = vadd.f32 %v11549_v10, %v3119_v59  ;;  %v3121_v45 = vpop.f32.mrb[239].mxu1 }
 0x2e3   : > { %13671 = vst [vmem:[#allocation47_spill] sm:$0xff] %v11740_v16  ;;  %v11745_v5 = vsel %vm526_vm2, %v4271_v0, %v4273_v31  ;;  %v11749_v2 = vsel %vm653_vm0, %v4383_v52, %v4385_v4  ;;  %v4149_v10 = vsel %vm3891_vm3, %v11740_v16, 0.0  ;;  %v13676_v45 = vld [vmem:[#allocation51_spill] sm:$0xff] }
 0x2e4   : > { %13672 = vst [vmem:[#allocation102_spill] sm:$0xff] %v11745_v5  ;;  %4722 = vmatprep.mubr.f32.mxu0 %v11745_v5  ;;  %13673 = vst [vmem:[#allocation103_spill] sm:$0xff] %v11749_v2  ;;  %vm3685_vm15 = vcmp.ge.f32.partialorder %v3631_v47, 0.0  ;;  %v3739_v6 = vmul.f32 0.2, %v3631_v47  ;;  %v3571_v55 = vadd.f32 %v3455_v42, %v13674_v15  ;;  %7330 = vmatmul.mubr.f32.gmra.mrb[34].mxu1 %v11749_v2  ;;  %v4275_v57 = vrot.slane %v4149_v10, 1 }
 0x2e5   : > { %4723 = vmatmul.mubr.f32.gmra.mrb[2].mxu0 %v11717_v48  ;;  %v3124_v51 = vpop.f32.mrb[240].mxu1  ;;  %v4387_v59 = vrot.slane %v4149_v10, 2 }
 0x2e6   : > { %v11757_v0 = vsel %vm3685_vm15, %v3631_v47, %v3739_v6  ;;  %v3632_v58 = vadd.f32 %v11627_v30, %v3571_v55  ;;  %v3460_v52 = vadd.f32 %v11541_v43, %v3124_v51  ;;  %v3126_v61 = vpop.f32.mrb[241].mxu1 }
 0x2e7   : > { %13675 = vst [vmem:[#allocation15_spill] sm:$0xff] %v11757_v0  ;;  %v4276_v31 = vrot.slane %v11757_v0, 1  ;;  %v4388_v4 = vrot.slane %v11757_v0, 2  ;;  %v13678_v61 = vld [vmem:[#allocation54_spill] sm:$0xff] }
 0x2e8   : > { %vm3686_vm1 = vcmp.ge.f32.partialorder %v3632_v58, 0.0  ;;  %v3740_v42 = vmul.f32 0.2, %v3632_v58  ;;  %v3572_v15 = vadd.f32 %v3460_v52, %v13676_v45 }
 0x2e9   : > { %v3129_v48 = vpop.f32.mrb[242].mxu1  ;;  %v11765_v5 = vsel %vm526_vm2, %v4275_v57, %v4276_v31  ;;  %v11768_v47 = vsel %vm653_vm0, %v4387_v59, %v4388_v4 }
 0x2ea   : > { %13677 = vst [vmem:[#allocation50_spill] sm:$0xff] %v11768_v47  ;;  %v3633_v43 = vadd.f32 %v11627_v30, %v3572_v15  ;;  %v3465_v55 = vadd.f32 %v11575_v27, %v3129_v48  ;;  %v3131_v6 = vpop.f32.mrb[243].mxu1  ;;  %4727 = vmatprep.mubr.f32.mxu0 %v11765_v5  ;;  %7332 = vmatprep.mubr.f32.mxu1 %v11768_v47 }
 0x2eb   : > { %v3794_v10 = vsel %vm3686_vm1, %v3632_v58, %v3740_v42  ;;  %6485 = vmatmul.mubr.msk.f32.gmra.mrb[4].mxu0 %vm3891_vm3, %v11740_v16 }
 0x2ec   : > { %v4151_v51 = vsel %vm3950_vm4, %v3794_v10, 0.0  ;;  %vm3687_vm5 = vcmp.ge.f32.partialorder %v3633_v43, 0.0  ;;  %v3741_v52 = vmul.f32 0.2, %v3633_v43  ;;  %v3573_v57 = vadd.f32 %v3465_v55, %v13678_v61  ;;  %v13682_v61 = vld [vmem:[#allocation83_spill] sm:$0xff] }
 0x2ed   : > { %v4278_v59 = vrot.slane %v4151_v51, 1  ;;  %v3134_v45 = vpop.f32.mrb[244].mxu1  ;;  %v4390_v27 = vrot.slane %v4151_v51, 2 }
 0x2ee   : > { %v11780_v48 = vsel %vm3687_vm5, %v3633_v43, %v3741_v52  ;;  %v3634_v15 = vadd.f32 %v11627_v30, %v3573_v57  ;;  %v3470_v58 = vadd.f32 %v11572_v50, %v3134_v45  ;;  %v3136_v42 = vpop.f32.mrb[245].mxu1 }
 0x2ef   : > { %13679 = vst [vmem:[#allocation52_spill] sm:$0xff] %v11780_v48  ;;  %v11785_v6 = vsel %vm526_vm2, %v4276_v31, %v4278_v59  ;;  %v11789_v10 = vsel %vm653_vm0, %v4388_v4, %v4390_v27  ;;  %v4152_v50 = vsel %vm3891_vm3, %v11780_v48, 0.0  ;;  %v13684_v42 = vld [vmem:[#allocation7_spill] sm:$0xff] }
 0x2f0   : > { %13680 = vst [vmem:[#allocation104_spill] sm:$0xff] %v11785_v6  ;;  %4732 = vmatprep.mubr.f32.mxu0 %v11785_v6  ;;  %13681 = vst [vmem:[#allocation105_spill] sm:$0xff] %v11789_v10  ;;  %vm3688_vm6 = vcmp.ge.f32.partialorder %v3634_v15, 0.0  ;;  %v3742_v55 = vmul.f32 0.2, %v3634_v15  ;;  %v3574_v16 = vadd.f32 %v3470_v58, %v13682_v61  ;;  %7333 = vmatmul.mubr.f32.gmra.mrb[36].mxu1 %v11789_v10  ;;  %v4280_v57 = vrot.slane %v4152_v50, 1 }
 0x2f1   : > { %4733 = vmatmul.mubr.f32.gmra.mrb[6].mxu0 %v11757_v0  ;;  %v3139_v43 = vpop.f32.mrb[246].mxu1  ;;  %v4392_v45 = vrot.slane %v4152_v50, 2 }
 0x2f2   : > { %v11797_v31 = vsel %vm3688_vm6, %v3634_v15, %v3742_v55  ;;  %v3635_v51 = vadd.f32 %v11627_v30, %v3574_v16  ;;  %v3475_v4 = vadd.f32 %v11598_v1, %v3139_v43  ;;  %v3141_v52 = vpop.f32.mrb[247].mxu1 }
 0x2f3   : > { %13683 = vst [vmem:[#allocation55_spill] sm:$0xff] %v11797_v31  ;;  %v4281_v59 = vrot.slane %v11797_v31, 1  ;;  %v4393_v27 = vrot.slane %v11797_v31, 2  ;;  %v13686_v52 = vld [vmem:[#allocation56_spill] sm:$0xff] }
 0x2f4   : > { %vm3689_vm7 = vcmp.ge.f32.partialorder %v3635_v51, 0.0  ;;  %v3743_v58 = vmul.f32 0.2, %v3635_v51  ;;  %v3575_v61 = vadd.f32 %v3475_v4, %v13684_v42 }
 0x2f5   : > { %v3144_v0 = vpop.f32.mrb[248].mxu1  ;;  %v11805_v6 = vsel %vm526_vm2, %v4280_v57, %v4281_v59  ;;  %v11808_v15 = vsel %vm653_vm0, %v4392_v45, %v4393_v27 }
 0x2f6   : > { %13685 = vst [vmem:[#allocation18_spill] sm:$0xff] %v11808_v15  ;;  %v3636_v1 = vadd.f32 %v11627_v30, %v3575_v61  ;;  %v3480_v16 = vadd.f32 %v11594_v24, %v3144_v0  ;;  %v3146_v55 = vpop.f32.mrb[249].mxu1  ;;  %4737 = vmatprep.mubr.f32.mxu0 %v11805_v6  ;;  %7335 = vmatprep.mubr.f32.mxu1 %v11808_v15 }
 0x2f7   : > { %v3797_v50 = vsel %vm3689_vm7, %v3635_v51, %v3743_v58  ;;  %6486 = vmatmul.mubr.msk.f32.gmra.mrb[8].mxu0 %vm3891_vm3, %v11780_v48 }
 0x2f8   : > { %v4154_v43 = vsel %vm3950_vm4, %v3797_v50, 0.0  ;;  %vm3690_vm8 = vcmp.ge.f32.partialorder %v3636_v1, 0.0  ;;  %v3744_v4 = vmul.f32 0.2, %v3636_v1  ;;  %v3576_v57 = vadd.f32 %v3480_v16, %v13686_v52  ;;  %v13690_v52 = vld [vmem:[#allocation61_spill] sm:$0xff] }
 0x2f9   : > { %v4283_v45 = vrot.slane %v4154_v43, 1  ;;  %v3149_v42 = vpop.f32.mrb[250].mxu1  ;;  %v4395_v24 = vrot.slane %v4154_v43, 2 }
 0x2fa   : > { %v11820_v0 = vsel %vm3690_vm8, %v3636_v1, %v3744_v4  ;;  %v3637_v61 = vadd.f32 %v11627_v30, %v3576_v57  ;;  %v3485_v51 = vadd.f32 %v11620_v21, %v3149_v42  ;;  %v3151_v58 = vpop.f32.mrb[251].mxu1 }
 0x2fb   : > { %13687 = vst [vmem:[#allocation57_spill] sm:$0xff] %v11820_v0  ;;  %v11825_v55 = vsel %vm526_vm2, %v4281_v59, %v4283_v45  ;;  %v11829_v50 = vsel %vm653_vm0, %v4393_v27, %v4395_v24  ;;  %v4155_v21 = vsel %vm3891_vm3, %v11820_v0, 0.0  ;;  %v13692_v58 = vld [vmem:[#allocation58_spill] sm:$0xff] }
 0x2fc   : > { %13688 = vst [vmem:[#allocation30_spill] sm:$0xff] %v11825_v55  ;;  %4742 = vmatprep.mubr.f32.mxu0 %v11825_v55  ;;  %13689 = vst [vmem:[#allocation106_spill] sm:$0xff] %v11829_v50  ;;  %vm3691_vm9 = vcmp.ge.f32.partialorder %v3637_v61, 0.0  ;;  %v3745_v16 = vmul.f32 0.2, %v3637_v61  ;;  %v3577_v48 = vadd.f32 %v3485_v51, %v13690_v52  ;;  %7336 = vmatmul.mubr.f32.gmra.mrb[38].mxu1 %v11829_v50  ;;  %v4285_v57 = vrot.slane %v4155_v21, 1 }
 0x2fd   : > { %4743 = vmatmul.mubr.f32.gmra.mrb[10].mxu0 %v11797_v31  ;;  %v3154_v1 = vpop.f32.mrb[252].mxu1  ;;  %v4397_v42 = vrot.slane %v4155_v21, 2 }
 0x2fe   : > { %v11837_v59 = vsel %vm3691_vm9, %v3637_v61, %v3745_v16  ;;  %v3638_v43 = vadd.f32 %v11627_v30, %v3577_v48  ;;  %v3490_v27 = vadd.f32 %v11612_v53, %v3154_v1  ;;  %v3156_v4 = vpop.f32.mrb[253].mxu1 }
 0x2ff   : > { %13691 = vst [vmem:[#allocation17_spill] sm:$0xff] %v11837_v59  ;;  %v4286_v45 = vrot.slane %v11837_v59, 1  ;;  %v4398_v24 = vrot.slane %v11837_v59, 2  ;;  %v13694_v4 = vld [vmem:[#allocation8_spill] sm:$0xff] }
 0x300   : > { %vm3692_vm10 = vcmp.ge.f32.partialorder %v3638_v43, 0.0  ;;  %v3746_v51 = vmul.f32 0.2, %v3638_v43  ;;  %v3578_v52 = vadd.f32 %v3490_v27, %v13692_v58 }
 0x301   : > { %v3159_v31 = vpop.f32.mrb[254].mxu1  ;;  %v11845_v55 = vsel %vm526_vm2, %v4285_v57, %v4286_v45  ;;  %v11848_v61 = vsel %vm653_vm0, %v4397_v42, %v4398_v24 }
 0x302   : > { %13693 = vst [vmem:[#allocation60_spill] sm:$0xff] %v11848_v61  ;;  %v3639_v53 = vadd.f32 %v11627_v30, %v3578_v52  ;;  %v3495_v48 = vadd.f32 %v11636_v26, %v3159_v31  ;;  %v3161_v16 = vpop.f32.mrb[255].mxu1  ;;  %4747 = vmatprep.mubr.f32.mxu0 %v11845_v55  ;;  %7338 = vmatprep.mubr.f32.mxu1 %v11848_v61 }
 0x303   : > { %v3800_v21 = vsel %vm3692_vm10, %v3638_v43, %v3746_v51  ;;  %6487 = vmatmul.mubr.msk.f32.gmra.mrb[12].mxu0 %vm3891_vm3, %v11820_v0 }
 0x304   : > { %v4157_v1 = vsel %vm3950_vm4, %v3800_v21, 0.0  ;;  %vm3693_vm11 = vcmp.ge.f32.partialorder %v3639_v53, 0.0  ;;  %v3747_v27 = vmul.f32 0.2, %v3639_v53  ;;  %v3579_v57 = vadd.f32 %v3495_v48, %v13694_v4  ;;  %v13698_v4 = vld [vmem:[#allocation2_spill] sm:$0xff] }
 0x305   : > { %v4288_v42 = vrot.slane %v4157_v1, 1  ;;  %v3164_v58 = vpop.f32.mrb[0].mxu1  ;;  %v4400_v26 = vrot.slane %v4157_v1, 2 }
 0x306   : > { %v11860_v31 = vsel %vm3693_vm11, %v3639_v53, %v3747_v27  ;;  %v3640_v52 = vadd.f32 %v11627_v30, %v3579_v57  ;;  %v3500_v43 = vadd.f32 %v11633_v56, %v3164_v58  ;;  %v3166_v51 = vpop.f32.mrb[1].mxu1 }
 0x307   : > { %13695 = vst [vmem:[#allocation107_spill] sm:$0xff] %v11860_v31  ;;  %v11865_v16 = vsel %vm526_vm2, %v4286_v45, %v4288_v42  ;;  %v11869_v21 = vsel %vm653_vm0, %v4398_v24, %v4400_v26  ;;  %v4158_v56 = vsel %vm3891_vm3, %v11860_v31, 0.0  ;;  %v13699_v51 = vld [vmem:[#allocation63_spill] sm:$0xff] }
 0x308   : > { %13696 = vst [vmem:[#allocation108_spill] sm:$0xff] %v11865_v16  ;;  %4752 = vmatprep.mubr.f32.mxu0 %v11865_v16  ;;  %13697 = vst [vmem:[#allocation62_spill] sm:$0xff] %v11869_v21  ;;  %vm3694_vm12 = vcmp.ge.f32.partialorder %v3640_v52, 0.0  ;;  %v3748_v48 = vmul.f32 0.2, %v3640_v52  ;;  %v3580_v0 = vadd.f32 %v3500_v43, %v13698_v4  ;;  %7339 = vmatmul.mubr.f32.gmra.mrb[40].mxu1 %v11869_v21  ;;  %v4290_v57 = vrot.slane %v4158_v56, 1 }
 0x309   : > { %4753 = vmatmul.mubr.f32.gmra.mrb[14].mxu0 %v11837_v59  ;;  %v3169_v53 = vpop.f32.mrb[2].mxu1  ;;  %v4402_v58 = vrot.slane %v4158_v56, 2 }
 0x30a   : > { %v11877_v45 = vsel %vm3694_vm12, %v3640_v52, %v3748_v48  ;;  %v3641_v1 = vadd.f32 %v11627_v30, %v3580_v0  ;;  %v3505_v24 = vadd.f32 %v11656_v23, %v3169_v53  ;;  %v3171_v27 = vpop.f32.mrb[3].mxu1 }
 0x30b   : > { %v4291_v42 = vrot.slane %v11877_v45, 1  ;;  %v4403_v26 = vrot.slane %v11877_v45, 2  ;;  %v13701_v27 = vld [vmem:[#allocation9_spill] sm:$0xff] }
 0x30c   : > { %vm3695_vm13 = vcmp.ge.f32.partialorder %v3641_v1, 0.0  ;;  %v3749_v43 = vmul.f32 0.2, %v3641_v1  ;;  %v3581_v4 = vadd.f32 %v3505_v24, %v13699_v51 }
 0x30d   : > { %v3174_v59 = vpop.f32.mrb[4].mxu1  ;;  %v11885_v16 = vsel %vm526_vm2, %v4290_v57, %v4291_v42  ;;  %v11888_v52 = vsel %vm653_vm0, %v4402_v58, %v4403_v26 }
 0x30e   : > { %13700 = vst [vmem:[#allocation20_spill] sm:$0xff] %v11888_v52  ;;  %v3642_v23 = vadd.f32 %v11627_v30, %v3581_v4  ;;  %v3510_v0 = vadd.f32 %v11653_v22, %v3174_v59  ;;  %v3176_v48 = vpop.f32.mrb[5].mxu1  ;;  %4757 = vmatprep.mubr.f32.mxu0 %v11885_v16  ;;  %7341 = vmatprep.mubr.f32.mxu1 %v11888_v52 }
 0x30f   : > { %v3803_v56 = vsel %vm3695_vm13, %v3641_v1, %v3749_v43  ;;  %6488 = vmatmul.mubr.msk.f32.gmra.mrb[16].mxu0 %vm3891_vm3, %v11860_v31 }
 0x310   : > { %v4160_v53 = vsel %vm3950_vm4, %v3803_v56, 0.0  ;;  %vm3696_vm14 = vcmp.ge.f32.partialorder %v3642_v23, 0.0  ;;  %v3750_v24 = vmul.f32 0.2, %v3642_v23  ;;  %v3582_v57 = vadd.f32 %v3510_v0, %v13701_v27  ;;  %v13704_v27 = vld [vmem:[#allocation65_spill] sm:$0xff] }
 0x311   : > { %v4293_v58 = vrot.slane %v4160_v53, 1  ;;  %v3179_v51 = vpop.f32.mrb[6].mxu1  ;;  %v4405_v22 = vrot.slane %v4160_v53, 2 }
 0x312   : > { %v11900_v59 = vsel %vm3696_vm14, %v3642_v23, %v3750_v24  ;;  %v3643_v4 = vadd.f32 %v11627_v30, %v3582_v57  ;;  %v3515_v1 = vadd.f32 %v11675_v32, %v3179_v51  ;;  %v3181_v43 = vpop.f32.mrb[7].mxu1 }
 0x313   : > { %13702 = vst [vmem:[#allocation64_spill] sm:$0xff] %v11900_v59  ;;  %v11905_v48 = vsel %vm526_vm2, %v4291_v42, %v4293_v58  ;;  %v11909_v56 = vsel %vm653_vm0, %v4403_v26, %v4405_v22  ;;  %v4161_v32 = vsel %vm3891_vm3, %v11900_v59, 0.0 }
 0x314   : > { %4762 = vmatprep.mubr.f32.mxu0 %v11905_v48  ;;  %13703 = vst [vmem:[#allocation109_spill] sm:$0xff] %v11909_v56  ;;  %vm3697_vm15 = vcmp.ge.f32.partialorder %v3643_v4, 0.0  ;;  %v3751_v0 = vmul.f32 0.2, %v3643_v4  ;;  %v3583_v31 = vadd.f32 %v3515_v1, %v13704_v27  ;;  %7342 = vmatmul.mubr.f32.gmra.mrb[42].mxu1 %v11909_v56  ;;  %v4490_v26 = vrot.slane %v4161_v32, 1 }
 0x315   : > { %4763 = vmatmul.mubr.f32.gmra.mrb[18].mxu0 %v11877_v45  ;;  %v3184_v23 = vpop.f32.mrb[8].mxu1  ;;  %v4497_v58 = vrot.slane %v4161_v32, 2 }
 0x316   : > { %v11917_v42 = vsel %vm3697_vm15, %v3643_v4, %v3751_v0  ;;  %v3644_v53 = vadd.f32 %v11627_v30, %v3583_v31  ;;  %v3186_v24 = vpop.f32.mrb[9].mxu1  ;;  %v13125_v23 = vmov 0.0  }
 0x317   : > { %13705 = vst [vmem:[#allocation110_spill] sm:$0xff] %v11917_v42  ;;  %v4491_v57 = vrot.slane %v11917_v42, 1  ;;  %v4498_v51 = vrot.slane %v11917_v42, 2  ;;  %v11936_v24 = vrot.slane %v13125_v23, 2 }
 0x318   : > { %vm3698_vm1 = vcmp.ge.f32.partialorder %v3644_v53, 0.0  ;;  %v3752_v22 = vmul.f32 0.2, %v3644_v53 }
 0x319   : > { %v11923_v1 = vsel %vm526_vm2, %v4490_v26, %v4491_v57  ;;  %v11926_v43 = vsel %vm653_vm0, %v4497_v58, %v4498_v51  ;;  %v3189_v27 = vpop.f32.mrb[10].mxu1  ;;  %13708 = vst [vmem:[#allocation111_spill] sm:$0xff] %v11936_v24  ;;  %v11939_v26 = vrot.slane %v13125_v23, 1 }
 0x31a   : > { %13706 = vst [vmem:[#allocation19_spill] sm:$0xff] %v11923_v1  ;;  %13707 = vst [vmem:[#allocation69_spill] sm:$0xff] %v11926_v43  ;;  %4767 = vmatprep.mubr.f32.mxu0 %v11923_v1  ;;  %7344 = vmatprep.mubr.f32.mxu1 %v11926_v43  ;;  %v3806_v30 = vsel %vm3698_vm1, %v3644_v53, %v3752_v22  ;;  %v3191_v31 = vpop.f32.mrb[11].mxu1  ;;  %v6506_v27 = vld [vmem:[%s12788_s4 + $0x308] sm:$0xff] }
 0x31b   : > { %6489 = vmatmul.mubr.msk.f32.gmra.mrb[20].mxu0 %vm3891_vm3, %v11900_v59  ;;  %v4163_v4 = vsel %vm3950_vm4, %v3806_v30, 0.0  ;;  %13709 = vst [vmem:[#allocation112_spill] sm:$0xff] %v11939_v26  ;;  %v7908_v31 = vpack.c.bf16 %v6506_v27, %v6505_v11  ;;  %v6542_v11 = vld [vmem:[%s12788_s4 + $0x428] sm:$0xff]  ;;  %v6532_v59 = vld [vmem:[%s12788_s4 + $0x3d8] sm:$0xff] }
 0x31c   : > { %v4493_v0 = vrot.slane %v4163_v4, 1  ;;  %v4500_v32 = vrot.slane %v4163_v4, 2  ;;  %v6507_v4 = vld [vmem:[%s12788_s4 + $0x310] sm:$0xff]  ;;  %v6530_v43 = vld [vmem:[%s12788_s4 + $0x3c8] sm:$0xff] }
 0x31d   : > { %v3194_v58 = vpop.f32.mrb[12].mxu1 }
 0x31e   : > { %v11942_v53 = vsel %vm526_vm2, %v4491_v57, %v4493_v0  ;;  %v11945_v22 = vsel %vm653_vm0, %v4498_v51, %v4500_v32  ;;  %v3196_v30 = vpop.f32.mrb[13].mxu1  ;;  %v6539_v57 = vld [vmem:[%s12788_s4 + $0x410] sm:$0xff]  ;;  %v6540_v51 = vld [vmem:[%s12788_s4 + $0x418] sm:$0xff]  ;;  %v6541_v58 = vld [vmem:[%s12788_s4 + $0x420] sm:$0xff] }
 0x31f   : > { %13710 = vst [vmem:[#allocation22_spill] sm:$0xff] %v11942_v53  ;;  %13711 = vst [vmem:[#allocation72_spill] sm:$0xff] %v11945_v22  ;;  %4772 = vmatprep.mubr.f32.mxu0 %v11942_v53  ;;  %7345 = vmatmul.mubr.f32.gmra.mrb[44].mxu1 %v11945_v22  ;;  %v6508_v0 = vld [vmem:[%s12788_s4 + $0x318] sm:$0xff]  ;;  %v7959_v32 = vpack.c.bf16 %v6540_v51, %v6539_v57  ;;  %v6510_v30 = vld [vmem:[%s12788_s4 + $0x328] sm:$0xff]  ;;  %v7963_v57 = vpack.c.bf16 %v6542_v11, %v6541_v58 }
 0x320   : > { %4773 = vmatmul.mubr.f32.gmra.mrb[22].mxu0 %v11917_v42  ;;  %7379 = vmatprep.mubr.f32.mxu1 %v11936_v24  ;;  %v7911_v27 = vpack.c.bf16 %v6508_v0, %v6507_v4  ;;  %v6544_v51 = vld [vmem:[%s12788_s4 + $0x438] sm:$0xff]  ;;  %v6546_v58 = vld [vmem:[%s12788_s4 + $0x448] sm:$0xff]  ;;  %v6531_v53 = vld [vmem:[%s12788_s4 + $0x3d0] sm:$0xff] }
 0x321   : > { %5067 = vmatprep.mubr.f32.mxu0 %v11939_v26  ;;  %v6512_v4 = vld [vmem:[%s12788_s4 + $0x338] sm:$0xff]  ;;  %v6514_v11 = vld [vmem:[%s12788_s4 + $0x348] sm:$0xff] }
 0x322   : > { %v6528_v22 = vld [vmem:[%s12788_s4 + $0x3b8] sm:$0xff]  ;;  %v13728_v42 = vld [vmem:[#allocation75_spill] sm:$0xff] }
 0x323   : > { %7380 = vmatmul.mubr.f32.vlgmr.msra.gmra.mrb[46].mxu1 %v11936_v24  ;;  %v13724_v24 = vld [vmem:[#allocation68_spill] sm:$0xff] }
 0x324   : > { %5068 = vmatmul.mubr.f32.vlgmr.msra.gmra.mrb[24].mxu0 %v13125_v23  ;;  %7382 = vmatprep.mubr.f32.mxu1 %v11131_v46  ;;  %v6509_v46 = vld [vmem:[%s12788_s4 + $0x320] sm:$0xff] }
 0x325   : > { %7909 = vmatpush1.bf16.msra.mxu1 %v7908_v31  ;;  %7958 = vmatpush3.bf16.msra.mxu0 %v11583_v49  ;;  %v6543_v49 = vld [vmem:[%s12788_s4 + $0x430] sm:$0xff]  ;;  %v7914_v31 = vpack.c.bf16 %v6510_v30, %v6509_v46  ;;  %v6548_v46 = vld [vmem:[%s12788_s4 + $0x458] sm:$0xff] }
 0x326   : > { %5072 = vmatprep.mubr.f32.mxu0 %v11939_v26  ;;  %7910 = vmatprep.subr.bf16.mxu1 %v13468_v20  ;;  %v7967_v0 = vpack.c.bf16 %v6544_v51, %v6543_v49  ;;  %v6549_v51 = vld [vmem:[%s12788_s4 + $0x460] sm:$0xff]  ;;  %v13726_v26 = vld [vmem:[#allocation73_spill] sm:$0xff] }
 0x327   : > { %7383 = vmatmul.mubr.f32.gmra.mrb[48].mxu1 %v11135_v63  ;;  %7960 = vmatprep.subr.bf16.mxu0 %v7959_v32  ;;  %v6511_v63 = vld [vmem:[%s12788_s4 + $0x330] sm:$0xff] }
 0x328   : > { %5073 = vmatmul.mubr.f32.gmra.mrb[26].mxu0 %v13125_v23  ;;  %7385 = vmatprep.mubr.f32.mxu1 %v11178_v8  ;;  %v13723_v23 = vld [vmem:[#allocation99_spill] sm:$0xff] }
 0x329   : > { %7912 = vmatpush1.bf16.msra.mxu1 %v7911_v27  ;;  %5077 = vmatprep.mubr.f32.mxu0 %v11126_v28  ;;  %v6545_v28 = vld [vmem:[%s12788_s4 + $0x440] sm:$0xff] }
 0x32a   : > { %7913 = vmatprep.subr.bf16.mxu1 %v13468_v20  ;;  %7962 = vmatpush3.bf16.msra.mxu0 %v7959_v32  ;;  %v7917_v32 = vpack.c.bf16 %v6512_v4, %v6511_v63  ;;  %v7971_v27 = vpack.c.bf16 %v6546_v58, %v6545_v28  ;;  %v6517_v4 = vld [vmem:[%s12788_s4 + $0x360] sm:$0xff]  ;;  %v6551_v58 = vld [vmem:[%s12788_s4 + $0x470] sm:$0xff] }
 0x32b   : > { %7386 = vmatmul.mubr.f32.gmra.mrb[50].mxu1 %v11204_v14  ;;  %7964 = vmatprep.subr.bf16.mxu0 %v7963_v57 }
 0x32c   : > { %6490 = vmatmul.mubr.msk.f32.gmra.mrb[28].mxu0 %vm3891_vm3, %v11084_v17  ;;  %7388 = vmatprep.mubr.f32.mxu1 %v11228_v12  ;;  %v6513_v17 = vld [vmem:[%s12788_s4 + $0x340] sm:$0xff] }
 0x32d   : > { %7915 = vmatpush1.bf16.msra.mxu1 %v7914_v31  ;;  %5082 = vmatprep.mubr.f32.mxu0 %v11159_v33  ;;  %v6547_v33 = vld [vmem:[%s12788_s4 + $0x450] sm:$0xff]  ;;  %v7920_v30 = vpack.c.bf16 %v6514_v11, %v6513_v17  ;;  %v6550_v31 = vld [vmem:[%s12788_s4 + $0x468] sm:$0xff] }
 0x32e   : > { %7916 = vmatprep.subr.bf16.mxu1 %v13468_v20  ;;  %7966 = vmatpush3.bf16.msra.mxu0 %v7963_v57  ;;  %v6516_v57 = vld [vmem:[%s12788_s4 + $0x358] sm:$0xff]  ;;  %v7975_v49 = vpack.c.bf16 %v6548_v46, %v6547_v33  ;;  %v7979_v28 = vpack.c.bf16 %v6550_v31, %v6549_v51  ;;  %v6519_v11 = vld [vmem:[%s12788_s4 + $0x370] sm:$0xff]  ;;  %v13712_v46 = vld [vmem:[#allocation10_spill] sm:$0xff] }
 0x32f   : > { %7389 = vmatmul.mubr.f32.gmra.mrb[52].mxu1 %v11232_v9  ;;  %7968 = vmatprep.subr.bf16.mxu0 %v7967_v0  ;;  %v6522_v51 = vld [vmem:[%s12788_s4 + $0x388] sm:$0xff]  ;;  %v13715_v31 = vld [vmem:[#allocation12_spill] sm:$0xff] }
 0x330   : > { %5083 = vmatmul.mubr.f32.gmra.mrb[30].mxu0 %v11110_v44  ;;  %7391 = vmatprep.mubr.f32.mxu1 %v11267_v62  ;;  %v6515_v44 = vld [vmem:[%s12788_s4 + $0x350] sm:$0xff] }
 0x331   : > { %7918 = vmatpush1.bf16.msra.mxu1 %v7917_v32  ;;  %5087 = vmatprep.mubr.f32.mxu0 %v11186_v39  ;;  %v7923_v63 = vpack.c.bf16 %v6516_v57, %v6515_v44  ;;  %v6552_v32 = vld [vmem:[%s12788_s4 + $0x478] sm:$0xff] }
 0x332   : > { %7919 = vmatprep.subr.bf16.mxu1 %v13468_v20  ;;  %7970 = vmatpush3.bf16.msra.mxu0 %v7967_v0  ;;  %v6518_v0 = vld [vmem:[%s12788_s4 + $0x368] sm:$0xff]  ;;  %v7983_v33 = vpack.c.bf16 %v6552_v32, %v6551_v58  ;;  %v13714_v44 = vld [vmem:[#allocation77_spill] sm:$0xff]  ;;  %v6523_v32 = vld [vmem:[%s12788_s4 + $0x390] sm:$0xff] }
 0x333   : > { %7392 = vmatmul.mubr.f32.gmra.mrb[54].mxu1 %v11276_v36  ;;  %7972 = vmatprep.subr.bf16.mxu0 %v7971_v27  ;;  %v7926_v17 = vpack.c.bf16 %v6518_v0, %v6517_v4  ;;  %v13717_v4 = vld [vmem:[#allocation11_spill] sm:$0xff]  ;;  %v13718_v0 = vld [vmem:[#allocation78_spill] sm:$0xff] }
 0x334   : > { %6491 = vmatmul.mubr.msk.f32.gmra.mrb[32].mxu0 %vm3891_vm3, %v11121_v29  ;;  %7394 = vmatprep.mubr.f32.mxu1 %v11308_v34 }
 0x335   : > { %7921 = vmatpush1.bf16.msra.mxu1 %v7920_v30  ;;  %5092 = vmatprep.mubr.f32.mxu0 %v11207_v18  ;;  %v13713_v30 = vld [vmem:[#allocation5_spill] sm:$0xff] }
 0x336   : > { %7922 = vmatprep.subr.bf16.mxu1 %v13468_v20  ;;  %7974 = vmatpush3.bf16.msra.mxu0 %v7971_v27  ;;  %v6520_v27 = vld [vmem:[%s12788_s4 + $0x378] sm:$0xff] }
 0x337   : > { %7395 = vmatmul.mubr.f32.gmra.mrb[56].mxu1 %v11355_v35  ;;  %7976 = vmatprep.subr.bf16.mxu0 %v7975_v49  ;;  %v7929_v57 = vpack.c.bf16 %v6520_v27, %v6519_v11  ;;  %v13720_v11 = vld [vmem:[#allocation70_spill] sm:$0xff] }
 0x338   : > { %5093 = vmatmul.mubr.f32.gmra.mrb[34].mxu0 %v11117_v54  ;;  %7397 = vmatprep.mubr.f32.mxu1 %v11406_v19  ;;  %v13721_v27 = vld [vmem:[#allocation38_spill] sm:$0xff] }
 0x339   : > { %7924 = vmatpush1.bf16.msra.mxu1 %v7923_v63  ;;  %5097 = vmatprep.mubr.f32.mxu0 %v11235_v38  ;;  %v13716_v63 = vld [vmem:[#allocation66_spill] sm:$0xff] }
 0x33a   : > { %7925 = vmatprep.subr.bf16.mxu1 %v13468_v20  ;;  %7978 = vmatpush3.bf16.msra.mxu0 %v7975_v49  ;;  %v6521_v49 = vld [vmem:[%s12788_s4 + $0x380] sm:$0xff] }
 0x33b   : > { %7398 = vmatmul.mubr.f32.gmra.mrb[58].mxu1 %v11445_v37  ;;  %7980 = vmatprep.subr.bf16.mxu0 %v7979_v28  ;;  %v7932_v58 = vpack.c.bf16 %v6522_v51, %v6521_v49  ;;  %v6525_v51 = vld [vmem:[%s12788_s4 + $0x3a0] sm:$0xff] }
 0x33c   : > { %6492 = vmatmul.mubr.msk.f32.gmra.mrb[36].mxu0 %vm3891_vm3, %v13712_v46  ;;  %7400 = vmatprep.mubr.f32.mxu1 %v13713_v30 }
 0x33d   : > { %7927 = vmatpush1.bf16.msra.mxu1 %v7926_v17  ;;  %5102 = vmatprep.mubr.f32.mxu0 %v13714_v44  ;;  %v13719_v17 = vld [vmem:[#allocation96_spill] sm:$0xff] }
 0x33e   : > { %7928 = vmatprep.subr.bf16.mxu1 %v13468_v20  ;;  %7982 = vmatpush3.bf16.msra.mxu0 %v7979_v28  ;;  %v6524_v28 = vld [vmem:[%s12788_s4 + $0x398] sm:$0xff] }
 0x33f   : > { %7401 = vmatmul.mubr.f32.gmra.mrb[60].mxu1 %v13715_v31  ;;  %7984 = vmatprep.subr.bf16.mxu0 %v7983_v33  ;;  %v7935_v49 = vpack.c.bf16 %v6524_v28, %v6523_v32  ;;  %v6527_v28 = vld [vmem:[%s12788_s4 + $0x3b0] sm:$0xff] }
 0x340   : > { %5103 = vmatmul.mubr.f32.gmra.mrb[38].mxu0 %v13716_v63  ;;  %7403 = vmatprep.mubr.f32.mxu1 %v13717_v4 }
 0x341   : > { %7930 = vmatpush1.bf16.msra.mxu1 %v7929_v57  ;;  %5107 = vmatprep.mubr.f32.mxu0 %v13718_v0  ;;  %v13722_v57 = vld [vmem:[#allocation80_spill] sm:$0xff] }
 0x342   : > { %7931 = vmatprep.subr.bf16.mxu1 %v13468_v20  ;;  %7986 = vmatpush3.bf16.msra.mxu0 %v7983_v33  ;;  %v6526_v33 = vld [vmem:[%s12788_s4 + $0x3a8] sm:$0xff] }
 0x343   : > { %7404 = vmatmul.mubr.f32.gmra.mrb[62].mxu1 %v13719_v17  ;;  %v7938_v32 = vpack.c.bf16 %v6526_v33, %v6525_v51  ;;  %v7941_v51 = vpack.c.bf16 %v6528_v22, %v6527_v28  ;;  %v6529_v33 = vld [vmem:[%s12788_s4 + $0x3c0] sm:$0xff] }
 0x344   : > { %6493 = vmatmul.mubr.msk.f32.gmra.mrb[40].mxu0 %vm3891_vm3, %v13720_v11  ;;  %7406 = vmatprep.mubr.f32.mxu1 %v13721_v27  ;;  %v7944_v22 = vpack.c.bf16 %v6530_v43, %v6529_v33  ;;  %v13732_v33 = vld [vmem:[#allocation6_spill] sm:$0xff] }
 0x345   : > { %7933 = vmatpush1.bf16.msra.mxu1 %v7932_v58  ;;  %5112 = vmatprep.mubr.f32.mxu0 %v13722_v57  ;;  %v13725_v58 = vld [vmem:[#allocation82_spill] sm:$0xff] }
 0x346   : > { %7934 = vmatprep.subr.bf16.mxu1 %v13468_v20 }
 0x347   : > { %7407 = vmatmul.mubr.f32.gmra.mrb[64].mxu1 %v13723_v23 }
 0x348   : > { %5113 = vmatmul.mubr.f32.gmra.mrb[42].mxu0 %v13724_v24  ;;  %7409 = vmatprep.mubr.f32.mxu1 %v11688_v13 }
 0x349   : > { %7936 = vmatpush1.bf16.msra.mxu1 %v7935_v49  ;;  %5117 = vmatprep.mubr.f32.mxu0 %v13725_v58  ;;  %v13727_v49 = vld [vmem:[#allocation3_spill] sm:$0xff] }
 0x34a   : > { %7937 = vmatprep.subr.bf16.mxu1 %v13468_v20 }
 0x34b   : > { %7410 = vmatmul.mubr.f32.gmra.mrb[66].mxu1 %v11709_v7 }
 0x34c   : > { %6494 = vmatmul.mubr.msk.f32.gmra.mrb[44].mxu0 %vm3891_vm3, %v13726_v26  ;;  %7412 = vmatprep.mubr.f32.mxu1 %v11728_v40  ;;  %v7947_v40 = vpack.c.bf16 %v6532_v59, %v6531_v53  ;;  %v13735_v53 = vld [vmem:[#allocation91_spill] sm:$0xff] }
 0x34d   : > { %7939 = vmatpush1.bf16.msra.mxu1 %v7938_v32  ;;  %5122 = vmatprep.mubr.f32.mxu0 %v13727_v49  ;;  %v13729_v32 = vld [vmem:[#allocation87_spill] sm:$0xff] }
 0x34e   : > { %7940 = vmatprep.subr.bf16.mxu1 %v13468_v20 }
 0x34f   : > { %7413 = vmatmul.mubr.f32.gmra.mrb[68].mxu1 %v11749_v2 }
 0x350   : > { %5123 = vmatmul.mubr.f32.gmra.mrb[46].mxu0 %v13728_v42  ;;  %7415 = vmatprep.mubr.f32.mxu1 %v11768_v47 }
 0x351   : > { %7942 = vmatpush1.bf16.msra.mxu1 %v7941_v51  ;;  %5127 = vmatprep.mubr.f32.mxu0 %v13729_v32  ;;  %v13730_v51 = vld [vmem:[#allocation4_spill] sm:$0xff] }
 0x352   : > { %v4619_v28 = vpop.f32.mrb[216].mxu0  ;;  %7943 = vmatprep.subr.bf16.mxu1 %v13468_v20 }
 0x353   : > { %v7301_v1 = vpop.f32.mrb[14].mxu1  ;;  %v4621_v2 = vpop.f32.mrb[217].mxu0  ;;  %7416 = vmatmul.mubr.f32.gmra.mrb[70].mxu1 %v11789_v10  ;;  %v6534_v10 = vld [vmem:[%s12788_s4 + $0x3e8] sm:$0xff] }
 0x354   : > { %v4844_v47 = vpop.f32.mrb[15].mxu1  ;;  %6495 = vmatmul.mubr.msk.f32.gmra.mrb[48].mxu0 %vm3891_vm3, %v13730_v51  ;;  %7418 = vmatprep.mubr.f32.mxu1 %v11808_v15  ;;  %v6533_v2 = vld [vmem:[%s12788_s4 + $0x3e0] sm:$0xff]  ;;  %v13733_v15 = vld [vmem:[#allocation85_spill] sm:$0xff] }
 0x355   : > { %v12154_v43 = vadd.f32 %v4844_v47, %v4619_v28  ;;  %7945 = vmatpush1.bf16.msra.mxu1 %v7944_v22  ;;  %5132 = vmatprep.mubr.f32.mxu0 %v13732_v33  ;;  %v7950_v22 = vpack.c.bf16 %v6534_v10, %v6533_v2  ;;  %v6535_v28 = vld [vmem:[%s12788_s4 + $0x3f0] sm:$0xff] }
 0x356   : > { %7946 = vmatprep.subr.bf16.mxu1 %v13468_v20 }
 0x357   : > { %13731 = vst [vmem:[#allocation113_spill] sm:$0xff] %v12154_v43  ;;  %7419 = vmatmul.mubr.f32.gmra.mrb[72].mxu1 %v11829_v50  ;;  %v6536_v43 = vld [vmem:[%s12788_s4 + $0x3f8] sm:$0xff] }
 0x358   : > { %v4624_v7 = vpop.f32.mrb[218].mxu0  ;;  %5133 = vmatmul.mubr.f32.gmra.mrb[50].mxu0 %v13733_v15  ;;  %7421 = vmatprep.mubr.f32.mxu1 %v11848_v61  ;;  %v13736_v61 = vld [vmem:[#allocation88_spill] sm:$0xff]  ;;  %v7953_v10 = vpack.c.bf16 %v6536_v43, %v6535_v28 }
 0x359   : > { %v12167_v47 = vadd.f32 %v7301_v1, %v4624_v7  ;;  %v4626_v59 = vpop.f32.mrb[219].mxu0  ;;  %7948 = vmatpush1.bf16.msra.mxu1 %v7947_v40  ;;  %5137 = vmatprep.mubr.f32.mxu0 %v13735_v53  ;;  %v13737_v40 = vld [vmem:[#allocation93_spill] sm:$0xff] }
 0x35a   : > { %7949 = vmatprep.subr.bf16.mxu1 %v13468_v20 }
 0x35b   : > { %13734 = vst [vmem:[#allocation114_spill] sm:$0xff] %v12167_v47  ;;  %7422 = vmatmul.mubr.f32.gmra.mrb[74].mxu1 %v11869_v21  ;;  %v13739_v21 = vld [vmem:[#allocation90_spill] sm:$0xff] }
 0x35c   : > { %6496 = vmatmul.mubr.msk.f32.gmra.mrb[52].mxu0 %vm3891_vm3, %v13736_v61  ;;  %7424 = vmatprep.mubr.f32.mxu1 %v11888_v52  ;;  %v13740_v52 = vld [vmem:[#allocation95_spill] sm:$0xff] }
 0x35d   : > { %v4629_v7 = vpop.f32.mrb[220].mxu0  ;;  %7951 = vmatpush1.bf16.msra.mxu1 %v7950_v22  ;;  %5142 = vmatprep.mubr.f32.mxu0 %v13737_v40 }
 0x35e   : > { %v4631_v2 = vpop.f32.mrb[221].mxu0  ;;  %7952 = vmatprep.subr.bf16.mxu1 %v13468_v20  ;;  %v13742_v20 = vld [vmem:[#allocation92_spill] sm:$0xff] }
 0x35f   : > { %v7304_v1 = vpop.f32.mrb[16].mxu1  ;;  %7425 = vmatmul.mubr.f32.gmra.mrb[76].mxu1 %v11909_v56 }
 0x360   : > { %v4854_v59 = vpop.f32.mrb[17].mxu1  ;;  %5143 = vmatmul.mubr.f32.gmra.mrb[54].mxu0 %v13739_v21  ;;  %5583 = vmatprep.mubr.f32.mxu1 %v11186_v39  ;;  %v13743_v39 = vld [vmem:[#allocation36_spill] sm:$0xff] }
 0x361   : > { %v12185_v47 = vadd.f32 %v4854_v59, %v4629_v7  ;;  %v4634_v50 = vpop.f32.mrb[222].mxu0  ;;  %7954 = vmatpush1.bf16.msra.mxu1 %v7953_v10  ;;  %5147 = vmatprep.mubr.f32.mxu0 %v13740_v52 }
 0x362   : > { %v12190_v22 = vadd.f32 %v7304_v1, %v4634_v50  ;;  %v4636_v43 = vpop.f32.mrb[223].mxu0 }
 0x363   : > { %13738 = vst [vmem:[#allocation21_spill] sm:$0xff] %v12185_v47  ;;  %v13744_v43 = vld [vmem:[#allocation94_spill] sm:$0xff] }
 0x364   : > { %13741 = vst [vmem:[#allocation76_spill] sm:$0xff] %v12190_v22  ;;  %v7307_v28 = vpop.f32.mrb[18].mxu1  ;;  %6553 = vmatmul.mubr.msk.f32.vlgmr.msra.gmra.mrb[78].mxu1 %vm3891_vm3, %v11121_v29  ;;  %6497 = vmatmul.mubr.msk.f32.gmra.mrb[56].mxu0 %vm3891_vm3, %v13742_v20  ;;  %v13745_v29 = vld [vmem:[#allocation14_spill] sm:$0xff] }
 0x365   : > { %v4864_v2 = vpop.f32.mrb[19].mxu1  ;;  %v4639_v7 = vpop.f32.mrb[224].mxu0  ;;  %5588 = vmatprep.mubr.f32.mxu1 %v11207_v18  ;;  %5152 = vmatprep.mubr.f32.mxu0 %v13743_v39  ;;  %v13747_v18 = vld [vmem:[#allocation35_spill] sm:$0xff] }
 0x366   : > { %v12200_v10 = vadd.f32 %v4864_v2, %v4639_v7  ;;  %v4641_v50 = vpop.f32.mrb[225].mxu0 }
 0x368   : > { %5589 = vmatmul.mubr.f32.gmra.mrb[80].mxu1 %v11117_v54  ;;  %5153 = vmatmul.mubr.f32.gmra.mrb[58].mxu0 %v13744_v43  ;;  %v13748_v54 = vld [vmem:[#allocation98_spill] sm:$0xff] }
 0x369   : > { %v7310_v1 = vpop.f32.mrb[20].mxu1  ;;  %v4644_v22 = vpop.f32.mrb[226].mxu0  ;;  %5593 = vmatprep.mubr.f32.mxu1 %v11235_v38  ;;  %5157 = vmatprep.mubr.f32.mxu0 %v13745_v29 }
 0x36a   : > { %v4874_v59 = vpop.f32.mrb[21].mxu1  ;;  %v12206_v47 = vadd.f32 %v7307_v28, %v4644_v22  ;;  %v4646_v56 = vpop.f32.mrb[227].mxu0 }
 0x36b   : > { %v13749_v56 = vld [vmem:[#allocation97_spill] sm:$0xff] }
 0x36c   : > { %13746 = vst [vmem:[#allocation115_spill] sm:$0xff] %v12206_v47  ;;  %6554 = vmatmul.mubr.msk.f32.gmra.mrb[82].mxu1 %vm3891_vm3, %v13712_v46  ;;  %6498 = vmatmul.mubr.msk.f32.gmra.mrb[60].mxu0 %vm3891_vm3, %v13747_v18 }
 0x36d   : > { %v4649_v2 = vpop.f32.mrb[228].mxu0  ;;  %5598 = vmatprep.mubr.f32.mxu1 %v13714_v44  ;;  %5162 = vmatprep.mubr.f32.mxu0 %v13748_v54 }
 0x36e   : > { %v12216_v7 = vadd.f32 %v4874_v59, %v4649_v2  ;;  %v4651_v38 = vpop.f32.mrb[229].mxu0 }
 0x370   : > { %v7313_v50 = vpop.f32.mrb[22].mxu1  ;;  %5599 = vmatmul.mubr.f32.gmra.mrb[84].mxu1 %v13716_v63  ;;  %5163 = vmatmul.mubr.f32.gmra.mrb[62].mxu0 %v13749_v56  ;;  %v13750_v63 = vld [vmem:[#allocation45_spill] sm:$0xff] }
 0x371   : > { %v4884_v22 = vpop.f32.mrb[23].mxu1  ;;  %5603 = vmatprep.mubr.f32.mxu1 %v13718_v0  ;;  %5167 = vmatprep.mubr.f32.mxu0 %v11685_v41 }
 0x372   : > { %v4654_v28 = vpop.f32.mrb[230].mxu0 }
 0x373   : > { %v12222_v46 = vadd.f32 %v7310_v1, %v4654_v28  ;;  %v4656_v47 = vpop.f32.mrb[231].mxu0  ;;  %v13751_v1 = vld [vmem:[#allocation13_spill] sm:$0xff] }
 0x374   : > { %6555 = vmatmul.mubr.msk.f32.gmra.mrb[86].mxu1 %vm3891_vm3, %v13720_v11  ;;  %6499 = vmatmul.mubr.msk.f32.gmra.mrb[64].mxu0 %vm3891_vm3, %v11658_v25 }
 0x375   : > { %5608 = vmatprep.mubr.f32.mxu1 %v13722_v57  ;;  %5172 = vmatprep.mubr.f32.mxu0 %v13750_v63  ;;  %v13752_v57 = vld [vmem:[#allocation43_spill] sm:$0xff] }
 0x376   : > { %v4659_v44 = vpop.f32.mrb[232].mxu0 }
 0x377   : > { %v12232_v59 = vadd.f32 %v4884_v22, %v4659_v44  ;;  %v4661_v0 = vpop.f32.mrb[233].mxu0  ;;  %v13753_v22 = vld [vmem:[#allocation102_spill] sm:$0xff] }
 0x378   : > { %5609 = vmatmul.mubr.f32.gmra.mrb[88].mxu1 %v13724_v24  ;;  %5173 = vmatmul.mubr.f32.gmra.mrb[66].mxu0 %v13751_v1 }
 0x379   : > { %5613 = vmatprep.mubr.f32.mxu1 %v13725_v58  ;;  %5177 = vmatprep.mubr.f32.mxu0 %v11725_v60 }
 0x37a   : > { %v4664_v47 = vpop.f32.mrb[234].mxu0 }
 0x37b   : > { %v12238_v11 = vadd.f32 %v7313_v50, %v4664_v47  ;;  %v4666_v2 = vpop.f32.mrb[235].mxu0  ;;  %v13754_v50 = vld [vmem:[#allocation101_spill] sm:$0xff] }
 0x37c   : > { %v7316_v38 = vpop.f32.mrb[24].mxu1  ;;  %6556 = vmatmul.mubr.msk.f32.gmra.mrb[90].mxu1 %vm3891_vm3, %v13726_v26  ;;  %6500 = vmatmul.mubr.msk.f32.gmra.mrb[68].mxu0 %vm3891_vm3, %v13752_v57 }
 0x37d   : > { %v4894_v28 = vpop.f32.mrb[25].mxu1  ;;  %5618 = vmatprep.mubr.f32.mxu1 %v13727_v49  ;;  %5182 = vmatprep.mubr.f32.mxu0 %v13753_v22  ;;  %v13755_v49 = vld [vmem:[#allocation47_spill] sm:$0xff] }
 0x37e   : > { %v4669_v24 = vpop.f32.mrb[236].mxu0 }
 0x37f   : > { %v4671_v58 = vpop.f32.mrb[237].mxu0  ;;  %v12248_v44 = vadd.f32 %v4894_v28, %v4669_v24 }
 0x380   : > { %5619 = vmatmul.mubr.f32.gmra.mrb[92].mxu1 %v13728_v42  ;;  %5183 = vmatmul.mubr.f32.gmra.mrb[70].mxu0 %v13754_v50  ;;  %v13756_v42 = vld [vmem:[#allocation104_spill] sm:$0xff] }
 0x381   : > { %5623 = vmatprep.mubr.f32.mxu1 %v13729_v32  ;;  %5187 = vmatprep.mubr.f32.mxu0 %v11765_v5 }
 0x382   : > { %v4674_v0 = vpop.f32.mrb[238].mxu0 }
 0x383   : > { %v12254_v26 = vadd.f32 %v7316_v38, %v4674_v0  ;;  %v4676_v47 = vpop.f32.mrb[239].mxu0  ;;  %v13757_v38 = vld [vmem:[#allocation15_spill] sm:$0xff] }
 0x384   : > { %6557 = vmatmul.mubr.msk.f32.gmra.mrb[94].mxu1 %vm3891_vm3, %v13730_v51  ;;  %6501 = vmatmul.mubr.msk.f32.gmra.mrb[72].mxu0 %vm3891_vm3, %v13755_v49 }
 0x385   : > { %5628 = vmatprep.mubr.f32.mxu1 %v13732_v33  ;;  %5192 = vmatprep.mubr.f32.mxu0 %v13756_v42  ;;  %v13758_v33 = vld [vmem:[#allocation52_spill] sm:$0xff] }
 0x386   : > { %v4679_v2 = vpop.f32.mrb[240].mxu0 }
 0x387   : > { %v4681_v28 = vpop.f32.mrb[241].mxu0  ;;  %v7319_v32 = vpop.f32.mrb[26].mxu1 }
 0x388   : > { %v4904_v24 = vpop.f32.mrb[27].mxu1  ;;  %5629 = vmatmul.mubr.f32.gmra.mrb[96].mxu1 %v13733_v15  ;;  %5193 = vmatmul.mubr.f32.gmra.mrb[74].mxu0 %v13757_v38  ;;  %v13759_v15 = vld [vmem:[#allocation30_spill] sm:$0xff] }
 0x389   : > { %v12266_v0 = vadd.f32 %v4904_v24, %v4679_v2  ;;  %5633 = vmatprep.mubr.f32.mxu1 %v13735_v53  ;;  %5197 = vmatprep.mubr.f32.mxu0 %v11805_v6  ;;  %v13760_v53 = vld [vmem:[#allocation55_spill] sm:$0xff] }
 0x38a   : > { %v4684_v58 = vpop.f32.mrb[242].mxu0 }
 0x38b   : > { %v12270_v51 = vadd.f32 %v7319_v32, %v4684_v58  ;;  %v4686_v47 = vpop.f32.mrb[243].mxu0 }
 0x38c   : > { %6558 = vmatmul.mubr.msk.f32.gmra.mrb[98].mxu1 %vm3891_vm3, %v13736_v61  ;;  %6502 = vmatmul.mubr.msk.f32.gmra.mrb[76].mxu0 %vm3891_vm3, %v13758_v33  ;;  %v13761_v47 = vld [vmem:[#allocation57_spill] sm:$0xff] }
 0x38d   : > { %5638 = vmatprep.mubr.f32.mxu1 %v13737_v40  ;;  %5202 = vmatprep.mubr.f32.mxu0 %v13759_v15 }
 0x38f   : > { %v4689_v2 = vpop.f32.mrb[244].mxu0 }
 0x390   : > { %v4691_v28 = vpop.f32.mrb[245].mxu0  ;;  %5639 = vmatmul.mubr.f32.gmra.mrb[100].mxu1 %v13739_v21  ;;  %5203 = vmatmul.mubr.f32.gmra.mrb[78].mxu0 %v13760_v53 }
 0x391   : > { %5643 = vmatprep.mubr.f32.mxu1 %v13740_v52  ;;  %5207 = vmatprep.mubr.f32.mxu0 %v11845_v55  ;;  %v13762_v52 = vld [vmem:[#allocation108_spill] sm:$0xff]  ;;  %v13763_v28 = vld [vmem:[#allocation17_spill] sm:$0xff] }
 0x394   : > { %6559 = vmatmul.mubr.msk.f32.gmra.mrb[102].mxu1 %vm3891_vm3, %v13742_v20  ;;  %6503 = vmatmul.mubr.msk.f32.gmra.mrb[80].mxu0 %vm3891_vm3, %v13761_v47 }
 0x395   : > { %v7322_v32 = vpop.f32.mrb[28].mxu1  ;;  %5648 = vmatprep.mubr.f32.mxu1 %v13743_v39  ;;  %5212 = vmatprep.mubr.f32.mxu0 %v13762_v52 }
 0x396   : > { %v4694_v61 = vpop.f32.mrb[246].mxu0  ;;  %v4914_v58 = vpop.f32.mrb[29].mxu1 }
 0x397   : > { %v12284_v24 = vadd.f32 %v7322_v32, %v4694_v61  ;;  %v4696_v40 = vpop.f32.mrb[247].mxu0  ;;  %v12292_v21 = vadd.f32 %v4914_v58, %v4689_v2  ;;  %v13764_v2 = vld [vmem:[#allocation107_spill] sm:$0xff] }
 0x398   : > { %5649 = vmatmul.mubr.f32.gmra.mrb[104].mxu1 %v13744_v43  ;;  %5213 = vmatmul.mubr.f32.gmra.mrb[82].mxu0 %v13763_v28 }
 0x399   : > { %5653 = vmatprep.mubr.f32.mxu1 %v13745_v29  ;;  %5217 = vmatprep.mubr.f32.mxu0 %v11885_v16 }
 0x39a   : > { %v4699_v20 = vpop.f32.mrb[248].mxu0 }
 0x39b   : > { %v4701_v32 = vpop.f32.mrb[249].mxu0 }
 0x39c   : > { %6560 = vmatmul.mubr.msk.f32.gmra.mrb[106].mxu1 %vm3891_vm3, %v13747_v18  ;;  %6504 = vmatmul.mubr.msk.f32.gmra.mrb[84].mxu0 %vm3891_vm3, %v13764_v2  ;;  %v13776_v32 = vld [vmem:[#allocation22_spill] sm:$0xff] }
 0x39d   : > { %5658 = vmatprep.mubr.f32.mxu1 %v13748_v54  ;;  %5222 = vmatprep.mubr.f32.mxu0 %v11905_v48 }
 0x3a0   : > { %v7325_v39 = vpop.f32.mrb[30].mxu1  ;;  %5659 = vmatmul.mubr.f32.gmra.mrb[108].mxu1 %v13749_v56  ;;  %5223 = vmatmul.mubr.f32.gmra.mrb[86].mxu0 %v11877_v45 }
 0x3a1   : > { %v4704_v43 = vpop.f32.mrb[250].mxu0  ;;  %v4924_v29 = vpop.f32.mrb[31].mxu1  ;;  %5663 = vmatprep.mubr.f32.mxu1 %v11685_v41  ;;  %7459 = vmatprep.mubr.f32.mxu0 %v11178_v8 }
 0x3a2   : > { %v12308_v61 = vadd.f32 %v7325_v39, %v4704_v43  ;;  %v4706_v58 = vpop.f32.mrb[251].mxu0  ;;  %v12312_v40 = vadd.f32 %v4924_v29, %v4699_v20  ;;  %v13774_v20 = vld [vmem:[#allocation64_spill] sm:$0xff]  ;;  %v13778_v43 = vld [vmem:[#allocation110_spill] sm:$0xff]  ;;  %v13779_v29 = vld [vmem:[#allocation109_spill] sm:$0xff] }
 0x3a3   : > { %v13780_v58 = vld [vmem:[#allocation69_spill] sm:$0xff] }
 0x3a4   : > { %6561 = vmatmul.mubr.msk.f32.gmra.mrb[110].mxu1 %vm3891_vm3, %v11658_v25  ;;  %7460 = vmatmul.mubr.f32.vlgmr.msra.gmra.mrb[88].mxu0 %v11204_v14 }
 0x3a5   : > { %5668 = vmatprep.mubr.f32.mxu1 %v13750_v63  ;;  %7462 = vmatprep.mubr.f32.mxu0 %v11228_v12 }
 0x3a6   : > { %v4709_v18 = vpop.f32.mrb[252].mxu0 }
 0x3a7   : > { %v4711_v54 = vpop.f32.mrb[253].mxu0 }
 0x3a8   : > { %5669 = vmatmul.mubr.f32.gmra.mrb[112].mxu1 %v13751_v1  ;;  %7463 = vmatmul.mubr.f32.gmra.mrb[90].mxu0 %v11232_v9 }
 0x3a9   : > { %5673 = vmatprep.mubr.f32.mxu1 %v11725_v60  ;;  %7465 = vmatprep.mubr.f32.mxu0 %v11267_v62 }
 0x3ab   : > { %v7328_v8 = vpop.f32.mrb[32].mxu1 }
 0x3ac   : > { %v4714_v41 = vpop.f32.mrb[254].mxu0  ;;  %v4934_v25 = vpop.f32.mrb[33].mxu1  ;;  %6562 = vmatmul.mubr.msk.f32.gmra.mrb[114].mxu1 %vm3891_vm3, %v13752_v57  ;;  %7466 = vmatmul.mubr.f32.gmra.mrb[92].mxu0 %v11276_v36 }
 0x3ad   : > { %v12326_v56 = vadd.f32 %v7328_v8, %v4714_v41  ;;  %v4716_v14 = vpop.f32.mrb[255].mxu0  ;;  %v12332_v12 = vadd.f32 %v4934_v25, %v4709_v18  ;;  %5678 = vmatprep.mubr.f32.mxu1 %v13753_v22  ;;  %7468 = vmatprep.mubr.f32.mxu0 %v11308_v34  ;;  %v13781_v18 = vld [vmem:[#allocation112_spill] sm:$0xff] }
 0x3ae   : > { %v13782_v14 = vmov 0.0  }
 0x3b0   : > { %5679 = vmatmul.mubr.f32.gmra.mrb[116].mxu1 %v13754_v50  ;;  %7469 = vmatmul.mubr.f32.gmra.mrb[94].mxu0 %v11355_v35  ;;  %v13769_v50 = vld [vmem:[#allocation105_spill] sm:$0xff] }
 0x3b1   : > { %5683 = vmatprep.mubr.f32.mxu1 %v11765_v5  ;;  %7471 = vmatprep.mubr.f32.mxu0 %v11406_v19 }
 0x3b2   : > { %v4719_v9 = vpop.f32.mrb[0].mxu0 }
 0x3b3   : > { %v4721_v62 = vpop.f32.mrb[1].mxu0 }
 0x3b4   : > { %6563 = vmatmul.mubr.msk.f32.gmra.mrb[118].mxu1 %vm3891_vm3, %v13755_v49  ;;  %7472 = vmatmul.mubr.f32.gmra.mrb[96].mxu0 %v11445_v37  ;;  %v13770_v49 = vld [vmem:[#allocation18_spill] sm:$0xff] }
 0x3b5   : > { %5688 = vmatprep.mubr.f32.mxu1 %v13756_v42  ;;  %7474 = vmatprep.mubr.f32.mxu0 %v13713_v30 }
 0x3b7   : > { %v7331_v36 = vpop.f32.mrb[34].mxu1 }
 0x3b8   : > { %v4724_v34 = vpop.f32.mrb[2].mxu0  ;;  %v4944_v35 = vpop.f32.mrb[35].mxu1  ;;  %5689 = vmatmul.mubr.f32.gmra.mrb[120].mxu1 %v13757_v38  ;;  %7475 = vmatmul.mubr.f32.gmra.mrb[98].mxu0 %v13715_v31 }
 0x3b9   : > { %v12346_v60 = vadd.f32 %v7331_v36, %v4724_v34  ;;  %v4726_v19 = vpop.f32.mrb[3].mxu0  ;;  %v12350_v5 = vadd.f32 %v4944_v35, %v4719_v9  ;;  %5693 = vmatprep.mubr.f32.mxu1 %v11805_v6  ;;  %7477 = vmatprep.mubr.f32.mxu0 %v13717_v4  ;;  %v13783_v9 = vld [vmem:[#allocation72_spill] sm:$0xff]  ;;  %v13784_v36 = vld [vmem:[#allocation111_spill] sm:$0xff] }
 0x3bc   : > { %6564 = vmatmul.mubr.msk.f32.gmra.mrb[122].mxu1 %vm3891_vm3, %v13758_v33  ;;  %7478 = vmatmul.mubr.f32.gmra.mrb[100].mxu0 %v13719_v17 }
 0x3bd   : > { %5698 = vmatprep.mubr.f32.mxu1 %v13759_v15  ;;  %7480 = vmatprep.mubr.f32.mxu0 %v13721_v27  ;;  %v13765_v27 = vld [vmem:[#allocation100_spill] sm:$0xff] }
 0x3be   : > { %v4729_v37 = vpop.f32.mrb[4].mxu0 }
 0x3bf   : > { %v4731_v30 = vpop.f32.mrb[5].mxu0 }
 0x3c0   : > { %5699 = vmatmul.mubr.f32.gmra.mrb[124].mxu1 %v13760_v53  ;;  %7481 = vmatmul.mubr.f32.gmra.mrb[102].mxu0 %v13723_v23  ;;  %v13766_v23 = vld [vmem:[#allocation16_spill] sm:$0xff]  ;;  %v13771_v53 = vld [vmem:[#allocation106_spill] sm:$0xff] }
 0x3c1   : > { %5703 = vmatprep.mubr.f32.mxu1 %v11845_v55  ;;  %7483 = vmatprep.mubr.f32.mxu0 %v11688_v13  ;;  %v13767_v13 = vld [vmem:[#allocation103_spill] sm:$0xff]  ;;  %v13768_v55 = vld [vmem:[#allocation50_spill] sm:$0xff] }
 0x3c3   : > { %v7334_v6 = vpop.f32.mrb[36].mxu1 }
 0x3c4   : > { %v4734_v31 = vpop.f32.mrb[6].mxu0  ;;  %v4954_v63 = vpop.f32.mrb[37].mxu1  ;;  %6565 = vmatmul.mubr.msk.f32.gmra.mrb[126].mxu1 %vm3891_vm3, %v13761_v47  ;;  %7484 = vmatmul.mubr.f32.gmra.mrb[104].mxu0 %v13765_v27 }
 0x3c5   : > { %v12364_v4 = vadd.f32 %v7334_v6, %v4734_v31  ;;  %v4736_v17 = vpop.f32.mrb[7].mxu0  ;;  %v12370_v1 = vadd.f32 %v4954_v63, %v4729_v37  ;;  %5708 = vmatprep.mubr.f32.mxu1 %v13762_v52  ;;  %7486 = vmatprep.mubr.f32.mxu0 %v13766_v23  ;;  %v13772_v52 = vld [vmem:[#allocation19_spill] sm:$0xff] }
 0x3c8   : > { %5709 = vmatmul.mubr.f32.gmra.mrb[128].mxu1 %v13763_v28  ;;  %7487 = vmatmul.mubr.f32.gmra.mrb[106].mxu0 %v13767_v13  ;;  %v13773_v28 = vld [vmem:[#allocation60_spill] sm:$0xff] }
 0x3c9   : > { %5713 = vmatprep.mubr.f32.mxu1 %v11885_v16  ;;  %7489 = vmatprep.mubr.f32.mxu0 %v13768_v55 }
 0x3ca   : > { %v4739_v57 = vpop.f32.mrb[8].mxu0 }
 0x3cb   : > { %v4741_v22 = vpop.f32.mrb[9].mxu0 }
 0x3cc   : > { %6566 = vmatmul.mubr.msk.f32.gmra.mrb[130].mxu1 %vm3891_vm3, %v13764_v2  ;;  %7490 = vmatmul.mubr.f32.gmra.mrb[108].mxu0 %v13769_v50  ;;  %v13777_v2 = vld [vmem:[#allocation20_spill] sm:$0xff] }
 0x3cd   : > { %5718 = vmatprep.mubr.f32.mxu1 %v11905_v48  ;;  %7492 = vmatprep.mubr.f32.mxu0 %v13770_v49  ;;  %v13775_v48 = vld [vmem:[#allocation62_spill] sm:$0xff] }
 0x3cf   : > { %v7337_v42 = vpop.f32.mrb[38].mxu1 }
 0x3d0   : > { %v4744_v38 = vpop.f32.mrb[10].mxu0  ;;  %v4964_v15 = vpop.f32.mrb[39].mxu1  ;;  %5719 = vmatmul.mubr.f32.gmra.mrb[132].mxu1 %v11877_v45  ;;  %7493 = vmatmul.mubr.f32.gmra.mrb[110].mxu0 %v13771_v53 }
 0x3d1   : > { %v12384_v33 = vadd.f32 %v7337_v42, %v4744_v38  ;;  %v4746_v16 = vpop.f32.mrb[11].mxu0  ;;  %v12388_v47 = vadd.f32 %v4964_v15, %v4739_v57  ;;  %5723 = vmatprep.mubr.f32.mxu1 %v13772_v52  ;;  %7495 = vmatprep.mubr.f32.mxu0 %v13773_v28  ;;  %v13785_v15 = vld [vmem:[#allocation113_spill] sm:$0xff] }
 0x3d4   : > { %6567 = vmatmul.mubr.msk.f32.gmra.mrb[134].mxu1 %vm3891_vm3, %v13774_v20  ;;  %7496 = vmatmul.mubr.f32.gmra.mrb[112].mxu0 %v13775_v48 }
 0x3d5   : > { %5728 = vmatprep.mubr.f32.mxu1 %v13776_v32  ;;  %7498 = vmatprep.mubr.f32.mxu0 %v13777_v2  ;;  %v13786_v32 = vld [vmem:[#allocation114_spill] sm:$0xff] }
 0x3d6   : > { %v4749_v45 = vpop.f32.mrb[12].mxu0 }
 0x3d7   : > { %v4751_v39 = vpop.f32.mrb[13].mxu0 }
 0x3d8   : > { %5729 = vmatmul.mubr.f32.gmra.mrb[136].mxu1 %v13778_v43  ;;  %7499 = vmatmul.mubr.f32.gmra.mrb[114].mxu0 %v13779_v29 }
 0x3d9   : > { %7501 = vmatprep.mubr.f32.mxu0 %v13780_v58  ;;  %5733 = vmatprep.mubr.f32.mxu1 %v13781_v18 }
 0x3db   : > { %v7340_v54 = vpop.f32.mrb[40].mxu1 }
 0x3dc   : > { %v4754_v8 = vpop.f32.mrb[14].mxu0  ;;  %v4974_v41 = vpop.f32.mrb[41].mxu1  ;;  %5734 = vmatmul.mubr.f32.gmra.mrb[138].mxu1 %v13782_v14  ;;  %7502 = vmatmul.mubr.f32.gmra.mrb[116].mxu0 %v13783_v9 }
 0x3dd   : > { %v12402_v3 = vadd.f32 %v7340_v54, %v4754_v8  ;;  %v4756_v25 = vpop.f32.mrb[15].mxu0  ;;  %v12406_v62 = vadd.f32 %v4974_v41, %v4749_v45  ;;  %5738 = vmatprep.mubr.f32.mxu1 %v13781_v18  ;;  %7504 = vmatprep.mubr.f32.mxu0 %v13784_v36  ;;  %v13787_v18 = vld [vmem:[#allocation21_spill] sm:$0xff] }
 0x3e0   : > { %5739 = vmatmul.mubr.f32.gmra.mrb[140].mxu1 %v13782_v14  ;;  %7505 = vmatmul.mubr.f32.gmra.mrb[118].mxu0 %v13784_v36  ;;  %v13788_v36 = vld [vmem:[#allocation76_spill] sm:$0xff] }
 0x3e2   : > { %v4759_v34 = vpop.f32.mrb[16].mxu0 }
 0x3e3   : > { %v4761_v35 = vpop.f32.mrb[17].mxu0 }
 0x3e7   : > { %v7343_v19 = vpop.f32.mrb[42].mxu1 }
 0x3e8   : > { %v4764_v37 = vpop.f32.mrb[18].mxu0  ;;  %v4984_v6 = vpop.f32.mrb[43].mxu1 }
 0x3e9   : > { %v12412_v30 = vadd.f32 %v7343_v19, %v4764_v37  ;;  %v4766_v31 = vpop.f32.mrb[19].mxu0  ;;  %v12414_v63 = vadd.f32 %v4984_v6, %v4759_v34 }
 0x3ee   : > { %v4769_v17 = vpop.f32.mrb[20].mxu0 }
 0x3ef   : > { %v4771_v27 = vpop.f32.mrb[21].mxu0 }
 0x3f2   : > { %v7346_v23 = vpop.f32.mrb[44].mxu1 }
 0x3f3   : > { %v4774_v13 = vpop.f32.mrb[22].mxu0  ;;  %v4994_v55 = vpop.f32.mrb[45].mxu1 }
 0x3f4   : > { %v12416_v57 = vadd.f32 %v7346_v23, %v4774_v13  ;;  %v12418_v22 = vadd.f32 %v4994_v55, %v4769_v17  ;;  %v4776_v50 = vpop.f32.mrb[23].mxu0 }
 0x3f6   : > { %v7381_v49 = vpop.f32.mrb[46].mxu1 }
 0x3f7   : > { %v5069_v42 = vpop.f32.mrb[24].mxu0  ;;  %v5294_v38 = vpop.f32.mrb[47].mxu1 }
 0x3f8   : > { %v5070_v16 = vadd.f32 %v5069_v42, %v13785_v15  ;;  %v5071_v53 = vpop.f32.mrb[25].mxu0 }
 0x3fa   : > { %v12421_v52 = vadd.f32 %v5294_v38, %v5070_v16  ;;  %v7384_v28 = vpop.f32.mrb[48].mxu1 }
 0x3fb   : > { %v5074_v20 = vpop.f32.mrb[26].mxu0  ;;  %v5304_v48 = vpop.f32.mrb[49].mxu1 }
 0x3fc   : > { %v5075_v2 = vadd.f32 %v5074_v20, %v13786_v32  ;;  %v5076_v45 = vpop.f32.mrb[27].mxu0 }
 0x3fe   : > { %v12424_v39 = vadd.f32 %v7381_v49, %v5075_v2  ;;  %v7387_v43 = vpop.f32.mrb[50].mxu1  ;;  %v13789_v49 = vld [vmem:[#allocation115_spill] sm:$0xff] }
 0x3ff   : > { %v5079_v29 = vpop.f32.mrb[28].mxu0  ;;  %v5314_v58 = vpop.f32.mrb[51].mxu1 }
 0x400   : > { %v5080_v54 = vadd.f32 %v5079_v29, %v13787_v18  ;;  %v5081_v8 = vpop.f32.mrb[29].mxu0 }
 0x402   : > { %v12427_v41 = vadd.f32 %v5304_v48, %v5080_v54  ;;  %v7390_v25 = vpop.f32.mrb[52].mxu1 }
 0x403   : > { %v5084_v14 = vpop.f32.mrb[30].mxu0  ;;  %v5324_v9 = vpop.f32.mrb[53].mxu1 }
 0x404   : > { %v5085_v34 = vadd.f32 %v5084_v14, %v13788_v36  ;;  %v5086_v35 = vpop.f32.mrb[31].mxu0 }
 0x406   : > { %v12430_v19 = vadd.f32 %v7384_v28, %v5085_v34  ;;  %v7393_v37 = vpop.f32.mrb[54].mxu1 }
 0x407   : > { %v5089_v6 = vpop.f32.mrb[32].mxu0  ;;  %v5334_v31 = vpop.f32.mrb[55].mxu1 }
 0x408   : > { %v5090_v17 = vadd.f32 %v5089_v6, %v12200_v10  ;;  %v5091_v27 = vpop.f32.mrb[33].mxu0 }
 0x40a   : > { %v12433_v23 = vadd.f32 %v5314_v58, %v5090_v17  ;;  %v7396_v13 = vpop.f32.mrb[56].mxu1 }
 0x40b   : > { %v5094_v55 = vpop.f32.mrb[34].mxu0  ;;  %v5344_v50 = vpop.f32.mrb[57].mxu1 }
 0x40c   : > { %v5095_v42 = vadd.f32 %v5094_v55, %v13789_v49  ;;  %v5096_v38 = vpop.f32.mrb[35].mxu0 }
 0x40e   : > { %v12436_v15 = vadd.f32 %v7387_v43, %v5095_v42  ;;  %v7399_v16 = vpop.f32.mrb[58].mxu1 }
 0x40f   : > { %v5099_v53 = vpop.f32.mrb[36].mxu0  ;;  %v5354_v28 = vpop.f32.mrb[59].mxu1 }
 0x410   : > { %v5100_v20 = vadd.f32 %v5099_v53, %v12216_v7  ;;  %v5101_v48 = vpop.f32.mrb[37].mxu0 }
 0x412   : > { %v12439_v32 = vadd.f32 %v5324_v9, %v5100_v20  ;;  %v7402_v10 = vpop.f32.mrb[60].mxu1 }
 0x413   : > { %v5104_v2 = vpop.f32.mrb[38].mxu0  ;;  %v5364_v45 = vpop.f32.mrb[61].mxu1 }
 0x414   : > { %v5105_v29 = vadd.f32 %v5104_v2, %v12222_v46  ;;  %v5106_v58 = vpop.f32.mrb[39].mxu0 }
 0x416   : > { %v12442_v18 = vadd.f32 %v7390_v25, %v5105_v29  ;;  %v7405_v54 = vpop.f32.mrb[62].mxu1 }
 0x417   : > { %v5109_v8 = vpop.f32.mrb[40].mxu0  ;;  %v5374_v43 = vpop.f32.mrb[63].mxu1 }
 0x418   : > { %v5110_v14 = vadd.f32 %v5109_v8, %v12232_v59  ;;  %v5111_v36 = vpop.f32.mrb[41].mxu0 }
 0x41a   : > { %v12445_v34 = vadd.f32 %v5334_v31, %v5110_v14  ;;  %v12447_v7 = vpop.f32.mrb[64].mxu1 }
 0x41b   : > { %v5114_v9 = vpop.f32.mrb[42].mxu0  ;;  %v5384_v35 = vpop.f32.mrb[65].mxu1 }
 0x41c   : > { %v5115_v6 = vadd.f32 %v5114_v9, %v12238_v11  ;;  %v5116_v17 = vpop.f32.mrb[43].mxu0 }
 0x41e   : > { %v12450_v27 = vadd.f32 %v7393_v37, %v5115_v6  ;;  %v12452_v46 = vpop.f32.mrb[66].mxu1 }
 0x41f   : > { %v5119_v25 = vpop.f32.mrb[44].mxu0  ;;  %v12454_v55 = vpop.f32.mrb[67].mxu1 }
 0x420   : > { %v5120_v49 = vadd.f32 %v5119_v25, %v12248_v44  ;;  %v5121_v59 = vpop.f32.mrb[45].mxu0 }
 0x422   : > { %v12457_v42 = vadd.f32 %v5344_v50, %v5120_v49  ;;  %v12459_v31 = vpop.f32.mrb[68].mxu1 }
 0x423   : > { %v5124_v38 = vpop.f32.mrb[46].mxu0  ;;  %v12461_v53 = vpop.f32.mrb[69].mxu1 }
 0x424   : > { %v5125_v11 = vadd.f32 %v5124_v38, %v12254_v26  ;;  %v5126_v20 = vpop.f32.mrb[47].mxu0 }
 0x426   : > { %v12464_v37 = vadd.f32 %v7396_v13, %v5125_v11  ;;  %v12466_v48 = vpop.f32.mrb[70].mxu1 }
 0x427   : > { %v5129_v2 = vpop.f32.mrb[48].mxu0  ;;  %v12468_v29 = vpop.f32.mrb[71].mxu1 }
 0x428   : > { %v5130_v44 = vadd.f32 %v5129_v2, %v12266_v0  ;;  %v5131_v58 = vpop.f32.mrb[49].mxu0 }
 0x42a   : > { %v12471_v50 = vadd.f32 %v5354_v28, %v5130_v44  ;;  %v12473_v8 = vpop.f32.mrb[72].mxu1 }
 0x42b   : > { %v5134_v14 = vpop.f32.mrb[50].mxu0  ;;  %v12475_v36 = vpop.f32.mrb[73].mxu1 }
 0x42c   : > { %v5135_v26 = vadd.f32 %v5134_v14, %v12270_v51  ;;  %v5136_v9 = vpop.f32.mrb[51].mxu0 }
 0x42e   : > { %v12478_v13 = vadd.f32 %v7399_v16, %v5135_v26  ;;  %v12480_v6 = vpop.f32.mrb[74].mxu1 }
 0x42f   : > { %v5139_v17 = vpop.f32.mrb[52].mxu0  ;;  %v12482_v25 = vpop.f32.mrb[75].mxu1 }
 0x430   : > { %v5140_v0 = vadd.f32 %v5139_v17, %v12292_v21  ;;  %v5141_v49 = vpop.f32.mrb[53].mxu0 }
 0x432   : > { %v12485_v28 = vadd.f32 %v5364_v45, %v5140_v0  ;;  %v12487_v59 = vpop.f32.mrb[76].mxu1 }
 0x433   : > { %v5144_v38 = vpop.f32.mrb[54].mxu0  ;;  %v12489_v11 = vpop.f32.mrb[77].mxu1 }
 0x434   : > { %v5145_v51 = vadd.f32 %v5144_v38, %v12284_v24  ;;  %v5146_v20 = vpop.f32.mrb[55].mxu0 }
 0x436   : > { %v12492_v16 = vadd.f32 %v7402_v10, %v5145_v51 }
 0x437   : > { %v12494_v2 = vpop.f32.mrb[78].mxu1  ;;  %v5149_v44 = vpop.f32.mrb[56].mxu0 }
 0x438   : > { %v5150_v58 = vadd.f32 %v5149_v44, %v12312_v40  ;;  %v5587_v14 = vpop.f32.mrb[79].mxu1  ;;  %v5151_v21 = vpop.f32.mrb[57].mxu0 }
 0x43a   : > { %v12497_v26 = vadd.f32 %v5374_v43, %v5150_v58 }
 0x43b   : > { %v12499_v45 = vpop.f32.mrb[80].mxu1  ;;  %v5154_v9 = vpop.f32.mrb[58].mxu0 }
 0x43c   : > { %v5155_v17 = vadd.f32 %v5154_v9, %v12308_v61  ;;  %v5592_v0 = vpop.f32.mrb[81].mxu1  ;;  %v5156_v49 = vpop.f32.mrb[59].mxu0 }
 0x43e   : > { %v12502_v24 = vadd.f32 %v7405_v54, %v5155_v17 }
 0x43f   : > { %v12504_v10 = vpop.f32.mrb[82].mxu1  ;;  %v5159_v38 = vpop.f32.mrb[60].mxu0 }
 0x440   : > { %v5160_v51 = vadd.f32 %v5159_v38, %v12332_v12  ;;  %v5597_v20 = vpop.f32.mrb[83].mxu1  ;;  %v5161_v40 = vpop.f32.mrb[61].mxu0 }
 0x442   : > { %v12507_v44 = vadd.f32 %v5384_v35, %v5160_v51 }
 0x443   : > { %v12509_v43 = vpop.f32.mrb[84].mxu1  ;;  %v5164_v58 = vpop.f32.mrb[62].mxu0 }
 0x444   : > { %v5165_v14 = vadd.f32 %v5164_v58, %v12326_v56  ;;  %v5602_v21 = vpop.f32.mrb[85].mxu1  ;;  %v5166_v61 = vpop.f32.mrb[63].mxu0 }
 0x446   : > { %v12513_v9 = vadd.f32 %v12447_v7, %v5165_v14 }
 0x447   : > { %v12515_v54 = vpop.f32.mrb[86].mxu1  ;;  %v5169_v17 = vpop.f32.mrb[64].mxu0 }
 0x448   : > { %v5170_v0 = vadd.f32 %v5169_v17, %v12350_v5  ;;  %v5607_v12 = vpop.f32.mrb[87].mxu1  ;;  %v5171_v49 = vpop.f32.mrb[65].mxu0 }
 0x44a   : > { %v12519_v35 = vadd.f32 %v12454_v55, %v5170_v0 }
 0x44b   : > { %v12521_v38 = vpop.f32.mrb[88].mxu1  ;;  %v5174_v51 = vpop.f32.mrb[66].mxu0 }
 0x44c   : > { %v5175_v56 = vadd.f32 %v5174_v51, %v12346_v60  ;;  %v5612_v20 = vpop.f32.mrb[89].mxu1  ;;  %v5176_v40 = vpop.f32.mrb[67].mxu0 }
 0x44e   : > { %v12525_v7 = vadd.f32 %v12452_v46, %v5175_v56 }
 0x44f   : > { %v12527_v58 = vpop.f32.mrb[90].mxu1  ;;  %v5179_v14 = vpop.f32.mrb[68].mxu0 }
 0x450   : > { %v5180_v5 = vadd.f32 %v5179_v14, %v12370_v1  ;;  %v5617_v21 = vpop.f32.mrb[91].mxu1  ;;  %v5181_v61 = vpop.f32.mrb[69].mxu0 }
 0x452   : > { %v12531_v55 = vadd.f32 %v12461_v53, %v5180_v5 }
 0x453   : > { %v12533_v17 = vpop.f32.mrb[92].mxu1  ;;  %v5184_v0 = vpop.f32.mrb[70].mxu0 }
 0x454   : > { %v5185_v60 = vadd.f32 %v5184_v0, %v12364_v4  ;;  %v5622_v12 = vpop.f32.mrb[93].mxu1  ;;  %v5186_v49 = vpop.f32.mrb[71].mxu0 }
 0x456   : > { %v12537_v46 = vadd.f32 %v12459_v31, %v5185_v60 }
 0x457   : > { %v12539_v51 = vpop.f32.mrb[94].mxu1  ;;  %v5189_v56 = vpop.f32.mrb[72].mxu0 }
 0x458   : > { %v5190_v1 = vadd.f32 %v5189_v56, %v12388_v47  ;;  %v5627_v20 = vpop.f32.mrb[95].mxu1  ;;  %v5191_v40 = vpop.f32.mrb[73].mxu0 }
 0x45a   : > { %v12543_v53 = vadd.f32 %v12468_v29, %v5190_v1 }
 0x45b   : > { %v12545_v14 = vpop.f32.mrb[96].mxu1  ;;  %v5194_v5 = vpop.f32.mrb[74].mxu0 }
 0x45c   : > { %v5195_v4 = vadd.f32 %v5194_v5, %v12384_v33  ;;  %v5632_v21 = vpop.f32.mrb[97].mxu1  ;;  %v5196_v61 = vpop.f32.mrb[75].mxu0 }
 0x45e   : > { %v12549_v31 = vadd.f32 %v12466_v48, %v5195_v4 }
 0x45f   : > { %v12551_v0 = vpop.f32.mrb[98].mxu1  ;;  %v5199_v60 = vpop.f32.mrb[76].mxu0 }
 0x460   : > { %v5200_v47 = vadd.f32 %v5199_v60, %v12406_v62  ;;  %v5637_v12 = vpop.f32.mrb[99].mxu1  ;;  %v5201_v49 = vpop.f32.mrb[77].mxu0 }
 0x462   : > { %v12555_v29 = vadd.f32 %v12475_v36, %v5200_v47 }
 0x463   : > { %v12557_v56 = vpop.f32.mrb[100].mxu1  ;;  %v5204_v1 = vpop.f32.mrb[78].mxu0 }
 0x464   : > { %v5205_v33 = vadd.f32 %v5204_v1, %v12402_v3  ;;  %v5642_v20 = vpop.f32.mrb[101].mxu1  ;;  %v5206_v40 = vpop.f32.mrb[79].mxu0 }
 0x466   : > { %v12561_v48 = vadd.f32 %v12473_v8, %v5205_v33 }
 0x467   : > { %v12563_v5 = vpop.f32.mrb[102].mxu1  ;;  %v5209_v4 = vpop.f32.mrb[80].mxu0 }
 0x468   : > { %v5210_v62 = vadd.f32 %v5209_v4, %v12414_v63  ;;  %v5647_v21 = vpop.f32.mrb[103].mxu1  ;;  %v5211_v61 = vpop.f32.mrb[81].mxu0 }
 0x46a   : > { %v12567_v36 = vadd.f32 %v12482_v25, %v5210_v62 }
 0x46b   : > { %v12569_v60 = vpop.f32.mrb[104].mxu1  ;;  %v5214_v47 = vpop.f32.mrb[82].mxu0 }
 0x46c   : > { %v5215_v3 = vadd.f32 %v5214_v47, %v12412_v30  ;;  %v5652_v12 = vpop.f32.mrb[105].mxu1  ;;  %v5216_v49 = vpop.f32.mrb[83].mxu0 }
 0x46d   : > { %v12593_v49 = vld [vmem:[%s12789_s5] ss:$0 sm:$0xff] }
 0x46e   : > { %v12573_v8 = vadd.f32 %v12480_v6, %v5215_v3 }
 0x46f   : > { %v12575_v1 = vpop.f32.mrb[106].mxu1  ;;  %v5219_v33 = vpop.f32.mrb[84].mxu0 }
 0x470   : > { %v5220_v63 = vadd.f32 %v5219_v33, %v12418_v22  ;;  %v5657_v20 = vpop.f32.mrb[107].mxu1  ;;  %v5221_v40 = vpop.f32.mrb[85].mxu0 }
 0x472   : > { %v12579_v25 = vadd.f32 %v12489_v11, %v5220_v63 }
 0x473   : > { %v12581_v4 = vpop.f32.mrb[108].mxu1  ;;  %v5224_v62 = vpop.f32.mrb[86].mxu0 }
 0x474   : > { %v5225_v30 = vadd.f32 %v5224_v62, %v12416_v57  ;;  %v5662_v21 = vpop.f32.mrb[109].mxu1  ;;  %v5226_v61 = vpop.f32.mrb[87].mxu0 }
 0x476   : > { %v12585_v6 = vadd.f32 %v12487_v59, %v5225_v30 }
 0x477   : > { %v12587_v47 = vpop.f32.mrb[110].mxu1  ;;  %v7461_v3 = vpop.f32.mrb[88].mxu0 }
 0x478   : > { %v5667_v22 = vpop.f32.mrb[111].mxu1  ;;  %v5816_v12 = vadd.f32 %v7461_v3, %v12499_v45  ;;  %v5810_v11 = vpop.f32.mrb[89].mxu0  ;;  %v8055_v3 = vld [vmem:[%s8218_s12 + $0x50] sm:$0xff] }
 0x479   : > { %v5811_v57 = vadd.f32 %v5810_v11, %v12494_v2  ;;  %v8056_v22 = vld [vmem:[%s8218_s12 + $0x48] sm:$0xff] }
 0x47a   : > { %v5970_v59 = vadd.f32 %v5816_v12, %v12424_v39 }
 0x47b   : > { %v5969_v33 = vadd.f32 %v5811_v57, %v12421_v52  ;;  %v12598_v63 = vpop.f32.mrb[112].mxu1  ;;  %v7464_v20 = vpop.f32.mrb[90].mxu0 }
 0x47c   : > { %v6009_v40 = vadd.f32 %v12593_v49, %v5970_v59  ;;  %v5672_v62 = vpop.f32.mrb[113].mxu1  ;;  %v5826_v45 = vadd.f32 %v7464_v20, %v12509_v43  ;;  %v5820_v30 = vpop.f32.mrb[91].mxu0 }
 0x47d   : > { %v6008_v21 = vadd.f32 %v12593_v49, %v5969_v33  ;;  %v5821_v61 = vadd.f32 %v5820_v30, %v12504_v10 }
 0x47e   : > { %v6041_v2 = vadd.f32 %v8055_v3, %v6009_v40  ;;  %v5972_v39 = vadd.f32 %v5826_v45, %v12430_v19  ;;  %v8057_v45 = vld [vmem:[%s8218_s12 + $0x70] sm:$0xff]  ;;  %v8058_v3 = vld [vmem:[%s8218_s12 + $0x68] sm:$0xff] }
 0x47f   : > { %v6040_v52 = vadd.f32 %v8056_v22, %v6008_v21  ;;  %v5971_v12 = vadd.f32 %v5821_v61, %v12427_v41  ;;  %v12609_v11 = vpop.f32.mrb[114].mxu1  ;;  %v7467_v57 = vpop.f32.mrb[92].mxu0 }
 0x480   : > { %vm6073_vm0 = vcmp.ge.f32.partialorder %v6041_v2, 0.0  ;;  %v6105_v10 = vmul.f32 0.2, %v6041_v2  ;;  %v6011_v43 = vadd.f32 %v12593_v49, %v5972_v39  ;;  %v5677_v19 = vpop.f32.mrb[115].mxu1  ;;  %v5836_v59 = vadd.f32 %v7467_v57, %v12521_v38  ;;  %v5830_v33 = vpop.f32.mrb[93].mxu0 }
 0x481   : > { %vm6072_vm2 = vcmp.ge.f32.partialorder %v6040_v52, 0.0  ;;  %v6104_v41 = vmul.f32 0.2, %v6040_v52  ;;  %v6010_v20 = vadd.f32 %v12593_v49, %v5971_v12  ;;  %v5831_v40 = vadd.f32 %v5830_v33, %v12515_v54 }
 0x482   : > { %v6137_v62 = vsel %vm6073_vm0, %v6041_v2, %v6105_v10  ;;  %v6043_v30 = vadd.f32 %v8057_v45, %v6011_v43  ;;  %v5974_v21 = vadd.f32 %v5836_v59, %v12436_v15  ;;  %v8059_v59 = vld [vmem:[%s8218_s12 + $0x90] sm:$0xff] }
 0x483   : > { %6169 = vst [vmem:[%s12614_s21 + $0x8] sm:$0xff] %v6137_v62  ;;  %v6136_v61 = vsel %vm6072_vm2, %v6040_v52, %v6104_v41  ;;  %v6042_v39 = vadd.f32 %v8058_v3, %v6010_v20  ;;  %v5973_v38 = vadd.f32 %v5831_v40, %v12433_v23  ;;  %v12625_v22 = vpop.f32.mrb[116].mxu1  ;;  %v7470_v57 = vpop.f32.mrb[94].mxu0  ;;  %v8060_v40 = vld [vmem:[%s8218_s12 + $0x88] sm:$0xff] }
 0x484   : > { %6168 = vst [vmem:[%s12614_s21] sm:$0xff] %v6136_v61  ;;  %vm6075_vm3 = vcmp.ge.f32.partialorder %v6043_v30, 0.0  ;;  %v6107_v54 = vmul.f32 0.2, %v6043_v30  ;;  %v6013_v2 = vadd.f32 %v12593_v49, %v5974_v21  ;;  %v5682_v12 = vpop.f32.mrb[117].mxu1  ;;  %v5846_v15 = vadd.f32 %v7470_v57, %v12533_v17  ;;  %v5840_v10 = vpop.f32.mrb[95].mxu0 }
 0x485   : > { %vm6074_vm4 = vcmp.ge.f32.partialorder %v6042_v39, 0.0  ;;  %v6106_v52 = vmul.f32 0.2, %v6042_v39  ;;  %v6012_v43 = vadd.f32 %v12593_v49, %v5973_v38  ;;  %v5841_v23 = vadd.f32 %v5840_v10, %v12527_v58  ;;  %v8062_v10 = vld [vmem:[%s8218_s12 + $0xa8] sm:$0xff] }
 0x486   : > { %v6139_v19 = vsel %vm6075_vm3, %v6043_v30, %v6107_v54  ;;  %v6045_v33 = vadd.f32 %v8059_v59, %v6013_v2  ;;  %v5976_v41 = vadd.f32 %v5846_v15, %v12442_v18  ;;  %v8061_v54 = vld [vmem:[%s8218_s12 + $0xb0] sm:$0xff] }
 0x487   : > { %6171 = vst [vmem:[%s12614_s21 + $0x18] sm:$0xff] %v6139_v19  ;;  %v6138_v20 = vsel %vm6074_vm4, %v6042_v39, %v6106_v52  ;;  %v6044_v62 = vadd.f32 %v8060_v40, %v6012_v43  ;;  %v5975_v17 = vadd.f32 %v5841_v23, %v12439_v32  ;;  %v12637_v45 = vpop.f32.mrb[118].mxu1  ;;  %v7473_v21 = vpop.f32.mrb[96].mxu0 }
 0x488   : > { %6170 = vst [vmem:[%s12614_s21 + $0x10] sm:$0xff] %v6138_v20  ;;  %vm6077_vm5 = vcmp.ge.f32.partialorder %v6045_v33, 0.0  ;;  %v6109_v58 = vmul.f32 0.2, %v6045_v33  ;;  %v6015_v30 = vadd.f32 %v12593_v49, %v5976_v41  ;;  %v5687_v61 = vpop.f32.mrb[119].mxu1  ;;  %v5856_v18 = vadd.f32 %v7473_v21, %v12545_v14  ;;  %v5850_v3 = vpop.f32.mrb[97].mxu0 }
 0x489   : > { %vm6076_vm6 = vcmp.ge.f32.partialorder %v6044_v62, 0.0  ;;  %v6108_v39 = vmul.f32 0.2, %v6044_v62  ;;  %v6014_v38 = vadd.f32 %v12593_v49, %v5975_v17  ;;  %v5851_v32 = vadd.f32 %v5850_v3, %v12539_v51 }
 0x48a   : > { %v6141_v57 = vsel %vm6077_vm5, %v6045_v33, %v6109_v58  ;;  %v6047_v2 = vadd.f32 %v8061_v54, %v6015_v30  ;;  %v5978_v12 = vadd.f32 %v5856_v18, %v12450_v27  ;;  %v8064_v30 = vld [vmem:[%s8218_s12 + $0xc8] sm:$0xff] }
 0x48b   : > { %6173 = vst [vmem:[%s12614_s21 + $0x28] sm:$0xff] %v6141_v57  ;;  %v6140_v15 = vsel %vm6076_vm6, %v6044_v62, %v6108_v39  ;;  %v6046_v52 = vadd.f32 %v8062_v10, %v6014_v38  ;;  %v5977_v14 = vadd.f32 %v5851_v32, %v12445_v34  ;;  %v12649_v43 = vpop.f32.mrb[120].mxu1  ;;  %v7476_v23 = vpop.f32.mrb[98].mxu0  ;;  %v8063_v62 = vld [vmem:[%s8218_s12 + $0xd0] sm:$0xff] }
 0x48c   : > { %6172 = vst [vmem:[%s12614_s21 + $0x20] sm:$0xff] %v6140_v15  ;;  %vm6079_vm7 = vcmp.ge.f32.partialorder %v6047_v2, 0.0  ;;  %v6111_v51 = vmul.f32 0.2, %v6047_v2  ;;  %v6017_v19 = vadd.f32 %v12593_v49, %v5978_v12  ;;  %v5692_v59 = vpop.f32.mrb[121].mxu1  ;;  %v5866_v27 = vadd.f32 %v7476_v23, %v12557_v56  ;;  %v5860_v33 = vpop.f32.mrb[99].mxu0 }
 0x48d   : > { %vm6078_vm8 = vcmp.ge.f32.partialorder %v6046_v52, 0.0  ;;  %v6110_v41 = vmul.f32 0.2, %v6046_v52  ;;  %v6016_v20 = vadd.f32 %v12593_v49, %v5977_v14  ;;  %v5861_v34 = vadd.f32 %v5860_v33, %v12551_v0  ;;  %v8065_v12 = vld [vmem:[%s8218_s12 + $0xf0] sm:$0xff]  ;;  %v8066_v14 = vld [vmem:[%s8218_s12 + $0xe8] sm:$0xff] }
 0x48e   : > { %v6143_v40 = vsel %vm6079_vm7, %v6047_v2, %v6111_v51  ;;  %v6049_v17 = vadd.f32 %v8063_v62, %v6017_v19  ;;  %v5980_v21 = vadd.f32 %v5866_v27, %v12464_v37 }
 0x48f   : > { %6175 = vst [vmem:[%s12614_s21 + $0x38] sm:$0xff] %v6143_v40  ;;  %v6142_v58 = vsel %vm6078_vm8, %v6046_v52, %v6110_v41  ;;  %v6048_v61 = vadd.f32 %v8064_v30, %v6016_v20  ;;  %v5979_v56 = vadd.f32 %v5861_v34, %v12457_v42  ;;  %v12661_v18 = vpop.f32.mrb[122].mxu1  ;;  %v7479_v3 = vpop.f32.mrb[100].mxu0  ;;  %v8067_v40 = vld [vmem:[%s8218_s12 + $0x110] sm:$0xff] }
 0x490   : > { %6174 = vst [vmem:[%s12614_s21 + $0x30] sm:$0xff] %v6142_v58  ;;  %vm6081_vm9 = vcmp.ge.f32.partialorder %v6049_v17, 0.0  ;;  %v6113_v0 = vmul.f32 0.2, %v6049_v17  ;;  %v6019_v39 = vadd.f32 %v12593_v49, %v5980_v21  ;;  %v5697_v38 = vpop.f32.mrb[123].mxu1  ;;  %v5876_v37 = vadd.f32 %v7479_v3, %v12569_v60  ;;  %v5870_v32 = vpop.f32.mrb[101].mxu0 }
 0x491   : > { %vm6080_vm10 = vcmp.ge.f32.partialorder %v6048_v61, 0.0  ;;  %v6112_v57 = vmul.f32 0.2, %v6048_v61  ;;  %v6018_v54 = vadd.f32 %v12593_v49, %v5979_v56  ;;  %v5871_v42 = vadd.f32 %v5870_v32, %v12563_v5  ;;  %v8068_v58 = vld [vmem:[%s8218_s12 + $0x108] sm:$0xff] }
 0x492   : > { %v6145_v2 = vsel %vm6081_vm9, %v6049_v17, %v6113_v0  ;;  %v6051_v15 = vadd.f32 %v8065_v12, %v6019_v39  ;;  %v5982_v10 = vadd.f32 %v5876_v37, %v12478_v13  ;;  %v8070_v12 = vld [vmem:[%s8218_s12 + $0x128] sm:$0xff] }
 0x493   : > { %6177 = vst [vmem:[%s12614_s21 + $0x48] sm:$0xff] %v6145_v2  ;;  %v6144_v52 = vsel %vm6080_vm10, %v6048_v61, %v6112_v57  ;;  %v6050_v23 = vadd.f32 %v8066_v14, %v6018_v54  ;;  %v5981_v60 = vadd.f32 %v5871_v42, %v12471_v50  ;;  %v12673_v51 = vpop.f32.mrb[124].mxu1  ;;  %v7482_v19 = vpop.f32.mrb[102].mxu0  ;;  %v8069_v57 = vld [vmem:[%s8218_s12 + $0x130] sm:$0xff] }
 0x494   : > { %6176 = vst [vmem:[%s12614_s21 + $0x40] sm:$0xff] %v6144_v52  ;;  %vm6083_vm11 = vcmp.ge.f32.partialorder %v6051_v15, 0.0  ;;  %v6115_v5 = vmul.f32 0.2, %v6051_v15  ;;  %v6021_v59 = vadd.f32 %v12593_v49, %v5982_v10  ;;  %v5702_v27 = vpop.f32.mrb[125].mxu1  ;;  %v5886_v13 = vadd.f32 %v7482_v19, %v12581_v4  ;;  %v5880_v33 = vpop.f32.mrb[103].mxu0 }
 0x495   : > { %vm6082_vm12 = vcmp.ge.f32.partialorder %v6050_v23, 0.0  ;;  %v6114_v41 = vmul.f32 0.2, %v6050_v23  ;;  %v6020_v20 = vadd.f32 %v12593_v49, %v5981_v60  ;;  %v5881_v50 = vadd.f32 %v5880_v33, %v12575_v1  ;;  %v8071_v27 = vld [vmem:[%s8218_s12 + $0x150] sm:$0xff] }
 0x496   : > { %v6147_v34 = vsel %vm6083_vm11, %v6051_v15, %v6115_v5  ;;  %v6053_v62 = vadd.f32 %v8067_v40, %v6021_v59  ;;  %v5984_v17 = vadd.f32 %v5886_v13, %v12492_v16 }
 0x497   : > { %6179 = vst [vmem:[%s12614_s21 + $0x58] sm:$0xff] %v6147_v34  ;;  %v6146_v21 = vsel %vm6082_vm12, %v6050_v23, %v6114_v41  ;;  %v6052_v30 = vadd.f32 %v8068_v58, %v6020_v20  ;;  %v5983_v4 = vadd.f32 %v5881_v50, %v12485_v28  ;;  %v12685_v61 = vpop.f32.mrb[126].mxu1  ;;  %v7485_v56 = vpop.f32.mrb[104].mxu0  ;;  %v8072_v20 = vld [vmem:[%s8218_s12 + $0x148] sm:$0xff] }
 0x498   : > { %6178 = vst [vmem:[%s12614_s21 + $0x50] sm:$0xff] %v6146_v21  ;;  %vm6085_vm13 = vcmp.ge.f32.partialorder %v6053_v62, 0.0  ;;  %v6117_v1 = vmul.f32 0.2, %v6053_v62  ;;  %v6023_v3 = vadd.f32 %v12593_v49, %v5984_v17  ;;  %v5707_v0 = vpop.f32.mrb[127].mxu1  ;;  %v5896_v16 = vadd.f32 %v7485_v56, %v12598_v63  ;;  %v5890_v39 = vpop.f32.mrb[105].mxu0 }
 0x499   : > { %vm6084_vm14 = vcmp.ge.f32.partialorder %v6052_v30, 0.0  ;;  %v6116_v38 = vmul.f32 0.2, %v6052_v30  ;;  %v6022_v37 = vadd.f32 %v12593_v49, %v5983_v4  ;;  %v5891_v28 = vadd.f32 %v5890_v39, %v12587_v47  ;;  %v8073_v56 = vld [vmem:[%s8218_s12 + $0x170] sm:$0xff] }
 0x49a   : > { %v6149_v32 = vsel %vm6085_vm13, %v6053_v62, %v6117_v1  ;;  %v6055_v54 = vadd.f32 %v8069_v57, %v6023_v3  ;;  %v5986_v42 = vadd.f32 %v5896_v16, %v12502_v24  ;;  %v8074_v16 = vld [vmem:[%s8218_s12 + $0x168] sm:$0xff] }
 0x49b   : > { %6181 = vst [vmem:[%s12614_s21 + $0x68] sm:$0xff] %v6149_v32  ;;  %v6148_v2 = vsel %vm6084_vm14, %v6052_v30, %v6116_v38  ;;  %v6054_v15 = vadd.f32 %v8070_v12, %v6022_v37  ;;  %v5985_v63 = vadd.f32 %v5891_v28, %v12497_v26  ;;  %v12697_v10 = vpop.f32.mrb[128].mxu1  ;;  %v7488_v52 = vpop.f32.mrb[106].mxu0  ;;  %v8075_v12 = vld [vmem:[%s8218_s12 + $0x190] sm:$0xff] }
 0x49c   : > { %6180 = vst [vmem:[%s12614_s21 + $0x60] sm:$0xff] %v6148_v2  ;;  %vm6087_vm15 = vcmp.ge.f32.partialorder %v6055_v54, 0.0  ;;  %v6119_v47 = vmul.f32 0.2, %v6055_v54  ;;  %v6025_v14 = vadd.f32 %v12593_v49, %v5986_v42  ;;  %v5712_v23 = vpop.f32.mrb[129].mxu1  ;;  %v5906_v24 = vadd.f32 %v7488_v52, %v12625_v22  ;;  %v5900_v60 = vpop.f32.mrb[107].mxu0 }
 0x49d   : > { %vm6086_vm1 = vcmp.ge.f32.partialorder %v6054_v15, 0.0  ;;  %v6118_v19 = vmul.f32 0.2, %v6054_v15  ;;  %v6024_v5 = vadd.f32 %v12593_v49, %v5985_v63  ;;  %v5901_v26 = vadd.f32 %v5900_v60, %v12609_v11 }
 0x49e   : > { %v6151_v59 = vsel %vm6087_vm15, %v6055_v54, %v6119_v47  ;;  %v6057_v13 = vadd.f32 %v8071_v27, %v6025_v14  ;;  %v5988_v33 = vadd.f32 %v5906_v24, %v12513_v9  ;;  %v8076_v47 = vld [vmem:[%s8218_s12 + $0x188] sm:$0xff] }
 0x49f   : > { %6183 = vst [vmem:[%s12614_s21 + $0x78] sm:$0xff] %v6151_v59  ;;  %v6150_v41 = vsel %vm6086_vm1, %v6054_v15, %v6118_v19  ;;  %v6056_v50 = vadd.f32 %v8072_v20, %v6024_v5  ;;  %v5987_v22 = vadd.f32 %v5901_v26, %v12507_v44  ;;  %v12709_v34 = vpop.f32.mrb[130].mxu1  ;;  %v7491_v40 = vpop.f32.mrb[108].mxu0 }
 0x4a0   : > { %6182 = vst [vmem:[%s12614_s21 + $0x70] sm:$0xff] %v6150_v41  ;;  %vm6089_vm0 = vcmp.ge.f32.partialorder %v6057_v13, 0.0  ;;  %v6121_v11 = vmul.f32 0.2, %v6057_v13  ;;  %v6027_v62 = vadd.f32 %v12593_v49, %v5988_v33  ;;  %v5717_v17 = vpop.f32.mrb[131].mxu1  ;;  %v5916_v9 = vadd.f32 %v7491_v40, %v12649_v43  ;;  %v5910_v21 = vpop.f32.mrb[109].mxu0 }
 0x4a1   : > { %vm6088_vm2 = vcmp.ge.f32.partialorder %v6056_v50, 0.0  ;;  %v6120_v58 = vmul.f32 0.2, %v6056_v50  ;;  %v6026_v30 = vadd.f32 %v12593_v49, %v5987_v22  ;;  %v5911_v44 = vadd.f32 %v5910_v21, %v12637_v45 }
 0x4a2   : > { %v6153_v4 = vsel %vm6089_vm0, %v6057_v13, %v6121_v11  ;;  %v6059_v1 = vadd.f32 %v8073_v56, %v6027_v62  ;;  %v5990_v3 = vadd.f32 %v5916_v9, %v12525_v7  ;;  %v8077_v13 = vld [vmem:[%s8218_s12 + $0x1b0] sm:$0xff] }
 0x4a3   : > { %6185 = vst [vmem:[%s12614_s21 + $0x88] sm:$0xff] %v6153_v4  ;;  %v6152_v0 = vsel %vm6088_vm2, %v6056_v50, %v6120_v58  ;;  %v6058_v39 = vadd.f32 %v8074_v16, %v6026_v30  ;;  %v5989_v43 = vadd.f32 %v5911_v44, %v12519_v35  ;;  %v5720_v38 = vpop.f32.mrb[132].mxu1  ;;  %v7494_v37 = vpop.f32.mrb[110].mxu0  ;;  %v8078_v50 = vld [vmem:[%s8218_s12 + $0x1a8] sm:$0xff]  ;;  %v8079_v44 = vld [vmem:[%s8218_s12 + $0x1d0] sm:$0xff] }
 0x4a4   : > { %6184 = vst [vmem:[%s12614_s21 + $0x80] sm:$0xff] %v6152_v0  ;;  %vm6091_vm3 = vcmp.ge.f32.partialorder %v6059_v1, 0.0  ;;  %v6123_v28 = vmul.f32 0.2, %v6059_v1  ;;  %v6029_v45 = vadd.f32 %v12593_v49, %v5990_v3  ;;  %v5722_v32 = vpop.f32.mrb[133].mxu1  ;;  %v5926_v57 = vadd.f32 %v7494_v37, %v12673_v51  ;;  %v5920_v7 = vpop.f32.mrb[111].mxu0 }
 0x4a5   : > { %vm6090_vm4 = vcmp.ge.f32.partialorder %v6058_v39, 0.0  ;;  %v6122_v54 = vmul.f32 0.2, %v6058_v39  ;;  %v6028_v42 = vadd.f32 %v12593_v49, %v5989_v43  ;;  %v5921_v35 = vadd.f32 %v5920_v7, %v12661_v18  ;;  %v8080_v3 = vld [vmem:[%s8218_s12 + $0x1c8] sm:$0xff] }
 0x4a6   : > { %v6155_v2 = vsel %vm6091_vm3, %v6059_v1, %v6123_v28  ;;  %v6061_v15 = vadd.f32 %v8075_v12, %v6029_v45  ;;  %v5992_v63 = vadd.f32 %v5926_v57, %v12537_v46 }
 0x4a7   : > { %6187 = vst [vmem:[%s12614_s21 + $0x98] sm:$0xff] %v6155_v2  ;;  %v6154_v52 = vsel %vm6090_vm4, %v6058_v39, %v6122_v54  ;;  %v6060_v14 = vadd.f32 %v8076_v47, %v6028_v42  ;;  %v5991_v51 = vadd.f32 %v5921_v35, %v12531_v55  ;;  %v5725_v23 = vpop.f32.mrb[134].mxu1  ;;  %v7497_v24 = vpop.f32.mrb[112].mxu0  ;;  %v8082_v2 = vld [vmem:[%s8218_s12 + $0x1e8] sm:$0xff] }
 0x4a8   : > { %6186 = vst [vmem:[%s12614_s21 + $0x90] sm:$0xff] %v6154_v52  ;;  %vm6093_vm5 = vcmp.ge.f32.partialorder %v6061_v15, 0.0  ;;  %v6125_v60 = vmul.f32 0.2, %v6061_v15  ;;  %v6031_v18 = vadd.f32 %v12593_v49, %v5992_v63  ;;  %v5727_v19 = vpop.f32.mrb[135].mxu1  ;;  %v5936_v5 = vadd.f32 %v7497_v24, %v12697_v10  ;;  %v5930_v46 = vpop.f32.mrb[113].mxu0 }
 0x4a9   : > { %vm6092_vm6 = vcmp.ge.f32.partialorder %v6060_v14, 0.0  ;;  %v6124_v26 = vmul.f32 0.2, %v6060_v14  ;;  %v6030_v59 = vadd.f32 %v12593_v49, %v5991_v51  ;;  %v5931_v55 = vadd.f32 %v5930_v46, %v12685_v61 }
 0x4aa   : > { %v6157_v27 = vsel %vm6093_vm5, %v6061_v15, %v6125_v60  ;;  %v6063_v33 = vadd.f32 %v8077_v13, %v6031_v18  ;;  %v5994_v41 = vadd.f32 %v5936_v5, %v12549_v31 }
 0x4ab   : > { %6189 = vst [vmem:[%s12614_s21 + $0xa8] sm:$0xff] %v6157_v27  ;;  %v6156_v20 = vsel %vm6092_vm6, %v6060_v14, %v6124_v26  ;;  %v6062_v22 = vadd.f32 %v8078_v50, %v6030_v59  ;;  %v5993_v10 = vadd.f32 %v5931_v55, %v12543_v53  ;;  %v5730_v40 = vpop.f32.mrb[136].mxu1  ;;  %v7500_v11 = vpop.f32.mrb[114].mxu0  ;;  %v8084_v59 = vld [vmem:[%s9036_s10 + $0x8] sm:$0xff]  ;;  %v8085_v50 = vld [vmem:[%s9036_s10 + $0x30] sm:$0xff] }
 0x4ac   : > { %6188 = vst [vmem:[%s12614_s21 + $0xa0] sm:$0xff] %v6156_v20  ;;  %vm6095_vm7 = vcmp.ge.f32.partialorder %v6063_v33, 0.0  ;;  %v6127_v62 = vmul.f32 0.2, %v6063_v33  ;;  %v6033_v61 = vadd.f32 %v12593_v49, %v5994_v41  ;;  %v5732_v17 = vpop.f32.mrb[137].mxu1  ;;  %v5946_v9 = vadd.f32 %v7500_v11, %v5720_v38  ;;  %v5940_v21 = vpop.f32.mrb[115].mxu0 }
 0x4ad   : > { %vm6094_vm8 = vcmp.ge.f32.partialorder %v6062_v22, 0.0  ;;  %v6126_v31 = vmul.f32 0.2, %v6062_v22  ;;  %v6032_v58 = vadd.f32 %v12593_v49, %v5993_v10  ;;  %v5941_v30 = vadd.f32 %v5940_v21, %v12709_v34 }
 0x4ae   : > { %v6159_v53 = vsel %vm6095_vm7, %v6063_v33, %v6127_v62  ;;  %v6065_v4 = vadd.f32 %v8079_v44, %v6033_v61  ;;  %v5996_v56 = vadd.f32 %v5946_v9, %v12561_v48 }
 0x4af   : > { %6191 = vst [vmem:[%s12614_s21 + $0xb8] sm:$0xff] %v6159_v53  ;;  %v6158_v1 = vsel %vm6094_vm8, %v6062_v22, %v6126_v31  ;;  %v6064_v0 = vadd.f32 %v8080_v3, %v6032_v58  ;;  %v5995_v16 = vadd.f32 %v5941_v30, %v12555_v29  ;;  %v7503_v39 = vpop.f32.mrb[116].mxu0  ;;  %v5735_v43 = vpop.f32.mrb[138].mxu1  ;;  %v8081_v29 = vld [vmem:[%s8218_s12 + $0x1f0] sm:$0xff] }
 0x4b0   : > { %6190 = vst [vmem:[%s12614_s21 + $0xb0] sm:$0xff] %v6158_v1  ;;  %vm6097_vm9 = vcmp.ge.f32.partialorder %v6065_v4, 0.0  ;;  %v6129_v38 = vmul.f32 0.2, %v6065_v4  ;;  %v6035_v34 = vadd.f32 %v12593_v49, %v5996_v56  ;;  %v5956_v37 = vadd.f32 %v7503_v39, %v5730_v40  ;;  %v5950_v28 = vpop.f32.mrb[117].mxu0  ;;  %v5737_v45 = vpop.f32.mrb[139].mxu1 }
 0x4b1   : > { %vm6096_vm10 = vcmp.ge.f32.partialorder %v6064_v0, 0.0  ;;  %v6128_v48 = vmul.f32 0.2, %v6064_v0  ;;  %v6034_v32 = vadd.f32 %v12593_v49, %v5995_v16  ;;  %v5951_v57 = vadd.f32 %v5950_v28, %v5725_v23  ;;  %v8086_v40 = vld [vmem:[%s9036_s10 + $0x28] sm:$0xff] }
 0x4b2   : > { %v6161_v7 = vsel %vm6097_vm9, %v6065_v4, %v6129_v38  ;;  %v6067_v54 = vadd.f32 %v8081_v29, %v6035_v34  ;;  %v5998_v42 = vadd.f32 %v5956_v37, %v12573_v8 }
 0x4b3   : > { %6193 = vst [vmem:[%s12614_s21 + $0xc8] sm:$0xff] %v6161_v7  ;;  %v6160_v35 = vsel %vm6096_vm10, %v6064_v0, %v6128_v48  ;;  %v6066_v12 = vadd.f32 %v8082_v2, %v6034_v32  ;;  %v5997_v15 = vadd.f32 %v5951_v57, %v12567_v36  ;;  %v5740_v63 = vpop.f32.mrb[140].mxu1  ;;  %v7506_v52 = vpop.f32.mrb[118].mxu0  ;;  %v8083_v36 = vld [vmem:[%s9036_s10 + $0x10] sm:$0xff] }
 0x4b4   : > { %6192 = vst [vmem:[%s12614_s21 + $0xc0] sm:$0xff] %v6160_v35  ;;  %vm6099_vm11 = vcmp.ge.f32.partialorder %v6067_v54, 0.0  ;;  %v6131_v47 = vmul.f32 0.2, %v6067_v54  ;;  %v6037_v14 = vadd.f32 %v12593_v49, %v5998_v42  ;;  %v5966_v51 = vadd.f32 %v7506_v52, %v5740_v63  ;;  %v5960_v23 = vpop.f32.mrb[119].mxu0  ;;  %v5742_v8 = vpop.f32.mrb[141].mxu1 }
 0x4b5   : > { %vm6098_vm12 = vcmp.ge.f32.partialorder %v6066_v12, 0.0  ;;  %v6130_v24 = vmul.f32 0.2, %v6066_v12  ;;  %v6036_v60 = vadd.f32 %v12593_v49, %v5997_v15  ;;  %v5961_v18 = vadd.f32 %v5960_v23, %v5735_v43 }
 0x4b6   : > { %v6163_v19 = vsel %vm6099_vm11, %v6067_v54, %v6131_v47  ;;  %v6069_v5 = vadd.f32 %v8083_v36, %v6037_v14  ;;  %v6000_v46 = vadd.f32 %v5966_v51, %v12585_v6 }
 0x4b7   : > { %6195 = vst [vmem:[%s12614_s21 + $0xd8] sm:$0xff] %v6163_v19  ;;  %v6162_v26 = vsel %vm6098_vm12, %v6066_v12, %v6130_v24  ;;  %v6068_v55 = vadd.f32 %v8084_v59, %v6036_v60  ;;  %v5999_v27 = vadd.f32 %v5961_v18, %v12579_v25 }
 0x4b8   : > { %6194 = vst [vmem:[%s12614_s21 + $0xd0] sm:$0xff] %v6162_v26  ;;  %vm6101_vm13 = vcmp.ge.f32.partialorder %v6069_v5, 0.0  ;;  %v6133_v13 = vmul.f32 0.2, %v6069_v5  ;;  %v6039_v33 = vadd.f32 %v12593_v49, %v6000_v46 }
 0x4b9   : > { %vm6100_vm14 = vcmp.ge.f32.partialorder %v6068_v55, 0.0  ;;  %v6132_v41 = vmul.f32 0.2, %v6068_v55  ;;  %v6038_v20 = vadd.f32 %v12593_v49, %v5999_v27 }
 0x4ba   : > { %v6165_v6 = vsel %vm6101_vm13, %v6069_v5, %v6133_v13  ;;  %v6071_v22 = vadd.f32 %v8085_v50, %v6039_v33 }
 0x4bb   : > { %6197 = vst [vmem:[%s12614_s21 + $0xe8] sm:$0xff] %v6165_v6  ;;  %v6164_v10 = vsel %vm6100_vm14, %v6068_v55, %v6132_v41  ;;  %v6070_v11 = vadd.f32 %v8086_v40, %v6038_v20 }
 0x4bc   : > { %6196 = vst [vmem:[%s12614_s21 + $0xe0] sm:$0xff] %v6164_v10  ;;  %vm6103_vm15 = vcmp.ge.f32.partialorder %v6071_v22, 0.0  ;;  %v6135_v25 = vmul.f32 0.2, %v6071_v22 }
 0x4bd   : > { %vm6102_vm1 = vcmp.ge.f32.partialorder %v6070_v11, 0.0  ;;  %v6134_v62 = vmul.f32 0.2, %v6070_v11 }
 0x4be   : > { %v6167_v61 = vsel %vm6103_vm15, %v6071_v22, %v6135_v25 }
 0x4bf   : > { %6199 = vst [vmem:[%s12614_s21 + $0xf8] sm:$0xff] %v6167_v61  ;;  %v6166_v17 = vsel %vm6102_vm1, %v6070_v11, %v6134_v62 }
 0x4c0   : > { %6198 = vst [vmem:[%s12614_s21 + $0xf0] sm:$0xff] %v6166_v17 }
 0x4c1 PF: > { %s16_s23 = sadd.s32 1, %s8109_s23   ;;  %s13790_s21 = smov %s8105_s22 }
 0x4c2   : > { %p13_p5 = scmp.ge.s32.totalorder %s16_s23, 4   ;;  %s13791_s22 = smov %s13793_s24 }
 0x4c4   :  { %15 = sbr.rel (!%p13_p5) target bundleno = 2 (0x2), region = 81 }

</bundles_post_ra>
